<compile_context>
chip_gen: v7x
topology: tpu7x:2x2x1
jax: 0.10.0
libtpu: 0.0.40
codegen_flags: <defaults>
</compile_context>

<pallas_src>
import functools
import math

import jax
import jax.numpy as jnp
from jax.experimental import pallas as pl
from jax.experimental.pallas import tpu as pltpu

COMPUTE_DTYPE = jnp.bfloat16   # MXU input dtype; weights are stored in this dtype
_MASK_VALUE = -1e30            # additive-mask equivalent of -inf (exp underflows to 0)


def _round_up(n, m=128):
    return ((n + m - 1) // m) * m


def _nbytes(shape, dtype):
    return math.prod(shape) * jnp.dtype(dtype).itemsize


def _vmem_limit(block_bytes):
    # double-buffered blocks + headroom for in-kernel intermediates,
    # clamped to v7x's 64 MiB physical VMEM.
    est = 2 * block_bytes + (8 << 20)
    return int(min(max(est, 16 << 20), 64 << 20))


# ----------------------------------------------------------------------------
# Fused DecoderBlock kernel (one pallas_call per block, grid over batch tiles)
# ----------------------------------------------------------------------------
_BLOCK_WEIGHT_ORDER = (
    "qp_w", "qp_b", "vp_w", "vp_b",
    "sa_qkv_w", "sa_qkv_b", "sa_o_w", "sa_o_b",
    "ca_q_w", "ca_q_b", "ca_kv_w", "ca_kv_b", "ca_o_w", "ca_o_b",
    "ln1_g", "ln1_b", "ln2_g", "ln2_b", "ln3_g", "ln3_b",
    "ff1_w", "ff1_b", "ff2_w", "ff2_b",
    "back_w", "back_b",
)


def _decoder_block_kernel(
    q_in_ref, v_in_ref,
    qp_w, qp_b, vp_w, vp_b,
    sa_qkv_w, sa_qkv_b, sa_o_w, sa_o_b,
    ca_q_w, ca_q_b, ca_kv_w, ca_kv_b, ca_o_w, ca_o_b,
    ln1_g, ln1_b, ln2_g, ln2_b, ln3_g, ln3_b,
    ff1_w, ff1_b, ff2_w, ff2_b,
    back_w, back_b,
    o_ref,
    *, n_heads, dh, dh_pad, d_model, eps,
):
    Bt, T, E_pad = q_in_ref.shape
    S = v_in_ref.shape[1]
    H = n_heads
    scale = 1.0 / math.sqrt(dh)
    cdt = COMPUTE_DTYPE
    HD = H * dh_pad  # lane width of one q/k/v group in head-padded layout

    def mm(x, w_ref, b_ref=None, relu=False):
        # weights already stored in COMPUTE_DTYPE (no per-step cast); f32 accumulation
        y = jnp.dot(x.astype(cdt), w_ref[...], preferred_element_type=jnp.float32)
        if b_ref is not None:
            y = y + b_ref[...]
        return jnp.maximum(y, 0.0) if relu else y

    def layer_norm(x, g_ref, b_ref):
        # Padded lanes of x are exactly zero, so plain sums divided by the REAL
        # d_model give the reference statistics (E[x^2]-E[x]^2 form, no masks).
        inv_d = 1.0 / d_model
        mu = jnp.sum(x, axis=-1, keepdims=True) * inv_d
        ex2 = jnp.sum(x * x, axis=-1, keepdims=True) * inv_d
        var = jnp.maximum(ex2 - mu * mu, 0.0)
        return (x - mu) * jax.lax.rsqrt(var + eps) * g_ref[...] + b_ref[...]

    # Causal mask generated in-kernel (no HBM DMA): a handful of VPU ops.
    row = jax.lax.broadcasted_iota(jnp.int32, (T, T), 0)
    col = jax.lax.broadcasted_iota(jnp.int32, (T, T), 1)
    causal = col <= row

    def attend(q_hd, k_hd, v_hd, o_w_ref, o_b_ref, masked):
        # q_hd: (Tq, H*dh_pad), k_hd/v_hd: (Tk, H*dh_pad) in COMPUTE_DTYPE.
        # Each head owns a 128-wide (dh_pad) lane slot -> every slice below is
        # 128-aligned and lane-dense.
        ctxs = []
        for h in range(H):
            lo = h * dh_pad
            qh = q_hd[:, lo:lo + dh_pad]
            kh = k_hd[:, lo:lo + dh_pad]
            vh = v_hd[:, lo:lo + dh_pad]
            # (Tq, dh_pad) x (Tk, dh_pad) contracting dh_pad -> (Tq, Tk)
            s = jax.lax.dot_general(
                qh, kh, (((1,), (1,)), ((), ())),
                preferred_element_type=jnp.float32) * scale
            if masked:
                s = jnp.where(causal, s, _MASK_VALUE)
            s = s - jnp.max(s, axis=-1, keepdims=True)
            p = jnp.exp(s)
            p = p * pl.reciprocal(jnp.sum(p, axis=-1, keepdims=True), approx=True)
            ctxs.append(jnp.dot(p.astype(cdt), vh, preferred_element_type=jnp.float32))
        # 128-lane-aligned concat (free layout) fused into ONE output projection
        # matmul (o_w is stored head-row-major (H*dh_pad, D_pad)).
        ctx = jnp.concatenate(ctxs, axis=-1)          # (Tq, H*dh_pad)
        return mm(ctx, o_w_ref, o_b_ref)              # (Tq, D_pad)

    # --- flatten the batch tile so the big GEMMs fill the MXU M dimension ---
    x_in = q_in_ref[...].reshape(Bt * T, E_pad)
    m_in = v_in_ref[...].reshape(Bt * S, E_pad)

    # --- input projections (+ReLU) ---
    q = mm(x_in, qp_w, qp_b, relu=True)               # (Bt*T, D_pad)
    mem = mm(m_in, vp_w, vp_b, relu=True)             # (Bt*S, D_pad)

    # --- self attention (fused QKV, head-padded layout) + residual + LN1 ---
    qkv = mm(q, sa_qkv_w, sa_qkv_b).astype(cdt)       # (Bt*T, 3*H*dh_pad)
    sa_rows = []
    for b in range(Bt):
        qkv_b = qkv[b * T:(b + 1) * T]
        sa_rows.append(attend(qkv_b[:, :HD], qkv_b[:, HD:2 * HD], qkv_b[:, 2 * HD:],
                              sa_o_w, sa_o_b, masked=True))
    sa = jnp.concatenate(sa_rows, axis=0)             # (Bt*T, D_pad)
    x = layer_norm(q + sa, ln1_g, ln1_b)

    # --- cross attention (fused KV, memory_mask=None -> no mask) + residual + LN2 ---
    cq = mm(x, ca_q_w, ca_q_b).astype(cdt)            # (Bt*T, H*dh_pad)
    kv = mm(mem, ca_kv_w, ca_kv_b).astype(cdt)        # (Bt*S, 2*H*dh_pad)
    ca_rows = []
    for b in range(Bt):
        cq_b = cq[b * T:(b + 1) * T]
        kv_b = kv[b * S:(b + 1) * S]
        ca_rows.append(attend(cq_b, kv_b[:, :HD], kv_b[:, HD:],
                              ca_o_w, ca_o_b, masked=False))
    ca = jnp.concatenate(ca_rows, axis=0)
    x = layer_norm(x + ca, ln2_g, ln2_b)

    # --- feed forward (hidden never leaves VMEM) + residual + LN3 ---
    h = mm(x, ff1_w, ff1_b, relu=True)                # (Bt*T, F_pad)
    h = mm(h, ff2_w, ff2_b)                           # (Bt*T, D_pad)
    x = layer_norm(x + h, ln3_g, ln3_b)

    # --- backproj (+ReLU), lane-dense (E_pad) output ---
    out = mm(x, back_w, back_b, relu=True)            # (Bt*T, E_pad)
    o_ref[...] = out.reshape(Bt, T, E_pad)


def _pick_bt(B, T):
    """Batch tile: as many sequences per grid step as keep Bt*T <= 256 rows."""
    bt = 1
    for cand in range(1, B + 1):
        if B % cand == 0 and cand * T <= 256:
            bt = cand
    # keep >=2 grid steps (v7x's 2 TensorCores) if it doesn't starve the MXU M dim
    if B // bt == 1 and bt % 2 == 0 and (bt // 2) * T >= 128:
        bt //= 2
    return bt


def decoder_block(query, value, blk, cfg):
    """Fused DecoderBlock. query: (B,T,E_pad), value: (B,S,E_pad) -> (B,T,E_pad)."""
    B, T, E_pad = query.shape
    S = value.shape[1]
    Bt = _pick_bt(B, T)
    weights = [blk[k] for k in _BLOCK_WEIGHT_ORDER]   # all 2-D, pre-padded, bf16/f32
    # NOTE: weight index_maps are constant across the grid; Pallas does not re-DMA
    # a block whose index doesn't change, and bf16 storage halves their VMEM share.
    w_specs = [pl.BlockSpec(w.shape, lambda b: (0, 0)) for w in weights]

    block_bytes = (2 * _nbytes((Bt, T, E_pad), jnp.float32)     # query in + out block
                   + _nbytes((Bt, S, E_pad), jnp.float32)
                   + sum(_nbytes(w.shape, w.dtype) for w in weights))

    kernel = functools.partial(
        _decoder_block_kernel,
        n_heads=cfg["n_heads"], dh=cfg["dh"], dh_pad=cfg["dh_pad"],
        d_model=cfg["d_model"], eps=1e-5)

    return pl.pallas_call(
        kernel,
        out_shape=jax.ShapeDtypeStruct((B, T, E_pad), jnp.float32),
        grid=(B // Bt,),
        in_specs=[
            pl.BlockSpec((Bt, T, E_pad), lambda b: (b, 0, 0)),
            pl.BlockSpec((Bt, S, E_pad), lambda b: (b, 0, 0)),
        ] + w_specs,
        out_specs=pl.BlockSpec((Bt, T, E_pad), lambda b: (b, 0, 0)),
        compiler_params=pltpu.CompilerParams(
            dimension_semantics=("parallel",),
            vmem_limit_bytes=_vmem_limit(block_bytes)),
    )(query, value, *weights)


# ----------------------------------------------------------------------------
# Final output projection: weights pre-padded at init, tiled over M and N
# ----------------------------------------------------------------------------
def _linear_kernel(x_ref, w_ref, b_ref, o_ref):
    o_ref[...] = jnp.dot(x_ref[...].astype(COMPUTE_DTYPE), w_ref[...],
                         preferred_element_type=jnp.float32) + b_ref[...]


def linear_padded(x, w, b):
    """x: (M, K_pad) f32, w: (K_pad, O_pad) bf16 (pre-padded), b: (1, O_pad) f32."""
    M, K = x.shape
    Op = w.shape[1]
    tm = M if M <= 256 else next((t for t in (256, 128, 64, 32, 16, 8) if M % t == 0), M)
    tn = Op if Op <= 1024 else next((t for t in (1024, 512, 256, 128) if Op % t == 0), Op)
    block_bytes = (_nbytes((tm, K), x.dtype) + _nbytes((K, tn), w.dtype)
                   + _nbytes((1, tn), b.dtype) + _nbytes((tm, tn), jnp.float32))
    return pl.pallas_call(
        _linear_kernel,
        out_shape=jax.ShapeDtypeStruct((M, Op), jnp.float32),
        grid=(M // tm, Op // tn),
        in_specs=[
            pl.BlockSpec((tm, K), lambda i, j: (i, 0)),
            pl.BlockSpec((K, tn), lambda i, j: (0, j)),
            pl.BlockSpec((1, tn), lambda i, j: (0, j)),
        ],
        out_specs=pl.BlockSpec((tm, tn), lambda i, j: (i, j)),
        compiler_params=pltpu.CompilerParams(
            dimension_semantics=("parallel", "parallel"),
            vmem_limit_bytes=_vmem_limit(block_bytes)),
    )(x, w, b)


# ----------------------------------------------------------------------------
# Model glue (embedding gather / PE add kept in XLA; hot path is in kernels)
# ----------------------------------------------------------------------------
def positional_encoding(seq_len, d_model):
    pos = jnp.arange(seq_len, dtype=jnp.float32)[:, None]
    div = jnp.exp(jnp.arange(0, d_model, 2, dtype=jnp.float32)
                  * (-math.log(10000.0) / d_model))
    pe = jnp.zeros((seq_len, d_model), jnp.float32)
    pe = pe.at[:, 0::2].set(jnp.sin(pos * div))
    pe = pe.at[:, 1::2].set(jnp.cos(pos * div))
    return pe


def decoder_forward(params, query_tokens, key_unused, value, cfg):
    del key_unused  # the reference forward never uses `key`
    B, T = query_tokens.shape
    E_pad = params["embedding"].shape[1]
    # TextEmbedder: embedding lookup (XLA gather) + precomputed (padded) pos-enc
    x = params["embedding"][query_tokens] + params["pos_enc"][:T][None, :, :]
    # pad the encoder memory's lane dim once (activation-only, weights pre-padded)
    pad_e = E_pad - value.shape[-1]
    value_p = jnp.pad(value, ((0, 0), (0, 0), (0, pad_e))) if pad_e else value
    for blk in params["blocks"]:
        x = decoder_block(x, value_p, blk, cfg)
    out = linear_padded(x.reshape(B * T, E_pad), params["out_w"], params["out_b"])
    return out.reshape(B, T, -1)[:, :, :cfg["output_size"]]


# ----------------------------------------------------------------------------
# Parameter init (PyTorch-style bounds) + one-time prep: pad lane dims to 128,
# head-padded layouts (one 128-wide lane slot per head), bf16 weight storage.
# ----------------------------------------------------------------------------
def _pad2d(x, rows, cols):
    r, c = x.shape
    return jnp.pad(x, ((0, rows - r), (0, cols - c)))


def _head_cols(w, b, n_heads, dh, dh_pad, n_groups, in_pad):
    """w: (d_in, n_groups*n_heads*dh) -> (in_pad, n_groups*n_heads*dh_pad),
    each head's dh real columns placed at the start of its 128-wide lane slot."""
    d_in = w.shape[0]
    out_w = jnp.zeros((in_pad, n_groups * n_heads * dh_pad), w.dtype)
    out_b = jnp.zeros((1, n_groups * n_heads * dh_pad), b.dtype)
    for g in range(n_groups):
        for h in range(n_heads):
            src = (g * n_heads + h) * dh
            dst = (g * n_heads + h) * dh_pad
            out_w = out_w.at[:d_in, dst:dst + dh].set(w[:, src:src + dh])
            out_b = out_b.at[:, dst:dst + dh].set(b[:, src:src + dh])
    return out_w, out_b


def _head_rows(w, n_heads, dh, dh_pad, out_pad):
    """w: (n_heads*dh, d_out) -> (n_heads*dh_pad, out_pad), head-row-major."""
    d_out = w.shape[1]
    out = jnp.zeros((n_heads * dh_pad, out_pad), w.dtype)
    for h in range(n_heads):
        out = out.at[h * dh_pad:h * dh_pad + dh, :d_out].set(w[h * dh:(h + 1) * dh, :])
    return out


def init_linear(key, fan_in, fan_out):
    k1, k2 = jax.random.split(key)
    bound = 1.0 / math.sqrt(fan_in)
    w = jax.random.uniform(k1, (fan_in, fan_out), jnp.float32, -bound, bound)
    b = jax.random.uniform(k2, (1, fan_out), jnp.float32, -bound, bound)
    return w, b


def init_block_raw(key, emb_dim, d_model, d_ff):
    ks = jax.random.split(key, 10)
    qp_w, qp_b = init_linear(ks[0], emb_dim, d_model)
    vp_w, vp_b = init_linear(ks[1], emb_dim, d_model)
    sa_qkv_w, sa_qkv_b = init_linear(ks[2], d_model, 3 * d_model)   # Q|K|V blocks
    sa_o_w, sa_o_b = init_linear(ks[3], d_model, d_model)
    ca_q_w, ca_q_b = init_linear(ks[4], d_model, d_model)
    ca_kv_w, ca_kv_b = init_linear(ks[5], d_model, 2 * d_model)     # K|V blocks
    ca_o_w, ca_o_b = init_linear(ks[6], d_model, d_model)
    ff1_w, ff1_b = init_linear(ks[7], d_model, d_ff)
    ff2_w, ff2_b = init_linear(ks[8], d_ff, d_model)
    back_w, back_b = init_linear(ks[9], d_model, emb_dim)
    return dict(
        qp_w=qp_w, qp_b=qp_b, vp_w=vp_w, vp_b=vp_b,
        sa_qkv_w=sa_qkv_w, sa_qkv_b=sa_qkv_b, sa_o_w=sa_o_w, sa_o_b=sa_o_b,
        ca_q_w=ca_q_w, ca_q_b=ca_q_b, ca_kv_w=ca_kv_w, ca_kv_b=ca_kv_b,
        ca_o_w=ca_o_w, ca_o_b=ca_o_b,
        ln1_g=jnp.ones((1, d_model), jnp.float32), ln1_b=jnp.zeros((1, d_model), jnp.float32),
        ln2_g=jnp.ones((1, d_model), jnp.float32), ln2_b=jnp.zeros((1, d_model), jnp.float32),
        ln3_g=jnp.ones((1, d_model), jnp.float32), ln3_b=jnp.zeros((1, d_model), jnp.float32),
        ff1_w=ff1_w, ff1_b=ff1_b, ff2_w=ff2_w, ff2_b=ff2_b,
        back_w=back_w, back_b=back_b,
    )


def prepare_block(raw, emb_dim, d_model, d_ff, n_heads):
    E_pad, D_pad, F_pad = _round_up(emb_dim), _round_up(d_model), _round_up(d_ff)
    dh = d_model // n_heads
    dh_pad = _round_up(dh)
    cdt = COMPUTE_DTYPE

    def pw(w, r, c):  # padded weight, bf16
        return _pad2d(w, r, c).astype(cdt)

    def pb(b, c):     # padded bias / LN param, f32
        return _pad2d(b, 1, c)

    sa_qkv_w, sa_qkv_b = _head_cols(raw["sa_qkv_w"], raw["sa_qkv_b"], n_heads, dh, dh_pad, 3, D_pad)
    ca_q_w, ca_q_b = _head_cols(raw["ca_q_w"], raw["ca_q_b"], n_heads, dh, dh_pad, 1, D_pad)
    ca_kv_w, ca_kv_b = _head_cols(raw["ca_kv_w"], raw["ca_kv_b"], n_heads, dh, dh_pad, 2, D_pad)

    return dict(
        qp_w=pw(raw["qp_w"], E_pad, D_pad), qp_b=pb(raw["qp_b"], D_pad),
        vp_w=pw(raw["vp_w"], E_pad, D_pad), vp_b=pb(raw["vp_b"], D_pad),
        sa_qkv_w=sa_qkv_w.astype(cdt), sa_qkv_b=sa_qkv_b,
        sa_o_w=_head_rows(raw["sa_o_w"], n_heads, dh, dh_pad, D_pad).astype(cdt),
        sa_o_b=pb(raw["sa_o_b"], D_pad),
        ca_q_w=ca_q_w.astype(cdt), ca_q_b=ca_q_b,
        ca_kv_w=ca_kv_w.astype(cdt), ca_kv_b=ca_kv_b,
        ca_o_w=_head_rows(raw["ca_o_w"], n_heads, dh, dh_pad, D_pad).astype(cdt),
        ca_o_b=pb(raw["ca_o_b"], D_pad),
        ln1_g=pb(raw["ln1_g"], D_pad), ln1_b=pb(raw["ln1_b"], D_pad),
        ln2_g=pb(raw["ln2_g"], D_pad), ln2_b=pb(raw["ln2_b"], D_pad),
        ln3_g=pb(raw["ln3_g"], D_pad), ln3_b=pb(raw["ln3_b"], D_pad),
        ff1_w=pw(raw["ff1_w"], D_pad, F_pad), ff1_b=pb(raw["ff1_b"], F_pad),
        ff2_w=pw(raw["ff2_w"], F_pad, D_pad), ff2_b=pb(raw["ff2_b"], D_pad),
        back_w=pw(raw["back_w"], D_pad, E_pad), back_b=pb(raw["back_b"], E_pad),
    )


def init_params(key, n_embeddings, output_size, n_blocks, emb_dim, d_model, d_ff,
                n_heads, max_seq_len):
    keys = jax.random.split(key, 2 + n_blocks)
    E_pad = _round_up(emb_dim)
    O_pad = _round_up(output_size)
    emb = jax.random.normal(keys[0], (n_embeddings, emb_dim), jnp.float32)
    emb = jnp.pad(emb, ((0, 0), (0, E_pad - emb_dim)))
    out_w, out_b = init_linear(keys[1], emb_dim, output_size)
    out_w = _pad2d(out_w, E_pad, O_pad).astype(COMPUTE_DTYPE)   # pre-padded at init
    out_b = _pad2d(out_b, 1, O_pad)
    blocks = [prepare_block(init_block_raw(keys[2 + i], emb_dim, d_model, d_ff),
                            emb_dim, d_model, d_ff, n_heads)
              for i in range(n_blocks)]
    pe = jnp.pad(positional_encoding(max_seq_len, emb_dim),
                 ((0, 0), (0, E_pad - emb_dim)))
    return dict(embedding=emb, out_w=out_w, out_b=out_b, blocks=blocks, pos_enc=pe)


# ----------------------------------------------------------------------------
if __name__ == "__main__":
    # Small but structure-consistent hyperparameters
    B, T, S = 2, 8, 8
    n_embeddings, output_size = 50, 24
    n_blocks, emb_dim, n_heads, d_model, d_ff = 2, 32, 4, 64, 96
    max_seq_len = 64

    cfg = dict(n_heads=n_heads, d_model=d_model, dh=d_model // n_heads,
               dh_pad=_round_up(d_model // n_heads), output_size=output_size)

    root = jax.random.PRNGKey(0)
    kp, ktok, kval, kkey = jax.random.split(root, 4)

    params = init_params(kp, n_embeddings, output_size, n_blocks, emb_dim,
                         d_model, d_ff, n_heads, max_seq_len)

    query_tokens = jax.random.randint(ktok, (B, T), 0, n_embeddings)     # token ids
    value = jax.random.normal(kval, (B, S, emb_dim), jnp.float32)        # encoder memory
    key_inp = jax.random.normal(kkey, (B, S, emb_dim), jnp.float32)      # unused (as in reference)

    fwd = jax.jit(lambda p, q, k, v: decoder_forward(p, q, k, v, cfg))
    out = jax.block_until_ready(fwd(params, query_tokens, key_inp, value))

    assert out.shape == (B, T, output_size)
    assert bool(jnp.all(jnp.isfinite(out)))
    print("KERNEL_OK")
</pallas_src>

<mosaic_0001>
module attributes {stable_mosaic.version = 11 : i64} {
  func.func @_decoder_block_kernel(%arg0: i32, %arg1: memref<2x8x128xf32, #tpu.memory_space<vmem>>, %arg2: memref<2x8x128xf32, #tpu.memory_space<vmem>>, %arg3: memref<128x128xbf16, #tpu.memory_space<vmem>>, %arg4: memref<1x128xf32, #tpu.memory_space<vmem>>, %arg5: memref<128x128xbf16, #tpu.memory_space<vmem>>, %arg6: memref<1x128xf32, #tpu.memory_space<vmem>>, %arg7: memref<128x1536xbf16, #tpu.memory_space<vmem>>, %arg8: memref<1x1536xf32, #tpu.memory_space<vmem>>, %arg9: memref<512x128xbf16, #tpu.memory_space<vmem>>, %arg10: memref<1x128xf32, #tpu.memory_space<vmem>>, %arg11: memref<128x512xbf16, #tpu.memory_space<vmem>>, %arg12: memref<1x512xf32, #tpu.memory_space<vmem>>, %arg13: memref<128x1024xbf16, #tpu.memory_space<vmem>>, %arg14: memref<1x1024xf32, #tpu.memory_space<vmem>>, %arg15: memref<512x128xbf16, #tpu.memory_space<vmem>>, %arg16: memref<1x128xf32, #tpu.memory_space<vmem>>, %arg17: memref<1x128xf32, #tpu.memory_space<vmem>>, %arg18: memref<1x128xf32, #tpu.memory_space<vmem>>, %arg19: memref<1x128xf32, #tpu.memory_space<vmem>>, %arg20: memref<1x128xf32, #tpu.memory_space<vmem>>, %arg21: memref<1x128xf32, #tpu.memory_space<vmem>>, %arg22: memref<1x128xf32, #tpu.memory_space<vmem>>, %arg23: memref<128x128xbf16, #tpu.memory_space<vmem>>, %arg24: memref<1x128xf32, #tpu.memory_space<vmem>>, %arg25: memref<128x128xbf16, #tpu.memory_space<vmem>>, %arg26: memref<1x128xf32, #tpu.memory_space<vmem>>, %arg27: memref<128x128xbf16, #tpu.memory_space<vmem>>, %arg28: memref<1x128xf32, #tpu.memory_space<vmem>>, %arg29: memref<2x8x128xf32, #tpu.memory_space<vmem>>) attributes {dimension_semantics = [#tpu.dimension_semantics<parallel>], iteration_bounds = array<i64: 1>, scalar_prefetch = 0 : i64, scratch_operands = 0 : i64, tpu.core_type = #tpu.core_type<tc>, window_params = [{transform_indices = @transform_0, window_bounds = array<i64: 2, 8, 128>}, {transform_indices = @transform_1, window_bounds = array<i64: 2, 8, 128>}, {pipeline_mode = #tpu.pipeline_mode<synchronous>, transform_indices = @transform_2, window_bounds = array<i64: 128, 128>}, {pipeline_mode = #tpu.pipeline_mode<synchronous>, transform_indices = @transform_3, window_bounds = array<i64: 1, 128>}, {pipeline_mode = #tpu.pipeline_mode<synchronous>, transform_indices = @transform_4, window_bounds = array<i64: 128, 128>}, {pipeline_mode = #tpu.pipeline_mode<synchronous>, transform_indices = @transform_5, window_bounds = array<i64: 1, 128>}, {pipeline_mode = #tpu.pipeline_mode<synchronous>, transform_indices = @transform_6, window_bounds = array<i64: 128, 1536>}, {pipeline_mode = #tpu.pipeline_mode<synchronous>, transform_indices = @transform_7, window_bounds = array<i64: 1, 1536>}, {pipeline_mode = #tpu.pipeline_mode<synchronous>, transform_indices = @transform_8, window_bounds = array<i64: 512, 128>}, {pipeline_mode = #tpu.pipeline_mode<synchronous>, transform_indices = @transform_9, window_bounds = array<i64: 1, 128>}, {pipeline_mode = #tpu.pipeline_mode<synchronous>, transform_indices = @transform_10, window_bounds = array<i64: 128, 512>}, {pipeline_mode = #tpu.pipeline_mode<synchronous>, transform_indices = @transform_11, window_bounds = array<i64: 1, 512>}, {pipeline_mode = #tpu.pipeline_mode<synchronous>, transform_indices = @transform_12, window_bounds = array<i64: 128, 1024>}, {pipeline_mode = #tpu.pipeline_mode<synchronous>, transform_indices = @transform_13, window_bounds = array<i64: 1, 1024>}, {pipeline_mode = #tpu.pipeline_mode<synchronous>, transform_indices = @transform_14, window_bounds = array<i64: 512, 128>}, {pipeline_mode = #tpu.pipeline_mode<synchronous>, transform_indices = @transform_15, window_bounds = array<i64: 1, 128>}, {pipeline_mode = #tpu.pipeline_mode<synchronous>, transform_indices = @transform_16, window_bounds = array<i64: 1, 128>}, {pipeline_mode = #tpu.pipeline_mode<synchronous>, transform_indices = @transform_17, window_bounds = array<i64: 1, 128>}, {pipeline_mode = #tpu.pipeline_mode<synchronous>, transform_indices = @transform_18, window_bounds = array<i64: 1, 128>}, {pipeline_mode = #tpu.pipeline_mode<synchronous>, transform_indices = @transform_19, window_bounds = array<i64: 1, 128>}, {pipeline_mode = #tpu.pipeline_mode<synchronous>, transform_indices = @transform_20, window_bounds = array<i64: 1, 128>}, {pipeline_mode = #tpu.pipeline_mode<synchronous>, transform_indices = @transform_21, window_bounds = array<i64: 1, 128>}, {pipeline_mode = #tpu.pipeline_mode<synchronous>, transform_indices = @transform_22, window_bounds = array<i64: 128, 128>}, {pipeline_mode = #tpu.pipeline_mode<synchronous>, transform_indices = @transform_23, window_bounds = array<i64: 1, 128>}, {pipeline_mode = #tpu.pipeline_mode<synchronous>, transform_indices = @transform_24, window_bounds = array<i64: 128, 128>}, {pipeline_mode = #tpu.pipeline_mode<synchronous>, transform_indices = @transform_25, window_bounds = array<i64: 1, 128>}, {pipeline_mode = #tpu.pipeline_mode<synchronous>, transform_indices = @transform_26, window_bounds = array<i64: 128, 128>}, {pipeline_mode = #tpu.pipeline_mode<synchronous>, transform_indices = @transform_27, window_bounds = array<i64: 1, 128>}, {transform_indices = @transform_28, window_bounds = array<i64: 2, 8, 128>}]} {
    %0 = tpu.iota {dimensions = array<i32: 0>} : vector<8x8xi32>
    %1 = tpu.iota {dimensions = array<i32: 1>} : vector<8x8xi32>
    %2 = arith.cmpi sle, %1, %0 : vector<8x8xi32>
    %c0 = arith.constant 0 : index
    %c0_0 = arith.constant 0 : index
    %c0_1 = arith.constant 0 : index
    %3 = vector.load %arg1[%c0, %c0_0, %c0_1] : memref<2x8x128xf32, #tpu.memory_space<vmem>>, vector<2x8x128xf32>
    %4 = vector.shape_cast %3 : vector<2x8x128xf32> to vector<16x128xf32>
    %c0_2 = arith.constant 0 : index
    %c0_3 = arith.constant 0 : index
    %c0_4 = arith.constant 0 : index
    %5 = vector.load %arg2[%c0_2, %c0_3, %c0_4] : memref<2x8x128xf32, #tpu.memory_space<vmem>>, vector<2x8x128xf32>
    %6 = vector.shape_cast %5 : vector<2x8x128xf32> to vector<16x128xf32>
    %7 = arith.truncf %4 : vector<16x128xf32> to vector<16x128xbf16>
    %c0_5 = arith.constant 0 : index
    %c0_6 = arith.constant 0 : index
    %8 = vector.load %arg3[%c0_5, %c0_6] : memref<128x128xbf16, #tpu.memory_space<vmem>>, vector<128x128xbf16>
    %cst = arith.constant dense<0.000000e+00> : vector<16x128xf32>
    %9 = tpu.matmul %7, %8, %cst {dimension_numbers = #tpu.dot_dimension_numbers<[1], [0], [0], [1], [0, 0, 1, 1], [], []>} : vector<16x128xbf16>, vector<128x128xbf16>, vector<16x128xf32> -> vector<16x128xf32>
    %c0_7 = arith.constant 0 : index
    %c0_8 = arith.constant 0 : index
    %10 = vector.load %arg4[%c0_7, %c0_8] : memref<1x128xf32, #tpu.memory_space<vmem>>, vector<1x128xf32>
    %11 = vector.broadcast %10 : vector<1x128xf32> to vector<16x128xf32>
    %12 = arith.addf %9, %11 : vector<16x128xf32>
    %cst_9 = arith.constant 0.000000e+00 : f32
    %13 = vector.broadcast %cst_9 : f32 to vector<16x128xf32>
    %14 = arith.maximumf %12, %13 : vector<16x128xf32>
    %15 = arith.truncf %6 : vector<16x128xf32> to vector<16x128xbf16>
    %c0_10 = arith.constant 0 : index
    %c0_11 = arith.constant 0 : index
    %16 = vector.load %arg5[%c0_10, %c0_11] : memref<128x128xbf16, #tpu.memory_space<vmem>>, vector<128x128xbf16>
    %cst_12 = arith.constant dense<0.000000e+00> : vector<16x128xf32>
    %17 = tpu.matmul %15, %16, %cst_12 {dimension_numbers = #tpu.dot_dimension_numbers<[1], [0], [0], [1], [0, 0, 1, 1], [], []>} : vector<16x128xbf16>, vector<128x128xbf16>, vector<16x128xf32> -> vector<16x128xf32>
    %c0_13 = arith.constant 0 : index
    %c0_14 = arith.constant 0 : index
    %18 = vector.load %arg6[%c0_13, %c0_14] : memref<1x128xf32, #tpu.memory_space<vmem>>, vector<1x128xf32>
    %19 = vector.broadcast %18 : vector<1x128xf32> to vector<16x128xf32>
    %20 = arith.addf %17, %19 : vector<16x128xf32>
    %cst_15 = arith.constant 0.000000e+00 : f32
    %21 = vector.broadcast %cst_15 : f32 to vector<16x128xf32>
    %22 = arith.maximumf %20, %21 : vector<16x128xf32>
    %23 = arith.truncf %14 : vector<16x128xf32> to vector<16x128xbf16>
    %c0_16 = arith.constant 0 : index
    %c0_17 = arith.constant 0 : index
    %24 = vector.load %arg7[%c0_16, %c0_17] : memref<128x1536xbf16, #tpu.memory_space<vmem>>, vector<128x1536xbf16>
    %cst_18 = arith.constant dense<0.000000e+00> : vector<16x1536xf32>
    %25 = tpu.matmul %23, %24, %cst_18 {dimension_numbers = #tpu.dot_dimension_numbers<[1], [0], [0], [1], [0, 0, 1, 1], [], []>} : vector<16x128xbf16>, vector<128x1536xbf16>, vector<16x1536xf32> -> vector<16x1536xf32>
    %c0_19 = arith.constant 0 : index
    %c0_20 = arith.constant 0 : index
    %26 = vector.load %arg8[%c0_19, %c0_20] : memref<1x1536xf32, #tpu.memory_space<vmem>>, vector<1x1536xf32>
    %27 = vector.broadcast %26 : vector<1x1536xf32> to vector<16x1536xf32>
    %28 = arith.addf %25, %27 : vector<16x1536xf32>
    %29 = arith.truncf %28 : vector<16x1536xf32> to vector<16x1536xbf16>
    %30 = vector.extract_strided_slice %29 {offsets = [0, 0], sizes = [8, 1536], strides = [1, 1]} : vector<16x1536xbf16> to vector<8x1536xbf16>
    %31 = vector.extract_strided_slice %30 {offsets = [0, 0], sizes = [8, 512], strides = [1, 1]} : vector<8x1536xbf16> to vector<8x512xbf16>
    %32 = vector.extract_strided_slice %30 {offsets = [0, 512], sizes = [8, 512], strides = [1, 1]} : vector<8x1536xbf16> to vector<8x512xbf16>
    %33 = vector.extract_strided_slice %30 {offsets = [0, 1024], sizes = [8, 512], strides = [1, 1]} : vector<8x1536xbf16> to vector<8x512xbf16>
    %34 = vector.extract_strided_slice %31 {offsets = [0, 0], sizes = [8, 128], strides = [1, 1]} : vector<8x512xbf16> to vector<8x128xbf16>
    %35 = vector.extract_strided_slice %32 {offsets = [0, 0], sizes = [8, 128], strides = [1, 1]} : vector<8x512xbf16> to vector<8x128xbf16>
    %36 = vector.extract_strided_slice %33 {offsets = [0, 0], sizes = [8, 128], strides = [1, 1]} : vector<8x512xbf16> to vector<8x128xbf16>
    %cst_21 = arith.constant dense<0.000000e+00> : vector<8x8xf32>
    %37 = tpu.matmul %34, %35, %cst_21 {dimension_numbers = #tpu.dot_dimension_numbers<[1], [1], [0], [0], [0, 0, 1, 0], [], []>} : vector<8x128xbf16>, vector<8x128xbf16>, vector<8x8xf32> -> vector<8x8xf32>
    %cst_22 = arith.constant 2.500000e-01 : f32
    %38 = vector.broadcast %cst_22 : f32 to vector<8x8xf32>
    %39 = arith.mulf %37, %38 : vector<8x8xf32>
    %cst_23 = arith.constant -1.000000e+30 : f32
    %40 = vector.broadcast %cst_23 : f32 to vector<8x8xf32>
    %41 = arith.select %2, %39, %40 : vector<8x8xi1>, vector<8x8xf32>
    %cst_24 = arith.constant dense<0xFF800000> : vector<8xf32>
    %42 = vector.multi_reduction <maximumf>, %41, %cst_24 [1] : vector<8x8xf32> to vector<8xf32>
    %43 = vector.shape_cast %42 : vector<8xf32> to vector<8x1xf32>
    %44 = vector.broadcast %43 : vector<8x1xf32> to vector<8x8xf32>
    %45 = arith.subf %41, %44 : vector<8x8xf32>
    %46 = math.exp %45 : vector<8x8xf32>
    %cst_25 = arith.constant dense<0.000000e+00> : vector<8xf32>
    %47 = vector.multi_reduction <add>, %46, %cst_25 [1] : vector<8x8xf32> to vector<8xf32>
    %48 = vector.shape_cast %47 : vector<8xf32> to vector<8x1xf32>
    %49 = tpu.reciprocal %48 {approx = true} : vector<8x1xf32> -> vector<8x1xf32>
    %50 = vector.broadcast %49 : vector<8x1xf32> to vector<8x8xf32>
    %51 = arith.mulf %46, %50 : vector<8x8xf32>
    %52 = arith.truncf %51 : vector<8x8xf32> to vector<8x8xbf16>
    %cst_26 = arith.constant dense<0.000000e+00> : vector<8x128xf32>
    %53 = tpu.matmul %52, %36, %cst_26 {dimension_numbers = #tpu.dot_dimension_numbers<[1], [0], [0], [1], [0, 0, 1, 1], [], []>} : vector<8x8xbf16>, vector<8x128xbf16>, vector<8x128xf32> -> vector<8x128xf32>
    %54 = vector.extract_strided_slice %31 {offsets = [0, 128], sizes = [8, 128], strides = [1, 1]} : vector<8x512xbf16> to vector<8x128xbf16>
    %55 = vector.extract_strided_slice %32 {offsets = [0, 128], sizes = [8, 128], strides = [1, 1]} : vector<8x512xbf16> to vector<8x128xbf16>
    %56 = vector.extract_strided_slice %33 {offsets = [0, 128], sizes = [8, 128], strides = [1, 1]} : vector<8x512xbf16> to vector<8x128xbf16>
    %cst_27 = arith.constant dense<0.000000e+00> : vector<8x8xf32>
    %57 = tpu.matmul %54, %55, %cst_27 {dimension_numbers = #tpu.dot_dimension_numbers<[1], [1], [0], [0], [0, 0, 1, 0], [], []>} : vector<8x128xbf16>, vector<8x128xbf16>, vector<8x8xf32> -> vector<8x8xf32>
    %cst_28 = arith.constant 2.500000e-01 : f32
    %58 = vector.broadcast %cst_28 : f32 to vector<8x8xf32>
    %59 = arith.mulf %57, %58 : vector<8x8xf32>
    %cst_29 = arith.constant -1.000000e+30 : f32
    %60 = vector.broadcast %cst_29 : f32 to vector<8x8xf32>
    %61 = arith.select %2, %59, %60 : vector<8x8xi1>, vector<8x8xf32>
    %cst_30 = arith.constant dense<0xFF800000> : vector<8xf32>
    %62 = vector.multi_reduction <maximumf>, %61, %cst_30 [1] : vector<8x8xf32> to vector<8xf32>
    %63 = vector.shape_cast %62 : vector<8xf32> to vector<8x1xf32>
    %64 = vector.broadcast %63 : vector<8x1xf32> to vector<8x8xf32>
    %65 = arith.subf %61, %64 : vector<8x8xf32>
    %66 = math.exp %65 : vector<8x8xf32>
    %cst_31 = arith.constant dense<0.000000e+00> : vector<8xf32>
    %67 = vector.multi_reduction <add>, %66, %cst_31 [1] : vector<8x8xf32> to vector<8xf32>
    %68 = vector.shape_cast %67 : vector<8xf32> to vector<8x1xf32>
    %69 = tpu.reciprocal %68 {approx = true} : vector<8x1xf32> -> vector<8x1xf32>
    %70 = vector.broadcast %69 : vector<8x1xf32> to vector<8x8xf32>
    %71 = arith.mulf %66, %70 : vector<8x8xf32>
    %72 = arith.truncf %71 : vector<8x8xf32> to vector<8x8xbf16>
    %cst_32 = arith.constant dense<0.000000e+00> : vector<8x128xf32>
    %73 = tpu.matmul %72, %56, %cst_32 {dimension_numbers = #tpu.dot_dimension_numbers<[1], [0], [0], [1], [0, 0, 1, 1], [], []>} : vector<8x8xbf16>, vector<8x128xbf16>, vector<8x128xf32> -> vector<8x128xf32>
    %74 = vector.extract_strided_slice %31 {offsets = [0, 256], sizes = [8, 128], strides = [1, 1]} : vector<8x512xbf16> to vector<8x128xbf16>
    %75 = vector.extract_strided_slice %32 {offsets = [0, 256], sizes = [8, 128], strides = [1, 1]} : vector<8x512xbf16> to vector<8x128xbf16>
    %76 = vector.extract_strided_slice %33 {offsets = [0, 256], sizes = [8, 128], strides = [1, 1]} : vector<8x512xbf16> to vector<8x128xbf16>
    %cst_33 = arith.constant dense<0.000000e+00> : vector<8x8xf32>
    %77 = tpu.matmul %74, %75, %cst_33 {dimension_numbers = #tpu.dot_dimension_numbers<[1], [1], [0], [0], [0, 0, 1, 0], [], []>} : vector<8x128xbf16>, vector<8x128xbf16>, vector<8x8xf32> -> vector<8x8xf32>
    %cst_34 = arith.constant 2.500000e-01 : f32
    %78 = vector.broadcast %cst_34 : f32 to vector<8x8xf32>
    %79 = arith.mulf %77, %78 : vector<8x8xf32>
    %cst_35 = arith.constant -1.000000e+30 : f32
    %80 = vector.broadcast %cst_35 : f32 to vector<8x8xf32>
    %81 = arith.select %2, %79, %80 : vector<8x8xi1>, vector<8x8xf32>
    %cst_36 = arith.constant dense<0xFF800000> : vector<8xf32>
    %82 = vector.multi_reduction <maximumf>, %81, %cst_36 [1] : vector<8x8xf32> to vector<8xf32>
    %83 = vector.shape_cast %82 : vector<8xf32> to vector<8x1xf32>
    %84 = vector.broadcast %83 : vector<8x1xf32> to vector<8x8xf32>
    %85 = arith.subf %81, %84 : vector<8x8xf32>
    %86 = math.exp %85 : vector<8x8xf32>
    %cst_37 = arith.constant dense<0.000000e+00> : vector<8xf32>
    %87 = vector.multi_reduction <add>, %86, %cst_37 [1] : vector<8x8xf32> to vector<8xf32>
    %88 = vector.shape_cast %87 : vector<8xf32> to vector<8x1xf32>
    %89 = tpu.reciprocal %88 {approx = true} : vector<8x1xf32> -> vector<8x1xf32>
    %90 = vector.broadcast %89 : vector<8x1xf32> to vector<8x8xf32>
    %91 = arith.mulf %86, %90 : vector<8x8xf32>
    %92 = arith.truncf %91 : vector<8x8xf32> to vector<8x8xbf16>
    %cst_38 = arith.constant dense<0.000000e+00> : vector<8x128xf32>
    %93 = tpu.matmul %92, %76, %cst_38 {dimension_numbers = #tpu.dot_dimension_numbers<[1], [0], [0], [1], [0, 0, 1, 1], [], []>} : vector<8x8xbf16>, vector<8x128xbf16>, vector<8x128xf32> -> vector<8x128xf32>
    %94 = vector.extract_strided_slice %31 {offsets = [0, 384], sizes = [8, 128], strides = [1, 1]} : vector<8x512xbf16> to vector<8x128xbf16>
    %95 = vector.extract_strided_slice %32 {offsets = [0, 384], sizes = [8, 128], strides = [1, 1]} : vector<8x512xbf16> to vector<8x128xbf16>
    %96 = vector.extract_strided_slice %33 {offsets = [0, 384], sizes = [8, 128], strides = [1, 1]} : vector<8x512xbf16> to vector<8x128xbf16>
    %cst_39 = arith.constant dense<0.000000e+00> : vector<8x8xf32>
    %97 = tpu.matmul %94, %95, %cst_39 {dimension_numbers = #tpu.dot_dimension_numbers<[1], [1], [0], [0], [0, 0, 1, 0], [], []>} : vector<8x128xbf16>, vector<8x128xbf16>, vector<8x8xf32> -> vector<8x8xf32>
    %cst_40 = arith.constant 2.500000e-01 : f32
    %98 = vector.broadcast %cst_40 : f32 to vector<8x8xf32>
    %99 = arith.mulf %97, %98 : vector<8x8xf32>
    %cst_41 = arith.constant -1.000000e+30 : f32
    %100 = vector.broadcast %cst_41 : f32 to vector<8x8xf32>
    %101 = arith.select %2, %99, %100 : vector<8x8xi1>, vector<8x8xf32>
    %cst_42 = arith.constant dense<0xFF800000> : vector<8xf32>
    %102 = vector.multi_reduction <maximumf>, %101, %cst_42 [1] : vector<8x8xf32> to vector<8xf32>
    %103 = vector.shape_cast %102 : vector<8xf32> to vector<8x1xf32>
    %104 = vector.broadcast %103 : vector<8x1xf32> to vector<8x8xf32>
    %105 = arith.subf %101, %104 : vector<8x8xf32>
    %106 = math.exp %105 : vector<8x8xf32>
    %cst_43 = arith.constant dense<0.000000e+00> : vector<8xf32>
    %107 = vector.multi_reduction <add>, %106, %cst_43 [1] : vector<8x8xf32> to vector<8xf32>
    %108 = vector.shape_cast %107 : vector<8xf32> to vector<8x1xf32>
    %109 = tpu.reciprocal %108 {approx = true} : vector<8x1xf32> -> vector<8x1xf32>
    %110 = vector.broadcast %109 : vector<8x1xf32> to vector<8x8xf32>
    %111 = arith.mulf %106, %110 : vector<8x8xf32>
    %112 = arith.truncf %111 : vector<8x8xf32> to vector<8x8xbf16>
    %cst_44 = arith.constant dense<0.000000e+00> : vector<8x128xf32>
    %113 = tpu.matmul %112, %96, %cst_44 {dimension_numbers = #tpu.dot_dimension_numbers<[1], [0], [0], [1], [0, 0, 1, 1], [], []>} : vector<8x8xbf16>, vector<8x128xbf16>, vector<8x128xf32> -> vector<8x128xf32>
    %114 = tpu.concatenate %53, %73, %93, %113 in 1 : vector<8x128xf32>, vector<8x128xf32>, vector<8x128xf32>, vector<8x128xf32> -> vector<8x512xf32>
    %115 = arith.truncf %114 : vector<8x512xf32> to vector<8x512xbf16>
    %c0_45 = arith.constant 0 : index
    %c0_46 = arith.constant 0 : index
    %116 = vector.load %arg9[%c0_45, %c0_46] : memref<512x128xbf16, #tpu.memory_space<vmem>>, vector<512x128xbf16>
    %cst_47 = arith.constant dense<0.000000e+00> : vector<8x128xf32>
    %117 = tpu.matmul %115, %116, %cst_47 {dimension_numbers = #tpu.dot_dimension_numbers<[1], [0], [0], [1], [0, 0, 1, 1], [], []>} : vector<8x512xbf16>, vector<512x128xbf16>, vector<8x128xf32> -> vector<8x128xf32>
    %c0_48 = arith.constant 0 : index
    %c0_49 = arith.constant 0 : index
    %118 = vector.load %arg10[%c0_48, %c0_49] : memref<1x128xf32, #tpu.memory_space<vmem>>, vector<1x128xf32>
    %119 = vector.broadcast %118 : vector<1x128xf32> to vector<8x128xf32>
    %120 = arith.addf %117, %119 : vector<8x128xf32>
    %121 = vector.extract_strided_slice %29 {offsets = [8, 0], sizes = [8, 1536], strides = [1, 1]} : vector<16x1536xbf16> to vector<8x1536xbf16>
    %122 = vector.extract_strided_slice %121 {offsets = [0, 0], sizes = [8, 512], strides = [1, 1]} : vector<8x1536xbf16> to vector<8x512xbf16>
    %123 = vector.extract_strided_slice %121 {offsets = [0, 512], sizes = [8, 512], strides = [1, 1]} : vector<8x1536xbf16> to vector<8x512xbf16>
    %124 = vector.extract_strided_slice %121 {offsets = [0, 1024], sizes = [8, 512], strides = [1, 1]} : vector<8x1536xbf16> to vector<8x512xbf16>
    %125 = vector.extract_strided_slice %122 {offsets = [0, 0], sizes = [8, 128], strides = [1, 1]} : vector<8x512xbf16> to vector<8x128xbf16>
    %126 = vector.extract_strided_slice %123 {offsets = [0, 0], sizes = [8, 128], strides = [1, 1]} : vector<8x512xbf16> to vector<8x128xbf16>
    %127 = vector.extract_strided_slice %124 {offsets = [0, 0], sizes = [8, 128], strides = [1, 1]} : vector<8x512xbf16> to vector<8x128xbf16>
    %cst_50 = arith.constant dense<0.000000e+00> : vector<8x8xf32>
    %128 = tpu.matmul %125, %126, %cst_50 {dimension_numbers = #tpu.dot_dimension_numbers<[1], [1], [0], [0], [0, 0, 1, 0], [], []>} : vector<8x128xbf16>, vector<8x128xbf16>, vector<8x8xf32> -> vector<8x8xf32>
    %cst_51 = arith.constant 2.500000e-01 : f32
    %129 = vector.broadcast %cst_51 : f32 to vector<8x8xf32>
    %130 = arith.mulf %128, %129 : vector<8x8xf32>
    %cst_52 = arith.constant -1.000000e+30 : f32
    %131 = vector.broadcast %cst_52 : f32 to vector<8x8xf32>
    %132 = arith.select %2, %130, %131 : vector<8x8xi1>, vector<8x8xf32>
    %cst_53 = arith.constant dense<0xFF800000> : vector<8xf32>
    %133 = vector.multi_reduction <maximumf>, %132, %cst_53 [1] : vector<8x8xf32> to vector<8xf32>
    %134 = vector.shape_cast %133 : vector<8xf32> to vector<8x1xf32>
    %135 = vector.broadcast %134 : vector<8x1xf32> to vector<8x8xf32>
    %136 = arith.subf %132, %135 : vector<8x8xf32>
    %137 = math.exp %136 : vector<8x8xf32>
    %cst_54 = arith.constant dense<0.000000e+00> : vector<8xf32>
    %138 = vector.multi_reduction <add>, %137, %cst_54 [1] : vector<8x8xf32> to vector<8xf32>
    %139 = vector.shape_cast %138 : vector<8xf32> to vector<8x1xf32>
    %140 = tpu.reciprocal %139 {approx = true} : vector<8x1xf32> -> vector<8x1xf32>
    %141 = vector.broadcast %140 : vector<8x1xf32> to vector<8x8xf32>
    %142 = arith.mulf %137, %141 : vector<8x8xf32>
    %143 = arith.truncf %142 : vector<8x8xf32> to vector<8x8xbf16>
    %cst_55 = arith.constant dense<0.000000e+00> : vector<8x128xf32>
    %144 = tpu.matmul %143, %127, %cst_55 {dimension_numbers = #tpu.dot_dimension_numbers<[1], [0], [0], [1], [0, 0, 1, 1], [], []>} : vector<8x8xbf16>, vector<8x128xbf16>, vector<8x128xf32> -> vector<8x128xf32>
    %145 = vector.extract_strided_slice %122 {offsets = [0, 128], sizes = [8, 128], strides = [1, 1]} : vector<8x512xbf16> to vector<8x128xbf16>
    %146 = vector.extract_strided_slice %123 {offsets = [0, 128], sizes = [8, 128], strides = [1, 1]} : vector<8x512xbf16> to vector<8x128xbf16>
    %147 = vector.extract_strided_slice %124 {offsets = [0, 128], sizes = [8, 128], strides = [1, 1]} : vector<8x512xbf16> to vector<8x128xbf16>
    %cst_56 = arith.constant dense<0.000000e+00> : vector<8x8xf32>
    %148 = tpu.matmul %145, %146, %cst_56 {dimension_numbers = #tpu.dot_dimension_numbers<[1], [1], [0], [0], [0, 0, 1, 0], [], []>} : vector<8x128xbf16>, vector<8x128xbf16>, vector<8x8xf32> -> vector<8x8xf32>
    %cst_57 = arith.constant 2.500000e-01 : f32
    %149 = vector.broadcast %cst_57 : f32 to vector<8x8xf32>
    %150 = arith.mulf %148, %149 : vector<8x8xf32>
    %cst_58 = arith.constant -1.000000e+30 : f32
    %151 = vector.broadcast %cst_58 : f32 to vector<8x8xf32>
    %152 = arith.select %2, %150, %151 : vector<8x8xi1>, vector<8x8xf32>
    %cst_59 = arith.constant dense<0xFF800000> : vector<8xf32>
    %153 = vector.multi_reduction <maximumf>, %152, %cst_59 [1] : vector<8x8xf32> to vector<8xf32>
    %154 = vector.shape_cast %153 : vector<8xf32> to vector<8x1xf32>
    %155 = vector.broadcast %154 : vector<8x1xf32> to vector<8x8xf32>
    %156 = arith.subf %152, %155 : vector<8x8xf32>
    %157 = math.exp %156 : vector<8x8xf32>
    %cst_60 = arith.constant dense<0.000000e+00> : vector<8xf32>
    %158 = vector.multi_reduction <add>, %157, %cst_60 [1] : vector<8x8xf32> to vector<8xf32>
    %159 = vector.shape_cast %158 : vector<8xf32> to vector<8x1xf32>
    %160 = tpu.reciprocal %159 {approx = true} : vector<8x1xf32> -> vector<8x1xf32>
    %161 = vector.broadcast %160 : vector<8x1xf32> to vector<8x8xf32>
    %162 = arith.mulf %157, %161 : vector<8x8xf32>
    %163 = arith.truncf %162 : vector<8x8xf32> to vector<8x8xbf16>
    %cst_61 = arith.constant dense<0.000000e+00> : vector<8x128xf32>
    %164 = tpu.matmul %163, %147, %cst_61 {dimension_numbers = #tpu.dot_dimension_numbers<[1], [0], [0], [1], [0, 0, 1, 1], [], []>} : vector<8x8xbf16>, vector<8x128xbf16>, vector<8x128xf32> -> vector<8x128xf32>
    %165 = vector.extract_strided_slice %122 {offsets = [0, 256], sizes = [8, 128], strides = [1, 1]} : vector<8x512xbf16> to vector<8x128xbf16>
    %166 = vector.extract_strided_slice %123 {offsets = [0, 256], sizes = [8, 128], strides = [1, 1]} : vector<8x512xbf16> to vector<8x128xbf16>
    %167 = vector.extract_strided_slice %124 {offsets = [0, 256], sizes = [8, 128], strides = [1, 1]} : vector<8x512xbf16> to vector<8x128xbf16>
    %cst_62 = arith.constant dense<0.000000e+00> : vector<8x8xf32>
    %168 = tpu.matmul %165, %166, %cst_62 {dimension_numbers = #tpu.dot_dimension_numbers<[1], [1], [0], [0], [0, 0, 1, 0], [], []>} : vector<8x128xbf16>, vector<8x128xbf16>, vector<8x8xf32> -> vector<8x8xf32>
    %cst_63 = arith.constant 2.500000e-01 : f32
    %169 = vector.broadcast %cst_63 : f32 to vector<8x8xf32>
    %170 = arith.mulf %168, %169 : vector<8x8xf32>
    %cst_64 = arith.constant -1.000000e+30 : f32
    %171 = vector.broadcast %cst_64 : f32 to vector<8x8xf32>
    %172 = arith.select %2, %170, %171 : vector<8x8xi1>, vector<8x8xf32>
    %cst_65 = arith.constant dense<0xFF800000> : vector<8xf32>
    %173 = vector.multi_reduction <maximumf>, %172, %cst_65 [1] : vector<8x8xf32> to vector<8xf32>
    %174 = vector.shape_cast %173 : vector<8xf32> to vector<8x1xf32>
    %175 = vector.broadcast %174 : vector<8x1xf32> to vector<8x8xf32>
    %176 = arith.subf %172, %175 : vector<8x8xf32>
    %177 = math.exp %176 : vector<8x8xf32>
    %cst_66 = arith.constant dense<0.000000e+00> : vector<8xf32>
    %178 = vector.multi_reduction <add>, %177, %cst_66 [1] : vector<8x8xf32> to vector<8xf32>
    %179 = vector.shape_cast %178 : vector<8xf32> to vector<8x1xf32>
    %180 = tpu.reciprocal %179 {approx = true} : vector<8x1xf32> -> vector<8x1xf32>
    %181 = vector.broadcast %180 : vector<8x1xf32> to vector<8x8xf32>
    %182 = arith.mulf %177, %181 : vector<8x8xf32>
    %183 = arith.truncf %182 : vector<8x8xf32> to vector<8x8xbf16>
    %cst_67 = arith.constant dense<0.000000e+00> : vector<8x128xf32>
    %184 = tpu.matmul %183, %167, %cst_67 {dimension_numbers = #tpu.dot_dimension_numbers<[1], [0], [0], [1], [0, 0, 1, 1], [], []>} : vector<8x8xbf16>, vector<8x128xbf16>, vector<8x128xf32> -> vector<8x128xf32>
    %185 = vector.extract_strided_slice %122 {offsets = [0, 384], sizes = [8, 128], strides = [1, 1]} : vector<8x512xbf16> to vector<8x128xbf16>
    %186 = vector.extract_strided_slice %123 {offsets = [0, 384], sizes = [8, 128], strides = [1, 1]} : vector<8x512xbf16> to vector<8x128xbf16>
    %187 = vector.extract_strided_slice %124 {offsets = [0, 384], sizes = [8, 128], strides = [1, 1]} : vector<8x512xbf16> to vector<8x128xbf16>
    %cst_68 = arith.constant dense<0.000000e+00> : vector<8x8xf32>
    %188 = tpu.matmul %185, %186, %cst_68 {dimension_numbers = #tpu.dot_dimension_numbers<[1], [1], [0], [0], [0, 0, 1, 0], [], []>} : vector<8x128xbf16>, vector<8x128xbf16>, vector<8x8xf32> -> vector<8x8xf32>
    %cst_69 = arith.constant 2.500000e-01 : f32
    %189 = vector.broadcast %cst_69 : f32 to vector<8x8xf32>
    %190 = arith.mulf %188, %189 : vector<8x8xf32>
    %cst_70 = arith.constant -1.000000e+30 : f32
    %191 = vector.broadcast %cst_70 : f32 to vector<8x8xf32>
    %192 = arith.select %2, %190, %191 : vector<8x8xi1>, vector<8x8xf32>
    %cst_71 = arith.constant dense<0xFF800000> : vector<8xf32>
    %193 = vector.multi_reduction <maximumf>, %192, %cst_71 [1] : vector<8x8xf32> to vector<8xf32>
    %194 = vector.shape_cast %193 : vector<8xf32> to vector<8x1xf32>
    %195 = vector.broadcast %194 : vector<8x1xf32> to vector<8x8xf32>
    %196 = arith.subf %192, %195 : vector<8x8xf32>
    %197 = math.exp %196 : vector<8x8xf32>
    %cst_72 = arith.constant dense<0.000000e+00> : vector<8xf32>
    %198 = vector.multi_reduction <add>, %197, %cst_72 [1] : vector<8x8xf32> to vector<8xf32>
    %199 = vector.shape_cast %198 : vector<8xf32> to vector<8x1xf32>
    %200 = tpu.reciprocal %199 {approx = true} : vector<8x1xf32> -> vector<8x1xf32>
    %201 = vector.broadcast %200 : vector<8x1xf32> to vector<8x8xf32>
    %202 = arith.mulf %197, %201 : vector<8x8xf32>
    %203 = arith.truncf %202 : vector<8x8xf32> to vector<8x8xbf16>
    %cst_73 = arith.constant dense<0.000000e+00> : vector<8x128xf32>
    %204 = tpu.matmul %203, %187, %cst_73 {dimension_numbers = #tpu.dot_dimension_numbers<[1], [0], [0], [1], [0, 0, 1, 1], [], []>} : vector<8x8xbf16>, vector<8x128xbf16>, vector<8x128xf32> -> vector<8x128xf32>
    %205 = tpu.concatenate %144, %164, %184, %204 in 1 : vector<8x128xf32>, vector<8x128xf32>, vector<8x128xf32>, vector<8x128xf32> -> vector<8x512xf32>
    %206 = arith.truncf %205 : vector<8x512xf32> to vector<8x512xbf16>
    %c0_74 = arith.constant 0 : index
    %c0_75 = arith.constant 0 : index
    %207 = vector.load %arg9[%c0_74, %c0_75] : memref<512x128xbf16, #tpu.memory_space<vmem>>, vector<512x128xbf16>
    %cst_76 = arith.constant dense<0.000000e+00> : vector<8x128xf32>
    %208 = tpu.matmul %206, %207, %cst_76 {dimension_numbers = #tpu.dot_dimension_numbers<[1], [0], [0], [1], [0, 0, 1, 1], [], []>} : vector<8x512xbf16>, vector<512x128xbf16>, vector<8x128xf32> -> vector<8x128xf32>
    %c0_77 = arith.constant 0 : index
    %c0_78 = arith.constant 0 : index
    %209 = vector.load %arg10[%c0_77, %c0_78] : memref<1x128xf32, #tpu.memory_space<vmem>>, vector<1x128xf32>
    %210 = vector.broadcast %209 : vector<1x128xf32> to vector<8x128xf32>
    %211 = arith.addf %208, %210 : vector<8x128xf32>
    %212 = tpu.concatenate %120, %211 in 0 : vector<8x128xf32>, vector<8x128xf32> -> vector<16x128xf32>
    %213 = arith.addf %14, %212 : vector<16x128xf32>
    %cst_79 = arith.constant dense<0.000000e+00> : vector<16xf32>
    %214 = vector.multi_reduction <add>, %213, %cst_79 [1] : vector<16x128xf32> to vector<16xf32>
    %215 = vector.shape_cast %214 : vector<16xf32> to vector<16x1xf32>
    %cst_80 = arith.constant 1.562500e-02 : f32
    %216 = vector.broadcast %cst_80 : f32 to vector<16x1xf32>
    %217 = arith.mulf %215, %216 : vector<16x1xf32>
    %218 = arith.mulf %213, %213 : vector<16x128xf32>
    %cst_81 = arith.constant dense<0.000000e+00> : vector<16xf32>
    %219 = vector.multi_reduction <add>, %218, %cst_81 [1] : vector<16x128xf32> to vector<16xf32>
    %220 = vector.shape_cast %219 : vector<16xf32> to vector<16x1xf32>
    %cst_82 = arith.constant 1.562500e-02 : f32
    %221 = vector.broadcast %cst_82 : f32 to vector<16x1xf32>
    %222 = arith.mulf %220, %221 : vector<16x1xf32>
    %223 = arith.mulf %217, %217 : vector<16x1xf32>
    %224 = arith.subf %222, %223 : vector<16x1xf32>
    %cst_83 = arith.constant 0.000000e+00 : f32
    %225 = vector.broadcast %cst_83 : f32 to vector<16x1xf32>
    %226 = arith.maximumf %224, %225 : vector<16x1xf32>
    %227 = vector.broadcast %217 : vector<16x1xf32> to vector<16x128xf32>
    %228 = arith.subf %213, %227 : vector<16x128xf32>
    %cst_84 = arith.constant 9.99999974E-6 : f32
    %229 = vector.broadcast %cst_84 : f32 to vector<16x1xf32>
    %230 = arith.addf %226, %229 : vector<16x1xf32>
    %231 = math.rsqrt %230 : vector<16x1xf32>
    %232 = vector.broadcast %231 : vector<16x1xf32> to vector<16x128xf32>
    %233 = arith.mulf %228, %232 : vector<16x128xf32>
    %c0_85 = arith.constant 0 : index
    %c0_86 = arith.constant 0 : index
    %234 = vector.load %arg17[%c0_85, %c0_86] : memref<1x128xf32, #tpu.memory_space<vmem>>, vector<1x128xf32>
    %235 = vector.broadcast %234 : vector<1x128xf32> to vector<16x128xf32>
    %236 = arith.mulf %233, %235 : vector<16x128xf32>
    %c0_87 = arith.constant 0 : index
    %c0_88 = arith.constant 0 : index
    %237 = vector.load %arg18[%c0_87, %c0_88] : memref<1x128xf32, #tpu.memory_space<vmem>>, vector<1x128xf32>
    %238 = vector.broadcast %237 : vector<1x128xf32> to vector<16x128xf32>
    %239 = arith.addf %236, %238 : vector<16x128xf32>
    %240 = arith.truncf %239 : vector<16x128xf32> to vector<16x128xbf16>
    %c0_89 = arith.constant 0 : index
    %c0_90 = arith.constant 0 : index
    %241 = vector.load %arg11[%c0_89, %c0_90] : memref<128x512xbf16, #tpu.memory_space<vmem>>, vector<128x512xbf16>
    %cst_91 = arith.constant dense<0.000000e+00> : vector<16x512xf32>
    %242 = tpu.matmul %240, %241, %cst_91 {dimension_numbers = #tpu.dot_dimension_numbers<[1], [0], [0], [1], [0, 0, 1, 1], [], []>} : vector<16x128xbf16>, vector<128x512xbf16>, vector<16x512xf32> -> vector<16x512xf32>
    %c0_92 = arith.constant 0 : index
    %c0_93 = arith.constant 0 : index
    %243 = vector.load %arg12[%c0_92, %c0_93] : memref<1x512xf32, #tpu.memory_space<vmem>>, vector<1x512xf32>
    %244 = vector.broadcast %243 : vector<1x512xf32> to vector<16x512xf32>
    %245 = arith.addf %242, %244 : vector<16x512xf32>
    %246 = arith.truncf %245 : vector<16x512xf32> to vector<16x512xbf16>
    %247 = arith.truncf %22 : vector<16x128xf32> to vector<16x128xbf16>
    %c0_94 = arith.constant 0 : index
    %c0_95 = arith.constant 0 : index
    %248 = vector.load %arg13[%c0_94, %c0_95] : memref<128x1024xbf16, #tpu.memory_space<vmem>>, vector<128x1024xbf16>
    %cst_96 = arith.constant dense<0.000000e+00> : vector<16x1024xf32>
    %249 = tpu.matmul %247, %248, %cst_96 {dimension_numbers = #tpu.dot_dimension_numbers<[1], [0], [0], [1], [0, 0, 1, 1], [], []>} : vector<16x128xbf16>, vector<128x1024xbf16>, vector<16x1024xf32> -> vector<16x1024xf32>
    %c0_97 = arith.constant 0 : index
    %c0_98 = arith.constant 0 : index
    %250 = vector.load %arg14[%c0_97, %c0_98] : memref<1x1024xf32, #tpu.memory_space<vmem>>, vector<1x1024xf32>
    %251 = vector.broadcast %250 : vector<1x1024xf32> to vector<16x1024xf32>
    %252 = arith.addf %249, %251 : vector<16x1024xf32>
    %253 = arith.truncf %252 : vector<16x1024xf32> to vector<16x1024xbf16>
    %254 = vector.extract_strided_slice %246 {offsets = [0, 0], sizes = [8, 512], strides = [1, 1]} : vector<16x512xbf16> to vector<8x512xbf16>
    %255 = vector.extract_strided_slice %253 {offsets = [0, 0], sizes = [8, 1024], strides = [1, 1]} : vector<16x1024xbf16> to vector<8x1024xbf16>
    %256 = vector.extract_strided_slice %255 {offsets = [0, 0], sizes = [8, 512], strides = [1, 1]} : vector<8x1024xbf16> to vector<8x512xbf16>
    %257 = vector.extract_strided_slice %255 {offsets = [0, 512], sizes = [8, 512], strides = [1, 1]} : vector<8x1024xbf16> to vector<8x512xbf16>
    %258 = vector.extract_strided_slice %254 {offsets = [0, 0], sizes = [8, 128], strides = [1, 1]} : vector<8x512xbf16> to vector<8x128xbf16>
    %259 = vector.extract_strided_slice %256 {offsets = [0, 0], sizes = [8, 128], strides = [1, 1]} : vector<8x512xbf16> to vector<8x128xbf16>
    %260 = vector.extract_strided_slice %257 {offsets = [0, 0], sizes = [8, 128], strides = [1, 1]} : vector<8x512xbf16> to vector<8x128xbf16>
    %cst_99 = arith.constant dense<0.000000e+00> : vector<8x8xf32>
    %261 = tpu.matmul %258, %259, %cst_99 {dimension_numbers = #tpu.dot_dimension_numbers<[1], [1], [0], [0], [0, 0, 1, 0], [], []>} : vector<8x128xbf16>, vector<8x128xbf16>, vector<8x8xf32> -> vector<8x8xf32>
    %cst_100 = arith.constant 2.500000e-01 : f32
    %262 = vector.broadcast %cst_100 : f32 to vector<8x8xf32>
    %263 = arith.mulf %261, %262 : vector<8x8xf32>
    %cst_101 = arith.constant dense<0xFF800000> : vector<8xf32>
    %264 = vector.multi_reduction <maximumf>, %263, %cst_101 [1] : vector<8x8xf32> to vector<8xf32>
    %265 = vector.shape_cast %264 : vector<8xf32> to vector<8x1xf32>
    %266 = vector.broadcast %265 : vector<8x1xf32> to vector<8x8xf32>
    %267 = arith.subf %263, %266 : vector<8x8xf32>
    %268 = math.exp %267 : vector<8x8xf32>
    %cst_102 = arith.constant dense<0.000000e+00> : vector<8xf32>
    %269 = vector.multi_reduction <add>, %268, %cst_102 [1] : vector<8x8xf32> to vector<8xf32>
    %270 = vector.shape_cast %269 : vector<8xf32> to vector<8x1xf32>
    %271 = tpu.reciprocal %270 {approx = true} : vector<8x1xf32> -> vector<8x1xf32>
    %272 = vector.broadcast %271 : vector<8x1xf32> to vector<8x8xf32>
    %273 = arith.mulf %268, %272 : vector<8x8xf32>
    %274 = arith.truncf %273 : vector<8x8xf32> to vector<8x8xbf16>
    %cst_103 = arith.constant dense<0.000000e+00> : vector<8x128xf32>
    %275 = tpu.matmul %274, %260, %cst_103 {dimension_numbers = #tpu.dot_dimension_numbers<[1], [0], [0], [1], [0, 0, 1, 1], [], []>} : vector<8x8xbf16>, vector<8x128xbf16>, vector<8x128xf32> -> vector<8x128xf32>
    %276 = vector.extract_strided_slice %254 {offsets = [0, 128], sizes = [8, 128], strides = [1, 1]} : vector<8x512xbf16> to vector<8x128xbf16>
    %277 = vector.extract_strided_slice %256 {offsets = [0, 128], sizes = [8, 128], strides = [1, 1]} : vector<8x512xbf16> to vector<8x128xbf16>
    %278 = vector.extract_strided_slice %257 {offsets = [0, 128], sizes = [8, 128], strides = [1, 1]} : vector<8x512xbf16> to vector<8x128xbf16>
    %cst_104 = arith.constant dense<0.000000e+00> : vector<8x8xf32>
    %279 = tpu.matmul %276, %277, %cst_104 {dimension_numbers = #tpu.dot_dimension_numbers<[1], [1], [0], [0], [0, 0, 1, 0], [], []>} : vector<8x128xbf16>, vector<8x128xbf16>, vector<8x8xf32> -> vector<8x8xf32>
    %cst_105 = arith.constant 2.500000e-01 : f32
    %280 = vector.broadcast %cst_105 : f32 to vector<8x8xf32>
    %281 = arith.mulf %279, %280 : vector<8x8xf32>
    %cst_106 = arith.constant dense<0xFF800000> : vector<8xf32>
    %282 = vector.multi_reduction <maximumf>, %281, %cst_106 [1] : vector<8x8xf32> to vector<8xf32>
    %283 = vector.shape_cast %282 : vector<8xf32> to vector<8x1xf32>
    %284 = vector.broadcast %283 : vector<8x1xf32> to vector<8x8xf32>
    %285 = arith.subf %281, %284 : vector<8x8xf32>
    %286 = math.exp %285 : vector<8x8xf32>
    %cst_107 = arith.constant dense<0.000000e+00> : vector<8xf32>
    %287 = vector.multi_reduction <add>, %286, %cst_107 [1] : vector<8x8xf32> to vector<8xf32>
    %288 = vector.shape_cast %287 : vector<8xf32> to vector<8x1xf32>
    %289 = tpu.reciprocal %288 {approx = true} : vector<8x1xf32> -> vector<8x1xf32>
    %290 = vector.broadcast %289 : vector<8x1xf32> to vector<8x8xf32>
    %291 = arith.mulf %286, %290 : vector<8x8xf32>
    %292 = arith.truncf %291 : vector<8x8xf32> to vector<8x8xbf16>
    %cst_108 = arith.constant dense<0.000000e+00> : vector<8x128xf32>
    %293 = tpu.matmul %292, %278, %cst_108 {dimension_numbers = #tpu.dot_dimension_numbers<[1], [0], [0], [1], [0, 0, 1, 1], [], []>} : vector<8x8xbf16>, vector<8x128xbf16>, vector<8x128xf32> -> vector<8x128xf32>
    %294 = vector.extract_strided_slice %254 {offsets = [0, 256], sizes = [8, 128], strides = [1, 1]} : vector<8x512xbf16> to vector<8x128xbf16>
    %295 = vector.extract_strided_slice %256 {offsets = [0, 256], sizes = [8, 128], strides = [1, 1]} : vector<8x512xbf16> to vector<8x128xbf16>
    %296 = vector.extract_strided_slice %257 {offsets = [0, 256], sizes = [8, 128], strides = [1, 1]} : vector<8x512xbf16> to vector<8x128xbf16>
    %cst_109 = arith.constant dense<0.000000e+00> : vector<8x8xf32>
    %297 = tpu.matmul %294, %295, %cst_109 {dimension_numbers = #tpu.dot_dimension_numbers<[1], [1], [0], [0], [0, 0, 1, 0], [], []>} : vector<8x128xbf16>, vector<8x128xbf16>, vector<8x8xf32> -> vector<8x8xf32>
    %cst_110 = arith.constant 2.500000e-01 : f32
    %298 = vector.broadcast %cst_110 : f32 to vector<8x8xf32>
    %299 = arith.mulf %297, %298 : vector<8x8xf32>
    %cst_111 = arith.constant dense<0xFF800000> : vector<8xf32>
    %300 = vector.multi_reduction <maximumf>, %299, %cst_111 [1] : vector<8x8xf32> to vector<8xf32>
    %301 = vector.shape_cast %300 : vector<8xf32> to vector<8x1xf32>
    %302 = vector.broadcast %301 : vector<8x1xf32> to vector<8x8xf32>
    %303 = arith.subf %299, %302 : vector<8x8xf32>
    %304 = math.exp %303 : vector<8x8xf32>
    %cst_112 = arith.constant dense<0.000000e+00> : vector<8xf32>
    %305 = vector.multi_reduction <add>, %304, %cst_112 [1] : vector<8x8xf32> to vector<8xf32>
    %306 = vector.shape_cast %305 : vector<8xf32> to vector<8x1xf32>
    %307 = tpu.reciprocal %306 {approx = true} : vector<8x1xf32> -> vector<8x1xf32>
    %308 = vector.broadcast %307 : vector<8x1xf32> to vector<8x8xf32>
    %309 = arith.mulf %304, %308 : vector<8x8xf32>
    %310 = arith.truncf %309 : vector<8x8xf32> to vector<8x8xbf16>
    %cst_113 = arith.constant dense<0.000000e+00> : vector<8x128xf32>
    %311 = tpu.matmul %310, %296, %cst_113 {dimension_numbers = #tpu.dot_dimension_numbers<[1], [0], [0], [1], [0, 0, 1, 1], [], []>} : vector<8x8xbf16>, vector<8x128xbf16>, vector<8x128xf32> -> vector<8x128xf32>
    %312 = vector.extract_strided_slice %254 {offsets = [0, 384], sizes = [8, 128], strides = [1, 1]} : vector<8x512xbf16> to vector<8x128xbf16>
    %313 = vector.extract_strided_slice %256 {offsets = [0, 384], sizes = [8, 128], strides = [1, 1]} : vector<8x512xbf16> to vector<8x128xbf16>
    %314 = vector.extract_strided_slice %257 {offsets = [0, 384], sizes = [8, 128], strides = [1, 1]} : vector<8x512xbf16> to vector<8x128xbf16>
    %cst_114 = arith.constant dense<0.000000e+00> : vector<8x8xf32>
    %315 = tpu.matmul %312, %313, %cst_114 {dimension_numbers = #tpu.dot_dimension_numbers<[1], [1], [0], [0], [0, 0, 1, 0], [], []>} : vector<8x128xbf16>, vector<8x128xbf16>, vector<8x8xf32> -> vector<8x8xf32>
    %cst_115 = arith.constant 2.500000e-01 : f32
    %316 = vector.broadcast %cst_115 : f32 to vector<8x8xf32>
    %317 = arith.mulf %315, %316 : vector<8x8xf32>
    %cst_116 = arith.constant dense<0xFF800000> : vector<8xf32>
    %318 = vector.multi_reduction <maximumf>, %317, %cst_116 [1] : vector<8x8xf32> to vector<8xf32>
    %319 = vector.shape_cast %318 : vector<8xf32> to vector<8x1xf32>
    %320 = vector.broadcast %319 : vector<8x1xf32> to vector<8x8xf32>
    %321 = arith.subf %317, %320 : vector<8x8xf32>
    %322 = math.exp %321 : vector<8x8xf32>
    %cst_117 = arith.constant dense<0.000000e+00> : vector<8xf32>
    %323 = vector.multi_reduction <add>, %322, %cst_117 [1] : vector<8x8xf32> to vector<8xf32>
    %324 = vector.shape_cast %323 : vector<8xf32> to vector<8x1xf32>
    %325 = tpu.reciprocal %324 {approx = true} : vector<8x1xf32> -> vector<8x1xf32>
    %326 = vector.broadcast %325 : vector<8x1xf32> to vector<8x8xf32>
    %327 = arith.mulf %322, %326 : vector<8x8xf32>
    %328 = arith.truncf %327 : vector<8x8xf32> to vector<8x8xbf16>
    %cst_118 = arith.constant dense<0.000000e+00> : vector<8x128xf32>
    %329 = tpu.matmul %328, %314, %cst_118 {dimension_numbers = #tpu.dot_dimension_numbers<[1], [0], [0], [1], [0, 0, 1, 1], [], []>} : vector<8x8xbf16>, vector<8x128xbf16>, vector<8x128xf32> -> vector<8x128xf32>
    %330 = tpu.concatenate %275, %293, %311, %329 in 1 : vector<8x128xf32>, vector<8x128xf32>, vector<8x128xf32>, vector<8x128xf32> -> vector<8x512xf32>
    %331 = arith.truncf %330 : vector<8x512xf32> to vector<8x512xbf16>
    %c0_119 = arith.constant 0 : index
    %c0_120 = arith.constant 0 : index
    %332 = vector.load %arg15[%c0_119, %c0_120] : memref<512x128xbf16, #tpu.memory_space<vmem>>, vector<512x128xbf16>
    %cst_121 = arith.constant dense<0.000000e+00> : vector<8x128xf32>
    %333 = tpu.matmul %331, %332, %cst_121 {dimension_numbers = #tpu.dot_dimension_numbers<[1], [0], [0], [1], [0, 0, 1, 1], [], []>} : vector<8x512xbf16>, vector<512x128xbf16>, vector<8x128xf32> -> vector<8x128xf32>
    %c0_122 = arith.constant 0 : index
    %c0_123 = arith.constant 0 : index
    %334 = vector.load %arg16[%c0_122, %c0_123] : memref<1x128xf32, #tpu.memory_space<vmem>>, vector<1x128xf32>
    %335 = vector.broadcast %334 : vector<1x128xf32> to vector<8x128xf32>
    %336 = arith.addf %333, %335 : vector<8x128xf32>
    %337 = vector.extract_strided_slice %246 {offsets = [8, 0], sizes = [8, 512], strides = [1, 1]} : vector<16x512xbf16> to vector<8x512xbf16>
    %338 = vector.extract_strided_slice %253 {offsets = [8, 0], sizes = [8, 1024], strides = [1, 1]} : vector<16x1024xbf16> to vector<8x1024xbf16>
    %339 = vector.extract_strided_slice %338 {offsets = [0, 0], sizes = [8, 512], strides = [1, 1]} : vector<8x1024xbf16> to vector<8x512xbf16>
    %340 = vector.extract_strided_slice %338 {offsets = [0, 512], sizes = [8, 512], strides = [1, 1]} : vector<8x1024xbf16> to vector<8x512xbf16>
    %341 = vector.extract_strided_slice %337 {offsets = [0, 0], sizes = [8, 128], strides = [1, 1]} : vector<8x512xbf16> to vector<8x128xbf16>
    %342 = vector.extract_strided_slice %339 {offsets = [0, 0], sizes = [8, 128], strides = [1, 1]} : vector<8x512xbf16> to vector<8x128xbf16>
    %343 = vector.extract_strided_slice %340 {offsets = [0, 0], sizes = [8, 128], strides = [1, 1]} : vector<8x512xbf16> to vector<8x128xbf16>
    %cst_124 = arith.constant dense<0.000000e+00> : vector<8x8xf32>
    %344 = tpu.matmul %341, %342, %cst_124 {dimension_numbers = #tpu.dot_dimension_numbers<[1], [1], [0], [0], [0, 0, 1, 0], [], []>} : vector<8x128xbf16>, vector<8x128xbf16>, vector<8x8xf32> -> vector<8x8xf32>
    %cst_125 = arith.constant 2.500000e-01 : f32
    %345 = vector.broadcast %cst_125 : f32 to vector<8x8xf32>
    %346 = arith.mulf %344, %345 : vector<8x8xf32>
    %cst_126 = arith.constant dense<0xFF800000> : vector<8xf32>
    %347 = vector.multi_reduction <maximumf>, %346, %cst_126 [1] : vector<8x8xf32> to vector<8xf32>
    %348 = vector.shape_cast %347 : vector<8xf32> to vector<8x1xf32>
    %349 = vector.broadcast %348 : vector<8x1xf32> to vector<8x8xf32>
    %350 = arith.subf %346, %349 : vector<8x8xf32>
    %351 = math.exp %350 : vector<8x8xf32>
    %cst_127 = arith.constant dense<0.000000e+00> : vector<8xf32>
    %352 = vector.multi_reduction <add>, %351, %cst_127 [1] : vector<8x8xf32> to vector<8xf32>
    %353 = vector.shape_cast %352 : vector<8xf32> to vector<8x1xf32>
    %354 = tpu.reciprocal %353 {approx = true} : vector<8x1xf32> -> vector<8x1xf32>
    %355 = vector.broadcast %354 : vector<8x1xf32> to vector<8x8xf32>
    %356 = arith.mulf %351, %355 : vector<8x8xf32>
    %357 = arith.truncf %356 : vector<8x8xf32> to vector<8x8xbf16>
    %cst_128 = arith.constant dense<0.000000e+00> : vector<8x128xf32>
    %358 = tpu.matmul %357, %343, %cst_128 {dimension_numbers = #tpu.dot_dimension_numbers<[1], [0], [0], [1], [0, 0, 1, 1], [], []>} : vector<8x8xbf16>, vector<8x128xbf16>, vector<8x128xf32> -> vector<8x128xf32>
    %359 = vector.extract_strided_slice %337 {offsets = [0, 128], sizes = [8, 128], strides = [1, 1]} : vector<8x512xbf16> to vector<8x128xbf16>
    %360 = vector.extract_strided_slice %339 {offsets = [0, 128], sizes = [8, 128], strides = [1, 1]} : vector<8x512xbf16> to vector<8x128xbf16>
    %361 = vector.extract_strided_slice %340 {offsets = [0, 128], sizes = [8, 128], strides = [1, 1]} : vector<8x512xbf16> to vector<8x128xbf16>
    %cst_129 = arith.constant dense<0.000000e+00> : vector<8x8xf32>
    %362 = tpu.matmul %359, %360, %cst_129 {dimension_numbers = #tpu.dot_dimension_numbers<[1], [1], [0], [0], [0, 0, 1, 0], [], []>} : vector<8x128xbf16>, vector<8x128xbf16>, vector<8x8xf32> -> vector<8x8xf32>
    %cst_130 = arith.constant 2.500000e-01 : f32
    %363 = vector.broadcast %cst_130 : f32 to vector<8x8xf32>
    %364 = arith.mulf %362, %363 : vector<8x8xf32>
    %cst_131 = arith.constant dense<0xFF800000> : vector<8xf32>
    %365 = vector.multi_reduction <maximumf>, %364, %cst_131 [1] : vector<8x8xf32> to vector<8xf32>
    %366 = vector.shape_cast %365 : vector<8xf32> to vector<8x1xf32>
    %367 = vector.broadcast %366 : vector<8x1xf32> to vector<8x8xf32>
    %368 = arith.subf %364, %367 : vector<8x8xf32>
    %369 = math.exp %368 : vector<8x8xf32>
    %cst_132 = arith.constant dense<0.000000e+00> : vector<8xf32>
    %370 = vector.multi_reduction <add>, %369, %cst_132 [1] : vector<8x8xf32> to vector<8xf32>
    %371 = vector.shape_cast %370 : vector<8xf32> to vector<8x1xf32>
    %372 = tpu.reciprocal %371 {approx = true} : vector<8x1xf32> -> vector<8x1xf32>
    %373 = vector.broadcast %372 : vector<8x1xf32> to vector<8x8xf32>
    %374 = arith.mulf %369, %373 : vector<8x8xf32>
    %375 = arith.truncf %374 : vector<8x8xf32> to vector<8x8xbf16>
    %cst_133 = arith.constant dense<0.000000e+00> : vector<8x128xf32>
    %376 = tpu.matmul %375, %361, %cst_133 {dimension_numbers = #tpu.dot_dimension_numbers<[1], [0], [0], [1], [0, 0, 1, 1], [], []>} : vector<8x8xbf16>, vector<8x128xbf16>, vector<8x128xf32> -> vector<8x128xf32>
    %377 = vector.extract_strided_slice %337 {offsets = [0, 256], sizes = [8, 128], strides = [1, 1]} : vector<8x512xbf16> to vector<8x128xbf16>
    %378 = vector.extract_strided_slice %339 {offsets = [0, 256], sizes = [8, 128], strides = [1, 1]} : vector<8x512xbf16> to vector<8x128xbf16>
    %379 = vector.extract_strided_slice %340 {offsets = [0, 256], sizes = [8, 128], strides = [1, 1]} : vector<8x512xbf16> to vector<8x128xbf16>
    %cst_134 = arith.constant dense<0.000000e+00> : vector<8x8xf32>
    %380 = tpu.matmul %377, %378, %cst_134 {dimension_numbers = #tpu.dot_dimension_numbers<[1], [1], [0], [0], [0, 0, 1, 0], [], []>} : vector<8x128xbf16>, vector<8x128xbf16>, vector<8x8xf32> -> vector<8x8xf32>
    %cst_135 = arith.constant 2.500000e-01 : f32
    %381 = vector.broadcast %cst_135 : f32 to vector<8x8xf32>
    %382 = arith.mulf %380, %381 : vector<8x8xf32>
    %cst_136 = arith.constant dense<0xFF800000> : vector<8xf32>
    %383 = vector.multi_reduction <maximumf>, %382, %cst_136 [1] : vector<8x8xf32> to vector<8xf32>
    %384 = vector.shape_cast %383 : vector<8xf32> to vector<8x1xf32>
    %385 = vector.broadcast %384 : vector<8x1xf32> to vector<8x8xf32>
    %386 = arith.subf %382, %385 : vector<8x8xf32>
    %387 = math.exp %386 : vector<8x8xf32>
    %cst_137 = arith.constant dense<0.000000e+00> : vector<8xf32>
    %388 = vector.multi_reduction <add>, %387, %cst_137 [1] : vector<8x8xf32> to vector<8xf32>
    %389 = vector.shape_cast %388 : vector<8xf32> to vector<8x1xf32>
    %390 = tpu.reciprocal %389 {approx = true} : vector<8x1xf32> -> vector<8x1xf32>
    %391 = vector.broadcast %390 : vector<8x1xf32> to vector<8x8xf32>
    %392 = arith.mulf %387, %391 : vector<8x8xf32>
    %393 = arith.truncf %392 : vector<8x8xf32> to vector<8x8xbf16>
    %cst_138 = arith.constant dense<0.000000e+00> : vector<8x128xf32>
    %394 = tpu.matmul %393, %379, %cst_138 {dimension_numbers = #tpu.dot_dimension_numbers<[1], [0], [0], [1], [0, 0, 1, 1], [], []>} : vector<8x8xbf16>, vector<8x128xbf16>, vector<8x128xf32> -> vector<8x128xf32>
    %395 = vector.extract_strided_slice %337 {offsets = [0, 384], sizes = [8, 128], strides = [1, 1]} : vector<8x512xbf16> to vector<8x128xbf16>
    %396 = vector.extract_strided_slice %339 {offsets = [0, 384], sizes = [8, 128], strides = [1, 1]} : vector<8x512xbf16> to vector<8x128xbf16>
    %397 = vector.extract_strided_slice %340 {offsets = [0, 384], sizes = [8, 128], strides = [1, 1]} : vector<8x512xbf16> to vector<8x128xbf16>
    %cst_139 = arith.constant dense<0.000000e+00> : vector<8x8xf32>
    %398 = tpu.matmul %395, %396, %cst_139 {dimension_numbers = #tpu.dot_dimension_numbers<[1], [1], [0], [0], [0, 0, 1, 0], [], []>} : vector<8x128xbf16>, vector<8x128xbf16>, vector<8x8xf32> -> vector<8x8xf32>
    %cst_140 = arith.constant 2.500000e-01 : f32
    %399 = vector.broadcast %cst_140 : f32 to vector<8x8xf32>
    %400 = arith.mulf %398, %399 : vector<8x8xf32>
    %cst_141 = arith.constant dense<0xFF800000> : vector<8xf32>
    %401 = vector.multi_reduction <maximumf>, %400, %cst_141 [1] : vector<8x8xf32> to vector<8xf32>
    %402 = vector.shape_cast %401 : vector<8xf32> to vector<8x1xf32>
    %403 = vector.broadcast %402 : vector<8x1xf32> to vector<8x8xf32>
    %404 = arith.subf %400, %403 : vector<8x8xf32>
    %405 = math.exp %404 : vector<8x8xf32>
    %cst_142 = arith.constant dense<0.000000e+00> : vector<8xf32>
    %406 = vector.multi_reduction <add>, %405, %cst_142 [1] : vector<8x8xf32> to vector<8xf32>
    %407 = vector.shape_cast %406 : vector<8xf32> to vector<8x1xf32>
    %408 = tpu.reciprocal %407 {approx = true} : vector<8x1xf32> -> vector<8x1xf32>
    %409 = vector.broadcast %408 : vector<8x1xf32> to vector<8x8xf32>
    %410 = arith.mulf %405, %409 : vector<8x8xf32>
    %411 = arith.truncf %410 : vector<8x8xf32> to vector<8x8xbf16>
    %cst_143 = arith.constant dense<0.000000e+00> : vector<8x128xf32>
    %412 = tpu.matmul %411, %397, %cst_143 {dimension_numbers = #tpu.dot_dimension_numbers<[1], [0], [0], [1], [0, 0, 1, 1], [], []>} : vector<8x8xbf16>, vector<8x128xbf16>, vector<8x128xf32> -> vector<8x128xf32>
    %413 = tpu.concatenate %358, %376, %394, %412 in 1 : vector<8x128xf32>, vector<8x128xf32>, vector<8x128xf32>, vector<8x128xf32> -> vector<8x512xf32>
    %414 = arith.truncf %413 : vector<8x512xf32> to vector<8x512xbf16>
    %c0_144 = arith.constant 0 : index
    %c0_145 = arith.constant 0 : index
    %415 = vector.load %arg15[%c0_144, %c0_145] : memref<512x128xbf16, #tpu.memory_space<vmem>>, vector<512x128xbf16>
    %cst_146 = arith.constant dense<0.000000e+00> : vector<8x128xf32>
    %416 = tpu.matmul %414, %415, %cst_146 {dimension_numbers = #tpu.dot_dimension_numbers<[1], [0], [0], [1], [0, 0, 1, 1], [], []>} : vector<8x512xbf16>, vector<512x128xbf16>, vector<8x128xf32> -> vector<8x128xf32>
    %c0_147 = arith.constant 0 : index
    %c0_148 = arith.constant 0 : index
    %417 = vector.load %arg16[%c0_147, %c0_148] : memref<1x128xf32, #tpu.memory_space<vmem>>, vector<1x128xf32>
    %418 = vector.broadcast %417 : vector<1x128xf32> to vector<8x128xf32>
    %419 = arith.addf %416, %418 : vector<8x128xf32>
    %420 = tpu.concatenate %336, %419 in 0 : vector<8x128xf32>, vector<8x128xf32> -> vector<16x128xf32>
    %421 = arith.addf %239, %420 : vector<16x128xf32>
    %cst_149 = arith.constant dense<0.000000e+00> : vector<16xf32>
    %422 = vector.multi_reduction <add>, %421, %cst_149 [1] : vector<16x128xf32> to vector<16xf32>
    %423 = vector.shape_cast %422 : vector<16xf32> to vector<16x1xf32>
    %cst_150 = arith.constant 1.562500e-02 : f32
    %424 = vector.broadcast %cst_150 : f32 to vector<16x1xf32>
    %425 = arith.mulf %423, %424 : vector<16x1xf32>
    %426 = arith.mulf %421, %421 : vector<16x128xf32>
    %cst_151 = arith.constant dense<0.000000e+00> : vector<16xf32>
    %427 = vector.multi_reduction <add>, %426, %cst_151 [1] : vector<16x128xf32> to vector<16xf32>
    %428 = vector.shape_cast %427 : vector<16xf32> to vector<16x1xf32>
    %cst_152 = arith.constant 1.562500e-02 : f32
    %429 = vector.broadcast %cst_152 : f32 to vector<16x1xf32>
    %430 = arith.mulf %428, %429 : vector<16x1xf32>
    %431 = arith.mulf %425, %425 : vector<16x1xf32>
    %432 = arith.subf %430, %431 : vector<16x1xf32>
    %cst_153 = arith.constant 0.000000e+00 : f32
    %433 = vector.broadcast %cst_153 : f32 to vector<16x1xf32>
    %434 = arith.maximumf %432, %433 : vector<16x1xf32>
    %435 = vector.broadcast %425 : vector<16x1xf32> to vector<16x128xf32>
    %436 = arith.subf %421, %435 : vector<16x128xf32>
    %cst_154 = arith.constant 9.99999974E-6 : f32
    %437 = vector.broadcast %cst_154 : f32 to vector<16x1xf32>
    %438 = arith.addf %434, %437 : vector<16x1xf32>
    %439 = math.rsqrt %438 : vector<16x1xf32>
    %440 = vector.broadcast %439 : vector<16x1xf32> to vector<16x128xf32>
    %441 = arith.mulf %436, %440 : vector<16x128xf32>
    %c0_155 = arith.constant 0 : index
    %c0_156 = arith.constant 0 : index
    %442 = vector.load %arg19[%c0_155, %c0_156] : memref<1x128xf32, #tpu.memory_space<vmem>>, vector<1x128xf32>
    %443 = vector.broadcast %442 : vector<1x128xf32> to vector<16x128xf32>
    %444 = arith.mulf %441, %443 : vector<16x128xf32>
    %c0_157 = arith.constant 0 : index
    %c0_158 = arith.constant 0 : index
    %445 = vector.load %arg20[%c0_157, %c0_158] : memref<1x128xf32, #tpu.memory_space<vmem>>, vector<1x128xf32>
    %446 = vector.broadcast %445 : vector<1x128xf32> to vector<16x128xf32>
    %447 = arith.addf %444, %446 : vector<16x128xf32>
    %448 = arith.truncf %447 : vector<16x128xf32> to vector<16x128xbf16>
    %c0_159 = arith.constant 0 : index
    %c0_160 = arith.constant 0 : index
    %449 = vector.load %arg23[%c0_159, %c0_160] : memref<128x128xbf16, #tpu.memory_space<vmem>>, vector<128x128xbf16>
    %cst_161 = arith.constant dense<0.000000e+00> : vector<16x128xf32>
    %450 = tpu.matmul %448, %449, %cst_161 {dimension_numbers = #tpu.dot_dimension_numbers<[1], [0], [0], [1], [0, 0, 1, 1], [], []>} : vector<16x128xbf16>, vector<128x128xbf16>, vector<16x128xf32> -> vector<16x128xf32>
    %c0_162 = arith.constant 0 : index
    %c0_163 = arith.constant 0 : index
    %451 = vector.load %arg24[%c0_162, %c0_163] : memref<1x128xf32, #tpu.memory_space<vmem>>, vector<1x128xf32>
    %452 = vector.broadcast %451 : vector<1x128xf32> to vector<16x128xf32>
    %453 = arith.addf %450, %452 : vector<16x128xf32>
    %cst_164 = arith.constant 0.000000e+00 : f32
    %454 = vector.broadcast %cst_164 : f32 to vector<16x128xf32>
    %455 = arith.maximumf %453, %454 : vector<16x128xf32>
    %456 = arith.truncf %455 : vector<16x128xf32> to vector<16x128xbf16>
    %c0_165 = arith.constant 0 : index
    %c0_166 = arith.constant 0 : index
    %457 = vector.load %arg25[%c0_165, %c0_166] : memref<128x128xbf16, #tpu.memory_space<vmem>>, vector<128x128xbf16>
    %cst_167 = arith.constant dense<0.000000e+00> : vector<16x128xf32>
    %458 = tpu.matmul %456, %457, %cst_167 {dimension_numbers = #tpu.dot_dimension_numbers<[1], [0], [0], [1], [0, 0, 1, 1], [], []>} : vector<16x128xbf16>, vector<128x128xbf16>, vector<16x128xf32> -> vector<16x128xf32>
    %c0_168 = arith.constant 0 : index
    %c0_169 = arith.constant 0 : index
    %459 = vector.load %arg26[%c0_168, %c0_169] : memref<1x128xf32, #tpu.memory_space<vmem>>, vector<1x128xf32>
    %460 = vector.broadcast %459 : vector<1x128xf32> to vector<16x128xf32>
    %461 = arith.addf %458, %460 : vector<16x128xf32>
    %462 = arith.addf %447, %461 : vector<16x128xf32>
    %cst_170 = arith.constant dense<0.000000e+00> : vector<16xf32>
    %463 = vector.multi_reduction <add>, %462, %cst_170 [1] : vector<16x128xf32> to vector<16xf32>
    %464 = vector.shape_cast %463 : vector<16xf32> to vector<16x1xf32>
    %cst_171 = arith.constant 1.562500e-02 : f32
    %465 = vector.broadcast %cst_171 : f32 to vector<16x1xf32>
    %466 = arith.mulf %464, %465 : vector<16x1xf32>
    %467 = arith.mulf %462, %462 : vector<16x128xf32>
    %cst_172 = arith.constant dense<0.000000e+00> : vector<16xf32>
    %468 = vector.multi_reduction <add>, %467, %cst_172 [1] : vector<16x128xf32> to vector<16xf32>
    %469 = vector.shape_cast %468 : vector<16xf32> to vector<16x1xf32>
    %cst_173 = arith.constant 1.562500e-02 : f32
    %470 = vector.broadcast %cst_173 : f32 to vector<16x1xf32>
    %471 = arith.mulf %469, %470 : vector<16x1xf32>
    %472 = arith.mulf %466, %466 : vector<16x1xf32>
    %473 = arith.subf %471, %472 : vector<16x1xf32>
    %cst_174 = arith.constant 0.000000e+00 : f32
    %474 = vector.broadcast %cst_174 : f32 to vector<16x1xf32>
    %475 = arith.maximumf %473, %474 : vector<16x1xf32>
    %476 = vector.broadcast %466 : vector<16x1xf32> to vector<16x128xf32>
    %477 = arith.subf %462, %476 : vector<16x128xf32>
    %cst_175 = arith.constant 9.99999974E-6 : f32
    %478 = vector.broadcast %cst_175 : f32 to vector<16x1xf32>
    %479 = arith.addf %475, %478 : vector<16x1xf32>
    %480 = math.rsqrt %479 : vector<16x1xf32>
    %481 = vector.broadcast %480 : vector<16x1xf32> to vector<16x128xf32>
    %482 = arith.mulf %477, %481 : vector<16x128xf32>
    %c0_176 = arith.constant 0 : index
    %c0_177 = arith.constant 0 : index
    %483 = vector.load %arg21[%c0_176, %c0_177] : memref<1x128xf32, #tpu.memory_space<vmem>>, vector<1x128xf32>
    %484 = vector.broadcast %483 : vector<1x128xf32> to vector<16x128xf32>
    %485 = arith.mulf %482, %484 : vector<16x128xf32>
    %c0_178 = arith.constant 0 : index
    %c0_179 = arith.constant 0 : index
    %486 = vector.load %arg22[%c0_178, %c0_179] : memref<1x128xf32, #tpu.memory_space<vmem>>, vector<1x128xf32>
    %487 = vector.broadcast %486 : vector<1x128xf32> to vector<16x128xf32>
    %488 = arith.addf %485, %487 : vector<16x128xf32>
    %489 = arith.truncf %488 : vector<16x128xf32> to vector<16x128xbf16>
    %c0_180 = arith.constant 0 : index
    %c0_181 = arith.constant 0 : index
    %490 = vector.load %arg27[%c0_180, %c0_181] : memref<128x128xbf16, #tpu.memory_space<vmem>>, vector<128x128xbf16>
    %cst_182 = arith.constant dense<0.000000e+00> : vector<16x128xf32>
    %491 = tpu.matmul %489, %490, %cst_182 {dimension_numbers = #tpu.dot_dimension_numbers<[1], [0], [0], [1], [0, 0, 1, 1], [], []>} : vector<16x128xbf16>, vector<128x128xbf16>, vector<16x128xf32> -> vector<16x128xf32>
    %c0_183 = arith.constant 0 : index
    %c0_184 = arith.constant 0 : index
    %492 = vector.load %arg28[%c0_183, %c0_184] : memref<1x128xf32, #tpu.memory_space<vmem>>, vector<1x128xf32>
    %493 = vector.broadcast %492 : vector<1x128xf32> to vector<16x128xf32>
    %494 = arith.addf %491, %493 : vector<16x128xf32>
    %cst_185 = arith.constant 0.000000e+00 : f32
    %495 = vector.broadcast %cst_185 : f32 to vector<16x128xf32>
    %496 = arith.maximumf %494, %495 : vector<16x128xf32>
    %497 = vector.shape_cast %496 : vector<16x128xf32> to vector<2x8x128xf32>
    %c0_186 = arith.constant 0 : index
    %c0_187 = arith.constant 0 : index
    %c0_188 = arith.constant 0 : index
    %498 = vector.load %arg29[%c0_186, %c0_187, %c0_188] : memref<2x8x128xf32, #tpu.memory_space<vmem>>, vector<2x8x128xf32>
    tpu.vector_store %arg29[%c0_186, %c0_187, %c0_188], %497 {strides = array<i32>} : memref<2x8x128xf32, #tpu.memory_space<vmem>>, vector<2x8x128xf32>,
    return
  }
  func.func @transform_0(%arg0: i32) -> (i32, i32, i32) {
    %c0_i32 = arith.constant 0 : i32
    %c0_i32_0 = arith.constant 0 : i32
    %c0_i32_1 = arith.constant 0 : i32
    return %arg0, %c0_i32, %c0_i32_0 : i32, i32, i32
  }
  func.func @transform_1(%arg0: i32) -> (i32, i32, i32) {
    %c0_i32 = arith.constant 0 : i32
    %c0_i32_0 = arith.constant 0 : i32
    %c0_i32_1 = arith.constant 0 : i32
    return %arg0, %c0_i32, %c0_i32_0 : i32, i32, i32
  }
  func.func @transform_2(%arg0: i32) -> (i32, i32) {
    %c0_i32 = arith.constant 0 : i32
    %c0_i32_0 = arith.constant 0 : i32
    %c0_i32_1 = arith.constant 0 : i32
    return %c0_i32, %c0_i32_0 : i32, i32
  }
  func.func @transform_3(%arg0: i32) -> (i32, i32) {
    %c0_i32 = arith.constant 0 : i32
    %c0_i32_0 = arith.constant 0 : i32
    %c0_i32_1 = arith.constant 0 : i32
    return %c0_i32, %c0_i32_0 : i32, i32
  }
  func.func @transform_4(%arg0: i32) -> (i32, i32) {
    %c0_i32 = arith.constant 0 : i32
    %c0_i32_0 = arith.constant 0 : i32
    %c0_i32_1 = arith.constant 0 : i32
    return %c0_i32, %c0_i32_0 : i32, i32
  }
  func.func @transform_5(%arg0: i32) -> (i32, i32) {
    %c0_i32 = arith.constant 0 : i32
    %c0_i32_0 = arith.constant 0 : i32
    %c0_i32_1 = arith.constant 0 : i32
    return %c0_i32, %c0_i32_0 : i32, i32
  }
  func.func @transform_6(%arg0: i32) -> (i32, i32) {
    %c0_i32 = arith.constant 0 : i32
    %c0_i32_0 = arith.constant 0 : i32
    %c0_i32_1 = arith.constant 0 : i32
    return %c0_i32, %c0_i32_0 : i32, i32
  }
  func.func @transform_7(%arg0: i32) -> (i32, i32) {
    %c0_i32 = arith.constant 0 : i32
    %c0_i32_0 = arith.constant 0 : i32
    %c0_i32_1 = arith.constant 0 : i32
    return %c0_i32, %c0_i32_0 : i32, i32
  }
  func.func @transform_8(%arg0: i32) -> (i32, i32) {
    %c0_i32 = arith.constant 0 : i32
    %c0_i32_0 = arith.constant 0 : i32
    %c0_i32_1 = arith.constant 0 : i32
    return %c0_i32, %c0_i32_0 : i32, i32
  }
  func.func @transform_9(%arg0: i32) -> (i32, i32) {
    %c0_i32 = arith.constant 0 : i32
    %c0_i32_0 = arith.constant 0 : i32
    %c0_i32_1 = arith.constant 0 : i32
    return %c0_i32, %c0_i32_0 : i32, i32
  }
  func.func @transform_10(%arg0: i32) -> (i32, i32) {
    %c0_i32 = arith.constant 0 : i32
    %c0_i32_0 = arith.constant 0 : i32
    %c0_i32_1 = arith.constant 0 : i32
    return %c0_i32, %c0_i32_0 : i32, i32
  }
  func.func @transform_11(%arg0: i32) -> (i32, i32) {
    %c0_i32 = arith.constant 0 : i32
    %c0_i32_0 = arith.constant 0 : i32
    %c0_i32_1 = arith.constant 0 : i32
    return %c0_i32, %c0_i32_0 : i32, i32
  }
  func.func @transform_12(%arg0: i32) -> (i32, i32) {
    %c0_i32 = arith.constant 0 : i32
    %c0_i32_0 = arith.constant 0 : i32
    %c0_i32_1 = arith.constant 0 : i32
    return %c0_i32, %c0_i32_0 : i32, i32
  }
  func.func @transform_13(%arg0: i32) -> (i32, i32) {
    %c0_i32 = arith.constant 0 : i32
    %c0_i32_0 = arith.constant 0 : i32
    %c0_i32_1 = arith.constant 0 : i32
    return %c0_i32, %c0_i32_0 : i32, i32
  }
  func.func @transform_14(%arg0: i32) -> (i32, i32) {
    %c0_i32 = arith.constant 0 : i32
    %c0_i32_0 = arith.constant 0 : i32
    %c0_i32_1 = arith.constant 0 : i32
    return %c0_i32, %c0_i32_0 : i32, i32
  }
  func.func @transform_15(%arg0: i32) -> (i32, i32) {
    %c0_i32 = arith.constant 0 : i32
    %c0_i32_0 = arith.constant 0 : i32
    %c0_i32_1 = arith.constant 0 : i32
    return %c0_i32, %c0_i32_0 : i32, i32
  }
  func.func @transform_16(%arg0: i32) -> (i32, i32) {
    %c0_i32 = arith.constant 0 : i32
    %c0_i32_0 = arith.constant 0 : i32
    %c0_i32_1 = arith.constant 0 : i32
    return %c0_i32, %c0_i32_0 : i32, i32
  }
  func.func @transform_17(%arg0: i32) -> (i32, i32) {
    %c0_i32 = arith.constant 0 : i32
    %c0_i32_0 = arith.constant 0 : i32
    %c0_i32_1 = arith.constant 0 : i32
    return %c0_i32, %c0_i32_0 : i32, i32
  }
  func.func @transform_18(%arg0: i32) -> (i32, i32) {
    %c0_i32 = arith.constant 0 : i32
    %c0_i32_0 = arith.constant 0 : i32
    %c0_i32_1 = arith.constant 0 : i32
    return %c0_i32, %c0_i32_0 : i32, i32
  }
  func.func @transform_19(%arg0: i32) -> (i32, i32) {
    %c0_i32 = arith.constant 0 : i32
    %c0_i32_0 = arith.constant 0 : i32
    %c0_i32_1 = arith.constant 0 : i32
    return %c0_i32, %c0_i32_0 : i32, i32
  }
  func.func @transform_20(%arg0: i32) -> (i32, i32) {
    %c0_i32 = arith.constant 0 : i32
    %c0_i32_0 = arith.constant 0 : i32
    %c0_i32_1 = arith.constant 0 : i32
    return %c0_i32, %c0_i32_0 : i32, i32
  }
  func.func @transform_21(%arg0: i32) -> (i32, i32) {
    %c0_i32 = arith.constant 0 : i32
    %c0_i32_0 = arith.constant 0 : i32
    %c0_i32_1 = arith.constant 0 : i32
    return %c0_i32, %c0_i32_0 : i32, i32
  }
  func.func @transform_22(%arg0: i32) -> (i32, i32) {
    %c0_i32 = arith.constant 0 : i32
    %c0_i32_0 = arith.constant 0 : i32
    %c0_i32_1 = arith.constant 0 : i32
    return %c0_i32, %c0_i32_0 : i32, i32
  }
  func.func @transform_23(%arg0: i32) -> (i32, i32) {
    %c0_i32 = arith.constant 0 : i32
    %c0_i32_0 = arith.constant 0 : i32
    %c0_i32_1 = arith.constant 0 : i32
    return %c0_i32, %c0_i32_0 : i32, i32
  }
  func.func @transform_24(%arg0: i32) -> (i32, i32) {
    %c0_i32 = arith.constant 0 : i32
    %c0_i32_0 = arith.constant 0 : i32
    %c0_i32_1 = arith.constant 0 : i32
    return %c0_i32, %c0_i32_0 : i32, i32
  }
  func.func @transform_25(%arg0: i32) -> (i32, i32) {
    %c0_i32 = arith.constant 0 : i32
    %c0_i32_0 = arith.constant 0 : i32
    %c0_i32_1 = arith.constant 0 : i32
    return %c0_i32, %c0_i32_0 : i32, i32
  }
  func.func @transform_26(%arg0: i32) -> (i32, i32) {
    %c0_i32 = arith.constant 0 : i32
    %c0_i32_0 = arith.constant 0 : i32
    %c0_i32_1 = arith.constant 0 : i32
    return %c0_i32, %c0_i32_0 : i32, i32
  }
  func.func @transform_27(%arg0: i32) -> (i32, i32) {
    %c0_i32 = arith.constant 0 : i32
    %c0_i32_0 = arith.constant 0 : i32
    %c0_i32_1 = arith.constant 0 : i32
    return %c0_i32, %c0_i32_0 : i32, i32
  }
  func.func @transform_28(%arg0: i32) -> (i32, i32, i32) {
    %c0_i32 = arith.constant 0 : i32
    %c0_i32_0 = arith.constant 0 : i32
    %c0_i32_1 = arith.constant 0 : i32
    return %arg0, %c0_i32, %c0_i32_0 : i32, i32, i32
  }
}

module attributes {stable_mosaic.version = 11 : i64} {
  func.func @_linear_kernel(%arg0: i32, %arg1: i32, %arg2: memref<16x128xf32, #tpu.memory_space<vmem>>, %arg3: memref<128x128xbf16, #tpu.memory_space<vmem>>, %arg4: memref<1x128xf32, #tpu.memory_space<vmem>>, %arg5: memref<16x128xf32, #tpu.memory_space<vmem>>) attributes {dimension_semantics = [#tpu.dimension_semantics<parallel>, #tpu.dimension_semantics<parallel>], iteration_bounds = array<i64: 1, 1>, scalar_prefetch = 0 : i64, scratch_operands = 0 : i64, tpu.core_type = #tpu.core_type<tc>, window_params = [{transform_indices = @transform_0, window_bounds = array<i64: 16, 128>}, {transform_indices = @transform_1, window_bounds = array<i64: 128, 128>}, {transform_indices = @transform_2, window_bounds = array<i64: 1, 128>}, {transform_indices = @transform_3, window_bounds = array<i64: 16, 128>}]} {
    %c0 = arith.constant 0 : index
    %c0_0 = arith.constant 0 : index
    %0 = vector.load %arg2[%c0, %c0_0] : memref<16x128xf32, #tpu.memory_space<vmem>>, vector<16x128xf32>
    %1 = arith.truncf %0 : vector<16x128xf32> to vector<16x128xbf16>
    %c0_1 = arith.constant 0 : index
    %c0_2 = arith.constant 0 : index
    %2 = vector.load %arg3[%c0_1, %c0_2] : memref<128x128xbf16, #tpu.memory_space<vmem>>, vector<128x128xbf16>
    %cst = arith.constant dense<0.000000e+00> : vector<16x128xf32>
    %3 = tpu.matmul %1, %2, %cst {dimension_numbers = #tpu.dot_dimension_numbers<[1], [0], [0], [1], [0, 0, 1, 1], [], []>} : vector<16x128xbf16>, vector<128x128xbf16>, vector<16x128xf32> -> vector<16x128xf32>
    %c0_3 = arith.constant 0 : index
    %c0_4 = arith.constant 0 : index
    %4 = vector.load %arg4[%c0_3, %c0_4] : memref<1x128xf32, #tpu.memory_space<vmem>>, vector<1x128xf32>
    %5 = vector.broadcast %4 : vector<1x128xf32> to vector<16x128xf32>
    %6 = arith.addf %3, %5 : vector<16x128xf32>
    %c0_5 = arith.constant 0 : index
    %c0_6 = arith.constant 0 : index
    %7 = vector.load %arg5[%c0_5, %c0_6] : memref<16x128xf32, #tpu.memory_space<vmem>>, vector<16x128xf32>
    tpu.vector_store %arg5[%c0_5, %c0_6], %6 {strides = array<i32>} : memref<16x128xf32, #tpu.memory_space<vmem>>, vector<16x128xf32>,
    return
  }
  func.func @transform_0(%arg0: i32, %arg1: i32) -> (i32, i32) {
    %c0_i32 = arith.constant 0 : i32
    %c0_i32_0 = arith.constant 0 : i32
    return %arg0, %c0_i32 : i32, i32
  }
  func.func @transform_1(%arg0: i32, %arg1: i32) -> (i32, i32) {
    %c0_i32 = arith.constant 0 : i32
    %c0_i32_0 = arith.constant 0 : i32
    return %c0_i32, %arg1 : i32, i32
  }
  func.func @transform_2(%arg0: i32, %arg1: i32) -> (i32, i32) {
    %c0_i32 = arith.constant 0 : i32
    %c0_i32_0 = arith.constant 0 : i32
    return %c0_i32, %arg1 : i32, i32
  }
  func.func @transform_3(%arg0: i32, %arg1: i32) -> (i32, i32) {
    %c0_i32 = arith.constant 0 : i32
    return %arg0, %arg1 : i32, i32
  }
}

module attributes {stable_mosaic.version = 11 : i64} {
  func.func @_decoder_block_kernel(%arg0: i32, %arg1: memref<2x8x128xf32, #tpu.memory_space<vmem>>, %arg2: memref<2x8x128xf32, #tpu.memory_space<vmem>>, %arg3: memref<128x128xbf16, #tpu.memory_space<vmem>>, %arg4: memref<1x128xf32, #tpu.memory_space<vmem>>, %arg5: memref<128x128xbf16, #tpu.memory_space<vmem>>, %arg6: memref<1x128xf32, #tpu.memory_space<vmem>>, %arg7: memref<128x1536xbf16, #tpu.memory_space<vmem>>, %arg8: memref<1x1536xf32, #tpu.memory_space<vmem>>, %arg9: memref<512x128xbf16, #tpu.memory_space<vmem>>, %arg10: memref<1x128xf32, #tpu.memory_space<vmem>>, %arg11: memref<128x512xbf16, #tpu.memory_space<vmem>>, %arg12: memref<1x512xf32, #tpu.memory_space<vmem>>, %arg13: memref<128x1024xbf16, #tpu.memory_space<vmem>>, %arg14: memref<1x1024xf32, #tpu.memory_space<vmem>>, %arg15: memref<512x128xbf16, #tpu.memory_space<vmem>>, %arg16: memref<1x128xf32, #tpu.memory_space<vmem>>, %arg17: memref<1x128xf32, #tpu.memory_space<vmem>>, %arg18: memref<1x128xf32, #tpu.memory_space<vmem>>, %arg19: memref<1x128xf32, #tpu.memory_space<vmem>>, %arg20: memref<1x128xf32, #tpu.memory_space<vmem>>, %arg21: memref<1x128xf32, #tpu.memory_space<vmem>>, %arg22: memref<1x128xf32, #tpu.memory_space<vmem>>, %arg23: memref<128x128xbf16, #tpu.memory_space<vmem>>, %arg24: memref<1x128xf32, #tpu.memory_space<vmem>>, %arg25: memref<128x128xbf16, #tpu.memory_space<vmem>>, %arg26: memref<1x128xf32, #tpu.memory_space<vmem>>, %arg27: memref<128x128xbf16, #tpu.memory_space<vmem>>, %arg28: memref<1x128xf32, #tpu.memory_space<vmem>>, %arg29: memref<2x8x128xf32, #tpu.memory_space<vmem>>) attributes {dimension_semantics = [#tpu.dimension_semantics<parallel>], iteration_bounds = array<i64: 1>, scalar_prefetch = 0 : i64, scratch_operands = 0 : i64, tpu.core_type = #tpu.core_type<tc>, window_params = [{transform_indices = @transform_0, window_bounds = array<i64: 2, 8, 128>}, {transform_indices = @transform_1, window_bounds = array<i64: 2, 8, 128>}, {pipeline_mode = #tpu.pipeline_mode<synchronous>, transform_indices = @transform_2, window_bounds = array<i64: 128, 128>}, {pipeline_mode = #tpu.pipeline_mode<synchronous>, transform_indices = @transform_3, window_bounds = array<i64: 1, 128>}, {pipeline_mode = #tpu.pipeline_mode<synchronous>, transform_indices = @transform_4, window_bounds = array<i64: 128, 128>}, {pipeline_mode = #tpu.pipeline_mode<synchronous>, transform_indices = @transform_5, window_bounds = array<i64: 1, 128>}, {pipeline_mode = #tpu.pipeline_mode<synchronous>, transform_indices = @transform_6, window_bounds = array<i64: 128, 1536>}, {pipeline_mode = #tpu.pipeline_mode<synchronous>, transform_indices = @transform_7, window_bounds = array<i64: 1, 1536>}, {pipeline_mode = #tpu.pipeline_mode<synchronous>, transform_indices = @transform_8, window_bounds = array<i64: 512, 128>}, {pipeline_mode = #tpu.pipeline_mode<synchronous>, transform_indices = @transform_9, window_bounds = array<i64: 1, 128>}, {pipeline_mode = #tpu.pipeline_mode<synchronous>, transform_indices = @transform_10, window_bounds = array<i64: 128, 512>}, {pipeline_mode = #tpu.pipeline_mode<synchronous>, transform_indices = @transform_11, window_bounds = array<i64: 1, 512>}, {pipeline_mode = #tpu.pipeline_mode<synchronous>, transform_indices = @transform_12, window_bounds = array<i64: 128, 1024>}, {pipeline_mode = #tpu.pipeline_mode<synchronous>, transform_indices = @transform_13, window_bounds = array<i64: 1, 1024>}, {pipeline_mode = #tpu.pipeline_mode<synchronous>, transform_indices = @transform_14, window_bounds = array<i64: 512, 128>}, {pipeline_mode = #tpu.pipeline_mode<synchronous>, transform_indices = @transform_15, window_bounds = array<i64: 1, 128>}, {pipeline_mode = #tpu.pipeline_mode<synchronous>, transform_indices = @transform_16, window_bounds = array<i64: 1, 128>}, {pipeline_mode = #tpu.pipeline_mode<synchronous>, transform_indices = @transform_17, window_bounds = array<i64: 1, 128>}, {pipeline_mode = #tpu.pipeline_mode<synchronous>, transform_indices = @transform_18, window_bounds = array<i64: 1, 128>}, {pipeline_mode = #tpu.pipeline_mode<synchronous>, transform_indices = @transform_19, window_bounds = array<i64: 1, 128>}, {pipeline_mode = #tpu.pipeline_mode<synchronous>, transform_indices = @transform_20, window_bounds = array<i64: 1, 128>}, {pipeline_mode = #tpu.pipeline_mode<synchronous>, transform_indices = @transform_21, window_bounds = array<i64: 1, 128>}, {pipeline_mode = #tpu.pipeline_mode<synchronous>, transform_indices = @transform_22, window_bounds = array<i64: 128, 128>}, {pipeline_mode = #tpu.pipeline_mode<synchronous>, transform_indices = @transform_23, window_bounds = array<i64: 1, 128>}, {pipeline_mode = #tpu.pipeline_mode<synchronous>, transform_indices = @transform_24, window_bounds = array<i64: 128, 128>}, {pipeline_mode = #tpu.pipeline_mode<synchronous>, transform_indices = @transform_25, window_bounds = array<i64: 1, 128>}, {pipeline_mode = #tpu.pipeline_mode<synchronous>, transform_indices = @transform_26, window_bounds = array<i64: 128, 128>}, {pipeline_mode = #tpu.pipeline_mode<synchronous>, transform_indices = @transform_27, window_bounds = array<i64: 1, 128>}, {transform_indices = @transform_28, window_bounds = array<i64: 2, 8, 128>}]} {
    %0 = tpu.iota {dimensions = array<i32: 0>} : vector<8x8xi32>
    %1 = tpu.iota {dimensions = array<i32: 1>} : vector<8x8xi32>
    %2 = arith.cmpi sle, %1, %0 : vector<8x8xi32>
    %c0 = arith.constant 0 : index
    %c0_0 = arith.constant 0 : index
    %c0_1 = arith.constant 0 : index
    %3 = vector.load %arg1[%c0, %c0_0, %c0_1] : memref<2x8x128xf32, #tpu.memory_space<vmem>>, vector<2x8x128xf32>
    %4 = vector.shape_cast %3 : vector<2x8x128xf32> to vector<16x128xf32>
    %c0_2 = arith.constant 0 : index
    %c0_3 = arith.constant 0 : index
    %c0_4 = arith.constant 0 : index
    %5 = vector.load %arg2[%c0_2, %c0_3, %c0_4] : memref<2x8x128xf32, #tpu.memory_space<vmem>>, vector<2x8x128xf32>
    %6 = vector.shape_cast %5 : vector<2x8x128xf32> to vector<16x128xf32>
    %7 = arith.truncf %4 : vector<16x128xf32> to vector<16x128xbf16>
    %c0_5 = arith.constant 0 : index
    %c0_6 = arith.constant 0 : index
    %8 = vector.load %arg3[%c0_5, %c0_6] : memref<128x128xbf16, #tpu.memory_space<vmem>>, vector<128x128xbf16>
    %cst = arith.constant dense<0.000000e+00> : vector<16x128xf32>
    %9 = tpu.matmul %7, %8, %cst {dimension_numbers = #tpu.dot_dimension_numbers<[1], [0], [0], [1], [0, 0, 1, 1], [], []>} : vector<16x128xbf16>, vector<128x128xbf16>, vector<16x128xf32> -> vector<16x128xf32>
    %c0_7 = arith.constant 0 : index
    %c0_8 = arith.constant 0 : index
    %10 = vector.load %arg4[%c0_7, %c0_8] : memref<1x128xf32, #tpu.memory_space<vmem>>, vector<1x128xf32>
    %11 = vector.broadcast %10 : vector<1x128xf32> to vector<16x128xf32>
    %12 = arith.addf %9, %11 : vector<16x128xf32>
    %cst_9 = arith.constant 0.000000e+00 : f32
    %13 = vector.broadcast %cst_9 : f32 to vector<16x128xf32>
    %14 = arith.maximumf %12, %13 : vector<16x128xf32>
    %15 = arith.truncf %6 : vector<16x128xf32> to vector<16x128xbf16>
    %c0_10 = arith.constant 0 : index
    %c0_11 = arith.constant 0 : index
    %16 = vector.load %arg5[%c0_10, %c0_11] : memref<128x128xbf16, #tpu.memory_space<vmem>>, vector<128x128xbf16>
    %cst_12 = arith.constant dense<0.000000e+00> : vector<16x128xf32>
    %17 = tpu.matmul %15, %16, %cst_12 {dimension_numbers = #tpu.dot_dimension_numbers<[1], [0], [0], [1], [0, 0, 1, 1], [], []>} : vector<16x128xbf16>, vector<128x128xbf16>, vector<16x128xf32> -> vector<16x128xf32>
    %c0_13 = arith.constant 0 : index
    %c0_14 = arith.constant 0 : index
    %18 = vector.load %arg6[%c0_13, %c0_14] : memref<1x128xf32, #tpu.memory_space<vmem>>, vector<1x128xf32>
    %19 = vector.broadcast %18 : vector<1x128xf32> to vector<16x128xf32>
    %20 = arith.addf %17, %19 : vector<16x128xf32>
    %cst_15 = arith.constant 0.000000e+00 : f32
    %21 = vector.broadcast %cst_15 : f32 to vector<16x128xf32>
    %22 = arith.maximumf %20, %21 : vector<16x128xf32>
    %23 = arith.truncf %14 : vector<16x128xf32> to vector<16x128xbf16>
    %c0_16 = arith.constant 0 : index
    %c0_17 = arith.constant 0 : index
    %24 = vector.load %arg7[%c0_16, %c0_17] : memref<128x1536xbf16, #tpu.memory_space<vmem>>, vector<128x1536xbf16>
    %cst_18 = arith.constant dense<0.000000e+00> : vector<16x1536xf32>
    %25 = tpu.matmul %23, %24, %cst_18 {dimension_numbers = #tpu.dot_dimension_numbers<[1], [0], [0], [1], [0, 0, 1, 1], [], []>} : vector<16x128xbf16>, vector<128x1536xbf16>, vector<16x1536xf32> -> vector<16x1536xf32>
    %c0_19 = arith.constant 0 : index
    %c0_20 = arith.constant 0 : index
    %26 = vector.load %arg8[%c0_19, %c0_20] : memref<1x1536xf32, #tpu.memory_space<vmem>>, vector<1x1536xf32>
    %27 = vector.broadcast %26 : vector<1x1536xf32> to vector<16x1536xf32>
    %28 = arith.addf %25, %27 : vector<16x1536xf32>
    %29 = arith.truncf %28 : vector<16x1536xf32> to vector<16x1536xbf16>
    %30 = vector.extract_strided_slice %29 {offsets = [0, 0], sizes = [8, 1536], strides = [1, 1]} : vector<16x1536xbf16> to vector<8x1536xbf16>
    %31 = vector.extract_strided_slice %30 {offsets = [0, 0], sizes = [8, 512], strides = [1, 1]} : vector<8x1536xbf16> to vector<8x512xbf16>
    %32 = vector.extract_strided_slice %30 {offsets = [0, 512], sizes = [8, 512], strides = [1, 1]} : vector<8x1536xbf16> to vector<8x512xbf16>
    %33 = vector.extract_strided_slice %30 {offsets = [0, 1024], sizes = [8, 512], strides = [1, 1]} : vector<8x1536xbf16> to vector<8x512xbf16>
    %34 = vector.extract_strided_slice %31 {offsets = [0, 0], sizes = [8, 128], strides = [1, 1]} : vector<8x512xbf16> to vector<8x128xbf16>
    %35 = vector.extract_strided_slice %32 {offsets = [0, 0], sizes = [8, 128], strides = [1, 1]} : vector<8x512xbf16> to vector<8x128xbf16>
    %36 = vector.extract_strided_slice %33 {offsets = [0, 0], sizes = [8, 128], strides = [1, 1]} : vector<8x512xbf16> to vector<8x128xbf16>
    %cst_21 = arith.constant dense<0.000000e+00> : vector<8x8xf32>
    %37 = tpu.matmul %34, %35, %cst_21 {dimension_numbers = #tpu.dot_dimension_numbers<[1], [1], [0], [0], [0, 0, 1, 0], [], []>} : vector<8x128xbf16>, vector<8x128xbf16>, vector<8x8xf32> -> vector<8x8xf32>
    %cst_22 = arith.constant 2.500000e-01 : f32
    %38 = vector.broadcast %cst_22 : f32 to vector<8x8xf32>
    %39 = arith.mulf %37, %38 : vector<8x8xf32>
    %cst_23 = arith.constant -1.000000e+30 : f32
    %40 = vector.broadcast %cst_23 : f32 to vector<8x8xf32>
    %41 = arith.select %2, %39, %40 : vector<8x8xi1>, vector<8x8xf32>
    %cst_24 = arith.constant dense<0xFF800000> : vector<8xf32>
    %42 = vector.multi_reduction <maximumf>, %41, %cst_24 [1] : vector<8x8xf32> to vector<8xf32>
    %43 = vector.shape_cast %42 : vector<8xf32> to vector<8x1xf32>
    %44 = vector.broadcast %43 : vector<8x1xf32> to vector<8x8xf32>
    %45 = arith.subf %41, %44 : vector<8x8xf32>
    %46 = math.exp %45 : vector<8x8xf32>
    %cst_25 = arith.constant dense<0.000000e+00> : vector<8xf32>
    %47 = vector.multi_reduction <add>, %46, %cst_25 [1] : vector<8x8xf32> to vector<8xf32>
    %48 = vector.shape_cast %47 : vector<8xf32> to vector<8x1xf32>
    %49 = tpu.reciprocal %48 {approx = true} : vector<8x1xf32> -> vector<8x1xf32>
    %50 = vector.broadcast %49 : vector<8x1xf32> to vector<8x8xf32>
    %51 = arith.mulf %46, %50 : vector<8x8xf32>
    %52 = arith.truncf %51 : vector<8x8xf32> to vector<8x8xbf16>
    %cst_26 = arith.constant dense<0.000000e+00> : vector<8x128xf32>
    %53 = tpu.matmul %52, %36, %cst_26 {dimension_numbers = #tpu.dot_dimension_numbers<[1], [0], [0], [1], [0, 0, 1, 1], [], []>} : vector<8x8xbf16>, vector<8x128xbf16>, vector<8x128xf32> -> vector<8x128xf32>
    %54 = vector.extract_strided_slice %31 {offsets = [0, 128], sizes = [8, 128], strides = [1, 1]} : vector<8x512xbf16> to vector<8x128xbf16>
    %55 = vector.extract_strided_slice %32 {offsets = [0, 128], sizes = [8, 128], strides = [1, 1]} : vector<8x512xbf16> to vector<8x128xbf16>
    %56 = vector.extract_strided_slice %33 {offsets = [0, 128], sizes = [8, 128], strides = [1, 1]} : vector<8x512xbf16> to vector<8x128xbf16>
    %cst_27 = arith.constant dense<0.000000e+00> : vector<8x8xf32>
    %57 = tpu.matmul %54, %55, %cst_27 {dimension_numbers = #tpu.dot_dimension_numbers<[1], [1], [0], [0], [0, 0, 1, 0], [], []>} : vector<8x128xbf16>, vector<8x128xbf16>, vector<8x8xf32> -> vector<8x8xf32>
    %cst_28 = arith.constant 2.500000e-01 : f32
    %58 = vector.broadcast %cst_28 : f32 to vector<8x8xf32>
    %59 = arith.mulf %57, %58 : vector<8x8xf32>
    %cst_29 = arith.constant -1.000000e+30 : f32
    %60 = vector.broadcast %cst_29 : f32 to vector<8x8xf32>
    %61 = arith.select %2, %59, %60 : vector<8x8xi1>, vector<8x8xf32>
    %cst_30 = arith.constant dense<0xFF800000> : vector<8xf32>
    %62 = vector.multi_reduction <maximumf>, %61, %cst_30 [1] : vector<8x8xf32> to vector<8xf32>
    %63 = vector.shape_cast %62 : vector<8xf32> to vector<8x1xf32>
    %64 = vector.broadcast %63 : vector<8x1xf32> to vector<8x8xf32>
    %65 = arith.subf %61, %64 : vector<8x8xf32>
    %66 = math.exp %65 : vector<8x8xf32>
    %cst_31 = arith.constant dense<0.000000e+00> : vector<8xf32>
    %67 = vector.multi_reduction <add>, %66, %cst_31 [1] : vector<8x8xf32> to vector<8xf32>
    %68 = vector.shape_cast %67 : vector<8xf32> to vector<8x1xf32>
    %69 = tpu.reciprocal %68 {approx = true} : vector<8x1xf32> -> vector<8x1xf32>
    %70 = vector.broadcast %69 : vector<8x1xf32> to vector<8x8xf32>
    %71 = arith.mulf %66, %70 : vector<8x8xf32>
    %72 = arith.truncf %71 : vector<8x8xf32> to vector<8x8xbf16>
    %cst_32 = arith.constant dense<0.000000e+00> : vector<8x128xf32>
    %73 = tpu.matmul %72, %56, %cst_32 {dimension_numbers = #tpu.dot_dimension_numbers<[1], [0], [0], [1], [0, 0, 1, 1], [], []>} : vector<8x8xbf16>, vector<8x128xbf16>, vector<8x128xf32> -> vector<8x128xf32>
    %74 = vector.extract_strided_slice %31 {offsets = [0, 256], sizes = [8, 128], strides = [1, 1]} : vector<8x512xbf16> to vector<8x128xbf16>
    %75 = vector.extract_strided_slice %32 {offsets = [0, 256], sizes = [8, 128], strides = [1, 1]} : vector<8x512xbf16> to vector<8x128xbf16>
    %76 = vector.extract_strided_slice %33 {offsets = [0, 256], sizes = [8, 128], strides = [1, 1]} : vector<8x512xbf16> to vector<8x128xbf16>
    %cst_33 = arith.constant dense<0.000000e+00> : vector<8x8xf32>
    %77 = tpu.matmul %74, %75, %cst_33 {dimension_numbers = #tpu.dot_dimension_numbers<[1], [1], [0], [0], [0, 0, 1, 0], [], []>} : vector<8x128xbf16>, vector<8x128xbf16>, vector<8x8xf32> -> vector<8x8xf32>
    %cst_34 = arith.constant 2.500000e-01 : f32
    %78 = vector.broadcast %cst_34 : f32 to vector<8x8xf32>
    %79 = arith.mulf %77, %78 : vector<8x8xf32>
    %cst_35 = arith.constant -1.000000e+30 : f32
    %80 = vector.broadcast %cst_35 : f32 to vector<8x8xf32>
    %81 = arith.select %2, %79, %80 : vector<8x8xi1>, vector<8x8xf32>
    %cst_36 = arith.constant dense<0xFF800000> : vector<8xf32>
    %82 = vector.multi_reduction <maximumf>, %81, %cst_36 [1] : vector<8x8xf32> to vector<8xf32>
    %83 = vector.shape_cast %82 : vector<8xf32> to vector<8x1xf32>
    %84 = vector.broadcast %83 : vector<8x1xf32> to vector<8x8xf32>
    %85 = arith.subf %81, %84 : vector<8x8xf32>
    %86 = math.exp %85 : vector<8x8xf32>
    %cst_37 = arith.constant dense<0.000000e+00> : vector<8xf32>
    %87 = vector.multi_reduction <add>, %86, %cst_37 [1] : vector<8x8xf32> to vector<8xf32>
    %88 = vector.shape_cast %87 : vector<8xf32> to vector<8x1xf32>
    %89 = tpu.reciprocal %88 {approx = true} : vector<8x1xf32> -> vector<8x1xf32>
    %90 = vector.broadcast %89 : vector<8x1xf32> to vector<8x8xf32>
    %91 = arith.mulf %86, %90 : vector<8x8xf32>
    %92 = arith.truncf %91 : vector<8x8xf32> to vector<8x8xbf16>
    %cst_38 = arith.constant dense<0.000000e+00> : vector<8x128xf32>
    %93 = tpu.matmul %92, %76, %cst_38 {dimension_numbers = #tpu.dot_dimension_numbers<[1], [0], [0], [1], [0, 0, 1, 1], [], []>} : vector<8x8xbf16>, vector<8x128xbf16>, vector<8x128xf32> -> vector<8x128xf32>
    %94 = vector.extract_strided_slice %31 {offsets = [0, 384], sizes = [8, 128], strides = [1, 1]} : vector<8x512xbf16> to vector<8x128xbf16>
    %95 = vector.extract_strided_slice %32 {offsets = [0, 384], sizes = [8, 128], strides = [1, 1]} : vector<8x512xbf16> to vector<8x128xbf16>
    %96 = vector.extract_strided_slice %33 {offsets = [0, 384], sizes = [8, 128], strides = [1, 1]} : vector<8x512xbf16> to vector<8x128xbf16>
    %cst_39 = arith.constant dense<0.000000e+00> : vector<8x8xf32>
    %97 = tpu.matmul %94, %95, %cst_39 {dimension_numbers = #tpu.dot_dimension_numbers<[1], [1], [0], [0], [0, 0, 1, 0], [], []>} : vector<8x128xbf16>, vector<8x128xbf16>, vector<8x8xf32> -> vector<8x8xf32>
    %cst_40 = arith.constant 2.500000e-01 : f32
    %98 = vector.broadcast %cst_40 : f32 to vector<8x8xf32>
    %99 = arith.mulf %97, %98 : vector<8x8xf32>
    %cst_41 = arith.constant -1.000000e+30 : f32
    %100 = vector.broadcast %cst_41 : f32 to vector<8x8xf32>
    %101 = arith.select %2, %99, %100 : vector<8x8xi1>, vector<8x8xf32>
    %cst_42 = arith.constant dense<0xFF800000> : vector<8xf32>
    %102 = vector.multi_reduction <maximumf>, %101, %cst_42 [1] : vector<8x8xf32> to vector<8xf32>
    %103 = vector.shape_cast %102 : vector<8xf32> to vector<8x1xf32>
    %104 = vector.broadcast %103 : vector<8x1xf32> to vector<8x8xf32>
    %105 = arith.subf %101, %104 : vector<8x8xf32>
    %106 = math.exp %105 : vector<8x8xf32>
    %cst_43 = arith.constant dense<0.000000e+00> : vector<8xf32>
    %107 = vector.multi_reduction <add>, %106, %cst_43 [1] : vector<8x8xf32> to vector<8xf32>
    %108 = vector.shape_cast %107 : vector<8xf32> to vector<8x1xf32>
    %109 = tpu.reciprocal %108 {approx = true} : vector<8x1xf32> -> vector<8x1xf32>
    %110 = vector.broadcast %109 : vector<8x1xf32> to vector<8x8xf32>
    %111 = arith.mulf %106, %110 : vector<8x8xf32>
    %112 = arith.truncf %111 : vector<8x8xf32> to vector<8x8xbf16>
    %cst_44 = arith.constant dense<0.000000e+00> : vector<8x128xf32>
    %113 = tpu.matmul %112, %96, %cst_44 {dimension_numbers = #tpu.dot_dimension_numbers<[1], [0], [0], [1], [0, 0, 1, 1], [], []>} : vector<8x8xbf16>, vector<8x128xbf16>, vector<8x128xf32> -> vector<8x128xf32>
    %114 = tpu.concatenate %53, %73, %93, %113 in 1 : vector<8x128xf32>, vector<8x128xf32>, vector<8x128xf32>, vector<8x128xf32> -> vector<8x512xf32>
    %115 = arith.truncf %114 : vector<8x512xf32> to vector<8x512xbf16>
    %c0_45 = arith.constant 0 : index
    %c0_46 = arith.constant 0 : index
    %116 = vector.load %arg9[%c0_45, %c0_46] : memref<512x128xbf16, #tpu.memory_space<vmem>>, vector<512x128xbf16>
    %cst_47 = arith.constant dense<0.000000e+00> : vector<8x128xf32>
    %117 = tpu.matmul %115, %116, %cst_47 {dimension_numbers = #tpu.dot_dimension_numbers<[1], [0], [0], [1], [0, 0, 1, 1], [], []>} : vector<8x512xbf16>, vector<512x128xbf16>, vector<8x128xf32> -> vector<8x128xf32>
    %c0_48 = arith.constant 0 : index
    %c0_49 = arith.constant 0 : index
    %118 = vector.load %arg10[%c0_48, %c0_49] : memref<1x128xf32, #tpu.memory_space<vmem>>, vector<1x128xf32>
    %119 = vector.broadcast %118 : vector<1x128xf32> to vector<8x128xf32>
    %120 = arith.addf %117, %119 : vector<8x128xf32>
    %121 = vector.extract_strided_slice %29 {offsets = [8, 0], sizes = [8, 1536], strides = [1, 1]} : vector<16x1536xbf16> to vector<8x1536xbf16>
    %122 = vector.extract_strided_slice %121 {offsets = [0, 0], sizes = [8, 512], strides = [1, 1]} : vector<8x1536xbf16> to vector<8x512xbf16>
    %123 = vector.extract_strided_slice %121 {offsets = [0, 512], sizes = [8, 512], strides = [1, 1]} : vector<8x1536xbf16> to vector<8x512xbf16>
    %124 = vector.extract_strided_slice %121 {offsets = [0, 1024], sizes = [8, 512], strides = [1, 1]} : vector<8x1536xbf16> to vector<8x512xbf16>
    %125 = vector.extract_strided_slice %122 {offsets = [0, 0], sizes = [8, 128], strides = [1, 1]} : vector<8x512xbf16> to vector<8x128xbf16>
    %126 = vector.extract_strided_slice %123 {offsets = [0, 0], sizes = [8, 128], strides = [1, 1]} : vector<8x512xbf16> to vector<8x128xbf16>
    %127 = vector.extract_strided_slice %124 {offsets = [0, 0], sizes = [8, 128], strides = [1, 1]} : vector<8x512xbf16> to vector<8x128xbf16>
    %cst_50 = arith.constant dense<0.000000e+00> : vector<8x8xf32>
    %128 = tpu.matmul %125, %126, %cst_50 {dimension_numbers = #tpu.dot_dimension_numbers<[1], [1], [0], [0], [0, 0, 1, 0], [], []>} : vector<8x128xbf16>, vector<8x128xbf16>, vector<8x8xf32> -> vector<8x8xf32>
    %cst_51 = arith.constant 2.500000e-01 : f32
    %129 = vector.broadcast %cst_51 : f32 to vector<8x8xf32>
    %130 = arith.mulf %128, %129 : vector<8x8xf32>
    %cst_52 = arith.constant -1.000000e+30 : f32
    %131 = vector.broadcast %cst_52 : f32 to vector<8x8xf32>
    %132 = arith.select %2, %130, %131 : vector<8x8xi1>, vector<8x8xf32>
    %cst_53 = arith.constant dense<0xFF800000> : vector<8xf32>
    %133 = vector.multi_reduction <maximumf>, %132, %cst_53 [1] : vector<8x8xf32> to vector<8xf32>
    %134 = vector.shape_cast %133 : vector<8xf32> to vector<8x1xf32>
    %135 = vector.broadcast %134 : vector<8x1xf32> to vector<8x8xf32>
    %136 = arith.subf %132, %135 : vector<8x8xf32>
    %137 = math.exp %136 : vector<8x8xf32>
    %cst_54 = arith.constant dense<0.000000e+00> : vector<8xf32>
    %138 = vector.multi_reduction <add>, %137, %cst_54 [1] : vector<8x8xf32> to vector<8xf32>
    %139 = vector.shape_cast %138 : vector<8xf32> to vector<8x1xf32>
    %140 = tpu.reciprocal %139 {approx = true} : vector<8x1xf32> -> vector<8x1xf32>
    %141 = vector.broadcast %140 : vector<8x1xf32> to vector<8x8xf32>
    %142 = arith.mulf %137, %141 : vector<8x8xf32>
    %143 = arith.truncf %142 : vector<8x8xf32> to vector<8x8xbf16>
    %cst_55 = arith.constant dense<0.000000e+00> : vector<8x128xf32>
    %144 = tpu.matmul %143, %127, %cst_55 {dimension_numbers = #tpu.dot_dimension_numbers<[1], [0], [0], [1], [0, 0, 1, 1], [], []>} : vector<8x8xbf16>, vector<8x128xbf16>, vector<8x128xf32> -> vector<8x128xf32>
    %145 = vector.extract_strided_slice %122 {offsets = [0, 128], sizes = [8, 128], strides = [1, 1]} : vector<8x512xbf16> to vector<8x128xbf16>
    %146 = vector.extract_strided_slice %123 {offsets = [0, 128], sizes = [8, 128], strides = [1, 1]} : vector<8x512xbf16> to vector<8x128xbf16>
    %147 = vector.extract_strided_slice %124 {offsets = [0, 128], sizes = [8, 128], strides = [1, 1]} : vector<8x512xbf16> to vector<8x128xbf16>
    %cst_56 = arith.constant dense<0.000000e+00> : vector<8x8xf32>
    %148 = tpu.matmul %145, %146, %cst_56 {dimension_numbers = #tpu.dot_dimension_numbers<[1], [1], [0], [0], [0, 0, 1, 0], [], []>} : vector<8x128xbf16>, vector<8x128xbf16>, vector<8x8xf32> -> vector<8x8xf32>
    %cst_57 = arith.constant 2.500000e-01 : f32
    %149 = vector.broadcast %cst_57 : f32 to vector<8x8xf32>
    %150 = arith.mulf %148, %149 : vector<8x8xf32>
    %cst_58 = arith.constant -1.000000e+30 : f32
    %151 = vector.broadcast %cst_58 : f32 to vector<8x8xf32>
    %152 = arith.select %2, %150, %151 : vector<8x8xi1>, vector<8x8xf32>
    %cst_59 = arith.constant dense<0xFF800000> : vector<8xf32>
    %153 = vector.multi_reduction <maximumf>, %152, %cst_59 [1] : vector<8x8xf32> to vector<8xf32>
    %154 = vector.shape_cast %153 : vector<8xf32> to vector<8x1xf32>
    %155 = vector.broadcast %154 : vector<8x1xf32> to vector<8x8xf32>
    %156 = arith.subf %152, %155 : vector<8x8xf32>
    %157 = math.exp %156 : vector<8x8xf32>
    %cst_60 = arith.constant dense<0.000000e+00> : vector<8xf32>
    %158 = vector.multi_reduction <add>, %157, %cst_60 [1] : vector<8x8xf32> to vector<8xf32>
    %159 = vector.shape_cast %158 : vector<8xf32> to vector<8x1xf32>
    %160 = tpu.reciprocal %159 {approx = true} : vector<8x1xf32> -> vector<8x1xf32>
    %161 = vector.broadcast %160 : vector<8x1xf32> to vector<8x8xf32>
    %162 = arith.mulf %157, %161 : vector<8x8xf32>
    %163 = arith.truncf %162 : vector<8x8xf32> to vector<8x8xbf16>
    %cst_61 = arith.constant dense<0.000000e+00> : vector<8x128xf32>
    %164 = tpu.matmul %163, %147, %cst_61 {dimension_numbers = #tpu.dot_dimension_numbers<[1], [0], [0], [1], [0, 0, 1, 1], [], []>} : vector<8x8xbf16>, vector<8x128xbf16>, vector<8x128xf32> -> vector<8x128xf32>
    %165 = vector.extract_strided_slice %122 {offsets = [0, 256], sizes = [8, 128], strides = [1, 1]} : vector<8x512xbf16> to vector<8x128xbf16>
    %166 = vector.extract_strided_slice %123 {offsets = [0, 256], sizes = [8, 128], strides = [1, 1]} : vector<8x512xbf16> to vector<8x128xbf16>
    %167 = vector.extract_strided_slice %124 {offsets = [0, 256], sizes = [8, 128], strides = [1, 1]} : vector<8x512xbf16> to vector<8x128xbf16>
    %cst_62 = arith.constant dense<0.000000e+00> : vector<8x8xf32>
    %168 = tpu.matmul %165, %166, %cst_62 {dimension_numbers = #tpu.dot_dimension_numbers<[1], [1], [0], [0], [0, 0, 1, 0], [], []>} : vector<8x128xbf16>, vector<8x128xbf16>, vector<8x8xf32> -> vector<8x8xf32>
    %cst_63 = arith.constant 2.500000e-01 : f32
    %169 = vector.broadcast %cst_63 : f32 to vector<8x8xf32>
    %170 = arith.mulf %168, %169 : vector<8x8xf32>
    %cst_64 = arith.constant -1.000000e+30 : f32
    %171 = vector.broadcast %cst_64 : f32 to vector<8x8xf32>
    %172 = arith.select %2, %170, %171 : vector<8x8xi1>, vector<8x8xf32>
    %cst_65 = arith.constant dense<0xFF800000> : vector<8xf32>
    %173 = vector.multi_reduction <maximumf>, %172, %cst_65 [1] : vector<8x8xf32> to vector<8xf32>
    %174 = vector.shape_cast %173 : vector<8xf32> to vector<8x1xf32>
    %175 = vector.broadcast %174 : vector<8x1xf32> to vector<8x8xf32>
    %176 = arith.subf %172, %175 : vector<8x8xf32>
    %177 = math.exp %176 : vector<8x8xf32>
    %cst_66 = arith.constant dense<0.000000e+00> : vector<8xf32>
    %178 = vector.multi_reduction <add>, %177, %cst_66 [1] : vector<8x8xf32> to vector<8xf32>
    %179 = vector.shape_cast %178 : vector<8xf32> to vector<8x1xf32>
    %180 = tpu.reciprocal %179 {approx = true} : vector<8x1xf32> -> vector<8x1xf32>
    %181 = vector.broadcast %180 : vector<8x1xf32> to vector<8x8xf32>
    %182 = arith.mulf %177, %181 : vector<8x8xf32>
    %183 = arith.truncf %182 : vector<8x8xf32> to vector<8x8xbf16>
    %cst_67 = arith.constant dense<0.000000e+00> : vector<8x128xf32>
    %184 = tpu.matmul %183, %167, %cst_67 {dimension_numbers = #tpu.dot_dimension_numbers<[1], [0], [0], [1], [0, 0, 1, 1], [], []>} : vector<8x8xbf16>, vector<8x128xbf16>, vector<8x128xf32> -> vector<8x128xf32>
    %185 = vector.extract_strided_slice %122 {offsets = [0, 384], sizes = [8, 128], strides = [1, 1]} : vector<8x512xbf16> to vector<8x128xbf16>
    %186 = vector.extract_strided_slice %123 {offsets = [0, 384], sizes = [8, 128], strides = [1, 1]} : vector<8x512xbf16> to vector<8x128xbf16>
    %187 = vector.extract_strided_slice %124 {offsets = [0, 384], sizes = [8, 128], strides = [1, 1]} : vector<8x512xbf16> to vector<8x128xbf16>
    %cst_68 = arith.constant dense<0.000000e+00> : vector<8x8xf32>
    %188 = tpu.matmul %185, %186, %cst_68 {dimension_numbers = #tpu.dot_dimension_numbers<[1], [1], [0], [0], [0, 0, 1, 0], [], []>} : vector<8x128xbf16>, vector<8x128xbf16>, vector<8x8xf32> -> vector<8x8xf32>
    %cst_69 = arith.constant 2.500000e-01 : f32
    %189 = vector.broadcast %cst_69 : f32 to vector<8x8xf32>
    %190 = arith.mulf %188, %189 : vector<8x8xf32>
    %cst_70 = arith.constant -1.000000e+30 : f32
    %191 = vector.broadcast %cst_70 : f32 to vector<8x8xf32>
    %192 = arith.select %2, %190, %191 : vector<8x8xi1>, vector<8x8xf32>
    %cst_71 = arith.constant dense<0xFF800000> : vector<8xf32>
    %193 = vector.multi_reduction <maximumf>, %192, %cst_71 [1] : vector<8x8xf32> to vector<8xf32>
    %194 = vector.shape_cast %193 : vector<8xf32> to vector<8x1xf32>
    %195 = vector.broadcast %194 : vector<8x1xf32> to vector<8x8xf32>
    %196 = arith.subf %192, %195 : vector<8x8xf32>
    %197 = math.exp %196 : vector<8x8xf32>
    %cst_72 = arith.constant dense<0.000000e+00> : vector<8xf32>
    %198 = vector.multi_reduction <add>, %197, %cst_72 [1] : vector<8x8xf32> to vector<8xf32>
    %199 = vector.shape_cast %198 : vector<8xf32> to vector<8x1xf32>
    %200 = tpu.reciprocal %199 {approx = true} : vector<8x1xf32> -> vector<8x1xf32>
    %201 = vector.broadcast %200 : vector<8x1xf32> to vector<8x8xf32>
    %202 = arith.mulf %197, %201 : vector<8x8xf32>
    %203 = arith.truncf %202 : vector<8x8xf32> to vector<8x8xbf16>
    %cst_73 = arith.constant dense<0.000000e+00> : vector<8x128xf32>
    %204 = tpu.matmul %203, %187, %cst_73 {dimension_numbers = #tpu.dot_dimension_numbers<[1], [0], [0], [1], [0, 0, 1, 1], [], []>} : vector<8x8xbf16>, vector<8x128xbf16>, vector<8x128xf32> -> vector<8x128xf32>
    %205 = tpu.concatenate %144, %164, %184, %204 in 1 : vector<8x128xf32>, vector<8x128xf32>, vector<8x128xf32>, vector<8x128xf32> -> vector<8x512xf32>
    %206 = arith.truncf %205 : vector<8x512xf32> to vector<8x512xbf16>
    %c0_74 = arith.constant 0 : index
    %c0_75 = arith.constant 0 : index
    %207 = vector.load %arg9[%c0_74, %c0_75] : memref<512x128xbf16, #tpu.memory_space<vmem>>, vector<512x128xbf16>
    %cst_76 = arith.constant dense<0.000000e+00> : vector<8x128xf32>
    %208 = tpu.matmul %206, %207, %cst_76 {dimension_numbers = #tpu.dot_dimension_numbers<[1], [0], [0], [1], [0, 0, 1, 1], [], []>} : vector<8x512xbf16>, vector<512x128xbf16>, vector<8x128xf32> -> vector<8x128xf32>
    %c0_77 = arith.constant 0 : index
    %c0_78 = arith.constant 0 : index
    %209 = vector.load %arg10[%c0_77, %c0_78] : memref<1x128xf32, #tpu.memory_space<vmem>>, vector<1x128xf32>
    %210 = vector.broadcast %209 : vector<1x128xf32> to vector<8x128xf32>
    %211 = arith.addf %208, %210 : vector<8x128xf32>
    %212 = tpu.concatenate %120, %211 in 0 : vector<8x128xf32>, vector<8x128xf32> -> vector<16x128xf32>
    %213 = arith.addf %14, %212 : vector<16x128xf32>
    %cst_79 = arith.constant dense<0.000000e+00> : vector<16xf32>
    %214 = vector.multi_reduction <add>, %213, %cst_79 [1] : vector<16x128xf32> to vector<16xf32>
    %215 = vector.shape_cast %214 : vector<16xf32> to vector<16x1xf32>
    %cst_80 = arith.constant 1.562500e-02 : f32
    %216 = vector.broadcast %cst_80 : f32 to vector<16x1xf32>
    %217 = arith.mulf %215, %216 : vector<16x1xf32>
    %218 = arith.mulf %213, %213 : vector<16x128xf32>
    %cst_81 = arith.constant dense<0.000000e+00> : vector<16xf32>
    %219 = vector.multi_reduction <add>, %218, %cst_81 [1] : vector<16x128xf32> to vector<16xf32>
    %220 = vector.shape_cast %219 : vector<16xf32> to vector<16x1xf32>
    %cst_82 = arith.constant 1.562500e-02 : f32
    %221 = vector.broadcast %cst_82 : f32 to vector<16x1xf32>
    %222 = arith.mulf %220, %221 : vector<16x1xf32>
    %223 = arith.mulf %217, %217 : vector<16x1xf32>
    %224 = arith.subf %222, %223 : vector<16x1xf32>
    %cst_83 = arith.constant 0.000000e+00 : f32
    %225 = vector.broadcast %cst_83 : f32 to vector<16x1xf32>
    %226 = arith.maximumf %224, %225 : vector<16x1xf32>
    %227 = vector.broadcast %217 : vector<16x1xf32> to vector<16x128xf32>
    %228 = arith.subf %213, %227 : vector<16x128xf32>
    %cst_84 = arith.constant 9.99999974E-6 : f32
    %229 = vector.broadcast %cst_84 : f32 to vector<16x1xf32>
    %230 = arith.addf %226, %229 : vector<16x1xf32>
    %231 = math.rsqrt %230 : vector<16x1xf32>
    %232 = vector.broadcast %231 : vector<16x1xf32> to vector<16x128xf32>
    %233 = arith.mulf %228, %232 : vector<16x128xf32>
    %c0_85 = arith.constant 0 : index
    %c0_86 = arith.constant 0 : index
    %234 = vector.load %arg17[%c0_85, %c0_86] : memref<1x128xf32, #tpu.memory_space<vmem>>, vector<1x128xf32>
    %235 = vector.broadcast %234 : vector<1x128xf32> to vector<16x128xf32>
    %236 = arith.mulf %233, %235 : vector<16x128xf32>
    %c0_87 = arith.constant 0 : index
    %c0_88 = arith.constant 0 : index
    %237 = vector.load %arg18[%c0_87, %c0_88] : memref<1x128xf32, #tpu.memory_space<vmem>>, vector<1x128xf32>
    %238 = vector.broadcast %237 : vector<1x128xf32> to vector<16x128xf32>
    %239 = arith.addf %236, %238 : vector<16x128xf32>
    %240 = arith.truncf %239 : vector<16x128xf32> to vector<16x128xbf16>
    %c0_89 = arith.constant 0 : index
    %c0_90 = arith.constant 0 : index
    %241 = vector.load %arg11[%c0_89, %c0_90] : memref<128x512xbf16, #tpu.memory_space<vmem>>, vector<128x512xbf16>
    %cst_91 = arith.constant dense<0.000000e+00> : vector<16x512xf32>
    %242 = tpu.matmul %240, %241, %cst_91 {dimension_numbers = #tpu.dot_dimension_numbers<[1], [0], [0], [1], [0, 0, 1, 1], [], []>} : vector<16x128xbf16>, vector<128x512xbf16>, vector<16x512xf32> -> vector<16x512xf32>
    %c0_92 = arith.constant 0 : index
    %c0_93 = arith.constant 0 : index
    %243 = vector.load %arg12[%c0_92, %c0_93] : memref<1x512xf32, #tpu.memory_space<vmem>>, vector<1x512xf32>
    %244 = vector.broadcast %243 : vector<1x512xf32> to vector<16x512xf32>
    %245 = arith.addf %242, %244 : vector<16x512xf32>
    %246 = arith.truncf %245 : vector<16x512xf32> to vector<16x512xbf16>
    %247 = arith.truncf %22 : vector<16x128xf32> to vector<16x128xbf16>
    %c0_94 = arith.constant 0 : index
    %c0_95 = arith.constant 0 : index
    %248 = vector.load %arg13[%c0_94, %c0_95] : memref<128x1024xbf16, #tpu.memory_space<vmem>>, vector<128x1024xbf16>
    %cst_96 = arith.constant dense<0.000000e+00> : vector<16x1024xf32>
    %249 = tpu.matmul %247, %248, %cst_96 {dimension_numbers = #tpu.dot_dimension_numbers<[1], [0], [0], [1], [0, 0, 1, 1], [], []>} : vector<16x128xbf16>, vector<128x1024xbf16>, vector<16x1024xf32> -> vector<16x1024xf32>
    %c0_97 = arith.constant 0 : index
    %c0_98 = arith.constant 0 : index
    %250 = vector.load %arg14[%c0_97, %c0_98] : memref<1x1024xf32, #tpu.memory_space<vmem>>, vector<1x1024xf32>
    %251 = vector.broadcast %250 : vector<1x1024xf32> to vector<16x1024xf32>
    %252 = arith.addf %249, %251 : vector<16x1024xf32>
    %253 = arith.truncf %252 : vector<16x1024xf32> to vector<16x1024xbf16>
    %254 = vector.extract_strided_slice %246 {offsets = [0, 0], sizes = [8, 512], strides = [1, 1]} : vector<16x512xbf16> to vector<8x512xbf16>
    %255 = vector.extract_strided_slice %253 {offsets = [0, 0], sizes = [8, 1024], strides = [1, 1]} : vector<16x1024xbf16> to vector<8x1024xbf16>
    %256 = vector.extract_strided_slice %255 {offsets = [0, 0], sizes = [8, 512], strides = [1, 1]} : vector<8x1024xbf16> to vector<8x512xbf16>
    %257 = vector.extract_strided_slice %255 {offsets = [0, 512], sizes = [8, 512], strides = [1, 1]} : vector<8x1024xbf16> to vector<8x512xbf16>
    %258 = vector.extract_strided_slice %254 {offsets = [0, 0], sizes = [8, 128], strides = [1, 1]} : vector<8x512xbf16> to vector<8x128xbf16>
    %259 = vector.extract_strided_slice %256 {offsets = [0, 0], sizes = [8, 128], strides = [1, 1]} : vector<8x512xbf16> to vector<8x128xbf16>
    %260 = vector.extract_strided_slice %257 {offsets = [0, 0], sizes = [8, 128], strides = [1, 1]} : vector<8x512xbf16> to vector<8x128xbf16>
    %cst_99 = arith.constant dense<0.000000e+00> : vector<8x8xf32>
    %261 = tpu.matmul %258, %259, %cst_99 {dimension_numbers = #tpu.dot_dimension_numbers<[1], [1], [0], [0], [0, 0, 1, 0], [], []>} : vector<8x128xbf16>, vector<8x128xbf16>, vector<8x8xf32> -> vector<8x8xf32>
    %cst_100 = arith.constant 2.500000e-01 : f32
    %262 = vector.broadcast %cst_100 : f32 to vector<8x8xf32>
    %263 = arith.mulf %261, %262 : vector<8x8xf32>
    %cst_101 = arith.constant dense<0xFF800000> : vector<8xf32>
    %264 = vector.multi_reduction <maximumf>, %263, %cst_101 [1] : vector<8x8xf32> to vector<8xf32>
    %265 = vector.shape_cast %264 : vector<8xf32> to vector<8x1xf32>
    %266 = vector.broadcast %265 : vector<8x1xf32> to vector<8x8xf32>
    %267 = arith.subf %263, %266 : vector<8x8xf32>
    %268 = math.exp %267 : vector<8x8xf32>
    %cst_102 = arith.constant dense<0.000000e+00> : vector<8xf32>
    %269 = vector.multi_reduction <add>, %268, %cst_102 [1] : vector<8x8xf32> to vector<8xf32>
    %270 = vector.shape_cast %269 : vector<8xf32> to vector<8x1xf32>
    %271 = tpu.reciprocal %270 {approx = true} : vector<8x1xf32> -> vector<8x1xf32>
    %272 = vector.broadcast %271 : vector<8x1xf32> to vector<8x8xf32>
    %273 = arith.mulf %268, %272 : vector<8x8xf32>
    %274 = arith.truncf %273 : vector<8x8xf32> to vector<8x8xbf16>
    %cst_103 = arith.constant dense<0.000000e+00> : vector<8x128xf32>
    %275 = tpu.matmul %274, %260, %cst_103 {dimension_numbers = #tpu.dot_dimension_numbers<[1], [0], [0], [1], [0, 0, 1, 1], [], []>} : vector<8x8xbf16>, vector<8x128xbf16>, vector<8x128xf32> -> vector<8x128xf32>
    %276 = vector.extract_strided_slice %254 {offsets = [0, 128], sizes = [8, 128], strides = [1, 1]} : vector<8x512xbf16> to vector<8x128xbf16>
    %277 = vector.extract_strided_slice %256 {offsets = [0, 128], sizes = [8, 128], strides = [1, 1]} : vector<8x512xbf16> to vector<8x128xbf16>
    %278 = vector.extract_strided_slice %257 {offsets = [0, 128], sizes = [8, 128], strides = [1, 1]} : vector<8x512xbf16> to vector<8x128xbf16>
    %cst_104 = arith.constant dense<0.000000e+00> : vector<8x8xf32>
    %279 = tpu.matmul %276, %277, %cst_104 {dimension_numbers = #tpu.dot_dimension_numbers<[1], [1], [0], [0], [0, 0, 1, 0], [], []>} : vector<8x128xbf16>, vector<8x128xbf16>, vector<8x8xf32> -> vector<8x8xf32>
    %cst_105 = arith.constant 2.500000e-01 : f32
    %280 = vector.broadcast %cst_105 : f32 to vector<8x8xf32>
    %281 = arith.mulf %279, %280 : vector<8x8xf32>
    %cst_106 = arith.constant dense<0xFF800000> : vector<8xf32>
    %282 = vector.multi_reduction <maximumf>, %281, %cst_106 [1] : vector<8x8xf32> to vector<8xf32>
    %283 = vector.shape_cast %282 : vector<8xf32> to vector<8x1xf32>
    %284 = vector.broadcast %283 : vector<8x1xf32> to vector<8x8xf32>
    %285 = arith.subf %281, %284 : vector<8x8xf32>
    %286 = math.exp %285 : vector<8x8xf32>
    %cst_107 = arith.constant dense<0.000000e+00> : vector<8xf32>
    %287 = vector.multi_reduction <add>, %286, %cst_107 [1] : vector<8x8xf32> to vector<8xf32>
    %288 = vector.shape_cast %287 : vector<8xf32> to vector<8x1xf32>
    %289 = tpu.reciprocal %288 {approx = true} : vector<8x1xf32> -> vector<8x1xf32>
    %290 = vector.broadcast %289 : vector<8x1xf32> to vector<8x8xf32>
    %291 = arith.mulf %286, %290 : vector<8x8xf32>
    %292 = arith.truncf %291 : vector<8x8xf32> to vector<8x8xbf16>
    %cst_108 = arith.constant dense<0.000000e+00> : vector<8x128xf32>
    %293 = tpu.matmul %292, %278, %cst_108 {dimension_numbers = #tpu.dot_dimension_numbers<[1], [0], [0], [1], [0, 0, 1, 1], [], []>} : vector<8x8xbf16>, vector<8x128xbf16>, vector<8x128xf32> -> vector<8x128xf32>
    %294 = vector.extract_strided_slice %254 {offsets = [0, 256], sizes = [8, 128], strides = [1, 1]} : vector<8x512xbf16> to vector<8x128xbf16>
    %295 = vector.extract_strided_slice %256 {offsets = [0, 256], sizes = [8, 128], strides = [1, 1]} : vector<8x512xbf16> to vector<8x128xbf16>
    %296 = vector.extract_strided_slice %257 {offsets = [0, 256], sizes = [8, 128], strides = [1, 1]} : vector<8x512xbf16> to vector<8x128xbf16>
    %cst_109 = arith.constant dense<0.000000e+00> : vector<8x8xf32>
    %297 = tpu.matmul %294, %295, %cst_109 {dimension_numbers = #tpu.dot_dimension_numbers<[1], [1], [0], [0], [0, 0, 1, 0], [], []>} : vector<8x128xbf16>, vector<8x128xbf16>, vector<8x8xf32> -> vector<8x8xf32>
    %cst_110 = arith.constant 2.500000e-01 : f32
    %298 = vector.broadcast %cst_110 : f32 to vector<8x8xf32>
    %299 = arith.mulf %297, %298 : vector<8x8xf32>
    %cst_111 = arith.constant dense<0xFF800000> : vector<8xf32>
    %300 = vector.multi_reduction <maximumf>, %299, %cst_111 [1] : vector<8x8xf32> to vector<8xf32>
    %301 = vector.shape_cast %300 : vector<8xf32> to vector<8x1xf32>
    %302 = vector.broadcast %301 : vector<8x1xf32> to vector<8x8xf32>
    %303 = arith.subf %299, %302 : vector<8x8xf32>
    %304 = math.exp %303 : vector<8x8xf32>
    %cst_112 = arith.constant dense<0.000000e+00> : vector<8xf32>
    %305 = vector.multi_reduction <add>, %304, %cst_112 [1] : vector<8x8xf32> to vector<8xf32>
    %306 = vector.shape_cast %305 : vector<8xf32> to vector<8x1xf32>
    %307 = tpu.reciprocal %306 {approx = true} : vector<8x1xf32> -> vector<8x1xf32>
    %308 = vector.broadcast %307 : vector<8x1xf32> to vector<8x8xf32>
    %309 = arith.mulf %304, %308 : vector<8x8xf32>
    %310 = arith.truncf %309 : vector<8x8xf32> to vector<8x8xbf16>
    %cst_113 = arith.constant dense<0.000000e+00> : vector<8x128xf32>
    %311 = tpu.matmul %310, %296, %cst_113 {dimension_numbers = #tpu.dot_dimension_numbers<[1], [0], [0], [1], [0, 0, 1, 1], [], []>} : vector<8x8xbf16>, vector<8x128xbf16>, vector<8x128xf32> -> vector<8x128xf32>
    %312 = vector.extract_strided_slice %254 {offsets = [0, 384], sizes = [8, 128], strides = [1, 1]} : vector<8x512xbf16> to vector<8x128xbf16>
    %313 = vector.extract_strided_slice %256 {offsets = [0, 384], sizes = [8, 128], strides = [1, 1]} : vector<8x512xbf16> to vector<8x128xbf16>
    %314 = vector.extract_strided_slice %257 {offsets = [0, 384], sizes = [8, 128], strides = [1, 1]} : vector<8x512xbf16> to vector<8x128xbf16>
    %cst_114 = arith.constant dense<0.000000e+00> : vector<8x8xf32>
    %315 = tpu.matmul %312, %313, %cst_114 {dimension_numbers = #tpu.dot_dimension_numbers<[1], [1], [0], [0], [0, 0, 1, 0], [], []>} : vector<8x128xbf16>, vector<8x128xbf16>, vector<8x8xf32> -> vector<8x8xf32>
    %cst_115 = arith.constant 2.500000e-01 : f32
    %316 = vector.broadcast %cst_115 : f32 to vector<8x8xf32>
    %317 = arith.mulf %315, %316 : vector<8x8xf32>
    %cst_116 = arith.constant dense<0xFF800000> : vector<8xf32>
    %318 = vector.multi_reduction <maximumf>, %317, %cst_116 [1] : vector<8x8xf32> to vector<8xf32>
    %319 = vector.shape_cast %318 : vector<8xf32> to vector<8x1xf32>
    %320 = vector.broadcast %319 : vector<8x1xf32> to vector<8x8xf32>
    %321 = arith.subf %317, %320 : vector<8x8xf32>
    %322 = math.exp %321 : vector<8x8xf32>
    %cst_117 = arith.constant dense<0.000000e+00> : vector<8xf32>
    %323 = vector.multi_reduction <add>, %322, %cst_117 [1] : vector<8x8xf32> to vector<8xf32>
    %324 = vector.shape_cast %323 : vector<8xf32> to vector<8x1xf32>
    %325 = tpu.reciprocal %324 {approx = true} : vector<8x1xf32> -> vector<8x1xf32>
    %326 = vector.broadcast %325 : vector<8x1xf32> to vector<8x8xf32>
    %327 = arith.mulf %322, %326 : vector<8x8xf32>
    %328 = arith.truncf %327 : vector<8x8xf32> to vector<8x8xbf16>
    %cst_118 = arith.constant dense<0.000000e+00> : vector<8x128xf32>
    %329 = tpu.matmul %328, %314, %cst_118 {dimension_numbers = #tpu.dot_dimension_numbers<[1], [0], [0], [1], [0, 0, 1, 1], [], []>} : vector<8x8xbf16>, vector<8x128xbf16>, vector<8x128xf32> -> vector<8x128xf32>
    %330 = tpu.concatenate %275, %293, %311, %329 in 1 : vector<8x128xf32>, vector<8x128xf32>, vector<8x128xf32>, vector<8x128xf32> -> vector<8x512xf32>
    %331 = arith.truncf %330 : vector<8x512xf32> to vector<8x512xbf16>
    %c0_119 = arith.constant 0 : index
    %c0_120 = arith.constant 0 : index
    %332 = vector.load %arg15[%c0_119, %c0_120] : memref<512x128xbf16, #tpu.memory_space<vmem>>, vector<512x128xbf16>
    %cst_121 = arith.constant dense<0.000000e+00> : vector<8x128xf32>
    %333 = tpu.matmul %331, %332, %cst_121 {dimension_numbers = #tpu.dot_dimension_numbers<[1], [0], [0], [1], [0, 0, 1, 1], [], []>} : vector<8x512xbf16>, vector<512x128xbf16>, vector<8x128xf32> -> vector<8x128xf32>
    %c0_122 = arith.constant 0 : index
    %c0_123 = arith.constant 0 : index
    %334 = vector.load %arg16[%c0_122, %c0_123] : memref<1x128xf32, #tpu.memory_space<vmem>>, vector<1x128xf32>
    %335 = vector.broadcast %334 : vector<1x128xf32> to vector<8x128xf32>
    %336 = arith.addf %333, %335 : vector<8x128xf32>
    %337 = vector.extract_strided_slice %246 {offsets = [8, 0], sizes = [8, 512], strides = [1, 1]} : vector<16x512xbf16> to vector<8x512xbf16>
    %338 = vector.extract_strided_slice %253 {offsets = [8, 0], sizes = [8, 1024], strides = [1, 1]} : vector<16x1024xbf16> to vector<8x1024xbf16>
    %339 = vector.extract_strided_slice %338 {offsets = [0, 0], sizes = [8, 512], strides = [1, 1]} : vector<8x1024xbf16> to vector<8x512xbf16>
    %340 = vector.extract_strided_slice %338 {offsets = [0, 512], sizes = [8, 512], strides = [1, 1]} : vector<8x1024xbf16> to vector<8x512xbf16>
    %341 = vector.extract_strided_slice %337 {offsets = [0, 0], sizes = [8, 128], strides = [1, 1]} : vector<8x512xbf16> to vector<8x128xbf16>
    %342 = vector.extract_strided_slice %339 {offsets = [0, 0], sizes = [8, 128], strides = [1, 1]} : vector<8x512xbf16> to vector<8x128xbf16>
    %343 = vector.extract_strided_slice %340 {offsets = [0, 0], sizes = [8, 128], strides = [1, 1]} : vector<8x512xbf16> to vector<8x128xbf16>
    %cst_124 = arith.constant dense<0.000000e+00> : vector<8x8xf32>
    %344 = tpu.matmul %341, %342, %cst_124 {dimension_numbers = #tpu.dot_dimension_numbers<[1], [1], [0], [0], [0, 0, 1, 0], [], []>} : vector<8x128xbf16>, vector<8x128xbf16>, vector<8x8xf32> -> vector<8x8xf32>
    %cst_125 = arith.constant 2.500000e-01 : f32
    %345 = vector.broadcast %cst_125 : f32 to vector<8x8xf32>
    %346 = arith.mulf %344, %345 : vector<8x8xf32>
    %cst_126 = arith.constant dense<0xFF800000> : vector<8xf32>
    %347 = vector.multi_reduction <maximumf>, %346, %cst_126 [1] : vector<8x8xf32> to vector<8xf32>
    %348 = vector.shape_cast %347 : vector<8xf32> to vector<8x1xf32>
    %349 = vector.broadcast %348 : vector<8x1xf32> to vector<8x8xf32>
    %350 = arith.subf %346, %349 : vector<8x8xf32>
    %351 = math.exp %350 : vector<8x8xf32>
    %cst_127 = arith.constant dense<0.000000e+00> : vector<8xf32>
    %352 = vector.multi_reduction <add>, %351, %cst_127 [1] : vector<8x8xf32> to vector<8xf32>
    %353 = vector.shape_cast %352 : vector<8xf32> to vector<8x1xf32>
    %354 = tpu.reciprocal %353 {approx = true} : vector<8x1xf32> -> vector<8x1xf32>
    %355 = vector.broadcast %354 : vector<8x1xf32> to vector<8x8xf32>
    %356 = arith.mulf %351, %355 : vector<8x8xf32>
    %357 = arith.truncf %356 : vector<8x8xf32> to vector<8x8xbf16>
    %cst_128 = arith.constant dense<0.000000e+00> : vector<8x128xf32>
    %358 = tpu.matmul %357, %343, %cst_128 {dimension_numbers = #tpu.dot_dimension_numbers<[1], [0], [0], [1], [0, 0, 1, 1], [], []>} : vector<8x8xbf16>, vector<8x128xbf16>, vector<8x128xf32> -> vector<8x128xf32>
    %359 = vector.extract_strided_slice %337 {offsets = [0, 128], sizes = [8, 128], strides = [1, 1]} : vector<8x512xbf16> to vector<8x128xbf16>
    %360 = vector.extract_strided_slice %339 {offsets = [0, 128], sizes = [8, 128], strides = [1, 1]} : vector<8x512xbf16> to vector<8x128xbf16>
    %361 = vector.extract_strided_slice %340 {offsets = [0, 128], sizes = [8, 128], strides = [1, 1]} : vector<8x512xbf16> to vector<8x128xbf16>
    %cst_129 = arith.constant dense<0.000000e+00> : vector<8x8xf32>
    %362 = tpu.matmul %359, %360, %cst_129 {dimension_numbers = #tpu.dot_dimension_numbers<[1], [1], [0], [0], [0, 0, 1, 0], [], []>} : vector<8x128xbf16>, vector<8x128xbf16>, vector<8x8xf32> -> vector<8x8xf32>
    %cst_130 = arith.constant 2.500000e-01 : f32
    %363 = vector.broadcast %cst_130 : f32 to vector<8x8xf32>
    %364 = arith.mulf %362, %363 : vector<8x8xf32>
    %cst_131 = arith.constant dense<0xFF800000> : vector<8xf32>
    %365 = vector.multi_reduction <maximumf>, %364, %cst_131 [1] : vector<8x8xf32> to vector<8xf32>
    %366 = vector.shape_cast %365 : vector<8xf32> to vector<8x1xf32>
    %367 = vector.broadcast %366 : vector<8x1xf32> to vector<8x8xf32>
    %368 = arith.subf %364, %367 : vector<8x8xf32>
    %369 = math.exp %368 : vector<8x8xf32>
    %cst_132 = arith.constant dense<0.000000e+00> : vector<8xf32>
    %370 = vector.multi_reduction <add>, %369, %cst_132 [1] : vector<8x8xf32> to vector<8xf32>
    %371 = vector.shape_cast %370 : vector<8xf32> to vector<8x1xf32>
    %372 = tpu.reciprocal %371 {approx = true} : vector<8x1xf32> -> vector<8x1xf32>
    %373 = vector.broadcast %372 : vector<8x1xf32> to vector<8x8xf32>
    %374 = arith.mulf %369, %373 : vector<8x8xf32>
    %375 = arith.truncf %374 : vector<8x8xf32> to vector<8x8xbf16>
    %cst_133 = arith.constant dense<0.000000e+00> : vector<8x128xf32>
    %376 = tpu.matmul %375, %361, %cst_133 {dimension_numbers = #tpu.dot_dimension_numbers<[1], [0], [0], [1], [0, 0, 1, 1], [], []>} : vector<8x8xbf16>, vector<8x128xbf16>, vector<8x128xf32> -> vector<8x128xf32>
    %377 = vector.extract_strided_slice %337 {offsets = [0, 256], sizes = [8, 128], strides = [1, 1]} : vector<8x512xbf16> to vector<8x128xbf16>
    %378 = vector.extract_strided_slice %339 {offsets = [0, 256], sizes = [8, 128], strides = [1, 1]} : vector<8x512xbf16> to vector<8x128xbf16>
    %379 = vector.extract_strided_slice %340 {offsets = [0, 256], sizes = [8, 128], strides = [1, 1]} : vector<8x512xbf16> to vector<8x128xbf16>
    %cst_134 = arith.constant dense<0.000000e+00> : vector<8x8xf32>
    %380 = tpu.matmul %377, %378, %cst_134 {dimension_numbers = #tpu.dot_dimension_numbers<[1], [1], [0], [0], [0, 0, 1, 0], [], []>} : vector<8x128xbf16>, vector<8x128xbf16>, vector<8x8xf32> -> vector<8x8xf32>
    %cst_135 = arith.constant 2.500000e-01 : f32
    %381 = vector.broadcast %cst_135 : f32 to vector<8x8xf32>
    %382 = arith.mulf %380, %381 : vector<8x8xf32>
    %cst_136 = arith.constant dense<0xFF800000> : vector<8xf32>
    %383 = vector.multi_reduction <maximumf>, %382, %cst_136 [1] : vector<8x8xf32> to vector<8xf32>
    %384 = vector.shape_cast %383 : vector<8xf32> to vector<8x1xf32>
    %385 = vector.broadcast %384 : vector<8x1xf32> to vector<8x8xf32>
    %386 = arith.subf %382, %385 : vector<8x8xf32>
    %387 = math.exp %386 : vector<8x8xf32>
    %cst_137 = arith.constant dense<0.000000e+00> : vector<8xf32>
    %388 = vector.multi_reduction <add>, %387, %cst_137 [1] : vector<8x8xf32> to vector<8xf32>
    %389 = vector.shape_cast %388 : vector<8xf32> to vector<8x1xf32>
    %390 = tpu.reciprocal %389 {approx = true} : vector<8x1xf32> -> vector<8x1xf32>
    %391 = vector.broadcast %390 : vector<8x1xf32> to vector<8x8xf32>
    %392 = arith.mulf %387, %391 : vector<8x8xf32>
    %393 = arith.truncf %392 : vector<8x8xf32> to vector<8x8xbf16>
    %cst_138 = arith.constant dense<0.000000e+00> : vector<8x128xf32>
    %394 = tpu.matmul %393, %379, %cst_138 {dimension_numbers = #tpu.dot_dimension_numbers<[1], [0], [0], [1], [0, 0, 1, 1], [], []>} : vector<8x8xbf16>, vector<8x128xbf16>, vector<8x128xf32> -> vector<8x128xf32>
    %395 = vector.extract_strided_slice %337 {offsets = [0, 384], sizes = [8, 128], strides = [1, 1]} : vector<8x512xbf16> to vector<8x128xbf16>
    %396 = vector.extract_strided_slice %339 {offsets = [0, 384], sizes = [8, 128], strides = [1, 1]} : vector<8x512xbf16> to vector<8x128xbf16>
    %397 = vector.extract_strided_slice %340 {offsets = [0, 384], sizes = [8, 128], strides = [1, 1]} : vector<8x512xbf16> to vector<8x128xbf16>
    %cst_139 = arith.constant dense<0.000000e+00> : vector<8x8xf32>
    %398 = tpu.matmul %395, %396, %cst_139 {dimension_numbers = #tpu.dot_dimension_numbers<[1], [1], [0], [0], [0, 0, 1, 0], [], []>} : vector<8x128xbf16>, vector<8x128xbf16>, vector<8x8xf32> -> vector<8x8xf32>
    %cst_140 = arith.constant 2.500000e-01 : f32
    %399 = vector.broadcast %cst_140 : f32 to vector<8x8xf32>
    %400 = arith.mulf %398, %399 : vector<8x8xf32>
    %cst_141 = arith.constant dense<0xFF800000> : vector<8xf32>
    %401 = vector.multi_reduction <maximumf>, %400, %cst_141 [1] : vector<8x8xf32> to vector<8xf32>
    %402 = vector.shape_cast %401 : vector<8xf32> to vector<8x1xf32>
    %403 = vector.broadcast %402 : vector<8x1xf32> to vector<8x8xf32>
    %404 = arith.subf %400, %403 : vector<8x8xf32>
    %405 = math.exp %404 : vector<8x8xf32>
    %cst_142 = arith.constant dense<0.000000e+00> : vector<8xf32>
    %406 = vector.multi_reduction <add>, %405, %cst_142 [1] : vector<8x8xf32> to vector<8xf32>
    %407 = vector.shape_cast %406 : vector<8xf32> to vector<8x1xf32>
    %408 = tpu.reciprocal %407 {approx = true} : vector<8x1xf32> -> vector<8x1xf32>
    %409 = vector.broadcast %408 : vector<8x1xf32> to vector<8x8xf32>
    %410 = arith.mulf %405, %409 : vector<8x8xf32>
    %411 = arith.truncf %410 : vector<8x8xf32> to vector<8x8xbf16>
    %cst_143 = arith.constant dense<0.000000e+00> : vector<8x128xf32>
    %412 = tpu.matmul %411, %397, %cst_143 {dimension_numbers = #tpu.dot_dimension_numbers<[1], [0], [0], [1], [0, 0, 1, 1], [], []>} : vector<8x8xbf16>, vector<8x128xbf16>, vector<8x128xf32> -> vector<8x128xf32>
    %413 = tpu.concatenate %358, %376, %394, %412 in 1 : vector<8x128xf32>, vector<8x128xf32>, vector<8x128xf32>, vector<8x128xf32> -> vector<8x512xf32>
    %414 = arith.truncf %413 : vector<8x512xf32> to vector<8x512xbf16>
    %c0_144 = arith.constant 0 : index
    %c0_145 = arith.constant 0 : index
    %415 = vector.load %arg15[%c0_144, %c0_145] : memref<512x128xbf16, #tpu.memory_space<vmem>>, vector<512x128xbf16>
    %cst_146 = arith.constant dense<0.000000e+00> : vector<8x128xf32>
    %416 = tpu.matmul %414, %415, %cst_146 {dimension_numbers = #tpu.dot_dimension_numbers<[1], [0], [0], [1], [0, 0, 1, 1], [], []>} : vector<8x512xbf16>, vector<512x128xbf16>, vector<8x128xf32> -> vector<8x128xf32>
    %c0_147 = arith.constant 0 : index
    %c0_148 = arith.constant 0 : index
    %417 = vector.load %arg16[%c0_147, %c0_148] : memref<1x128xf32, #tpu.memory_space<vmem>>, vector<1x128xf32>
    %418 = vector.broadcast %417 : vector<1x128xf32> to vector<8x128xf32>
    %419 = arith.addf %416, %418 : vector<8x128xf32>
    %420 = tpu.concatenate %336, %419 in 0 : vector<8x128xf32>, vector<8x128xf32> -> vector<16x128xf32>
    %421 = arith.addf %239, %420 : vector<16x128xf32>
    %cst_149 = arith.constant dense<0.000000e+00> : vector<16xf32>
    %422 = vector.multi_reduction <add>, %421, %cst_149 [1] : vector<16x128xf32> to vector<16xf32>
    %423 = vector.shape_cast %422 : vector<16xf32> to vector<16x1xf32>
    %cst_150 = arith.constant 1.562500e-02 : f32
    %424 = vector.broadcast %cst_150 : f32 to vector<16x1xf32>
    %425 = arith.mulf %423, %424 : vector<16x1xf32>
    %426 = arith.mulf %421, %421 : vector<16x128xf32>
    %cst_151 = arith.constant dense<0.000000e+00> : vector<16xf32>
    %427 = vector.multi_reduction <add>, %426, %cst_151 [1] : vector<16x128xf32> to vector<16xf32>
    %428 = vector.shape_cast %427 : vector<16xf32> to vector<16x1xf32>
    %cst_152 = arith.constant 1.562500e-02 : f32
    %429 = vector.broadcast %cst_152 : f32 to vector<16x1xf32>
    %430 = arith.mulf %428, %429 : vector<16x1xf32>
    %431 = arith.mulf %425, %425 : vector<16x1xf32>
    %432 = arith.subf %430, %431 : vector<16x1xf32>
    %cst_153 = arith.constant 0.000000e+00 : f32
    %433 = vector.broadcast %cst_153 : f32 to vector<16x1xf32>
    %434 = arith.maximumf %432, %433 : vector<16x1xf32>
    %435 = vector.broadcast %425 : vector<16x1xf32> to vector<16x128xf32>
    %436 = arith.subf %421, %435 : vector<16x128xf32>
    %cst_154 = arith.constant 9.99999974E-6 : f32
    %437 = vector.broadcast %cst_154 : f32 to vector<16x1xf32>
    %438 = arith.addf %434, %437 : vector<16x1xf32>
    %439 = math.rsqrt %438 : vector<16x1xf32>
    %440 = vector.broadcast %439 : vector<16x1xf32> to vector<16x128xf32>
    %441 = arith.mulf %436, %440 : vector<16x128xf32>
    %c0_155 = arith.constant 0 : index
    %c0_156 = arith.constant 0 : index
    %442 = vector.load %arg19[%c0_155, %c0_156] : memref<1x128xf32, #tpu.memory_space<vmem>>, vector<1x128xf32>
    %443 = vector.broadcast %442 : vector<1x128xf32> to vector<16x128xf32>
    %444 = arith.mulf %441, %443 : vector<16x128xf32>
    %c0_157 = arith.constant 0 : index
    %c0_158 = arith.constant 0 : index
    %445 = vector.load %arg20[%c0_157, %c0_158] : memref<1x128xf32, #tpu.memory_space<vmem>>, vector<1x128xf32>
    %446 = vector.broadcast %445 : vector<1x128xf32> to vector<16x128xf32>
    %447 = arith.addf %444, %446 : vector<16x128xf32>
    %448 = arith.truncf %447 : vector<16x128xf32> to vector<16x128xbf16>
    %c0_159 = arith.constant 0 : index
    %c0_160 = arith.constant 0 : index
    %449 = vector.load %arg23[%c0_159, %c0_160] : memref<128x128xbf16, #tpu.memory_space<vmem>>, vector<128x128xbf16>
    %cst_161 = arith.constant dense<0.000000e+00> : vector<16x128xf32>
    %450 = tpu.matmul %448, %449, %cst_161 {dimension_numbers = #tpu.dot_dimension_numbers<[1], [0], [0], [1], [0, 0, 1, 1], [], []>} : vector<16x128xbf16>, vector<128x128xbf16>, vector<16x128xf32> -> vector<16x128xf32>
    %c0_162 = arith.constant 0 : index
    %c0_163 = arith.constant 0 : index
    %451 = vector.load %arg24[%c0_162, %c0_163] : memref<1x128xf32, #tpu.memory_space<vmem>>, vector<1x128xf32>
    %452 = vector.broadcast %451 : vector<1x128xf32> to vector<16x128xf32>
    %453 = arith.addf %450, %452 : vector<16x128xf32>
    %cst_164 = arith.constant 0.000000e+00 : f32
    %454 = vector.broadcast %cst_164 : f32 to vector<16x128xf32>
    %455 = arith.maximumf %453, %454 : vector<16x128xf32>
    %456 = arith.truncf %455 : vector<16x128xf32> to vector<16x128xbf16>
    %c0_165 = arith.constant 0 : index
    %c0_166 = arith.constant 0 : index
    %457 = vector.load %arg25[%c0_165, %c0_166] : memref<128x128xbf16, #tpu.memory_space<vmem>>, vector<128x128xbf16>
    %cst_167 = arith.constant dense<0.000000e+00> : vector<16x128xf32>
    %458 = tpu.matmul %456, %457, %cst_167 {dimension_numbers = #tpu.dot_dimension_numbers<[1], [0], [0], [1], [0, 0, 1, 1], [], []>} : vector<16x128xbf16>, vector<128x128xbf16>, vector<16x128xf32> -> vector<16x128xf32>
    %c0_168 = arith.constant 0 : index
    %c0_169 = arith.constant 0 : index
    %459 = vector.load %arg26[%c0_168, %c0_169] : memref<1x128xf32, #tpu.memory_space<vmem>>, vector<1x128xf32>
    %460 = vector.broadcast %459 : vector<1x128xf32> to vector<16x128xf32>
    %461 = arith.addf %458, %460 : vector<16x128xf32>
    %462 = arith.addf %447, %461 : vector<16x128xf32>
    %cst_170 = arith.constant dense<0.000000e+00> : vector<16xf32>
    %463 = vector.multi_reduction <add>, %462, %cst_170 [1] : vector<16x128xf32> to vector<16xf32>
    %464 = vector.shape_cast %463 : vector<16xf32> to vector<16x1xf32>
    %cst_171 = arith.constant 1.562500e-02 : f32
    %465 = vector.broadcast %cst_171 : f32 to vector<16x1xf32>
    %466 = arith.mulf %464, %465 : vector<16x1xf32>
    %467 = arith.mulf %462, %462 : vector<16x128xf32>
    %cst_172 = arith.constant dense<0.000000e+00> : vector<16xf32>
    %468 = vector.multi_reduction <add>, %467, %cst_172 [1] : vector<16x128xf32> to vector<16xf32>
    %469 = vector.shape_cast %468 : vector<16xf32> to vector<16x1xf32>
    %cst_173 = arith.constant 1.562500e-02 : f32
    %470 = vector.broadcast %cst_173 : f32 to vector<16x1xf32>
    %471 = arith.mulf %469, %470 : vector<16x1xf32>
    %472 = arith.mulf %466, %466 : vector<16x1xf32>
    %473 = arith.subf %471, %472 : vector<16x1xf32>
    %cst_174 = arith.constant 0.000000e+00 : f32
    %474 = vector.broadcast %cst_174 : f32 to vector<16x1xf32>
    %475 = arith.maximumf %473, %474 : vector<16x1xf32>
    %476 = vector.broadcast %466 : vector<16x1xf32> to vector<16x128xf32>
    %477 = arith.subf %462, %476 : vector<16x128xf32>
    %cst_175 = arith.constant 9.99999974E-6 : f32
    %478 = vector.broadcast %cst_175 : f32 to vector<16x1xf32>
    %479 = arith.addf %475, %478 : vector<16x1xf32>
    %480 = math.rsqrt %479 : vector<16x1xf32>
    %481 = vector.broadcast %480 : vector<16x1xf32> to vector<16x128xf32>
    %482 = arith.mulf %477, %481 : vector<16x128xf32>
    %c0_176 = arith.constant 0 : index
    %c0_177 = arith.constant 0 : index
    %483 = vector.load %arg21[%c0_176, %c0_177] : memref<1x128xf32, #tpu.memory_space<vmem>>, vector<1x128xf32>
    %484 = vector.broadcast %483 : vector<1x128xf32> to vector<16x128xf32>
    %485 = arith.mulf %482, %484 : vector<16x128xf32>
    %c0_178 = arith.constant 0 : index
    %c0_179 = arith.constant 0 : index
    %486 = vector.load %arg22[%c0_178, %c0_179] : memref<1x128xf32, #tpu.memory_space<vmem>>, vector<1x128xf32>
    %487 = vector.broadcast %486 : vector<1x128xf32> to vector<16x128xf32>
    %488 = arith.addf %485, %487 : vector<16x128xf32>
    %489 = arith.truncf %488 : vector<16x128xf32> to vector<16x128xbf16>
    %c0_180 = arith.constant 0 : index
    %c0_181 = arith.constant 0 : index
    %490 = vector.load %arg27[%c0_180, %c0_181] : memref<128x128xbf16, #tpu.memory_space<vmem>>, vector<128x128xbf16>
    %cst_182 = arith.constant dense<0.000000e+00> : vector<16x128xf32>
    %491 = tpu.matmul %489, %490, %cst_182 {dimension_numbers = #tpu.dot_dimension_numbers<[1], [0], [0], [1], [0, 0, 1, 1], [], []>} : vector<16x128xbf16>, vector<128x128xbf16>, vector<16x128xf32> -> vector<16x128xf32>
    %c0_183 = arith.constant 0 : index
    %c0_184 = arith.constant 0 : index
    %492 = vector.load %arg28[%c0_183, %c0_184] : memref<1x128xf32, #tpu.memory_space<vmem>>, vector<1x128xf32>
    %493 = vector.broadcast %492 : vector<1x128xf32> to vector<16x128xf32>
    %494 = arith.addf %491, %493 : vector<16x128xf32>
    %cst_185 = arith.constant 0.000000e+00 : f32
    %495 = vector.broadcast %cst_185 : f32 to vector<16x128xf32>
    %496 = arith.maximumf %494, %495 : vector<16x128xf32>
    %497 = vector.shape_cast %496 : vector<16x128xf32> to vector<2x8x128xf32>
    %c0_186 = arith.constant 0 : index
    %c0_187 = arith.constant 0 : index
    %c0_188 = arith.constant 0 : index
    %498 = vector.load %arg29[%c0_186, %c0_187, %c0_188] : memref<2x8x128xf32, #tpu.memory_space<vmem>>, vector<2x8x128xf32>
    tpu.vector_store %arg29[%c0_186, %c0_187, %c0_188], %497 {strides = array<i32>} : memref<2x8x128xf32, #tpu.memory_space<vmem>>, vector<2x8x128xf32>,
    return
  }
  func.func @transform_0(%arg0: i32) -> (i32, i32, i32) {
    %c0_i32 = arith.constant 0 : i32
    %c0_i32_0 = arith.constant 0 : i32
    %c0_i32_1 = arith.constant 0 : i32
    return %arg0, %c0_i32, %c0_i32_0 : i32, i32, i32
  }
  func.func @transform_1(%arg0: i32) -> (i32, i32, i32) {
    %c0_i32 = arith.constant 0 : i32
    %c0_i32_0 = arith.constant 0 : i32
    %c0_i32_1 = arith.constant 0 : i32
    return %arg0, %c0_i32, %c0_i32_0 : i32, i32, i32
  }
  func.func @transform_2(%arg0: i32) -> (i32, i32) {
    %c0_i32 = arith.constant 0 : i32
    %c0_i32_0 = arith.constant 0 : i32
    %c0_i32_1 = arith.constant 0 : i32
    return %c0_i32, %c0_i32_0 : i32, i32
  }
  func.func @transform_3(%arg0: i32) -> (i32, i32) {
    %c0_i32 = arith.constant 0 : i32
    %c0_i32_0 = arith.constant 0 : i32
    %c0_i32_1 = arith.constant 0 : i32
    return %c0_i32, %c0_i32_0 : i32, i32
  }
  func.func @transform_4(%arg0: i32) -> (i32, i32) {
    %c0_i32 = arith.constant 0 : i32
    %c0_i32_0 = arith.constant 0 : i32
    %c0_i32_1 = arith.constant 0 : i32
    return %c0_i32, %c0_i32_0 : i32, i32
  }
  func.func @transform_5(%arg0: i32) -> (i32, i32) {
    %c0_i32 = arith.constant 0 : i32
    %c0_i32_0 = arith.constant 0 : i32
    %c0_i32_1 = arith.constant 0 : i32
    return %c0_i32, %c0_i32_0 : i32, i32
  }
  func.func @transform_6(%arg0: i32) -> (i32, i32) {
    %c0_i32 = arith.constant 0 : i32
    %c0_i32_0 = arith.constant 0 : i32
    %c0_i32_1 = arith.constant 0 : i32
    return %c0_i32, %c0_i32_0 : i32, i32
  }
  func.func @transform_7(%arg0: i32) -> (i32, i32) {
    %c0_i32 = arith.constant 0 : i32
    %c0_i32_0 = arith.constant 0 : i32
    %c0_i32_1 = arith.constant 0 : i32
    return %c0_i32, %c0_i32_0 : i32, i32
  }
  func.func @transform_8(%arg0: i32) -> (i32, i32) {
    %c0_i32 = arith.constant 0 : i32
    %c0_i32_0 = arith.constant 0 : i32
    %c0_i32_1 = arith.constant 0 : i32
    return %c0_i32, %c0_i32_0 : i32, i32
  }
  func.func @transform_9(%arg0: i32) -> (i32, i32) {
    %c0_i32 = arith.constant 0 : i32
    %c0_i32_0 = arith.constant 0 : i32
    %c0_i32_1 = arith.constant 0 : i32
    return %c0_i32, %c0_i32_0 : i32, i32
  }
  func.func @transform_10(%arg0: i32) -> (i32, i32) {
    %c0_i32 = arith.constant 0 : i32
    %c0_i32_0 = arith.constant 0 : i32
    %c0_i32_1 = arith.constant 0 : i32
    return %c0_i32, %c0_i32_0 : i32, i32
  }
  func.func @transform_11(%arg0: i32) -> (i32, i32) {
    %c0_i32 = arith.constant 0 : i32
    %c0_i32_0 = arith.constant 0 : i32
    %c0_i32_1 = arith.constant 0 : i32
    return %c0_i32, %c0_i32_0 : i32, i32
  }
  func.func @transform_12(%arg0: i32) -> (i32, i32) {
    %c0_i32 = arith.constant 0 : i32
    %c0_i32_0 = arith.constant 0 : i32
    %c0_i32_1 = arith.constant 0 : i32
    return %c0_i32, %c0_i32_0 : i32, i32
  }
  func.func @transform_13(%arg0: i32) -> (i32, i32) {
    %c0_i32 = arith.constant 0 : i32
    %c0_i32_0 = arith.constant 0 : i32
    %c0_i32_1 = arith.constant 0 : i32
    return %c0_i32, %c0_i32_0 : i32, i32
  }
  func.func @transform_14(%arg0: i32) -> (i32, i32) {
    %c0_i32 = arith.constant 0 : i32
    %c0_i32_0 = arith.constant 0 : i32
    %c0_i32_1 = arith.constant 0 : i32
    return %c0_i32, %c0_i32_0 : i32, i32
  }
  func.func @transform_15(%arg0: i32) -> (i32, i32) {
    %c0_i32 = arith.constant 0 : i32
    %c0_i32_0 = arith.constant 0 : i32
    %c0_i32_1 = arith.constant 0 : i32
    return %c0_i32, %c0_i32_0 : i32, i32
  }
  func.func @transform_16(%arg0: i32) -> (i32, i32) {
    %c0_i32 = arith.constant 0 : i32
    %c0_i32_0 = arith.constant 0 : i32
    %c0_i32_1 = arith.constant 0 : i32
    return %c0_i32, %c0_i32_0 : i32, i32
  }
  func.func @transform_17(%arg0: i32) -> (i32, i32) {
    %c0_i32 = arith.constant 0 : i32
    %c0_i32_0 = arith.constant 0 : i32
    %c0_i32_1 = arith.constant 0 : i32
    return %c0_i32, %c0_i32_0 : i32, i32
  }
  func.func @transform_18(%arg0: i32) -> (i32, i32) {
    %c0_i32 = arith.constant 0 : i32
    %c0_i32_0 = arith.constant 0 : i32
    %c0_i32_1 = arith.constant 0 : i32
    return %c0_i32, %c0_i32_0 : i32, i32
  }
  func.func @transform_19(%arg0: i32) -> (i32, i32) {
    %c0_i32 = arith.constant 0 : i32
    %c0_i32_0 = arith.constant 0 : i32
    %c0_i32_1 = arith.constant 0 : i32
    return %c0_i32, %c0_i32_0 : i32, i32
  }
  func.func @transform_20(%arg0: i32) -> (i32, i32) {
    %c0_i32 = arith.constant 0 : i32
    %c0_i32_0 = arith.constant 0 : i32
    %c0_i32_1 = arith.constant 0 : i32
    return %c0_i32, %c0_i32_0 : i32, i32
  }
  func.func @transform_21(%arg0: i32) -> (i32, i32) {
    %c0_i32 = arith.constant 0 : i32
    %c0_i32_0 = arith.constant 0 : i32
    %c0_i32_1 = arith.constant 0 : i32
    return %c0_i32, %c0_i32_0 : i32, i32
  }
  func.func @transform_22(%arg0: i32) -> (i32, i32) {
    %c0_i32 = arith.constant 0 : i32
    %c0_i32_0 = arith.constant 0 : i32
    %c0_i32_1 = arith.constant 0 : i32
    return %c0_i32, %c0_i32_0 : i32, i32
  }
  func.func @transform_23(%arg0: i32) -> (i32, i32) {
    %c0_i32 = arith.constant 0 : i32
    %c0_i32_0 = arith.constant 0 : i32
    %c0_i32_1 = arith.constant 0 : i32
    return %c0_i32, %c0_i32_0 : i32, i32
  }
  func.func @transform_24(%arg0: i32) -> (i32, i32) {
    %c0_i32 = arith.constant 0 : i32
    %c0_i32_0 = arith.constant 0 : i32
    %c0_i32_1 = arith.constant 0 : i32
    return %c0_i32, %c0_i32_0 : i32, i32
  }
  func.func @transform_25(%arg0: i32) -> (i32, i32) {
    %c0_i32 = arith.constant 0 : i32
    %c0_i32_0 = arith.constant 0 : i32
    %c0_i32_1 = arith.constant 0 : i32
    return %c0_i32, %c0_i32_0 : i32, i32
  }
  func.func @transform_26(%arg0: i32) -> (i32, i32) {
    %c0_i32 = arith.constant 0 : i32
    %c0_i32_0 = arith.constant 0 : i32
    %c0_i32_1 = arith.constant 0 : i32
    return %c0_i32, %c0_i32_0 : i32, i32
  }
  func.func @transform_27(%arg0: i32) -> (i32, i32) {
    %c0_i32 = arith.constant 0 : i32
    %c0_i32_0 = arith.constant 0 : i32
    %c0_i32_1 = arith.constant 0 : i32
    return %c0_i32, %c0_i32_0 : i32, i32
  }
  func.func @transform_28(%arg0: i32) -> (i32, i32, i32) {
    %c0_i32 = arith.constant 0 : i32
    %c0_i32_0 = arith.constant 0 : i32
    %c0_i32_1 = arith.constant 0 : i32
    return %arg0, %c0_i32, %c0_i32_0 : i32, i32, i32
  }
}

</mosaic_0001>

<bundles_post_ra>
// kernel: _lambda_.5
= control target key start
LH: loop header
LB: loop body
LE: loop exit
PB: predicated region body
PF: predicated region fallthrough
CT: control target
= control target key end

     0   :  { %v224_v1 = vmov 0.0   ;;  %vm225_vm0 = vmmov 0   ;;  %s294_s0 = inlined_call_operand.vmem [shape: f32[16,128], index: 0, kind: input, shape index: {}]   ;;  %s295_s1 = inlined_call_operand.vmem [shape: bf16[128,128], index: 1, kind: input, shape index: {}]   ;;  %s296_s2 = inlined_call_operand.vmem [shape: f32[1,128], index: 2, kind: input, shape index: {}]   ;;  %s297_s3 = inlined_call_operand.hbm [shape: f32[16,128], index: 3, kind: output, shape index: {}]  }
   0x1   :  { %v192_v0 = vld [vmem:[%s295_s1] sm:$0xff]   ;;  %167 = vmatprep.subr.bf16.mxu0 %v224_v1  ;;  %v193_v2 = vld [vmem:[%s295_s1 + $0x8] sm:$0xff]   ;;  %183 = vmatprep.mubr.msk.bf16.mxu0 %vm225_vm0, %v224_v1  ;;  %v194_v3 = vld [vmem:[%s295_s1 + $0x10] sm:$0xff]  }
   0x2   :  { %168 = vmatpush3.bf16.msra.mxu0 %v192_v0 }
   0x3   :  { %169 = vmatprep.subr.bf16.mxu0 %v224_v1 }
   0x6   :  { %170 = vmatpush3.bf16.msra.mxu0 %v193_v2 }
   0x7   :  { %171 = vmatprep.subr.bf16.mxu0 %v224_v1 }
   0x8   :  { %8 = vsyncpa [#allocation3], 0  ;;  %v195_v4 = vld [vmem:[%s295_s1 + $0x18] sm:$0xff]   ;;  %v196_v5 = vld [vmem:[%s295_s1 + $0x20] sm:$0xff]   ;;  %s226_s7 = smov [#allocation2]  }
   0x9   :  { %v197_v6 = vld [vmem:[%s295_s1 + $0x28] sm:$0xff]   ;;  %v198_v7 = vld [vmem:[%s295_s1 + $0x30] sm:$0xff]   ;;  %v199_v8 = vld [vmem:[%s295_s1 + $0x38] sm:$0xff]   ;;  %s138_s8 = sshll.u32 %s226_s7, 4  ;;  %s139_s8 = int_to_ptr.vmem [resolvable:$true] %s138_s8 }
   0xa   :  { %172 = vmatpush3.bf16.msra.mxu0 %v194_v3  ;;  %v16_v9 = vld [vmem:[%s294_s0] sm:$0xff]  ;;  %v17_v10 = vld [vmem:[%s294_s0 + $0x8] sm:$0xff]  ;;  %s200_s0 = scalar_lea.vmem %s139_s8, 256  ;;  %p205_p1 = scmp.lt.s32.totalorder %s139_s8, %s139_s8 }
   0xb   :  { %173 = vmatprep.subr.bf16.mxu0 %v224_v1  ;;  %v18_v11 = vpack.c.bf16 %v17_v10, %v16_v9  ;;  %v149_v12 = vld [vmem:[%s296_s2] ss:$0 sm:$0xff]  ;;  %p201_p0 = scmp.ne.s32.totalorder %s139_s8, %s200_s0  ;;  %p206_p2 = scmp.lt.s32.totalorder %s200_s0, %s200_s0 }
   0xd   :  { %p207_p3 = por %p206_p2, %p205_p1 }
   0xe   :  { %174 = vmatpush3.bf16.msra.mxu0 %v195_v4 }
   0xf   :  { %175 = vmatprep.subr.bf16.mxu0 %v224_v1  ;;  %p208_p4 = pnand %p207_p3, %p201_p0 }
  0x12   :  { %176 = vmatpush3.bf16.msra.mxu0 %v196_v5 }
  0x13   :  { %177 = vmatprep.subr.bf16.mxu0 %v224_v1 }
  0x16   :  { %178 = vmatpush3.bf16.msra.mxu0 %v197_v6 }
  0x17   :  { %179 = vmatprep.subr.bf16.mxu0 %v224_v1 }
  0x1a   :  { %180 = vmatpush3.bf16.msra.mxu0 %v198_v7 }
  0x1b   :  { %181 = vmatprep.subr.bf16.mxu0 %v224_v1 }
  0x1e   :  { %182 = vmatpush3.bf16.msra.mxu0 %v199_v8 }
  0x21   :  { %184 = vmatmul.mubr.bf16.vlgmr.msra.gmra.mrb[0].mxu0 %v18_v11 }
  0xf4   :  { %v124_v13 = vpop.f32.mrb[0].mxu0 }
  0xf5   :  { %v125_v14 = vadd.f32 %v149_v12, %v124_v13  ;;  %v185_v15 = vpop.f32.mrb[1].mxu0 }
  0xf6   :  { %v127_v16 = vpop.f32.mrb[2].mxu0 }
  0xf7   :  { %131 = vst [vmem:[#allocation2] sm:$0xff] %v125_v14  ;;  %v128_v17 = vadd.f32 %v149_v12, %v127_v16  ;;  %v186_v18 = vpop.f32.mrb[3].mxu0 }
  0xf9   :  { %132 = vst [vmem:[#allocation2 + $0x8] sm:$0xff] %v128_v17 }
  0xfa   :  { %211 = shalt.err (!%p208_p4)
}
  0xfb   :  { %s212_s9 = scalar_lea.hbm %s297_s3, 256 }
  0xfc   :  { %p213_p5 = scmp.ne.s32.totalorder %s297_s3, %s212_s9  ;;  %p216_p6 = scmp.lt.u32.totalorder %s212_s9, %s297_s3 }
  0xfe   :  { %p218_p7 = pnand %p216_p6, %p213_p5 }
 0x100   :  { %221 = shalt.err (!%p218_p7)
}
 0x101   :  { %s227_s14 = smov 128   ;;  %s228_s15 = smov 8  }
 0x102   :  { %144 = dma.vmem_to_hbm [thread:$0]  %s139_s8, 256, %s297_s3, [#allocation3], %s227_s14, %s227_s14, %s228_s15  }
 0x103   :  { %222 = dma.done.wait [#allocation3], 256  }
 0x104   :  { %223 = vsyncadd [#allocation3], 4294967040 }
 0x105   :  { %148 = vsyncpa [#allocation3], 1 }

// kernel: _lambda_.4
= control target key start
LH: loop header
LB: loop body
LE: loop exit
PB: predicated region body
PF: predicated region fallthrough
CT: control target
= control target key end

     0   :  { %v6442_v0 = vmov 0.0   ;;  %vm6443_vm0 = vmmov 0   ;;  %v8331_v57 = vmov 0   ;;  %vm1298_vm1 = vcmask 1043456   ;;  %s8288_s2 = inlined_call_operand.vmem [shape: bf16[128,128], index: 2, kind: input, shape index: {}]   ;;  %s8289_s4 = inlined_call_operand.vmem [shape: bf16[128,128], index: 4, kind: input, shape index: {}]   ;;  %s8290_s6 = inlined_call_operand.vmem [shape: bf16[128,1536], index: 6, kind: input, shape index: {}]   ;;  %s8291_s0 = inlined_call_operand.vmem [shape: f32[2,8,128], index: 0, kind: input, shape index: {}]   ;;  %s8292_s1 = inlined_call_operand.vmem [shape: f32[2,8,128], index: 1, kind: input, shape index: {}]   ;;  %s8293_s3 = inlined_call_operand.vmem [shape: f32[1,128], index: 3, kind: input, shape index: {}]   ;;  %s8294_s5 = inlined_call_operand.vmem [shape: f32[1,128], index: 5, kind: input, shape index: {}]   ;;  %s8295_s7 = inlined_call_operand.vmem [shape: f32[1,1536], index: 7, kind: input, shape index: {}]   ;;  %s8296_s8 = inlined_call_operand.vmem [shape: bf16[512,128], index: 8, kind: input, shape index: {}]   ;;  %s8297_s9 = inlined_call_operand.vmem [shape: f32[1,128], index: 9, kind: input, shape index: {}]   ;;  %s8298_s10 = inlined_call_operand.vmem [shape: bf16[128,512], index: 10, kind: input, shape index: {}]   ;;  %s8299_s12 = inlined_call_operand.vmem [shape: bf16[128,1024], index: 12, kind: input, shape index: {}]   ;;  %s8300_s16 = inlined_call_operand.vmem [shape: f32[1,128], index: 16, kind: input, shape index: {}]   ;;  %s8301_s17 = inlined_call_operand.vmem [shape: f32[1,128], index: 17, kind: input, shape index: {}]   ;;  %s8302_s11 = inlined_call_operand.vmem [shape: f32[1,512], index: 11, kind: input, shape index: {}]   ;;  %s8303_s13 = inlined_call_operand.vmem [shape: f32[1,1024], index: 13, kind: input, shape index: {}]   ;;  %s8304_s14 = inlined_call_operand.vmem [shape: bf16[512,128], index: 14, kind: input, shape index: {}]   ;;  %s8305_s15 = inlined_call_operand.vmem [shape: f32[1,128], index: 15, kind: input, shape index: {}]   ;;  %s8306_s22 = inlined_call_operand.vmem [shape: bf16[128,128], index: 22, kind: input, shape index: {}]   ;;  %s8307_s24 = inlined_call_operand.vmem [shape: bf16[128,128], index: 24, kind: input, shape index: {}]   ;;  %s8308_s18 = inlined_call_operand.vmem [shape: f32[1,128], index: 18, kind: input, shape index: {}]   ;;  %s8309_s19 = inlined_call_operand.vmem [shape: f32[1,128], index: 19, kind: input, shape index: {}]   ;;  %s8310_s23 = inlined_call_operand.vmem [shape: f32[1,128], index: 23, kind: input, shape index: {}]   ;;  %s8311_s25 = inlined_call_operand.vmem [shape: f32[1,128], index: 25, kind: input, shape index: {}]   ;;  %s8312_s26 = inlined_call_operand.vmem [shape: bf16[128,128], index: 26, kind: input, shape index: {}]   ;;  %s8313_s20 = inlined_call_operand.vmem [shape: f32[1,128], index: 20, kind: input, shape index: {}]   ;;  %s8314_s21 = inlined_call_operand.vmem [shape: f32[1,128], index: 21, kind: input, shape index: {}]   ;;  %s8315_s27 = inlined_call_operand.vmem [shape: f32[1,128], index: 27, kind: input, shape index: {}]   ;;  %s8316_s28 = inlined_call_operand.vmem [shape: f32[2,8,128], index: 28, kind: output, shape index: {}]  }
   0x1   :  { %8334 = sst [smem:[#allocation2_spill]] %s8288_s2  ;;  %5775 = vmatprep.subr.bf16.mxu0 %v6442_v0  ;;  %5791 = vmatprep.mubr.msk.bf16.mxu0 %vm6443_vm0, %v6442_v0  ;;  %vm1282_vm3 = vcmask 64512  }
   0x2   :  { %8335 = sst [smem:[#allocation3_spill]] %s8289_s4  ;;  %5795 = vmatprep.subr.bf16.mxu1 %v6442_v0  ;;  %5811 = vmatprep.mubr.msk.bf16.mxu1 %vm6443_vm0, %v6442_v0 }
   0x3   :  { %8336 = sst [smem:[#allocation4_spill]] %s8290_s6  ;;  %s8348_s29 = sld [smem:[#allocation3_spill]] }
   0x4   :  { %8337 = sst [smem:[#allocation5_spill]] %s8291_s0 }
   0x5   :  { %8338 = sst [smem:[#allocation6_spill]] %s8292_s1  ;;  %s8349_s30 = sld [smem:[#allocation5_spill]] }
   0x6   :  { %8339 = sst [smem:[#allocation7_spill]] %s8293_s3  ;;  %s8351_s1 = sld [smem:[#allocation6_spill]] }
   0x7   :  { %8340 = sst [smem:[#allocation8_spill]] %s8294_s5  ;;  %s8352_s4 = sld [smem:[#allocation7_spill]] }
   0x8   :  { %8341 = sst [smem:[#allocation9_spill]] %s8295_s7  ;;  %s8350_s7 = sld [smem:[#allocation4_spill]] }
   0x9   :  { %8342 = sst [smem:[#allocation10_spill]] %s8296_s8  ;;  %v6078_v4 = vld [vmem:[%s8348_s29] sm:$0xff]   ;;  %v6079_v6 = vld [vmem:[%s8348_s29 + $0x8] sm:$0xff]   ;;  %v6080_v8 = vld [vmem:[%s8348_s29 + $0x10] sm:$0xff]   ;;  %s8353_s3 = sld [smem:[#allocation8_spill]] }
   0xa   :  { %8343 = sst [smem:[#allocation11_spill]] %s8297_s9  ;;  %s8347_s9 = sld [smem:[#allocation2_spill]]  ;;  %5796 = vmatpush3.bf16.msra.mxu1 %v6078_v4  ;;  %v6081_v10 = vld [vmem:[%s8348_s29 + $0x18] sm:$0xff]   ;;  %v6082_v12 = vld [vmem:[%s8348_s29 + $0x20] sm:$0xff]   ;;  %v6083_v16 = vld [vmem:[%s8348_s29 + $0x28] sm:$0xff]  }
   0xb   :  { %8344 = sst [smem:[#allocation12_spill]] %s8298_s10  ;;  %5797 = vmatprep.subr.bf16.mxu1 %v6442_v0  ;;  %v95_v14 = vld [vmem:[%s8349_s30] sm:$0xff]  ;;  %v96_v15 = vld [vmem:[%s8349_s30 + $0x8] sm:$0xff]  ;;  %v6084_v20 = vld [vmem:[%s8348_s29 + $0x30] sm:$0xff]   ;;  %s8357_s0 = sld [smem:[#allocation10_spill]] }
   0xc   :  { %8345 = sst [smem:[#allocation13_spill]] %s8299_s12  ;;  %v99_v18 = vpack.c.bf16 %v96_v15, %v95_v14  ;;  %v6085_v22 = vld [vmem:[%s8348_s29 + $0x38] sm:$0xff]   ;;  %v97_v23 = vld [vmem:[%s8351_s1] sm:$0xff]  ;;  %v98_v24 = vld [vmem:[%s8351_s1 + $0x8] sm:$0xff]  ;;  %s8354_s1 = sld [smem:[#allocation9_spill]] }
   0xd   :  { %8346 = sst [smem:[#allocation14_spill]] %s8300_s16  ;;  %v214_v31 = vpack.c.bf16 %v98_v24, %v97_v23  ;;  %v5165_v58 = vld [vmem:[%s8352_s4] ss:$0 sm:$0xff]  ;;  %s8361_s12 = sld [smem:[#allocation12_spill]] }
   0xe   :  { %5798 = vmatpush3.bf16.msra.mxu1 %v6079_v6  ;;  %v6088_v17 = vld [vmem:[%s8350_s7 + $0x4] ss:$48 sps:$4 sm:$0xff]   ;;  %v6086_v19 = vld [vmem:[%s8350_s7] ss:$48 sps:$4 sm:$0xff]   ;;  %v6091_v27 = vld [vmem:[%s8350_s7 + $0xc] ss:$48 sps:$4 sm:$0xff]  }
   0xf   :  { %5799 = vmatprep.subr.bf16.mxu1 %v6442_v0  ;;  %v6094_v21 = vld [vmem:[%s8350_s7 + $0x64] ss:$48 sps:$4 sm:$0xff]   ;;  %v6092_v25 = vld [vmem:[%s8350_s7 + $0x60] ss:$48 sps:$4 sm:$0xff]   ;;  %v6089_v29 = vld [vmem:[%s8350_s7 + $0x8] ss:$48 sps:$4 sm:$0xff]  }
  0x10   :  { %v6070_v1 = vld [vmem:[%s8347_s9] sm:$0xff]   ;;  %v6071_v2 = vld [vmem:[%s8347_s9 + $0x8] sm:$0xff]   ;;  %v6072_v3 = vld [vmem:[%s8347_s9 + $0x10] sm:$0xff]   ;;  %s8363_s5 = sld [smem:[#allocation13_spill]]  ;;  %s8364_s6 = sld [smem:[#allocation14_spill]] }
  0x11   :  { %5776 = vmatpush3.bf16.msra.mxu0 %v6070_v1  ;;  %v6073_v5 = vld [vmem:[%s8347_s9 + $0x18] sm:$0xff]   ;;  %v6074_v7 = vld [vmem:[%s8347_s9 + $0x20] sm:$0xff]   ;;  %v6075_v9 = vld [vmem:[%s8347_s9 + $0x28] sm:$0xff]  }
  0x12   :  { %5777 = vmatprep.subr.bf16.mxu0 %v6442_v0  ;;  %5800 = vmatpush3.bf16.msra.mxu1 %v6080_v8  ;;  %v6076_v11 = vld [vmem:[%s8347_s9 + $0x30] sm:$0xff]   ;;  %v6077_v13 = vld [vmem:[%s8347_s9 + $0x38] sm:$0xff]  }
  0x13   :  { %5801 = vmatprep.subr.bf16.mxu1 %v6442_v0  ;;  %v6100_v26 = vld [vmem:[%s8350_s7 + $0xc4] ss:$48 sps:$4 sm:$0xff]   ;;  %v6098_v28 = vld [vmem:[%s8350_s7 + $0xc0] ss:$48 sps:$4 sm:$0xff]   ;;  %v6097_v32 = vld [vmem:[%s8350_s7 + $0x6c] ss:$48 sps:$4 sm:$0xff]  }
  0x14   :  { %v6106_v30 = vld [vmem:[%s8350_s7 + $0x124] ss:$48 sps:$4 sm:$0xff]   ;;  %v6104_v33 = vld [vmem:[%s8350_s7 + $0x120] ss:$48 sps:$4 sm:$0xff]   ;;  %v6095_v34 = vld [vmem:[%s8350_s7 + $0x68] ss:$48 sps:$4 sm:$0xff]  }
  0x15   :  { %5778 = vmatpush3.bf16.msra.mxu0 %v6071_v2  ;;  %v6112_v35 = vld [vmem:[%s8350_s7 + $0x184] ss:$48 sps:$4 sm:$0xff]   ;;  %v6103_v36 = vld [vmem:[%s8350_s7 + $0xcc] ss:$48 sps:$4 sm:$0xff]   ;;  %v6110_v37 = vld [vmem:[%s8350_s7 + $0x180] ss:$48 sps:$4 sm:$0xff]  }
  0x16   :  { %5779 = vmatprep.subr.bf16.mxu0 %v6442_v0  ;;  %5802 = vmatpush3.bf16.msra.mxu1 %v6081_v10  ;;  %v6101_v38 = vld [vmem:[%s8350_s7 + $0xc8] ss:$48 sps:$4 sm:$0xff]   ;;  %v6118_v39 = vld [vmem:[%s8350_s7 + $0x1e4] ss:$48 sps:$4 sm:$0xff]   ;;  %v6109_v40 = vld [vmem:[%s8350_s7 + $0x12c] ss:$48 sps:$4 sm:$0xff]  }
  0x17   :  { %5803 = vmatprep.subr.bf16.mxu1 %v6442_v0  ;;  %v6116_v41 = vld [vmem:[%s8350_s7 + $0x1e0] ss:$48 sps:$4 sm:$0xff]   ;;  %v6107_v42 = vld [vmem:[%s8350_s7 + $0x128] ss:$48 sps:$4 sm:$0xff]   ;;  %v6115_v43 = vld [vmem:[%s8350_s7 + $0x18c] ss:$48 sps:$4 sm:$0xff]  }
  0x18   :  { %v6113_v44 = vld [vmem:[%s8350_s7 + $0x188] ss:$48 sps:$4 sm:$0xff]   ;;  %v6121_v45 = vld [vmem:[%s8350_s7 + $0x1ec] ss:$48 sps:$4 sm:$0xff]   ;;  %v6124_v47 = vld [vmem:[%s8350_s7 + $0x244] ss:$48 sps:$4 sm:$0xff]  }
  0x19   :  { %5780 = vmatpush3.bf16.msra.mxu0 %v6072_v3  ;;  %v6119_v46 = vld [vmem:[%s8350_s7 + $0x1e8] ss:$48 sps:$4 sm:$0xff]   ;;  %v6127_v48 = vld [vmem:[%s8350_s7 + $0x24c] ss:$48 sps:$4 sm:$0xff]   ;;  %v6122_v49 = vld [vmem:[%s8350_s7 + $0x240] ss:$48 sps:$4 sm:$0xff]  }
  0x1a   :  { %5781 = vmatprep.subr.bf16.mxu0 %v6442_v0  ;;  %5804 = vmatpush3.bf16.msra.mxu1 %v6082_v12  ;;  %v6125_v50 = vld [vmem:[%s8350_s7 + $0x248] ss:$48 sps:$4 sm:$0xff]   ;;  %v6130_v51 = vld [vmem:[%s8350_s7 + $0x2a4] ss:$48 sps:$4 sm:$0xff]   ;;  %v6133_v52 = vld [vmem:[%s8350_s7 + $0x2ac] ss:$48 sps:$4 sm:$0xff]  }
  0x1b   :  { %5805 = vmatprep.subr.bf16.mxu1 %v6442_v0  ;;  %v6128_v53 = vld [vmem:[%s8350_s7 + $0x2a0] ss:$48 sps:$4 sm:$0xff]   ;;  %v6131_v54 = vld [vmem:[%s8350_s7 + $0x2a8] ss:$48 sps:$4 sm:$0xff]   ;;  %v6136_v55 = vld [vmem:[%s8350_s7 + $0x14] ss:$48 sps:$4 sm:$0xff]  }
  0x1c   :  { %v6139_v56 = vld [vmem:[%s8350_s7 + $0x1c] ss:$48 sps:$4 sm:$0xff]   ;;  %v6134_v4 = vld [vmem:[%s8350_s7 + $0x10] ss:$48 sps:$4 sm:$0xff]   ;;  %v6143_v12 = vld [vmem:[%s8350_s7 + $0x78] ss:$48 sps:$4 sm:$0xff]  }
  0x1d   :  { %5782 = vmatpush3.bf16.msra.mxu0 %v6073_v5  ;;  %v6137_v5 = vld [vmem:[%s8350_s7 + $0x18] ss:$48 sps:$4 sm:$0xff]   ;;  %v6145_v8 = vld [vmem:[%s8350_s7 + $0x7c] ss:$48 sps:$4 sm:$0xff]   ;;  %v6148_v15 = vld [vmem:[%s8350_s7 + $0xd4] ss:$48 sps:$4 sm:$0xff]  }
  0x1e   :  { %5783 = vmatprep.subr.bf16.mxu0 %v6442_v0  ;;  %5806 = vmatpush3.bf16.msra.mxu1 %v6083_v16  ;;  %v6151_v16 = vld [vmem:[%s8350_s7 + $0xdc] ss:$48 sps:$4 sm:$0xff]   ;;  %v6154_v24 = vld [vmem:[%s8350_s7 + $0x134] ss:$48 sps:$4 sm:$0xff]  }
  0x1f   :  { %5807 = vmatprep.subr.bf16.mxu1 %v6442_v0 }
  0x21   :  { %5784 = vmatpush3.bf16.msra.mxu0 %v6074_v7  ;;  %v6142_v7 = vld [vmem:[%s8350_s7 + $0x74] ss:$48 sps:$4 sm:$0xff]  }
  0x22   :  { %5785 = vmatprep.subr.bf16.mxu0 %v6442_v0  ;;  %5808 = vmatpush3.bf16.msra.mxu1 %v6084_v20 }
  0x23   :  { %5809 = vmatprep.subr.bf16.mxu1 %v6442_v0 }
  0x25   :  { %5786 = vmatpush3.bf16.msra.mxu0 %v6075_v9  ;;  %v5174_v9 = vld [vmem:[%s8353_s3] ss:$0 sm:$0xff] }
  0x26   :  { %5787 = vmatprep.subr.bf16.mxu0 %v6442_v0  ;;  %5810 = vmatpush3.bf16.msra.mxu1 %v6085_v22  ;;  %v6149_v22 = vld [vmem:[%s8350_s7 + $0xd8] ss:$48 sps:$4 sm:$0xff]  }
  0x27   :  { %1013 = vmatprep.subr.bf16.mxu1 %v6091_v27  ;;  %v6152_v27 = vld [vmem:[%s8350_s7 + $0x130] ss:$48 sps:$4 sm:$0xff]  }
  0x29   :  { %5788 = vmatpush3.bf16.msra.mxu0 %v6076_v11  ;;  %5812 = vmatmul.mubr.bf16.vlgmr.msra.gmra.mrb[0].mxu1 %v214_v31  ;;  %v6140_v11 = vld [vmem:[%s8350_s7 + $0x70] ss:$48 sps:$4 sm:$0xff]  }
  0x2a   :  { %5789 = vmatprep.subr.bf16.mxu0 %v6442_v0  ;;  %1014 = vmatpush1.bf16.msra.mxu1 %v6089_v29  ;;  %v6160_v29 = vld [vmem:[%s8350_s7 + $0x194] ss:$48 sps:$4 sm:$0xff]   ;;  %v6158_v31 = vld [vmem:[%s8350_s7 + $0x190] ss:$48 sps:$4 sm:$0xff]  }
  0x2b   :  { %1015 = vmatprep.subr.bf16.mxu1 %v6097_v32  ;;  %1045 = vmatprep.mubr.bf16.mxu1 %v8331_v57  ;;  %v6161_v32 = vld [vmem:[%s8350_s7 + $0x198] ss:$48 sps:$4 sm:$0xff]  }
  0x2d   :  { %5790 = vmatpush3.bf16.msra.mxu0 %v6077_v13 }
  0x2e   :  { %970 = vmatprep.subr.bf16.mxu0 %v6088_v17  ;;  %1016 = vmatpush1.bf16.msra.mxu1 %v6095_v34  ;;  %v6169_v34 = vld [vmem:[%s8350_s7 + $0x1fc] ss:$48 sps:$4 sm:$0xff]  }
  0x2f   :  { %1017 = vmatprep.subr.bf16.mxu1 %v6103_v36  ;;  %v6167_v36 = vld [vmem:[%s8350_s7 + $0x1f8] ss:$48 sps:$4 sm:$0xff]  }
  0x30   :  { %5792 = vmatmul.mubr.bf16.vlgmr.msra.gmra.mrb[0].mxu0 %v99_v18 }
  0x31   :  { %971 = vmatpush1.bf16.msra.mxu0 %v6086_v19  ;;  %1002 = vmatprep.mubr.bf16.mxu0 %v8331_v57 }
  0x32   :  { %972 = vmatprep.subr.bf16.mxu0 %v6094_v21  ;;  %1018 = vmatpush1.bf16.msra.mxu1 %v6101_v38  ;;  %v6146_v21 = vld [vmem:[%s8350_s7 + $0xd0] ss:$48 sps:$4 sm:$0xff]   ;;  %v6175_v38 = vld [vmem:[%s8350_s7 + $0x25c] ss:$48 sps:$4 sm:$0xff]  }
  0x33   :  { %1019 = vmatprep.subr.bf16.mxu1 %v6109_v40  ;;  %v6173_v40 = vld [vmem:[%s8350_s7 + $0x258] ss:$48 sps:$4 sm:$0xff]  }
  0x35   :  { %973 = vmatpush1.bf16.msra.mxu0 %v6092_v25  ;;  %v6157_v25 = vld [vmem:[%s8350_s7 + $0x13c] ss:$48 sps:$4 sm:$0xff]  }
  0x36   :  { %974 = vmatprep.subr.bf16.mxu0 %v6100_v26  ;;  %1020 = vmatpush1.bf16.msra.mxu1 %v6107_v42  ;;  %v6181_v42 = vld [vmem:[%s8350_s7 + $0x2bc] ss:$48 sps:$4 sm:$0xff]  }
  0x37   :  { %1021 = vmatprep.subr.bf16.mxu1 %v6115_v43  ;;  %v6176_v43 = vld [vmem:[%s8350_s7 + $0x2b0] ss:$48 sps:$4 sm:$0xff]  }
  0x39   :  { %975 = vmatpush1.bf16.msra.mxu0 %v6098_v28  ;;  %v6155_v28 = vld [vmem:[%s8350_s7 + $0x138] ss:$48 sps:$4 sm:$0xff]  }
  0x3a   :  { %976 = vmatprep.subr.bf16.mxu0 %v6106_v30  ;;  %1022 = vmatpush1.bf16.msra.mxu1 %v6113_v44  ;;  %v6163_v30 = vld [vmem:[%s8350_s7 + $0x19c] ss:$48 sps:$4 sm:$0xff]   ;;  %v6179_v44 = vld [vmem:[%s8350_s7 + $0x2b8] ss:$48 sps:$4 sm:$0xff]  }
  0x3b   :  { %1023 = vmatprep.subr.bf16.mxu1 %v6121_v45  ;;  %v6184_v45 = vld [vmem:[%s8350_s7 + $0x24] ss:$48 sps:$4 sm:$0xff]  }
  0x3d   :  { %977 = vmatpush1.bf16.msra.mxu0 %v6104_v33  ;;  %v6166_v33 = vld [vmem:[%s8350_s7 + $0x1f4] ss:$48 sps:$4 sm:$0xff]  }
  0x3e   :  { %978 = vmatprep.subr.bf16.mxu0 %v6112_v35  ;;  %1024 = vmatpush1.bf16.msra.mxu1 %v6119_v46  ;;  %v6164_v35 = vld [vmem:[%s8350_s7 + $0x1f0] ss:$48 sps:$4 sm:$0xff]   ;;  %v6187_v46 = vld [vmem:[%s8350_s7 + $0x2c] ss:$48 sps:$4 sm:$0xff]  }
  0x3f   :  { %1025 = vmatprep.subr.bf16.mxu1 %v6127_v48  ;;  %v6185_v48 = vld [vmem:[%s8350_s7 + $0x28] ss:$48 sps:$4 sm:$0xff]  }
  0x41   :  { %979 = vmatpush1.bf16.msra.mxu0 %v6110_v37  ;;  %v6172_v37 = vld [vmem:[%s8350_s7 + $0x254] ss:$48 sps:$4 sm:$0xff]  }
  0x42   :  { %980 = vmatprep.subr.bf16.mxu0 %v6118_v39  ;;  %1026 = vmatpush1.bf16.msra.mxu1 %v6125_v50  ;;  %v6170_v39 = vld [vmem:[%s8350_s7 + $0x250] ss:$48 sps:$4 sm:$0xff]   ;;  %v6193_v50 = vld [vmem:[%s8350_s7 + $0x8c] ss:$48 sps:$4 sm:$0xff]  }
  0x43   :  { %1027 = vmatprep.subr.bf16.mxu1 %v6133_v52  ;;  %v6191_v52 = vld [vmem:[%s8350_s7 + $0x88] ss:$48 sps:$4 sm:$0xff]  }
  0x45   :  { %981 = vmatpush1.bf16.msra.mxu0 %v6116_v41  ;;  %v6178_v41 = vld [vmem:[%s8350_s7 + $0x2b4] ss:$48 sps:$4 sm:$0xff]  }
  0x46   :  { %982 = vmatprep.subr.bf16.mxu0 %v6124_v47  ;;  %1028 = vmatpush1.bf16.msra.mxu1 %v6131_v54  ;;  %v6182_v47 = vld [vmem:[%s8350_s7 + $0x20] ss:$48 sps:$4 sm:$0xff]   ;;  %v6199_v54 = vld [vmem:[%s8350_s7 + $0xec] ss:$48 sps:$4 sm:$0xff]  }
  0x47   :  { %1099 = vmatprep.subr.bf16.mxu1 %v6139_v56  ;;  %v6197_v56 = vld [vmem:[%s8350_s7 + $0xe8] ss:$48 sps:$4 sm:$0xff]  }
  0x49   :  { %983 = vmatpush1.bf16.msra.mxu0 %v6122_v49  ;;  %v6190_v49 = vld [vmem:[%s8350_s7 + $0x84] ss:$48 sps:$4 sm:$0xff]  }
  0x4a   :  { %984 = vmatprep.subr.bf16.mxu0 %v6130_v51  ;;  %v6188_v51 = vld [vmem:[%s8350_s7 + $0x80] ss:$48 sps:$4 sm:$0xff]  }
  0x4d   :  { %985 = vmatpush1.bf16.msra.mxu0 %v6128_v53  ;;  %v6196_v53 = vld [vmem:[%s8350_s7 + $0xe4] ss:$48 sps:$4 sm:$0xff]  }
  0x4e   :  { %1056 = vmatprep.subr.bf16.mxu0 %v6136_v55  ;;  %v6194_v55 = vld [vmem:[%s8350_s7 + $0xe0] ss:$48 sps:$4 sm:$0xff]  }
  0xfc   :  { %v320_v10 = vpop.f32.mrb[0].mxu1 }
  0xfd   :  { %v321_v13 = vadd.f32 %v5174_v9, %v320_v10  ;;  %v5813_v14 = vpop.f32.mrb[1].mxu1  ;;  %v6212_v10 = vld [vmem:[%s8350_s7 + $0x200] ss:$48 sps:$4 sm:$0xff]  }
  0xfe   :  { %v323_v17 = vpop.f32.mrb[2].mxu1  ;;  %v6218_v14 = vld [vmem:[%s8350_s7 + $0x260] ss:$48 sps:$4 sm:$0xff]  }
  0xff   :  { %v327_v18 = vmax.f32 %v321_v13, 0.0  ;;  %v324_v19 = vadd.f32 %v5174_v9, %v323_v17  ;;  %v5814_v20 = vpop.f32.mrb[3].mxu1  ;;  %v6217_v9 = vld [vmem:[%s8350_s7 + $0x20c] ss:$48 sps:$4 sm:$0xff]  }
 0x100   :  { %v6223_v13 = vld [vmem:[%s8350_s7 + $0x26c] ss:$48 sps:$4 sm:$0xff]   ;;  %v90_v20 = vlaneseq }
 0x101   :  { %v328_v23 = vmax.f32 %v324_v19, 0.0  ;;  %v6229_v17 = vld [vmem:[%s8350_s7 + $0x2cc] ss:$48 sps:$4 sm:$0xff]   ;;  %v6227_v19 = vld [vmem:[%s8350_s7 + $0x2c8] ss:$48 sps:$4 sm:$0xff]  }
 0x103   :  { %v205_v59 = vpop.f32.mrb[0].mxu0  ;;  %v6832_v26 = vpack.c.bf16 %v328_v23, %v327_v18  ;;  %v6224_v18 = vld [vmem:[%s8350_s7 + $0x2c0] ss:$48 sps:$4 sm:$0xff]  }
 0x104   :  { %v6777_v60 = vadd.f32 %v5165_v58, %v205_v59  ;;  %v5793_v61 = vpop.f32.mrb[1].mxu0  ;;  %v6205_v59 = vld [vmem:[%s8350_s7 + $0x14c] ss:$48 sps:$4 sm:$0xff]  }
 0x105   :  { %v208_v62 = vpop.f32.mrb[2].mxu0  ;;  %v6200_v61 = vld [vmem:[%s8350_s7 + $0x140] ss:$48 sps:$4 sm:$0xff]  }
 0x106   :  { %v6779_v63 = vadd.f32 %v5165_v58, %v208_v62  ;;  %v5794_v1 = vpop.f32.mrb[3].mxu0  ;;  %v8333_v2 = vmax.f32 %v6777_v60, 0.0  ;;  %v6202_v58 = vld [vmem:[%s8350_s7 + $0x144] ss:$48 sps:$4 sm:$0xff]   ;;  %v6203_v62 = vld [vmem:[%s8350_s7 + $0x148] ss:$48 sps:$4 sm:$0xff]  }
 0x107   :  { %v6208_v1 = vld [vmem:[%s8350_s7 + $0x1a4] ss:$48 sps:$4 sm:$0xff]  }
 0x108   :  { %v8330_v3 = vmax.f32 %v6779_v63, 0.0 }
 0x10a   :  { %v6793_v6 = vpack.c.bf16 %v8330_v3, %v8333_v2 }
 0x10c   :  { %1003 = vmatmul.mubr.bf16.vlgmr.msra.gmra.mrb[4].mxu0 %v6793_v6  ;;  %1046 = vmatmul.mubr.bf16.vlgmr.msra.gmra.mrb[4].mxu1 %v6793_v6 }
 0x10d   :  { %1057 = vmatpush1.bf16.msra.mxu0 %v6134_v4  ;;  %1100 = vmatpush1.bf16.msra.mxu1 %v6137_v5  ;;  %v6211_v4 = vld [vmem:[%s8350_s7 + $0x1ac] ss:$48 sps:$4 sm:$0xff]   ;;  %v6206_v5 = vld [vmem:[%s8350_s7 + $0x1a0] ss:$48 sps:$4 sm:$0xff]  }
 0x10e   :  { %1058 = vmatprep.subr.bf16.mxu0 %v6142_v7  ;;  %1101 = vmatprep.subr.bf16.mxu1 %v6145_v8  ;;  %v6209_v7 = vld [vmem:[%s8350_s7 + $0x1a8] ss:$48 sps:$4 sm:$0xff]   ;;  %v6214_v8 = vld [vmem:[%s8350_s7 + $0x204] ss:$48 sps:$4 sm:$0xff]  }
 0x10f   :  { %1088 = vmatprep.mubr.bf16.mxu0 %v8331_v57  ;;  %1131 = vmatprep.mubr.bf16.mxu1 %v8331_v57 }
 0x111   :  { %1059 = vmatpush1.bf16.msra.mxu0 %v6140_v11  ;;  %1102 = vmatpush1.bf16.msra.mxu1 %v6143_v12  ;;  %v6215_v11 = vld [vmem:[%s8350_s7 + $0x208] ss:$48 sps:$4 sm:$0xff]   ;;  %v6220_v12 = vld [vmem:[%s8350_s7 + $0x264] ss:$48 sps:$4 sm:$0xff]  }
 0x112   :  { %1060 = vmatprep.subr.bf16.mxu0 %v6148_v15  ;;  %1103 = vmatprep.subr.bf16.mxu1 %v6151_v16  ;;  %v6221_v15 = vld [vmem:[%s8350_s7 + $0x268] ss:$48 sps:$4 sm:$0xff]   ;;  %v6226_v16 = vld [vmem:[%s8350_s7 + $0x2c4] ss:$48 sps:$4 sm:$0xff]   ;;  %s8358_s7 = sld [smem:[#allocation11_spill]] }
 0x115   :  { %1061 = vmatpush1.bf16.msra.mxu0 %v6146_v21  ;;  %1104 = vmatpush1.bf16.msra.mxu1 %v6149_v22  ;;  %v6997_v21 = vshrl.u32 %v90_v20, 7 }
 0x116   :  { %1062 = vmatprep.subr.bf16.mxu0 %v6154_v24  ;;  %1105 = vmatprep.subr.bf16.mxu1 %v6157_v25 }
 0x117   :  { %v7000_v22 = vsub.s32 0, %v6997_v21  ;;  %v7003_v23 = vsub.s32 2, %v6997_v21  ;;  %v7009_v24 = vsub.s32 1, %v6997_v21  ;;  %v7012_v25 = vsub.s32 3, %v6997_v21 }
 0x119   :  { %1063 = vmatpush1.bf16.msra.mxu0 %v6152_v27  ;;  %1106 = vmatpush1.bf16.msra.mxu1 %v6155_v28 }
 0x11a   :  { %1064 = vmatprep.subr.bf16.mxu0 %v6160_v29  ;;  %1107 = vmatprep.subr.bf16.mxu1 %v6163_v30 }
 0x11d   :  { %1065 = vmatpush1.bf16.msra.mxu0 %v6158_v31  ;;  %1108 = vmatpush1.bf16.msra.mxu1 %v6161_v32 }
 0x11e   :  { %1066 = vmatprep.subr.bf16.mxu0 %v6166_v33  ;;  %1109 = vmatprep.subr.bf16.mxu1 %v6169_v34 }
 0x121   :  { %1067 = vmatpush1.bf16.msra.mxu0 %v6164_v35  ;;  %1110 = vmatpush1.bf16.msra.mxu1 %v6167_v36 }
 0x122   :  { %1068 = vmatprep.subr.bf16.mxu0 %v6172_v37  ;;  %1111 = vmatprep.subr.bf16.mxu1 %v6175_v38 }
 0x125   :  { %1069 = vmatpush1.bf16.msra.mxu0 %v6170_v39  ;;  %1112 = vmatpush1.bf16.msra.mxu1 %v6173_v40 }
 0x126   :  { %1070 = vmatprep.subr.bf16.mxu0 %v6178_v41  ;;  %1113 = vmatprep.subr.bf16.mxu1 %v6181_v42 }
 0x129   :  { %1071 = vmatpush1.bf16.msra.mxu0 %v6176_v43  ;;  %1114 = vmatpush1.bf16.msra.mxu1 %v6179_v44 }
 0x12a   :  { %1142 = vmatprep.subr.bf16.mxu0 %v6184_v45  ;;  %1185 = vmatprep.subr.bf16.mxu1 %v6187_v46 }
 0x12c   :  { %1089 = vmatmul.mubr.bf16.vlgmr.msra.gmra.mrb[8].mxu0 %v6793_v6  ;;  %1132 = vmatmul.mubr.bf16.vlgmr.msra.gmra.mrb[8].mxu1 %v6793_v6 }
 0x12d   :  { %1143 = vmatpush1.bf16.msra.mxu0 %v6182_v47  ;;  %1186 = vmatpush1.bf16.msra.mxu1 %v6185_v48 }
 0x12e   :  { %1144 = vmatprep.subr.bf16.mxu0 %v6190_v49  ;;  %1187 = vmatprep.subr.bf16.mxu1 %v6193_v50 }
 0x12f   :  { %1174 = vmatprep.mubr.bf16.mxu0 %v8331_v57  ;;  %1217 = vmatprep.mubr.bf16.mxu1 %v8331_v57 }
 0x131   :  { %1145 = vmatpush1.bf16.msra.mxu0 %v6188_v51  ;;  %1188 = vmatpush1.bf16.msra.mxu1 %v6191_v52  ;;  %v8326_v51 = vsub.s32 4, %v6997_v21  ;;  %v8329_v52 = vsub.s32 6, %v6997_v21 }
 0x132   :  { %1146 = vmatprep.subr.bf16.mxu0 %v6196_v53  ;;  %1189 = vmatprep.subr.bf16.mxu1 %v6199_v54  ;;  %v8328_v53 = vsub.s32 5, %v6997_v21  ;;  %v8327_v54 = vsub.s32 7, %v6997_v21 }
 0x135   :  { %1147 = vmatpush1.bf16.msra.mxu0 %v6194_v55  ;;  %1190 = vmatpush1.bf16.msra.mxu1 %v6197_v56 }
 0x136   :  { %1148 = vmatprep.subr.bf16.mxu0 %v6202_v58  ;;  %1191 = vmatprep.subr.bf16.mxu1 %v6205_v59 }
 0x139   :  { %1149 = vmatpush1.bf16.msra.mxu0 %v6200_v61  ;;  %1192 = vmatpush1.bf16.msra.mxu1 %v6203_v62 }
 0x13a   :  { %1150 = vmatprep.subr.bf16.mxu0 %v6208_v1  ;;  %1193 = vmatprep.subr.bf16.mxu1 %v6211_v4 }
 0x13d   :  { %1151 = vmatpush1.bf16.msra.mxu0 %v6206_v5  ;;  %1194 = vmatpush1.bf16.msra.mxu1 %v6209_v7 }
 0x13e   :  { %1152 = vmatprep.subr.bf16.mxu0 %v6214_v8  ;;  %1195 = vmatprep.subr.bf16.mxu1 %v6217_v9 }
 0x141   :  { %1153 = vmatpush1.bf16.msra.mxu0 %v6212_v10  ;;  %1196 = vmatpush1.bf16.msra.mxu1 %v6215_v11 }
 0x142   :  { %1154 = vmatprep.subr.bf16.mxu0 %v6220_v12  ;;  %1197 = vmatprep.subr.bf16.mxu1 %v6223_v13 }
 0x145   :  { %1155 = vmatpush1.bf16.msra.mxu0 %v6218_v14  ;;  %1198 = vmatpush1.bf16.msra.mxu1 %v6221_v15 }
 0x146   :  { %1156 = vmatprep.subr.bf16.mxu0 %v6226_v16  ;;  %1199 = vmatprep.subr.bf16.mxu1 %v6229_v17 }
 0x149   :  { %1157 = vmatpush1.bf16.msra.mxu0 %v6224_v18  ;;  %1200 = vmatpush1.bf16.msra.mxu1 %v6227_v19 }
 0x14a   :  { %5815 = vmatprep.subr.bf16.mxu1 %v6442_v0  ;;  %5839 = vmatprep.subr.bf16.mxu0 %v6442_v0 }
 0x14c   :  { %1175 = vmatmul.mubr.bf16.vlgmr.msra.gmra.mrb[12].mxu0 %v6793_v6  ;;  %1218 = vmatmul.mubr.bf16.vlgmr.msra.gmra.mrb[12].mxu1 %v6793_v6  ;;  %v426_v6 = vld [vmem:[%s8354_s1] sm:$0xff] }
 0x14d   :  { %5817 = vmatprep.mubr.msk.bf16.mxu1 %vm6443_vm0, %v6442_v0  ;;  %5841 = vmatprep.mubr.msk.bf16.mxu0 %vm6443_vm0, %v6442_v0  ;;  %v433_v27 = vrot.slane %v426_v6, %v7000_v22  ;;  %v441_v28 = vrot.slane %v426_v6, %v7003_v23  ;;  %v437_v31 = vrot.slane %v426_v6, %v7009_v24 }
 0x14e   :  { %v445_v32 = vrot.slane %v426_v6, %v7012_v25  ;;  %v449_v55 = vrot.slane %v426_v6, %v8326_v51  ;;  %v457_v56 = vrot.slane %v426_v6, %v8329_v52  ;;  %v453_v61 = vrot.slane %v426_v6, %v8328_v53 }
 0x14f   :  { %v461_v62 = vrot.slane %v426_v6, %v8327_v54 }
 0x1df   :  { %v1004_v29 = vpop.f32.mrb[4].mxu0  ;;  %v1047_v30 = vpop.f32.mrb[4].mxu1 }
 0x1e0   :  { %v1006_v33 = vpop.f32.mrb[5].mxu0  ;;  %v1049_v34 = vpop.f32.mrb[5].mxu1  ;;  %v1005_v37 = vadd.f32 %v1004_v29, %v433_v27  ;;  %v1048_v38 = vadd.f32 %v1047_v30, %v441_v28 }
 0x1e1   :  { %v1008_v35 = vpop.f32.mrb[6].mxu0  ;;  %v1051_v36 = vpop.f32.mrb[6].mxu1  ;;  %v1007_v43 = vadd.f32 %v1006_v33, %v437_v31  ;;  %v1050_v44 = vadd.f32 %v1049_v34, %v445_v32 }
 0x1e2   :  { %v1009_v39 = vadd.f32 %v1008_v35, %v433_v27  ;;  %v1052_v40 = vadd.f32 %v1051_v36, %v441_v28  ;;  %v1010_v41 = vpop.f32.mrb[7].mxu0  ;;  %v1053_v42 = vpop.f32.mrb[7].mxu1  ;;  %v427_v28 = vld [vmem:[%s8354_s1 + $0x8] sm:$0xf] }
 0x1e3   :  { %v1011_v45 = vadd.f32 %v1010_v41, %v437_v31  ;;  %v1054_v46 = vadd.f32 %v1053_v42, %v445_v32  ;;  %v473_v29 = vrot.slane %v427_v28, %v7003_v23  ;;  %v469_v30 = vrot.slane %v427_v28, %v7009_v24 }
 0x1e4   :  { %v7018_v47 = vpack.c.bf16 %v1009_v39, %v1005_v37  ;;  %v7020_v48 = vpack.c.bf16 %v1052_v40, %v1048_v38  ;;  %v477_v31 = vrot.slane %v427_v28, %v7012_v25  ;;  %v465_v32 = vrot.slane %v427_v28, %v7000_v22 }
 0x1e5   :  { %v7022_v49 = vpack.c.bf16 %v1011_v45, %v1007_v43  ;;  %v7024_v50 = vpack.c.bf16 %v1054_v46, %v1050_v44 }
 0x1ff   :  { %v1090_v58 = vpop.f32.mrb[8].mxu0  ;;  %v1133_v59 = vpop.f32.mrb[8].mxu1 }
 0x200   :  { %v1092_v1 = vpop.f32.mrb[9].mxu0  ;;  %v1135_v4 = vpop.f32.mrb[9].mxu1  ;;  %v1091_v8 = vadd.f32 %v1090_v58, %v449_v55  ;;  %v1134_v9 = vadd.f32 %v1133_v59, %v457_v56 }
 0x201   :  { %v1094_v5 = vpop.f32.mrb[10].mxu0  ;;  %v1137_v7 = vpop.f32.mrb[10].mxu1  ;;  %v1093_v14 = vadd.f32 %v1092_v1, %v453_v61  ;;  %v1136_v15 = vadd.f32 %v1135_v4, %v461_v62  ;;  %v93_v4 = vand.u32 127, %v90_v20 }
 0x202   :  { %v1095_v10 = vadd.f32 %v1094_v5, %v449_v55  ;;  %v1138_v11 = vadd.f32 %v1137_v7, %v457_v56  ;;  %v1096_v12 = vpop.f32.mrb[11].mxu0  ;;  %v1139_v13 = vpop.f32.mrb[11].mxu1 }
 0x203   :  { %v1097_v16 = vadd.f32 %v1096_v12, %v453_v61  ;;  %v1140_v17 = vadd.f32 %v1139_v13, %v461_v62  ;;  %vm7078_vm2 = vcmp.le.s32.totalorder %v93_v4, %v6997_v21 }
 0x204   :  { %v7038_v18 = vpack.c.bf16 %v1095_v10, %v1091_v8  ;;  %v7040_v19 = vpack.c.bf16 %v1138_v11, %v1134_v9 }
 0x205   :  { %v7042_v27 = vpack.c.bf16 %v1097_v16, %v1093_v14  ;;  %v7044_v6 = vpack.c.bf16 %v1140_v17, %v1136_v15 }
 0x206   :  { %5816 = vmatpush3.bf16.xpose.msra.mxu1 %v7038_v18  ;;  %5840 = vmatpush3.bf16.xpose.msra.mxu0 %v7040_v19  ;;  %v1993_v53 = vrot.slane %v7038_v18, 4 }
 0x207   :  { %5851 = vmatprep.subr.bf16.mxu0 %v6442_v0  ;;  %5821 = vmatprep.subr.bf16.mxu1 %v6442_v0  ;;  %v2101_v2 = vrot.slane %v7042_v27, 4 }
 0x20d   :  { %5818 = vmatmul.mubr.bf16.vlgmr.msra.gmra.mrb[16].mxu1 %v7018_v47  ;;  %5842 = vmatmul.mubr.bf16.vlgmr.msra.gmra.mrb[16].mxu0 %v7020_v48 }
 0x20e   :  { %5852 = vmatpush3.bf16.xpose.msra.mxu0 %v7044_v6  ;;  %5853 = vmatprep.mubr.msk.bf16.mxu0 %vm6443_vm0, %v6442_v0 }
 0x20f   :  { %5823 = vmatprep.mubr.msk.bf16.mxu1 %vm6443_vm0, %v6442_v0 }
 0x215   :  { %5854 = vmatmul.mubr.bf16.vlgmr.msra.gmra.mrb[20].mxu0 %v7024_v50 }
 0x21f   :  { %v1176_v33 = vpop.f32.mrb[12].mxu0  ;;  %v1219_v34 = vpop.f32.mrb[12].mxu1 }
 0x220   :  { %v1220_v35 = vadd.f32 %v1219_v34, %v473_v29  ;;  %v1178_v36 = vpop.f32.mrb[13].mxu0  ;;  %v1221_v37 = vpop.f32.mrb[13].mxu1  ;;  %v1177_v42 = vadd.f32 %v1176_v33, %v465_v32 }
 0x221   :  { %v1179_v38 = vadd.f32 %v1178_v36, %v469_v30  ;;  %v1222_v39 = vadd.f32 %v1221_v37, %v477_v31  ;;  %v1180_v40 = vpop.f32.mrb[14].mxu0  ;;  %v1223_v41 = vpop.f32.mrb[14].mxu1 }
 0x222   :  { %v1181_v43 = vadd.f32 %v1180_v40, %v465_v32  ;;  %v1224_v44 = vadd.f32 %v1223_v41, %v473_v29  ;;  %v1182_v45 = vpop.f32.mrb[15].mxu0  ;;  %v1225_v46 = vpop.f32.mrb[15].mxu1 }
 0x223   :  { %v1183_v55 = vadd.f32 %v1182_v45, %v469_v30  ;;  %v1226_v56 = vadd.f32 %v1225_v46, %v477_v31 }
 0x224   :  { %v7065_v58 = vpack.c.bf16 %v1181_v43, %v1177_v42  ;;  %v7067_v59 = vpack.c.bf16 %v1224_v44, %v1220_v35 }
 0x225   :  { %v7069_v61 = vpack.c.bf16 %v1183_v55, %v1179_v38  ;;  %v7071_v62 = vpack.c.bf16 %v1226_v56, %v1222_v39 }
 0x226   :  { %v1300_v1 = vsel %vm1298_vm1, %v7065_v58, 0 }
 0x227   :  { %5822 = vmatpush3.bf16.msra.mxu1 %v1300_v1  ;;  %v1400_v56 = vsel %vm1298_vm1, %v7069_v61, 0 }
 0x228   :  { %5827 = vmatprep.subr.bf16.mxu1 %v6442_v0 }
 0x2e0   :  { %v1274_v5 = vpop.f32.mrb[16].mxu1  ;;  %v1476_v7 = vpop.f32.mrb[16].mxu0 }
 0x2e1   :  { %v1280_v9 = vmul.f32 0.25, %v1274_v5  ;;  %v5819_v10 = vpop.f32.mrb[17].mxu1  ;;  %v5843_v11 = vpop.f32.mrb[17].mxu0  ;;  %v1482_v34 = vmul.f32 0.25, %v1476_v7 }
 0x2e2   :  { %v1277_v12 = vpop.f32.mrb[18].mxu1  ;;  %v1479_v13 = vpop.f32.mrb[18].mxu0 }
 0x2e3   :  { %v5820_v14 = vpop.f32.mrb[19].mxu1  ;;  %v5844_v15 = vpop.f32.mrb[19].mxu0  ;;  %v1281_v16 = vsel %vm7078_vm2, %v1280_v9, -1e+30  ;;  %v1483_v37 = vsel %vm7078_vm2, %v1482_v34, -1e+30 }
 0x2e4   :  { %v1283_v20 = vsel %vm1282_vm3, %v1281_v16, -inf  ;;  %v1484_v38 = vsel %vm1282_vm3, %v1483_v37, -inf }
 0x2e5   :  { %1284 = vmax.xlane.f32.xlu0 %v1283_v20 }
 0x2e8   :  { %v1576_v17 = vpop.f32.mrb[20].mxu0 }
 0x2e9   :  { %v5855_v28 = vpop.f32.mrb[21].mxu0 }
 0x2ea   :  { %v1579_v29 = vpop.f32.mrb[22].mxu0 }
 0x2eb   :  { %v5856_v30 = vpop.f32.mrb[23].mxu0  ;;  %v1582_v29 = vmul.f32 0.25, %v1576_v17 }
 0x372   :  { %v1285_v31 = vpop.xlane.xlu0 %1284 }
 0x373   :  { %v1286_v32 = vsub.f32 %v1281_v16, %v1285_v31 }
 0x375   :  { %v1287_v33 = vmul.f32 1.442695, %v1286_v32  ;;  %v1583_v32 = vsel %vm7078_vm2, %v1582_v29, -1e+30  ;;  %v7206_v29 = vld [vmem:[%s8357_s0 + $0x78] sm:$0xff]  }
 0x377   :  { %6366 = vpow2.f32 %v1287_v33  ;;  %v1584_v33 = vsel %vm1282_vm3, %v1583_v32, -inf }
 0x381   :  { %v6367_v35 = vpop.eup %6366 }
 0x382   :  { %v1289_v36 = vsel %vm1282_vm3, %v6367_v35, 0.0 }
 0x383   :  { %1290 = vadd.xlane.f32.xlu0 %v1289_v36 }
 0x387   :  { %1485 = vmax.xlane.f32.xlu0 %v1484_v38 }
 0x410   :  { %v1291_v39 = vpop.xlane.xlu0 %1290 }
 0x411   :  { %6368 = vrcp.f32 %v1291_v39 }
 0x414   :  { %v1486_v40 = vpop.xlane.xlu0 %1485 }
 0x415   :  { %v1487_v41 = vsub.f32 %v1483_v37, %v1486_v40 }
 0x417   :  { %v1488_v42 = vmul.f32 1.442695, %v1487_v41 }
 0x419   :  { %6370 = vpow2.f32 %v1488_v42  ;;  %v1500_v42 = vsel %vm1298_vm1, %v7067_v59, 0 }
 0x41b   :  { %v6369_v43 = vpop.eup %6368 }
 0x41c   :  { %v1293_v44 = vmul.f32 %v6369_v43, %v6367_v35 }
 0x41e   :  { %v1294_v45 = vpack.c.bf16 %v1293_v44, %v1293_v44 }
 0x420   :  { %5824 = vmatmul.mubr.msk.bf16.vlgmr.msra.gmra.mrb[20].mxu1 %vm1282_vm3, %v1294_v45 }
 0x421   :  { %5828 = vmatpush3.bf16.xpose.msra.mxu1 %v7042_v27  ;;  %5829 = vmatprep.mubr.msk.bf16.mxu1 %vm6443_vm0, %v6442_v0 }
 0x422   :  { %5833 = vmatprep.subr.bf16.mxu1 %v6442_v0 }
 0x423   :  { %v6371_v46 = vpop.eup %6370 }
 0x424   :  { %v1490_v55 = vsel %vm1282_vm3, %v6371_v46, 0.0 }
 0x425   :  { %1491 = vadd.xlane.f32.xlu0 %v1490_v55 }
 0x428   :  { %5830 = vmatmul.mubr.bf16.vlgmr.msra.gmra.mrb[24].mxu1 %v7022_v49 }
 0x429   :  { %5834 = vmatpush3.bf16.msra.mxu1 %v1400_v56  ;;  %5835 = vmatprep.mubr.msk.bf16.mxu1 %vm6443_vm0, %v6442_v0  ;;  %v1600_v56 = vsel %vm1298_vm1, %v7071_v62, 0 }
 0x42a   :  { %5845 = vmatprep.subr.bf16.mxu1 %v6442_v0 }
 0x4b2   :  { %v1492_v35 = vpop.xlane.xlu0 %1491 }
 0x4f3   :  { %v7101_v1 = vpop.f32.mrb[20].mxu1 }
 0x4f4   :  { %v5825_v4 = vpop.f32.mrb[21].mxu1  ;;  %v1642_v51 = vpack.c.bf16 %v7101_v1, %v7101_v1 }
 0x4f5   :  { %v1339_v5 = vpop.f32.mrb[22].mxu1  ;;  %v7130_v4 = vld [vmem:[%s8357_s0] sm:$0xff]  }
 0x4f6   :  { %v5826_v7 = vpop.f32.mrb[23].mxu1  ;;  %v7136_v5 = vld [vmem:[%s8357_s0 + $0x48] sm:$0xff]  }
 0x4f7   :  { %v7142_v7 = vld [vmem:[%s8357_s0 + $0x8] sm:$0xff]  }
 0x4fb   :  { %v1376_v9 = vpop.f32.mrb[24].mxu1 }
 0x4fc   :  { %v1382_v10 = vmul.f32 0.25, %v1376_v9  ;;  %v5831_v11 = vpop.f32.mrb[25].mxu1  ;;  %v7148_v9 = vld [vmem:[%s8357_s0 + $0x50] sm:$0xff]  }
 0x4fd   :  { %v1379_v12 = vpop.f32.mrb[26].mxu1  ;;  %v7160_v11 = vld [vmem:[%s8357_s0 + $0x58] sm:$0xff]  }
 0x4fe   :  { %v5832_v13 = vpop.f32.mrb[27].mxu1  ;;  %v1383_v14 = vsel %vm7078_vm2, %v1382_v10, -1e+30  ;;  %v7154_v10 = vld [vmem:[%s8357_s0 + $0x10] sm:$0xff]   ;;  %v7166_v12 = vld [vmem:[%s8357_s0 + $0x18] sm:$0xff]  }
 0x4ff   :  { %v1384_v15 = vsel %vm1282_vm3, %v1383_v14, -inf  ;;  %v7172_v13 = vld [vmem:[%s8357_s0 + $0x60] sm:$0xff]  }
 0x500   :  { %1385 = vmax.xlane.f32.xlu1 %v1384_v15  ;;  %v7183_v15 = vld [vmem:[%s8357_s0 + $0x68] sm:$0xff]  }
 0x58d   :  { %v1386_v16 = vpop.xlane.xlu1 %1385 }
 0x58e   :  { %v1387_v20 = vsub.f32 %v1383_v14, %v1386_v16  ;;  %v7177_v14 = vld [vmem:[%s8357_s0 + $0x20] sm:$0xff]   ;;  %v7189_v16 = vld [vmem:[%s8357_s0 + $0x28] sm:$0xff]  }
 0x590   :  { %v1388_v28 = vmul.f32 1.442695, %v1387_v20  ;;  %v7194_v20 = vld [vmem:[%s8357_s0 + $0x70] sm:$0xff]  }
 0x592   :  { %6372 = vpow2.f32 %v1388_v28  ;;  %v7201_v28 = vld [vmem:[%s8357_s0 + $0x30] sm:$0xff]  }
 0x59c   :  { %v6373_v30 = vpop.eup %6372 }
 0x59d   :  { %v1390_v31 = vsel %vm1282_vm3, %v6373_v30, 0.0 }
 0x59e   :  { %1391 = vadd.xlane.f32.xlu1 %v1390_v31  ;;  %v7222_v31 = vld [vmem:[%s8357_s0 + $0xc0] sm:$0xff]  }
 0x5a2   :  { %1585 = vmax.xlane.f32.xlu1 %v1584_v33 }
 0x62b   :  { %v1392_v34 = vpop.xlane.xlu1 %1391 }
 0x62c   :  { %6374 = vrcp.f32 %v1392_v34 }
 0x62d   :  { %6376 = vrcp.f32 %v1492_v35  ;;  %v7228_v35 = vld [vmem:[%s8357_s0 + $0x80] sm:$0xff]  }
 0x62f   :  { %v1586_v36 = vpop.xlane.xlu1 %1585 }
 0x630   :  { %v1587_v37 = vsub.f32 %v1583_v32, %v1586_v36 }
 0x632   :  { %v1588_v38 = vmul.f32 1.442695, %v1587_v37  ;;  %v7233_v37 = vld [vmem:[%s8357_s0 + $0xc8] sm:$0xff]  }
 0x634   :  { %6378 = vpow2.f32 %v1588_v38  ;;  %v7240_v38 = vld [vmem:[%s8357_s0 + $0x88] sm:$0xff]  }
 0x636   :  { %v6375_v39 = vpop.eup %6374 }
 0x637   :  { %v1394_v17 = vmul.f32 %v6375_v39, %v6373_v30  ;;  %v6377_v41 = vpop.eup %6376  ;;  %v7214_v30 = vld [vmem:[%s8357_s0 + $0x38] sm:$0xff]   ;;  %v7246_v39 = vld [vmem:[%s8357_s0 + $0xd0] sm:$0xff]  }
 0x638   :  { %v1494_v43 = vmul.f32 %v6377_v41, %v6371_v46  ;;  %v7125_v46 = vld [vmem:[%s8357_s0 + $0x40] sm:$0xff]   ;;  %v7264_v41 = vld [vmem:[%s8357_s0 + $0x98] sm:$0xff]  }
 0x639   :  { %v1395_v40 = vpack.c.bf16 %v1394_v17, %v1394_v17  ;;  %5524 = vmatprep.subr.bf16.mxu0 %v7125_v46  ;;  %v7252_v17 = vld [vmem:[%s8357_s0 + $0x90] sm:$0xff]  }
 0x63a   :  { %v1495_v55 = vpack.c.bf16 %v1494_v43, %v1494_v43  ;;  %5525 = vmatpush3.bf16.msra.mxu0 %v7130_v4  ;;  %v7276_v43 = vld [vmem:[%s8357_s0 + $0xa0] sm:$0xff]  }
 0x63b   :  { %5836 = vmatmul.mubr.msk.bf16.vlgmr.msra.gmra.mrb[28].mxu1 %vm1282_vm3, %v1395_v40  ;;  %5526 = vmatprep.subr.bf16.mxu0 %v7136_v5  ;;  %v7258_v40 = vld [vmem:[%s8357_s0 + $0xd8] sm:$0xff]  }
 0x63c   :  { %5846 = vmatpush3.bf16.msra.mxu1 %v1500_v42  ;;  %5847 = vmatprep.mubr.msk.bf16.mxu1 %vm6443_vm0, %v6442_v0  ;;  %v7270_v42 = vld [vmem:[%s8357_s0 + $0xe0] sm:$0xff]  }
 0x63d   :  { %5857 = vmatprep.subr.bf16.mxu1 %v6442_v0 }
 0x63e   :  { %v6379_v44 = vpop.eup %6378  ;;  %5527 = vmatpush3.bf16.msra.mxu0 %v7142_v7 }
 0x63f   :  { %v1590_v45 = vsel %vm1282_vm3, %v6379_v44, 0.0  ;;  %5528 = vmatprep.subr.bf16.mxu0 %v7148_v9 }
 0x640   :  { %1591 = vadd.xlane.f32.xlu1 %v1590_v45  ;;  %v7288_v45 = vld [vmem:[%s8357_s0 + $0xa8] sm:$0xff]  }
 0x642   :  { %5529 = vmatpush3.bf16.msra.mxu0 %v7154_v10 }
 0x643   :  { %5848 = vmatmul.mubr.msk.bf16.vlgmr.msra.gmra.mrb[32].mxu1 %vm1282_vm3, %v1495_v55  ;;  %5530 = vmatprep.subr.bf16.mxu0 %v7160_v11  ;;  %v7294_v55 = vld [vmem:[%s8357_s0 + $0xf0] sm:$0xff]  }
 0x644   :  { %5858 = vmatpush3.bf16.msra.mxu1 %v1600_v56  ;;  %5859 = vmatprep.mubr.msk.bf16.mxu1 %vm6443_vm0, %v6442_v0  ;;  %v7300_v56 = vld [vmem:[%s8357_s0 + $0xb0] sm:$0xff]  }
 0x645   :  { %5546 = vmatprep.subr.bf16.mxu1 %v7222_v31 }
 0x646   :  { %5531 = vmatpush3.bf16.msra.mxu0 %v7166_v12 }
 0x647   :  { %5532 = vmatprep.subr.bf16.mxu0 %v7172_v13 }
 0x64a   :  { %5533 = vmatpush3.bf16.msra.mxu0 %v7177_v14 }
 0x64b   :  { %5534 = vmatprep.subr.bf16.mxu0 %v7183_v15 }
 0x64e   :  { %5535 = vmatpush3.bf16.msra.mxu0 %v7189_v16 }
 0x64f   :  { %5536 = vmatprep.subr.bf16.mxu0 %v7194_v20 }
 0x652   :  { %5537 = vmatpush3.bf16.msra.mxu0 %v7201_v28 }
 0x653   :  { %5538 = vmatprep.subr.bf16.mxu0 %v7206_v29 }
 0x656   :  { %5539 = vmatpush3.bf16.msra.mxu0 %v7214_v30 }
 0x657   :  { %5863 = vmatprep.subr.bf16.mxu0 %v6442_v0 }
 0x6cd   :  { %v1592_v32 = vpop.xlane.xlu1 %1591 }
 0x6ce   :  { %6380 = vrcp.f32 %v1592_v32  ;;  %v7306_v32 = vld [vmem:[%s8357_s0 + $0xf8] sm:$0xff]  }
 0x6d8   :  { %v6381_v33 = vpop.eup %6380 }
 0x6d9   :  { %v1594_v34 = vmul.f32 %v6381_v33, %v6379_v44  ;;  %v7282_v44 = vld [vmem:[%s8357_s0 + $0xe8] sm:$0xff]  }
 0x6db   :  { %v1595_v36 = vpack.c.bf16 %v1594_v34, %v1594_v34 }
 0x6dd   :  { %5860 = vmatmul.mubr.msk.bf16.vlgmr.msra.gmra.mrb[36].mxu1 %vm1282_vm3, %v1595_v36 }
 0x6de   :  { %5547 = vmatpush3.bf16.msra.mxu1 %v7228_v35 }
 0x6df   :  { %5548 = vmatprep.subr.bf16.mxu1 %v7233_v37 }
 0x6e2   :  { %5549 = vmatpush3.bf16.msra.mxu1 %v7240_v38 }
 0x6e3   :  { %5550 = vmatprep.subr.bf16.mxu1 %v7246_v39 }
 0x6e6   :  { %5551 = vmatpush3.bf16.msra.mxu1 %v7252_v17 }
 0x6e7   :  { %5552 = vmatprep.subr.bf16.mxu1 %v7258_v40 }
 0x6ea   :  { %5553 = vmatpush3.bf16.msra.mxu1 %v7264_v41 }
 0x6eb   :  { %5554 = vmatprep.subr.bf16.mxu1 %v7270_v42 }
 0x6ee   :  { %5555 = vmatpush3.bf16.msra.mxu1 %v7276_v43 }
 0x6ef   :  { %5556 = vmatprep.subr.bf16.mxu1 %v7282_v44 }
 0x6f2   :  { %5557 = vmatpush3.bf16.msra.mxu1 %v7288_v45 }
 0x6f3   :  { %5558 = vmatprep.subr.bf16.mxu1 %v7294_v55 }
 0x6f6   :  { %5559 = vmatpush3.bf16.msra.mxu1 %v7300_v56 }
 0x6f7   :  { %5560 = vmatprep.subr.bf16.mxu1 %v7306_v32 }
 0x70e   :  { %v1436_v33 = vpop.f32.mrb[28].mxu1 }
 0x70f   :  { %v1643_v34 = vpack.c.bf16 %v1436_v33, %v1436_v33  ;;  %v5837_v36 = vpop.f32.mrb[29].mxu1  ;;  %v1990_v33 = vrot.slane %v7018_v47, 4  ;;  %v7334_v47 = vld [vmem:[%s8357_s0 + $0xb8] sm:$0xff]  }
 0x710   :  { %v1439_v54 = vpop.f32.mrb[30].mxu1  ;;  %5561 = vmatpush3.bf16.msra.mxu1 %v7334_v47 }
 0x711   :  { %v5838_v52 = vpop.f32.mrb[31].mxu1  ;;  %1941 = vmatprep.mubr.bf16.mxu0 %v1643_v34  ;;  %5869 = vmatprep.subr.bf16.mxu1 %v6442_v0 }
 0x712   :  { %1942 = vmatmul.mubr.bf16.vlgmr.msra.gmra.mrb[24].mxu0 %v1642_v51  ;;  %v2098_v51 = vrot.slane %v7022_v49, 4  ;;  %v2209_v52 = vrot.slane %v7040_v19, 4  ;;  %v2314_v49 = vrot.slane %v7024_v50, 4 }
 0x713   :  { %5864 = vmatpush3.bf16.xpose.msra.mxu0 %v1993_v53  ;;  %5865 = vmatprep.mubr.msk.bf16.mxu0 %vm6443_vm0, %v6442_v0 }
 0x714   :  { %5875 = vmatprep.subr.bf16.mxu0 %v6442_v0 }
 0x716   :  { %v1536_v3 = vpop.f32.mrb[32].mxu1 }
 0x717   :  { %v5849_v57 = vpop.f32.mrb[33].mxu1  ;;  %v1644_v18 = vpack.c.bf16 %v1536_v3, %v1536_v3 }
 0x718   :  { %v1539_v36 = vpop.f32.mrb[34].mxu1  ;;  %v2206_v57 = vrot.slane %v7020_v48, 4  ;;  %v2050_v48 = vrot.slane %v7065_v58, 4 }
 0x719   :  { %v5850_v1 = vpop.f32.mrb[35].mxu1 }
 0x71a   :  { %5866 = vmatmul.mubr.bf16.vlgmr.msra.gmra.mrb[28].mxu0 %v1990_v33 }
 0x71b   :  { %5876 = vmatpush3.bf16.xpose.msra.mxu0 %v2101_v2  ;;  %5877 = vmatprep.mubr.msk.bf16.mxu0 %vm6443_vm0, %v6442_v0  ;;  %v2317_v2 = vrot.slane %v7044_v6, 4  ;;  %v2055_v6 = vsel %vm1298_vm1, %v2050_v48, 0 }
 0x71c   :  { %5887 = vmatprep.subr.bf16.mxu0 %v6442_v0 }
 0x722   :  { %5878 = vmatmul.mubr.bf16.vlgmr.msra.gmra.mrb[32].mxu0 %v2098_v51 }
 0x723   :  { %5888 = vmatpush3.bf16.xpose.msra.mxu0 %v2209_v52  ;;  %5889 = vmatprep.mubr.msk.bf16.mxu0 %vm6443_vm0, %v6442_v0 }
 0x724   :  { %5899 = vmatprep.subr.bf16.mxu0 %v6442_v0 }
 0x72a   :  { %5890 = vmatmul.mubr.bf16.vlgmr.msra.gmra.mrb[36].mxu0 %v2206_v57 }
 0x72b   :  { %5900 = vmatpush3.bf16.xpose.msra.mxu0 %v2317_v2  ;;  %5901 = vmatprep.mubr.msk.bf16.mxu0 %vm6443_vm0, %v6442_v0 }
 0x72c   :  { %5584 = vmatprep.subr.bf16.mxu0 %v7125_v46 }
 0x732   :  { %5902 = vmatmul.mubr.bf16.vlgmr.msra.gmra.mrb[40].mxu0 %v2314_v49 }
 0x733   :  { %5585 = vmatpush3.bf16.msra.mxu0 %v7130_v4 }
 0x734   :  { %5586 = vmatprep.subr.bf16.mxu0 %v7136_v5 }
 0x737   :  { %5587 = vmatpush3.bf16.msra.mxu0 %v7142_v7 }
 0x738   :  { %5588 = vmatprep.subr.bf16.mxu0 %v7148_v9 }
 0x73b   :  { %5589 = vmatpush3.bf16.msra.mxu0 %v7154_v10 }
 0x73c   :  { %5590 = vmatprep.subr.bf16.mxu0 %v7160_v11 }
 0x73f   :  { %5591 = vmatpush3.bf16.msra.mxu0 %v7166_v12 }
 0x740   :  { %5592 = vmatprep.subr.bf16.mxu0 %v7172_v13 }
 0x743   :  { %5593 = vmatpush3.bf16.msra.mxu0 %v7177_v14 }
 0x744   :  { %5594 = vmatprep.subr.bf16.mxu0 %v7183_v15 }
 0x747   :  { %5595 = vmatpush3.bf16.msra.mxu0 %v7189_v16 }
 0x748   :  { %5596 = vmatprep.subr.bf16.mxu0 %v7194_v20 }
 0x74b   :  { %5597 = vmatpush3.bf16.msra.mxu0 %v7201_v28 }
 0x74c   :  { %5598 = vmatprep.subr.bf16.mxu0 %v7206_v29 }
 0x74f   :  { %5599 = vmatpush3.bf16.msra.mxu0 %v7214_v30 }
 0x7b0   :  { %v1636_v50 = vpop.f32.mrb[36].mxu1 }
 0x7b1   :  { %v1645_v53 = vpack.c.bf16 %v1636_v50, %v1636_v50  ;;  %v5861_v54 = vpop.f32.mrb[37].mxu1 }
 0x7b2   :  { %v1639_v19 = vpop.f32.mrb[38].mxu1 }
 0x7b3   :  { %v5862_v27 = vpop.f32.mrb[39].mxu1  ;;  %1981 = vmatprep.mubr.bf16.mxu1 %v1645_v53 }
 0x7b4   :  { %1982 = vmatmul.mubr.bf16.vlgmr.msra.gmra.mrb[40].mxu1 %v1644_v18 }
 0x7b5   :  { %5870 = vmatpush3.bf16.msra.mxu1 %v2055_v6  ;;  %5871 = vmatprep.mubr.msk.bf16.mxu1 %vm6443_vm0, %v6442_v0 }
 0x7b6   :  { %5881 = vmatprep.subr.bf16.mxu1 %v6442_v0 }
 0x7e5   :  { %v5540_v46 = vpop.f32.mrb[24].mxu0 }
 0x7e6   :  { %v5541_v4 = vpop.f32.mrb[25].mxu0 }
 0x7e7   :  { %v5542_v5 = vadd.f32 %v5541_v4, %v5540_v46  ;;  %v5543_v58 = vpop.f32.mrb[26].mxu0  ;;  %v7374_v4 = vld [vmem:[%s8358_s7] ss:$0 sm:$0xff] }
 0x7e8   :  { %v5544_v7 = vpop.f32.mrb[27].mxu0 }
 0x7ed   :  { %v2029_v9 = vpop.f32.mrb[28].mxu0 }
 0x7ee   :  { %v2035_v10 = vmul.f32 0.25, %v2029_v9  ;;  %v5867_v3 = vpop.f32.mrb[29].mxu0 }
 0x7ef   :  { %v2032_v11 = vpop.f32.mrb[30].mxu0  ;;  %v1944_v3 = vadd.f32 %v5542_v5, %v7374_v4 }
 0x7f0   :  { %v5868_v12 = vpop.f32.mrb[31].mxu0  ;;  %v2036_v13 = vsel %vm7078_vm2, %v2035_v10, -1e+30 }
 0x7f1   :  { %v2037_v14 = vsel %vm1282_vm3, %v2036_v13, -inf }
 0x7f2   :  { %2038 = vmax.xlane.f32.xlu0 %v2037_v14 }
 0x7f5   :  { %v2137_v15 = vpop.f32.mrb[32].mxu0 }
 0x7f6   :  { %v2143_v16 = vmul.f32 0.25, %v2137_v15  ;;  %v5879_v20 = vpop.f32.mrb[33].mxu0 }
 0x7f7   :  { %v2140_v28 = vpop.f32.mrb[34].mxu0 }
 0x7f8   :  { %v5880_v29 = vpop.f32.mrb[35].mxu0  ;;  %v2144_v30 = vsel %vm7078_vm2, %v2143_v16, -1e+30 }
 0x7f9   :  { %v2145_v34 = vsel %vm1282_vm3, %v2144_v30, -inf }
 0x7fa   :  { %2146 = vmax.xlane.f32.xlu1 %v2145_v34 }
 0x7fd   :  { %v2245_v33 = vpop.f32.mrb[36].mxu0 }
 0x7fe   :  { %v2251_v36 = vmul.f32 0.25, %v2245_v33  ;;  %v5891_v1 = vpop.f32.mrb[37].mxu0 }
 0x7ff   :  { %v2248_v51 = vpop.f32.mrb[38].mxu0 }
 0x800   :  { %v5892_v52 = vpop.f32.mrb[39].mxu0  ;;  %v2252_v57 = vsel %vm7078_vm2, %v2251_v36, -1e+30 }
 0x801   :  { %v2253_v2 = vsel %vm1282_vm3, %v2252_v57, -inf  ;;  %v8359_v52 = vmax.f32 %v6777_v60, 0.0 }
 0x802   :  { %2254 = vmax.xlane.f32.xlu0 %v2253_v2 }
 0x805   :  { %v2353_v49 = vpop.f32.mrb[40].mxu0 }
 0x806   :  { %v2359_v48 = vmul.f32 0.25, %v2353_v49  ;;  %v5903_v50 = vpop.f32.mrb[41].mxu0 }
 0x807   :  { %v2356_v53 = vpop.f32.mrb[42].mxu0 }
 0x808   :  { %v5904_v54 = vpop.f32.mrb[43].mxu0  ;;  %v2360_v18 = vsel %vm7078_vm2, %v2359_v48, -1e+30 }
 0x809   :  { %v2361_v19 = vsel %vm1282_vm3, %v2360_v18, -inf }
 0x80a   :  { %2362 = vmax.xlane.f32.xlu1 %v2361_v19 }
 0x87f   :  { %v2039_v27 = vpop.xlane.xlu0 %2038 }
 0x880   :  { %v2040_v6 = vsub.f32 %v2036_v13, %v2039_v27 }
 0x882   :  { %v2041_v46 = vmul.f32 1.442695, %v2040_v6 }
 0x884   :  { %6382 = vpow2.f32 %v2041_v46 }
 0x887   :  { %v2147_v58 = vpop.xlane.xlu1 %2146  ;;  %v5562_v7 = vpop.f32.mrb[40].mxu1 }
 0x888   :  { %v2148_v9 = vsub.f32 %v2144_v30, %v2147_v58  ;;  %v5563_v10 = vpop.f32.mrb[41].mxu1  ;;  %v2266_v58 = vrot.slane %v7067_v59, 4 }
 0x889   :  { %v5564_v8 = vadd.f32 %v5563_v10, %v5562_v7  ;;  %v5565_v11 = vpop.f32.mrb[42].mxu1 }
 0x88a   :  { %v2149_v12 = vmul.f32 1.442695, %v2148_v9  ;;  %v5566_v14 = vpop.f32.mrb[43].mxu1  ;;  %v2271_v10 = vsel %vm1298_vm1, %v2266_v58, 0  ;;  %v6271_v58 = vld [vmem:[%s8361_s12 + $0x28] ss:$16 sps:$4 sm:$0xff]  }
 0x88b   :  { %v1984_v15 = vadd.f32 %v5564_v8, %v1944_v3  ;;  %v2374_v8 = vrot.slane %v7071_v62, 4 }
 0x88c   :  { %6384 = vpow2.f32 %v2149_v12 }
 0x88d   :  { %v7382_v2 = vadd.f32 %v1984_v15, %v8359_v52  ;;  %v2379_v59 = vsel %vm1298_vm1, %v2374_v8, 0  ;;  %v6285_v8 = vld [vmem:[%s8361_s12 + $0x6c] ss:$16 sps:$4 sm:$0xff]  }
 0x88e   :  { %v6383_v13 = vpop.eup %6382 }
 0x88f   :  { %v2255_v16 = vpop.xlane.xlu0 %2254  ;;  %v2043_v20 = vsel %vm1282_vm3, %v6383_v13, 0.0  ;;  %v2513_v49 = vmul.f32 %v7382_v2, %v7382_v2 }
 0x890   :  { %v2256_v28 = vsub.f32 %v2252_v57, %v2255_v16  ;;  %2044 = vadd.xlane.f32.xlu0 %v2043_v20 }
 0x892   :  { %v2257_v29 = vmul.f32 1.442695, %v2256_v28 }
 0x894   :  { %6386 = vpow2.f32 %v2257_v29 }
 0x896   :  { %v6385_v34 = vpop.eup %6384 }
 0x897   :  { %v2363_v33 = vpop.xlane.xlu1 %2362  ;;  %v2151_v30 = vsel %vm1282_vm3, %v6385_v34, 0.0 }
 0x898   :  { %v2364_v36 = vsub.f32 %v2360_v18, %v2363_v33  ;;  %2152 = vadd.xlane.f32.xlu1 %v2151_v30  ;;  %v2158_v18 = vrot.slane %v7069_v61, 4  ;;  %v6264_v33 = vld [vmem:[%s8361_s12 + $0x4] ss:$16 sps:$4 sm:$0xff]   ;;  %v6265_v30 = vld [vmem:[%s8361_s12 + $0x8] ss:$16 sps:$4 sm:$0xff]  }
 0x899   :  { %2768 = vmatprep.subr.bf16.mxu0 %v6264_v33 }
 0x89a   :  { %v2365_v5 = vmul.f32 1.442695, %v2364_v36  ;;  %v2163_v6 = vsel %vm1298_vm1, %v2158_v18, 0  ;;  %v6267_v36 = vld [vmem:[%s8361_s12 + $0xc] ss:$16 sps:$4 sm:$0xff]  }
 0x89c   :  { %6388 = vpow2.f32 %v2365_v5 }
 0x89e   :  { %v6387_v1 = vpop.eup %6386 }
 0x89f   :  { %v2259_v51 = vsel %vm1282_vm3, %v6387_v1, 0.0 }
 0x8a0   :  { %2260 = vadd.xlane.f32.xlu0 %v2259_v51 }
 0x8a4   :  { %2507 = vadd.xlane.f32.xlu0 %v7382_v2 }
 0x8a6   :  { %v6389_v57 = vpop.eup %6388 }
 0x8a7   :  { %v2367_v48 = vsel %vm1282_vm3, %v6389_v57, 0.0 }
 0x8a8   :  { %2368 = vadd.xlane.f32.xlu1 %v2367_v48  ;;  %2515 = vadd.xlane.f32.xlu0 %v2513_v49 }
 0x91d   :  { %v2045_v50 = vpop.xlane.xlu0 %2044 }
 0x91e   :  { %6390 = vrcp.f32 %v2045_v50 }
 0x925   :  { %v2153_v53 = vpop.xlane.xlu1 %2152 }
 0x926   :  { %6392 = vrcp.f32 %v2153_v53 }
 0x928   :  { %v6391_v54 = vpop.eup %6390 }
 0x929   :  { %v2047_v60 = vmul.f32 %v6391_v54, %v6383_v13 }
 0x92b   :  { %v2048_v19 = vpack.c.bf16 %v2047_v60, %v2047_v60 }
 0x92d   :  { %v2261_v27 = vpop.xlane.xlu0 %2260  ;;  %5872 = vmatmul.mubr.msk.bf16.vlgmr.msra.gmra.mrb[44].mxu1 %vm1282_vm3, %v2048_v19  ;;  %v8362_v19 = vmax.f32 %v6779_v63, 0.0  ;;  %v6268_v63 = vld [vmem:[%s8361_s12 + $0x20] ss:$16 sps:$4 sm:$0xff]  }
 0x92e   :  { %6394 = vrcp.f32 %v2261_v27  ;;  %5882 = vmatpush3.bf16.msra.mxu1 %v2163_v6  ;;  %5883 = vmatprep.mubr.msk.bf16.mxu1 %vm6443_vm0, %v6442_v0 }
 0x92f   :  { %5893 = vmatprep.subr.bf16.mxu1 %v6442_v0 }
 0x930   :  { %v6393_v46 = vpop.eup %6392 }
 0x931   :  { %v2155_v7 = vmul.f32 %v6393_v46, %v6385_v34  ;;  %v6262_v34 = vld [vmem:[%s8361_s12] ss:$16 sps:$4 sm:$0xff]   ;;  %v6270_v46 = vld [vmem:[%s8361_s12 + $0x24] ss:$16 sps:$4 sm:$0xff]  }
 0x933   :  { %v2156_v9 = vpack.c.bf16 %v2155_v7, %v2155_v7  ;;  %v6276_v7 = vld [vmem:[%s8361_s12 + $0x44] ss:$16 sps:$4 sm:$0xff]  }
 0x935   :  { %v2369_v61 = vpop.xlane.xlu1 %2368  ;;  %5884 = vmatmul.mubr.msk.bf16.vlgmr.msra.gmra.mrb[48].mxu1 %vm1282_vm3, %v2156_v9  ;;  %v6279_v9 = vld [vmem:[%s8361_s12 + $0x4c] ss:$16 sps:$4 sm:$0xff]  }
 0x936   :  { %6396 = vrcp.f32 %v2369_v61  ;;  %5894 = vmatpush3.bf16.msra.mxu1 %v2271_v10  ;;  %5895 = vmatprep.mubr.msk.bf16.mxu1 %vm6443_vm0, %v6442_v0  ;;  %v6274_v61 = vld [vmem:[%s8361_s12 + $0x40] ss:$16 sps:$4 sm:$0xff]   ;;  %v6277_v10 = vld [vmem:[%s8361_s12 + $0x48] ss:$16 sps:$4 sm:$0xff]  }
 0x937   :  { %5905 = vmatprep.subr.bf16.mxu1 %v6442_v0 }
 0x938   :  { %v6395_v3 = vpop.eup %6394 }
 0x939   :  { %v2263_v11 = vmul.f32 %v6395_v3, %v6387_v1  ;;  %v6282_v3 = vld [vmem:[%s8361_s12 + $0x64] ss:$16 sps:$4 sm:$0xff]  }
 0x93b   :  { %v2264_v12 = vpack.c.bf16 %v2263_v11, %v2263_v11  ;;  %v6280_v11 = vld [vmem:[%s8361_s12 + $0x60] ss:$16 sps:$4 sm:$0xff]  }
 0x93d   :  { %5896 = vmatmul.mubr.msk.bf16.vlgmr.msra.gmra.mrb[52].mxu1 %vm1282_vm3, %v2264_v12  ;;  %v6283_v12 = vld [vmem:[%s8361_s12 + $0x68] ss:$16 sps:$4 sm:$0xff]  }
 0x93e   :  { %5906 = vmatpush3.bf16.msra.mxu1 %v2379_v59  ;;  %5907 = vmatprep.mubr.msk.bf16.mxu1 %vm6443_vm0, %v6442_v0  ;;  %v6286_v59 = vld [vmem:[%s8361_s12 + $0x80] ss:$16 sps:$4 sm:$0xff]  }
 0x93f   :  { %5606 = vmatprep.subr.bf16.mxu1 %v7222_v31 }
 0x940   :  { %v6397_v14 = vpop.eup %6396 }
 0x941   :  { %v2371_v15 = vmul.f32 %v6397_v14, %v6389_v57  ;;  %v6288_v14 = vld [vmem:[%s8361_s12 + $0x84] ss:$16 sps:$4 sm:$0xff]  }
 0x943   :  { %v2372_v13 = vpack.c.bf16 %v2371_v15, %v2371_v15  ;;  %v6289_v15 = vld [vmem:[%s8361_s12 + $0x88] ss:$16 sps:$4 sm:$0xff]  }
 0x945   :  { %5908 = vmatmul.mubr.msk.bf16.vlgmr.msra.gmra.mrb[56].mxu1 %vm1282_vm3, %v2372_v13  ;;  %v6291_v13 = vld [vmem:[%s8361_s12 + $0x8c] ss:$16 sps:$4 sm:$0xff]  }
 0x946   :  { %5607 = vmatpush3.bf16.msra.mxu1 %v7228_v35 }
 0x947   :  { %5608 = vmatprep.subr.bf16.mxu1 %v7233_v37 }
 0x94a   :  { %5609 = vmatpush3.bf16.msra.mxu1 %v7240_v38 }
 0x94b   :  { %5610 = vmatprep.subr.bf16.mxu1 %v7246_v39 }
 0x94e   :  { %5611 = vmatpush3.bf16.msra.mxu1 %v7252_v17 }
 0x94f   :  { %5612 = vmatprep.subr.bf16.mxu1 %v7258_v40 }
 0x952   :  { %5613 = vmatpush3.bf16.msra.mxu1 %v7264_v41 }
 0x953   :  { %5614 = vmatprep.subr.bf16.mxu1 %v7270_v42 }
 0x956   :  { %5615 = vmatpush3.bf16.msra.mxu1 %v7276_v43  ;;  %v8360_v43 = vmov 0  }
 0x957   :  { %5616 = vmatprep.subr.bf16.mxu1 %v7282_v44 }
 0x95a   :  { %5617 = vmatpush3.bf16.msra.mxu1 %v7288_v45 }
 0x95b   :  { %5618 = vmatprep.subr.bf16.mxu1 %v7294_v55 }
 0x95e   :  { %5619 = vmatpush3.bf16.msra.mxu1 %v7300_v56 }
 0x95f   :  { %5620 = vmatprep.subr.bf16.mxu1 %v7306_v32 }
 0x962   :  { %5621 = vmatpush3.bf16.msra.mxu1 %v7334_v47 }
 0x963   :  { %2811 = vmatprep.subr.bf16.mxu1 %v6267_v36 }
 0xa00   :  { %v2091_v62 = vpop.f32.mrb[44].mxu1 }
 0xa01   :  { %v5873_v31 = vpop.f32.mrb[45].mxu1  ;;  %v2421_v40 = vpack.c.bf16 %v2091_v62, %v2091_v62  ;;  %v6294_v62 = vld [vmem:[%s8361_s12 + $0xa4] ss:$16 sps:$4 sm:$0xff]  }
 0xa02   :  { %v2094_v35 = vpop.f32.mrb[46].mxu1  ;;  %v6297_v31 = vld [vmem:[%s8361_s12 + $0xac] ss:$16 sps:$4 sm:$0xff]  }
 0xa03   :  { %v5874_v37 = vpop.f32.mrb[47].mxu1  ;;  %v6292_v35 = vld [vmem:[%s8361_s12 + $0xa0] ss:$16 sps:$4 sm:$0xff]  }
 0xa04   :  { %v6295_v37 = vld [vmem:[%s8361_s12 + $0xa8] ss:$16 sps:$4 sm:$0xff]  }
 0xa08   :  { %v2199_v38 = vpop.f32.mrb[48].mxu1 }
 0xa09   :  { %v2422_v39 = vpack.c.bf16 %v2199_v38, %v2199_v38  ;;  %v5885_v17 = vpop.f32.mrb[49].mxu1  ;;  %v6300_v38 = vld [vmem:[%s8361_s12 + $0xc4] ss:$16 sps:$4 sm:$0xff]  }
 0xa0a   :  { %v2202_v41 = vpop.f32.mrb[50].mxu1  ;;  %v7513_v17 = vld [vmem:[%s8363_s5] sm:$0xff] }
 0xa0b   :  { %v5886_v42 = vpop.f32.mrb[51].mxu1  ;;  %2457 = vmatprep.mubr.bf16.mxu0 %v2422_v39  ;;  %v6303_v39 = vld [vmem:[%s8361_s12 + $0xcc] ss:$16 sps:$4 sm:$0xff]  }
 0xa0c   :  { %2458 = vmatmul.mubr.bf16.vlgmr.msra.gmra.mrb[44].mxu0 %v2421_v40  ;;  %v7518_v40 = vld [vmem:[%s8363_s5 + $0x20] sm:$0xff]  ;;  %v7525_v42 = vld [vmem:[%s8363_s5 + $0x8] sm:$0xff] }
 0xa0d   :  { %2800 = vmatprep.mubr.bf16.mxu0 %v8360_v43  ;;  %2769 = vmatpush1.bf16.msra.mxu0 %v6262_v34  ;;  %v5354_v41 = vcombine.low %v7513_v17, %v7518_v40  ;;  %v2508_v34 = vpop.xlane.xlu0 %2507 }
 0xa0e   :  { %2770 = vmatprep.subr.bf16.mxu0 %v6270_v46 }
 0xa10   :  { %v2307_v44 = vpop.f32.mrb[52].mxu1 }
 0xa11   :  { %v5897_v45 = vpop.f32.mrb[53].mxu1  ;;  %v2423_v20 = vpack.c.bf16 %v2307_v44, %v2307_v44  ;;  %2771 = vmatpush1.bf16.msra.mxu0 %v6268_v63  ;;  %v7530_v44 = vld [vmem:[%s8363_s5 + $0x28] sm:$0xff]  ;;  %v2516_v33 = vpop.xlane.xlu0 %2515 }
 0xa12   :  { %v2310_v55 = vpop.f32.mrb[54].mxu1  ;;  %2772 = vmatprep.subr.bf16.mxu0 %v6276_v7  ;;  %v5356_v45 = vcombine.low %v7525_v42, %v7530_v44  ;;  %v2519_v36 = vmul.f32 0.015625, %v2516_v33 }
 0xa13   :  { %v5898_v56 = vpop.f32.mrb[55].mxu1  ;;  %v6298_v55 = vld [vmem:[%s8361_s12 + $0xc0] ss:$16 sps:$4 sm:$0xff]  }
 0xa14   :  { %v6301_v56 = vld [vmem:[%s8361_s12 + $0xc8] ss:$16 sps:$4 sm:$0xff]  }
 0xa15   :  { %2773 = vmatpush1.bf16.msra.mxu0 %v6274_v61  ;;  %v5321_v61 = vld [vmem:[%s8301_s17] ss:$0 sm:$0xff] }
 0xa16   :  { %2774 = vmatprep.subr.bf16.mxu0 %v6282_v3  ;;  %v2867_v3 = vld [vmem:[%s8363_s5 + $0x40] sm:$0xff] }
 0xa18   :  { %v2415_v32 = vpop.f32.mrb[56].mxu1 }
 0xa19   :  { %v2424_v47 = vpack.c.bf16 %v2415_v32, %v2415_v32  ;;  %v5909_v16 = vpop.f32.mrb[57].mxu1  ;;  %2775 = vmatpush1.bf16.msra.mxu0 %v6280_v11  ;;  %v6306_v32 = vld [vmem:[%s8361_s12 + $0xe4] ss:$16 sps:$4 sm:$0xff]  }
 0xa1a   :  { %v2418_v28 = vpop.f32.mrb[58].mxu1  ;;  %2776 = vmatprep.subr.bf16.mxu0 %v6288_v14  ;;  %v6304_v16 = vld [vmem:[%s8361_s12 + $0xe0] ss:$16 sps:$4 sm:$0xff]  }
 0xa1b   :  { %v5910_v29 = vpop.f32.mrb[59].mxu1  ;;  %2497 = vmatprep.mubr.bf16.mxu1 %v2424_v47  ;;  %v6309_v47 = vld [vmem:[%s8361_s12 + $0xec] ss:$16 sps:$4 sm:$0xff]   ;;  %v5355_v28 = vcombine.high %v7513_v17, %v7518_v40 }
 0xa1c   :  { %2498 = vmatmul.mubr.bf16.vlgmr.msra.gmra.mrb[60].mxu1 %v2423_v20  ;;  %v6307_v20 = vld [vmem:[%s8361_s12 + $0xe8] ss:$16 sps:$4 sm:$0xff]   ;;  %v5357_v29 = vcombine.high %v7525_v42, %v7530_v44 }
 0xa1d   :  { %2843 = vmatprep.mubr.bf16.mxu1 %v8360_v43  ;;  %2812 = vmatpush1.bf16.msra.mxu1 %v6265_v30  ;;  %v2511_v30 = vmul.f32 0.015625, %v2508_v34  ;;  %v2884_v17 = vld [vmem:[%s8363_s5 + $0xc8] sm:$0xff] }
 0xa1e   :  { %2777 = vmatpush1.bf16.msra.mxu0 %v6286_v59  ;;  %v2888_v40 = vld [vmem:[%s8363_s5 + $0xe8] sm:$0xff] }
 0xa1f   :  { %2778 = vmatprep.subr.bf16.mxu0 %v6294_v62  ;;  %v2879_v62 = vld [vmem:[%s8363_s5 + $0xa0] sm:$0xff]  ;;  %v5380_v34 = vcombine.low %v2884_v17, %v2888_v40 }
 0xa22   :  { %2779 = vmatpush1.bf16.msra.mxu0 %v6292_v35  ;;  %v2880_v35 = vld [vmem:[%s8363_s5 + $0xa8] sm:$0xff] }
 0xa23   :  { %2780 = vmatprep.subr.bf16.mxu0 %v6300_v38 }
 0xa26   :  { %2781 = vmatpush1.bf16.msra.mxu0 %v6298_v55 }
 0xa27   :  { %2782 = vmatprep.subr.bf16.mxu0 %v6306_v32  ;;  %v2887_v32 = vld [vmem:[%s8363_s5 + $0xe0] sm:$0xff] }
 0xa2a   :  { %2783 = vmatpush1.bf16.msra.mxu0 %v6304_v16  ;;  %v2895_v16 = vld [vmem:[%s8363_s5 + $0x120] sm:$0xff] }
 0xa2b   :  { %3285 = vmatprep.subr.bf16.mxu0 %v5355_v28  ;;  %v2896_v28 = vld [vmem:[%s8363_s5 + $0x128] sm:$0xff] }
 0xadf   :  { %v5600_v5 = vpop.f32.mrb[44].mxu0 }
 0xae0   :  { %v5601_v1 = vpop.f32.mrb[45].mxu0 }
 0xae1   :  { %v5602_v51 = vadd.f32 %v5601_v1, %v5600_v5  ;;  %v5603_v52 = vpop.f32.mrb[46].mxu0  ;;  %v2521_v5 = vmul.f32 %v2511_v30, %v2511_v30 }
 0xae2   :  { %v5604_v57 = vpop.f32.mrb[47].mxu0 }
 0xae3   :  { %v2460_v50 = vadd.f32 %v5602_v51, %v7374_v4  ;;  %v6273_v4 = vld [vmem:[%s8361_s12 + $0x2c] ss:$16 sps:$4 sm:$0xff]   ;;  %v2523_v1 = vsub.f32 %v2519_v36, %v2521_v5  ;;  %v2899_v36 = vld [vmem:[%s8363_s5 + $0x140] sm:$0xff] }
 0xae4   :  { %2813 = vmatprep.subr.bf16.mxu1 %v6273_v4  ;;  %v5320_v4 = vld [vmem:[%s8364_s6] ss:$0 sm:$0xff] }
 0xae5   :  { %2814 = vmatpush1.bf16.msra.mxu1 %v6271_v58  ;;  %v2525_v51 = vmax.f32 %v2523_v1, 0.0  ;;  %v2903_v5 = vld [vmem:[%s8363_s5 + $0x160] sm:$0xff]  ;;  %v2900_v1 = vld [vmem:[%s8363_s5 + $0x148] sm:$0xff] }
 0xae6   :  { %2815 = vmatprep.subr.bf16.mxu1 %v6279_v9 }
 0xae9   :  { %2816 = vmatpush1.bf16.msra.mxu1 %v6277_v10 }
 0xaea   :  { %2817 = vmatprep.subr.bf16.mxu1 %v6285_v8  ;;  %v2872_v8 = vld [vmem:[%s8363_s5 + $0x68] sm:$0xff] }
 0xaed   :  { %2818 = vmatpush1.bf16.msra.mxu1 %v6283_v12 }
 0xaee   :  { %2819 = vmatprep.subr.bf16.mxu1 %v6291_v13  ;;  %v2875_v13 = vld [vmem:[%s8363_s5 + $0x80] sm:$0xff] }
 0xaef   :  { %v5622_v49 = vpop.f32.mrb[60].mxu1 }
 0xaf0   :  { %v5623_v48 = vpop.f32.mrb[61].mxu1 }
 0xaf1   :  { %v5624_v53 = vadd.f32 %v5623_v48, %v5622_v49  ;;  %v5625_v54 = vpop.f32.mrb[62].mxu1  ;;  %2820 = vmatpush1.bf16.msra.mxu1 %v6289_v15  ;;  %v2529_v49 = vadd.f32 1e-05, %v2525_v51  ;;  %v2904_v51 = vld [vmem:[%s8363_s5 + $0x168] sm:$0xff] }
 0xaf2   :  { %v5626_v18 = vpop.f32.mrb[63].mxu1  ;;  %2821 = vmatprep.subr.bf16.mxu1 %v6297_v31  ;;  %v2876_v31 = vld [vmem:[%s8363_s5 + $0x88] sm:$0xff] }
 0xaf3   :  { %v2500_v60 = vadd.f32 %v5624_v53, %v2460_v50  ;;  %6398 = vrsqrt.f32 %v2529_v49  ;;  %v5373_v55 = vcombine.high %v2876_v31, %v2880_v35  ;;  %v5372_v42 = vcombine.low %v2876_v31, %v2880_v35  ;;  %v2869_v31 = vld [vmem:[%s8363_s5 + $0x50] sm:$0xff] }
 0xaf4   :  { %v5395_v49 = vcombine.high %v2899_v36, %v2903_v5  ;;  %v2873_v35 = vld [vmem:[%s8363_s5 + $0x70] sm:$0xff] }
 0xaf5   :  { %v7439_v27 = vadd.f32 %v2500_v60, %v8362_v19  ;;  %2822 = vmatpush1.bf16.msra.mxu1 %v6295_v37 }
 0xaf6   :  { %2823 = vmatprep.subr.bf16.mxu1 %v6303_v39  ;;  %v5371_v39 = vcombine.high %v2875_v13, %v2879_v62 }
 0xaf7   :  { %2509 = vadd.xlane.f32.xlu1 %v7439_v27  ;;  %v2514_v6 = vmul.f32 %v7439_v27, %v7439_v27 }
 0xaf9   :  { %2824 = vmatpush1.bf16.msra.mxu1 %v6301_v56  ;;  %v2883_v56 = vld [vmem:[%s8363_s5 + $0xc0] sm:$0xff] }
 0xafa   :  { %2825 = vmatprep.subr.bf16.mxu1 %v6309_v47  ;;  %v5379_v44 = vcombine.high %v2883_v56, %v2887_v32  ;;  %v2891_v47 = vld [vmem:[%s8363_s5 + $0x100] sm:$0xff] }
 0xafb   :  { %2517 = vadd.xlane.f32.xlu1 %v2514_v6  ;;  %v2527_v6 = vsub.f32 %v7382_v2, %v2511_v30  ;;  %v2871_v2 = vld [vmem:[%s8363_s5 + $0x60] sm:$0xff]  ;;  %v5387_v33 = vcombine.high %v2891_v47, %v2895_v16 }
 0xafc   :  { %v5363_v14 = vcombine.high %v2867_v3, %v2871_v2  ;;  %v5362_v37 = vcombine.low %v2867_v3, %v2871_v2  ;;  %v2861_v2 = vld [vmem:[%s8363_s5 + $0x10] sm:$0xff] }
 0xafd   :  { %2826 = vmatpush1.bf16.msra.mxu1 %v6307_v20  ;;  %v6399_v19 = vpop.eup %6398  ;;  %v2892_v20 = vld [vmem:[%s8363_s5 + $0x108] sm:$0xff] }
 0xafe   :  { %3328 = vmatprep.subr.bf16.mxu1 %v5357_v29  ;;  %v2533_v46 = vmul.f32 %v6399_v19, %v2527_v6  ;;  %v5378_v29 = vcombine.low %v2883_v56, %v2887_v32  ;;  %v5389_v30 = vcombine.high %v2892_v20, %v2896_v28  ;;  %v5396_v19 = vcombine.low %v2900_v1, %v2904_v51 }
 0xaff   :  { %v5367_v56 = vcombine.high %v2869_v31, %v2873_v35 }
 0xb00   :  { %v2542_v9 = vmul.f32 %v5320_v4, %v2533_v46 }
 0xb02   :  { %v7576_v11 = vadd.f32 %v5321_v61, %v2542_v9 }
 0xb84   :  { %v2510_v52 = vpop.xlane.xlu1 %2509 }
 0xb85   :  { %v2512_v57 = vmul.f32 0.015625, %v2510_v52  ;;  %v5386_v52 = vcombine.low %v2891_v47, %v2895_v16 }
 0xb87   :  { %v2522_v50 = vmul.f32 %v2512_v57, %v2512_v57  ;;  %v2528_v63 = vsub.f32 %v7439_v27, %v2512_v57  ;;  %v2868_v27 = vld [vmem:[%s8363_s5 + $0x48] sm:$0xff]  ;;  %v5388_v57 = vcombine.low %v2892_v20, %v2896_v28  ;;  %v2885_v20 = vld [vmem:[%s8363_s5 + $0xd0] sm:$0xff] }
 0xb88   :  { %v2518_v48 = vpop.xlane.xlu1 %2517  ;;  %v5365_v15 = vcombine.high %v2868_v27, %v2872_v8  ;;  %v5364_v38 = vcombine.low %v2868_v27, %v2872_v8  ;;  %v2865_v27 = vld [vmem:[%s8363_s5 + $0x30] sm:$0xff]  ;;  %v2862_v8 = vld [vmem:[%s8363_s5 + $0x18] sm:$0xff] }
 0xb89   :  { %v2520_v53 = vmul.f32 0.015625, %v2518_v48  ;;  %v5397_v48 = vcombine.high %v2900_v1, %v2904_v51  ;;  %v2889_v28 = vld [vmem:[%s8363_s5 + $0xf0] sm:$0xff] }
 0xb8a   :  { %v2893_v1 = vld [vmem:[%s8363_s5 + $0x110] sm:$0xff] }
 0xb8b   :  { %v2524_v54 = vsub.f32 %v2520_v53, %v2522_v50  ;;  %v2907_v50 = vld [vmem:[%s8363_s5 + $0x180] sm:$0xff]  ;;  %v2897_v51 = vld [vmem:[%s8363_s5 + $0x130] sm:$0xff] }
 0xb8c   :  { %v2911_v53 = vld [vmem:[%s8363_s5 + $0x1a0] sm:$0xff] }
 0xb8d   :  { %v2526_v18 = vmax.f32 %v2524_v54, 0.0  ;;  %v2908_v54 = vld [vmem:[%s8363_s5 + $0x188] sm:$0xff]  ;;  %v5403_v6 = vcombine.high %v2907_v50, %v2911_v53  ;;  %v5402_v9 = vcombine.low %v2907_v50, %v2911_v53  ;;  %v2901_v53 = vld [vmem:[%s8363_s5 + $0x150] sm:$0xff] }
 0xb8f   :  { %v2530_v60 = vadd.f32 1e-05, %v2526_v18  ;;  %v2912_v18 = vld [vmem:[%s8363_s5 + $0x1a8] sm:$0xff] }
 0xb90   :  { %v5405_v46 = vcombine.high %v2908_v54, %v2912_v18 }
 0xb91   :  { %6400 = vrsqrt.f32 %v2530_v60  ;;  %v5394_v60 = vcombine.low %v2899_v36, %v2903_v5  ;;  %v5383_v36 = vcombine.high %v2885_v20, %v2889_v28 }
 0xb9b   :  { %v6401_v58 = vpop.eup %6400 }
 0xb9c   :  { %v2534_v7 = vmul.f32 %v6401_v58, %v2528_v63  ;;  %v2919_v63 = vld [vmem:[%s8363_s5 + $0x1e0] sm:$0xff]  ;;  %v2916_v58 = vld [vmem:[%s8363_s5 + $0x1c8] sm:$0xff] }
 0xb9e   :  { %v2543_v10 = vmul.f32 %v5320_v4, %v2534_v7  ;;  %v2915_v4 = vld [vmem:[%s8363_s5 + $0x1c0] sm:$0xff]  ;;  %v2920_v7 = vld [vmem:[%s8363_s5 + $0x1e8] sm:$0xff] }
 0xb9f   :  { %v5413_v3 = vcombine.high %v2916_v58, %v2920_v7 }
 0xba0   :  { %v7578_v12 = vadd.f32 %v5321_v61, %v2543_v10  ;;  %v5404_v61 = vcombine.low %v2908_v54, %v2912_v18  ;;  %v5411_v10 = vcombine.high %v2915_v4, %v2919_v63  ;;  %v2905_v54 = vld [vmem:[%s8363_s5 + $0x170] sm:$0xff]  ;;  %v2902_v18 = vld [vmem:[%s8363_s5 + $0x158] sm:$0xff] }
 0xba2   :  { %v2553_v59 = vpack.c.bf16 %v7578_v12, %v7576_v11 }
 0xba4   :  { %2801 = vmatmul.mubr.bf16.vlgmr.msra.gmra.mrb[48].mxu0 %v2553_v59  ;;  %2844 = vmatmul.mubr.bf16.vlgmr.msra.gmra.mrb[64].mxu1 %v2553_v59  ;;  %v2866_v59 = vld [vmem:[%s8363_s5 + $0x38] sm:$0xff] }
 0xba5   :  { %3286 = vmatpush1.bf16.msra.mxu0 %v5354_v41  ;;  %3329 = vmatpush1.bf16.msra.mxu1 %v5356_v45  ;;  %v5370_v41 = vcombine.low %v2875_v13, %v2879_v62  ;;  %v5381_v45 = vcombine.high %v2884_v17, %v2888_v40  ;;  %v5359_v13 = vcombine.high %v2861_v2, %v2865_v27  ;;  %v2877_v17 = vld [vmem:[%s8363_s5 + $0x90] sm:$0xff] }
 0xba6   :  { %3287 = vmatprep.subr.bf16.mxu0 %v5363_v14  ;;  %3330 = vmatprep.subr.bf16.mxu1 %v5365_v15  ;;  %v5410_v14 = vcombine.low %v2915_v4, %v2919_v63  ;;  %v5412_v15 = vcombine.low %v2916_v58, %v2920_v7  ;;  %v5361_v62 = vcombine.high %v2862_v8, %v2866_v59  ;;  %v2881_v40 = vld [vmem:[%s8363_s5 + $0xb0] sm:$0xff]  ;;  %v2910_v7 = vld [vmem:[%s8363_s5 + $0x198] sm:$0xff] }
 0xba7   :  { %3317 = vmatprep.mubr.bf16.mxu0 %v8360_v43  ;;  %3360 = vmatprep.mubr.bf16.mxu1 %v8360_v43  ;;  %v5375_v47 = vcombine.high %v2877_v17, %v2881_v40  ;;  %v2909_v63 = vld [vmem:[%s8363_s5 + $0x190] sm:$0xff] }
 0xba8   :  { %v2913_v58 = vld [vmem:[%s8363_s5 + $0x1b0] sm:$0xff] }
 0xba9   :  { %3288 = vmatpush1.bf16.msra.mxu0 %v5362_v37  ;;  %3331 = vmatpush1.bf16.msra.mxu1 %v5364_v38  ;;  %v2870_v37 = vld [vmem:[%s8363_s5 + $0x58] sm:$0xff] }
 0xbaa   :  { %3289 = vmatprep.subr.bf16.mxu0 %v5371_v39  ;;  %3332 = vmatprep.subr.bf16.mxu1 %v5373_v55  ;;  %v2874_v38 = vld [vmem:[%s8363_s5 + $0x78] sm:$0xff]  ;;  %v5358_v39 = vcombine.low %v2861_v2, %v2865_v27  ;;  %v5360_v55 = vcombine.low %v2862_v8, %v2866_v59  ;;  %v2917_v27 = vld [vmem:[%s8363_s5 + $0x1d0] sm:$0xff] }
 0xbab   :  { %v5369_v32 = vcombine.high %v2870_v37, %v2874_v38  ;;  %v2921_v8 = vld [vmem:[%s8363_s5 + $0x1f0] sm:$0xff]  ;;  %v2918_v59 = vld [vmem:[%s8363_s5 + $0x1d8] sm:$0xff] }
 0xbad   :  { %3290 = vmatpush1.bf16.msra.mxu0 %v5370_v41  ;;  %3333 = vmatpush1.bf16.msra.mxu1 %v5372_v42  ;;  %v2878_v41 = vld [vmem:[%s8363_s5 + $0x98] sm:$0xff] }
 0xbae   :  { %3291 = vmatprep.subr.bf16.mxu0 %v5379_v44  ;;  %3334 = vmatprep.subr.bf16.mxu1 %v5381_v45  ;;  %v2882_v42 = vld [vmem:[%s8363_s5 + $0xb8] sm:$0xff]  ;;  %v5366_v44 = vcombine.low %v2869_v31, %v2873_v35  ;;  %v5368_v45 = vcombine.low %v2870_v37, %v2874_v38  ;;  %v5414_v35 = vcombine.low %v2917_v27, %v2921_v8  ;;  %v2586_v38 = vld [vmem:[%s8302_s11] sm:$0xf] }
 0xbaf   :  { %v5377_v16 = vcombine.high %v2878_v41, %v2882_v42 }
 0xbb1   :  { %3292 = vmatpush1.bf16.msra.mxu0 %v5378_v29  ;;  %3335 = vmatpush1.bf16.msra.mxu1 %v5380_v34  ;;  %v2886_v29 = vld [vmem:[%s8363_s5 + $0xd8] sm:$0xff] }
 0xbb2   :  { %3293 = vmatprep.subr.bf16.mxu0 %v5387_v33  ;;  %3336 = vmatprep.subr.bf16.mxu1 %v5389_v30  ;;  %v2890_v34 = vld [vmem:[%s8363_s5 + $0xf8] sm:$0xff]  ;;  %v5374_v33 = vcombine.low %v2877_v17, %v2881_v40  ;;  %v5376_v30 = vcombine.low %v2878_v41, %v2882_v42  ;;  %v2595_v17 = vrot.slane %v2586_v38, %v7009_v24 }
 0xbb3   :  { %v5385_v5 = vcombine.high %v2886_v29, %v2890_v34 }
 0xbb5   :  { %3294 = vmatpush1.bf16.msra.mxu0 %v5386_v52  ;;  %3337 = vmatpush1.bf16.msra.mxu1 %v5388_v57  ;;  %v2898_v52 = vld [vmem:[%s8363_s5 + $0x138] sm:$0xff]  ;;  %v5382_v57 = vcombine.low %v2885_v20, %v2889_v28 }
 0xbb6   :  { %3295 = vmatprep.subr.bf16.mxu0 %v5395_v49  ;;  %3338 = vmatprep.subr.bf16.mxu1 %v5397_v48  ;;  %v5384_v49 = vcombine.low %v2886_v29, %v2890_v34  ;;  %v5391_v48 = vcombine.high %v2893_v1, %v2897_v51 }
 0xbb9   :  { %3296 = vmatpush1.bf16.msra.mxu0 %v5394_v60  ;;  %3339 = vmatpush1.bf16.msra.mxu1 %v5396_v19  ;;  %v2906_v60 = vld [vmem:[%s8363_s5 + $0x178] sm:$0xff]  ;;  %v5390_v19 = vcombine.low %v2893_v1, %v2897_v51 }
 0xbba   :  { %3297 = vmatprep.subr.bf16.mxu0 %v5403_v6  ;;  %3340 = vmatprep.subr.bf16.mxu1 %v5405_v46  ;;  %v5399_v46 = vcombine.high %v2901_v53, %v2905_v54  ;;  %v5401_v4 = vcombine.high %v2902_v18, %v2906_v60 }
 0xbbd   :  { %3298 = vmatpush1.bf16.msra.mxu0 %v5402_v9  ;;  %3341 = vmatpush1.bf16.msra.mxu1 %v5404_v61  ;;  %v2914_v9 = vld [vmem:[%s8363_s5 + $0x1b8] sm:$0xff]  ;;  %v5398_v61 = vcombine.low %v2901_v53, %v2905_v54 }
 0xbbe   :  { %3299 = vmatprep.subr.bf16.mxu0 %v5411_v10  ;;  %3342 = vmatprep.subr.bf16.mxu1 %v5413_v3  ;;  %v5400_v10 = vcombine.low %v2902_v18, %v2906_v60  ;;  %v5407_v3 = vcombine.high %v2909_v63, %v2913_v58  ;;  %v5409_v2 = vcombine.high %v2910_v7, %v2914_v9 }
 0xbc1   :  { %3300 = vmatpush1.bf16.msra.mxu0 %v5410_v14  ;;  %3343 = vmatpush1.bf16.msra.mxu1 %v5412_v15  ;;  %v2922_v14 = vld [vmem:[%s8363_s5 + $0x1f8] sm:$0xff]  ;;  %v5406_v15 = vcombine.low %v2909_v63, %v2913_v58 }
 0xbc2   :  { %3371 = vmatprep.subr.bf16.mxu0 %v5359_v13  ;;  %3414 = vmatprep.subr.bf16.mxu1 %v5361_v62  ;;  %v5408_v13 = vcombine.low %v2910_v7, %v2914_v9  ;;  %v5415_v62 = vcombine.high %v2917_v27, %v2921_v8  ;;  %v5417_v31 = vcombine.high %v2918_v59, %v2922_v14  ;;  %v8365_v27 = vsub.s32 6, %v6997_v21 }
 0xbc3   :  { %v5416_v37 = vcombine.low %v2918_v59, %v2922_v14  ;;  %v8366_v59 = vsub.s32 5, %v6997_v21 }
 0xbc4   :  { %3318 = vmatmul.mubr.bf16.vlgmr.msra.gmra.mrb[52].mxu0 %v6832_v26  ;;  %3361 = vmatmul.mubr.bf16.vlgmr.msra.gmra.mrb[68].mxu1 %v6832_v26 }
 0xbc5   :  { %3372 = vmatpush1.bf16.msra.mxu0 %v5358_v39  ;;  %3415 = vmatpush1.bf16.msra.mxu1 %v5360_v55  ;;  %v2591_v39 = vrot.slane %v2586_v38, %v7000_v22  ;;  %v2599_v55 = vrot.slane %v2586_v38, %v7003_v23 }
 0xbc6   :  { %3373 = vmatprep.subr.bf16.mxu0 %v5367_v56  ;;  %3416 = vmatprep.subr.bf16.mxu1 %v5369_v32 }
 0xbc7   :  { %3403 = vmatprep.mubr.bf16.mxu0 %v8360_v43  ;;  %3446 = vmatprep.mubr.bf16.mxu1 %v8360_v43  ;;  %v2894_v43 = vld [vmem:[%s8363_s5 + $0x118] sm:$0xff] }
 0xbc8   :  { %v5393_v50 = vcombine.high %v2894_v43, %v2898_v52  ;;  %v5392_v6 = vcombine.low %v2894_v43, %v2898_v52  ;;  %v2923_v52 = vld [vmem:[%s8303_s13] sm:$0xff] }
 0xbc9   :  { %3374 = vmatpush1.bf16.msra.mxu0 %v5366_v44  ;;  %3417 = vmatpush1.bf16.msra.mxu1 %v5368_v45  ;;  %v2932_v53 = vrot.slane %v2923_v52, %v7009_v24  ;;  %v2940_v54 = vrot.slane %v2923_v52, %v7012_v25  ;;  %v2952_v8 = vrot.slane %v2923_v52, %v8365_v27 }
 0xbca   :  { %3375 = vmatprep.subr.bf16.mxu0 %v5375_v47  ;;  %3418 = vmatprep.subr.bf16.mxu1 %v5377_v16  ;;  %v2948_v14 = vrot.slane %v2923_v52, %v8366_v59 }
 0xbcd   :  { %3376 = vmatpush1.bf16.msra.mxu0 %v5374_v33  ;;  %3419 = vmatpush1.bf16.msra.mxu1 %v5376_v30 }
 0xbce   :  { %3377 = vmatprep.subr.bf16.mxu0 %v5383_v36  ;;  %3420 = vmatprep.subr.bf16.mxu1 %v5385_v5 }
 0xbd1   :  { %3378 = vmatpush1.bf16.msra.mxu0 %v5382_v57  ;;  %3421 = vmatpush1.bf16.msra.mxu1 %v5384_v49  ;;  %v2928_v57 = vrot.slane %v2923_v52, %v7000_v22  ;;  %v2936_v49 = vrot.slane %v2923_v52, %v7003_v23 }
 0xbd2   :  { %3379 = vmatprep.subr.bf16.mxu0 %v5391_v48  ;;  %3422 = vmatprep.subr.bf16.mxu1 %v5393_v50 }
 0xbd5   :  { %3380 = vmatpush1.bf16.msra.mxu0 %v5390_v19  ;;  %3423 = vmatpush1.bf16.msra.mxu1 %v5392_v6 }
 0xbd6   :  { %3381 = vmatprep.subr.bf16.mxu0 %v5399_v46  ;;  %3424 = vmatprep.subr.bf16.mxu1 %v5401_v4 }
 0xbd9   :  { %3382 = vmatpush1.bf16.msra.mxu0 %v5398_v61  ;;  %3425 = vmatpush1.bf16.msra.mxu1 %v5400_v10 }
 0xbda   :  { %3383 = vmatprep.subr.bf16.mxu0 %v5407_v3  ;;  %3426 = vmatprep.subr.bf16.mxu1 %v5409_v2 }
 0xbdd   :  { %3384 = vmatpush1.bf16.msra.mxu0 %v5406_v15  ;;  %3427 = vmatpush1.bf16.msra.mxu1 %v5408_v13  ;;  %v8367_v15 = vsub.s32 7, %v6997_v21 }
 0xbde   :  { %3385 = vmatprep.subr.bf16.mxu0 %v5415_v62  ;;  %3428 = vmatprep.subr.bf16.mxu1 %v5417_v31  ;;  %v8368_v62 = vsub.s32 4, %v6997_v21 }
 0xbdf   :  { %v2956_v13 = vrot.slane %v2923_v52, %v8367_v15 }
 0xbe0   :  { %v2944_v31 = vrot.slane %v2923_v52, %v8368_v62 }
 0xbe1   :  { %3386 = vmatpush1.bf16.msra.mxu0 %v5414_v35  ;;  %3429 = vmatpush1.bf16.msra.mxu1 %v5416_v37 }
 0xbe2   :  { %5911 = vmatprep.subr.bf16.mxu0 %v6442_v0  ;;  %5917 = vmatprep.subr.bf16.mxu1 %v6442_v0 }
 0xbe4   :  { %3404 = vmatmul.mubr.bf16.vlgmr.msra.gmra.mrb[56].mxu0 %v6832_v26  ;;  %3447 = vmatmul.mubr.bf16.vlgmr.msra.gmra.mrb[72].mxu1 %v6832_v26  ;;  %v2603_v26 = vrot.slane %v2586_v38, %v7012_v25 }
 0xbe5   :  { %5913 = vmatprep.mubr.msk.bf16.mxu0 %vm6443_vm0, %v6442_v0  ;;  %5919 = vmatprep.mubr.msk.bf16.mxu1 %vm6443_vm0, %v6442_v0 }
 0xc77   :  { %v2802_v56 = vpop.f32.mrb[48].mxu0  ;;  %v2845_v32 = vpop.f32.mrb[64].mxu1 }
 0xc78   :  { %v2804_v40 = vpop.f32.mrb[49].mxu0  ;;  %v2847_v41 = vpop.f32.mrb[65].mxu1  ;;  %v2803_v45 = vadd.f32 %v2802_v56, %v2591_v39  ;;  %v2846_v47 = vadd.f32 %v2845_v32, %v2599_v55 }
 0xc79   :  { %v2806_v42 = vpop.f32.mrb[50].mxu0  ;;  %v2849_v44 = vpop.f32.mrb[66].mxu1  ;;  %v2805_v34 = vadd.f32 %v2804_v40, %v2595_v17  ;;  %v2848_v33 = vadd.f32 %v2847_v41, %v2603_v26 }
 0xc7a   :  { %v2807_v16 = vadd.f32 %v2806_v42, %v2591_v39  ;;  %v2850_v20 = vadd.f32 %v2849_v44, %v2599_v55  ;;  %v2808_v28 = vpop.f32.mrb[51].mxu0  ;;  %v2851_v29 = vpop.f32.mrb[67].mxu1 }
 0xc7b   :  { %v2809_v30 = vadd.f32 %v2808_v28, %v2595_v17  ;;  %v2852_v36 = vadd.f32 %v2851_v29, %v2603_v26 }
 0xc7c   :  { %v7777_v5 = vpack.c.bf16 %v2807_v16, %v2803_v45  ;;  %v7779_v1 = vpack.c.bf16 %v2850_v20, %v2846_v47 }
 0xc7d   :  { %v7781_v51 = vpack.c.bf16 %v2809_v30, %v2805_v34  ;;  %v7783_v43 = vpack.c.bf16 %v2852_v36, %v2848_v33 }
 0xc97   :  { %v3319_v48 = vpop.f32.mrb[52].mxu0  ;;  %v3362_v50 = vpop.f32.mrb[68].mxu1 }
 0xc98   :  { %v3321_v18 = vpop.f32.mrb[53].mxu0  ;;  %v3364_v60 = vpop.f32.mrb[69].mxu1  ;;  %v3320_v46 = vadd.f32 %v3319_v48, %v2928_v57  ;;  %v3363_v4 = vadd.f32 %v3362_v50, %v2936_v49 }
 0xc99   :  { %v3323_v19 = vpop.f32.mrb[54].mxu0  ;;  %v3366_v6 = vpop.f32.mrb[70].mxu1  ;;  %v3322_v61 = vadd.f32 %v3321_v18, %v2932_v53  ;;  %v3365_v22 = vadd.f32 %v3364_v60, %v2940_v54 }
 0xc9a   :  { %v3324_v63 = vadd.f32 %v3323_v19, %v2928_v57  ;;  %v3367_v58 = vadd.f32 %v3366_v6, %v2936_v49  ;;  %v3325_v7 = vpop.f32.mrb[55].mxu0  ;;  %v3368_v9 = vpop.f32.mrb[71].mxu1 }
 0xc9b   :  { %v3326_v10 = vadd.f32 %v3325_v7, %v2932_v53  ;;  %v3369_v23 = vadd.f32 %v3368_v9, %v2940_v54 }
 0xc9c   :  { %v7792_v3 = vpack.c.bf16 %v3324_v63, %v3320_v46  ;;  %v7794_v2 = vpack.c.bf16 %v3367_v58, %v3363_v4 }
 0xc9d   :  { %v7796_v24 = vpack.c.bf16 %v3326_v10, %v3322_v61  ;;  %v7798_v25 = vpack.c.bf16 %v3369_v23, %v3365_v22 }
 0xc9e   :  { %5912 = vmatpush3.bf16.xpose.msra.mxu0 %v7792_v3 }
 0xc9f   :  { %5923 = vmatprep.subr.bf16.mxu0 %v6442_v0 }
 0xca5   :  { %5914 = vmatmul.mubr.bf16.vlgmr.msra.gmra.mrb[60].mxu0 %v7777_v5 }
 0xca6   :  { %5924 = vmatpush3.bf16.xpose.msra.mxu0 %v7796_v24  ;;  %5925 = vmatprep.mubr.msk.bf16.mxu0 %vm6443_vm0, %v6442_v0 }
 0xca7   :  { %5935 = vmatprep.subr.bf16.mxu0 %v6442_v0 }
 0xcad   :  { %5926 = vmatmul.mubr.bf16.vlgmr.msra.gmra.mrb[64].mxu0 %v7781_v51 }
 0xcae   :  { %5936 = vmatpush3.bf16.xpose.msra.mxu0 %v7794_v2  ;;  %5937 = vmatprep.mubr.msk.bf16.mxu0 %vm6443_vm0, %v6442_v0 }
 0xcaf   :  { %5947 = vmatprep.subr.bf16.mxu0 %v6442_v0 }
 0xcb5   :  { %5938 = vmatmul.mubr.bf16.vlgmr.msra.gmra.mrb[68].mxu0 %v7779_v1 }
 0xcb6   :  { %5948 = vmatpush3.bf16.xpose.msra.mxu0 %v7798_v25  ;;  %5949 = vmatprep.mubr.msk.bf16.mxu0 %vm6443_vm0, %v6442_v0 }
 0xcb7   :  { %v3405_v35 = vpop.f32.mrb[56].mxu0  ;;  %v3448_v37 = vpop.f32.mrb[72].mxu1 }
 0xcb8   :  { %v3449_v38 = vadd.f32 %v3448_v37, %v2952_v8  ;;  %v3407_v39 = vpop.f32.mrb[57].mxu0  ;;  %v3450_v55 = vpop.f32.mrb[73].mxu1  ;;  %v3406_v40 = vadd.f32 %v3405_v35, %v2944_v31 }
 0xcb9   :  { %v3408_v56 = vadd.f32 %v3407_v39, %v2948_v14  ;;  %v3451_v32 = vadd.f32 %v3450_v55, %v2956_v13  ;;  %v3409_v17 = vpop.f32.mrb[58].mxu0  ;;  %v3452_v26 = vpop.f32.mrb[74].mxu1 }
 0xcba   :  { %v3410_v41 = vadd.f32 %v3409_v17, %v2944_v31  ;;  %v3453_v42 = vadd.f32 %v3452_v26, %v2952_v8  ;;  %v3411_v44 = vpop.f32.mrb[59].mxu0  ;;  %v3454_v45 = vpop.f32.mrb[75].mxu1 }
 0xcbb   :  { %v3412_v47 = vadd.f32 %v3411_v44, %v2948_v14  ;;  %v3455_v21 = vadd.f32 %v3454_v45, %v2956_v13 }
 0xcbc   :  { %v7824_v16 = vpack.c.bf16 %v3410_v41, %v3406_v40  ;;  %v7826_v20 = vpack.c.bf16 %v3453_v42, %v3449_v38 }
 0xcbd   :  { %v7828_v28 = vpack.c.bf16 %v3412_v47, %v3408_v56  ;;  %v7830_v29 = vpack.c.bf16 %v3455_v21, %v3451_v32  ;;  %5950 = vmatmul.mubr.bf16.vlgmr.msra.gmra.mrb[72].mxu0 %v7783_v43 }
 0xcbe   :  { %v3522_v34 = vsel %vm1298_vm1, %v7824_v16, 0 }
 0xcbf   :  { %5918 = vmatpush3.bf16.msra.mxu1 %v3522_v34  ;;  %v3621_v45 = vsel %vm1298_vm1, %v7828_v28, 0 }
 0xcc0   :  { %5929 = vmatprep.subr.bf16.mxu1 %v6442_v0 }
 0xd78   :  { %v3499_v33 = vpop.f32.mrb[60].mxu0 }
 0xd79   :  { %v3505_v30 = vmul.f32 0.25, %v3499_v33  ;;  %v5915_v36 = vpop.f32.mrb[61].mxu0 }
 0xd7a   :  { %v3502_v52 = vpop.f32.mrb[62].mxu0  ;;  %v3720_v36 = vsel %vm1298_vm1, %v7826_v20, 0 }
 0xd7b   :  { %v5916_v57 = vpop.f32.mrb[63].mxu0  ;;  %v3506_v49 = vsel %vm1282_vm3, %v3505_v30, -inf }
 0xd7c   :  { %3507 = vmax.xlane.f32.xlu0 %v3506_v49  ;;  %v7859_v49 = vld [vmem:[%s8304_s14 + $0x40] sm:$0xff]  }
 0xd7d   :  { %5644 = vmatprep.subr.bf16.mxu0 %v7859_v49 }
 0xd80   :  { %v3598_v48 = vpop.f32.mrb[64].mxu0 }
 0xd81   :  { %v3604_v50 = vmul.f32 0.25, %v3598_v48  ;;  %v5927_v53 = vpop.f32.mrb[65].mxu0  ;;  %v7864_v48 = vld [vmem:[%s8304_s14] sm:$0xff]  }
 0xd82   :  { %v3601_v54 = vpop.f32.mrb[66].mxu0  ;;  %5645 = vmatpush3.bf16.msra.mxu0 %v7864_v48  ;;  %v7876_v53 = vld [vmem:[%s8304_s14 + $0x8] sm:$0xff]  }
 0xd83   :  { %v5928_v18 = vpop.f32.mrb[67].mxu0  ;;  %v3605_v60 = vsel %vm1282_vm3, %v3604_v50, -inf  ;;  %v7882_v54 = vld [vmem:[%s8304_s14 + $0x50] sm:$0xff]  }
 0xd84   :  { %3606 = vmax.xlane.f32.xlu1 %v3605_v60  ;;  %v7888_v18 = vld [vmem:[%s8304_s14 + $0x10] sm:$0xff]   ;;  %v7894_v60 = vld [vmem:[%s8304_s14 + $0x58] sm:$0xff]  }
 0xd88   :  { %v3697_v19 = vpop.f32.mrb[68].mxu0 }
 0xd89   :  { %v5939_v6 = vpop.f32.mrb[69].mxu0  ;;  %v3703_v14 = vmul.f32 0.25, %v3697_v19  ;;  %v7900_v19 = vld [vmem:[%s8304_s14 + $0x18] sm:$0xff]  }
 0xd8a   :  { %v3700_v46 = vpop.f32.mrb[70].mxu0  ;;  %v7906_v6 = vld [vmem:[%s8304_s14 + $0x60] sm:$0xff]  }
 0xd8b   :  { %v5940_v4 = vpop.f32.mrb[71].mxu0  ;;  %v3704_v13 = vsel %vm1282_vm3, %v3703_v14, -inf  ;;  %v7911_v46 = vld [vmem:[%s8304_s14 + $0x20] sm:$0xff]  }
 0xd8c   :  { %v7916_v4 = vld [vmem:[%s8304_s14 + $0x68] sm:$0xff]  }
 0xd90   :  { %v3796_v63 = vpop.f32.mrb[72].mxu0 }
 0xd91   :  { %v5951_v58 = vpop.f32.mrb[73].mxu0  ;;  %v3802_v31 = vmul.f32 0.25, %v3796_v63  ;;  %v7923_v63 = vld [vmem:[%s8304_s14 + $0x28] sm:$0xff]  }
 0xd92   :  { %v3799_v7 = vpop.f32.mrb[74].mxu0  ;;  %v7928_v58 = vld [vmem:[%s8304_s14 + $0x70] sm:$0xff]  }
 0xd93   :  { %v5952_v9 = vpop.f32.mrb[75].mxu0  ;;  %v3803_v37 = vsel %vm1282_vm3, %v3802_v31, -inf  ;;  %v7935_v7 = vld [vmem:[%s8304_s14 + $0x30] sm:$0xff]  }
 0xd94   :  { %v7943_v9 = vld [vmem:[%s8304_s14 + $0x78] sm:$0xff]  }
 0xe09   :  { %v3508_v61 = vpop.xlane.xlu0 %3507 }
 0xe0a   :  { %v3509_v22 = vsub.f32 %v3505_v30, %v3508_v61  ;;  %v7948_v61 = vld [vmem:[%s8304_s14 + $0x38] sm:$0xff]  }
 0xe0c   :  { %v3510_v10 = vmul.f32 1.442695, %v3509_v22 }
 0xe0e   :  { %6402 = vpow2.f32 %v3510_v10 }
 0xe11   :  { %v3607_v23 = vpop.xlane.xlu1 %3606 }
 0xe12   :  { %v3608_v27 = vsub.f32 %v3604_v50, %v3607_v23  ;;  %v7870_v50 = vld [vmem:[%s8304_s14 + $0x48] sm:$0xff]  }
 0xe13   :  { %5646 = vmatprep.subr.bf16.mxu0 %v7870_v50 }
 0xe14   :  { %v3609_v8 = vmul.f32 1.442695, %v3608_v27  ;;  %5647 = vmatpush3.bf16.msra.mxu0 %v7876_v53 }
 0xe15   :  { %5648 = vmatprep.subr.bf16.mxu0 %v7882_v54 }
 0xe16   :  { %6404 = vpow2.f32 %v3609_v8 }
 0xe18   :  { %v6403_v59 = vpop.eup %6402  ;;  %5649 = vmatpush3.bf16.msra.mxu0 %v7888_v18 }
 0xe19   :  { %v3512_v15 = vsel %vm1282_vm3, %v6403_v59, 0.0  ;;  %5650 = vmatprep.subr.bf16.mxu0 %v7894_v60 }
 0xe1a   :  { %3513 = vadd.xlane.f32.xlu0 %v3512_v15 }
 0xe1c   :  { %5651 = vmatpush3.bf16.msra.mxu0 %v7900_v19 }
 0xe1d   :  { %5652 = vmatprep.subr.bf16.mxu0 %v7906_v6 }
 0xe1e   :  { %3705 = vmax.xlane.f32.xlu0 %v3704_v13 }
 0xe20   :  { %v6405_v62 = vpop.eup %6404  ;;  %5653 = vmatpush3.bf16.msra.mxu0 %v7911_v46 }
 0xe21   :  { %v3611_v35 = vsel %vm1282_vm3, %v6405_v62, 0.0  ;;  %5654 = vmatprep.subr.bf16.mxu0 %v7916_v4 }
 0xe22   :  { %3612 = vadd.xlane.f32.xlu1 %v3611_v35  ;;  %v7972_v35 = vld [vmem:[%s8304_s14 + $0xc8] sm:$0xff]  }
 0xe24   :  { %5655 = vmatpush3.bf16.msra.mxu0 %v7923_v63 }
 0xe25   :  { %5656 = vmatprep.subr.bf16.mxu0 %v7928_v58 }
 0xe26   :  { %3804 = vmax.xlane.f32.xlu1 %v3803_v37  ;;  %v7979_v37 = vld [vmem:[%s8304_s14 + $0x88] sm:$0xff]  }
 0xe28   :  { %5657 = vmatpush3.bf16.msra.mxu0 %v7935_v7 }
 0xe29   :  { %5658 = vmatprep.subr.bf16.mxu0 %v7943_v9 }
 0xe2c   :  { %5659 = vmatpush3.bf16.msra.mxu0 %v7948_v61 }
 0xe2d   :  { %5959 = vmatprep.subr.bf16.mxu0 %v6442_v0 }
 0xea7   :  { %v3514_v38 = vpop.xlane.xlu0 %3513 }
 0xea8   :  { %6406 = vrcp.f32 %v3514_v38  ;;  %v7985_v38 = vld [vmem:[%s8304_s14 + $0xd0] sm:$0xff]  }
 0xeab   :  { %v3706_v39 = vpop.xlane.xlu0 %3705 }
 0xeac   :  { %v3707_v55 = vsub.f32 %v3703_v14, %v3706_v39  ;;  %v3819_v14 = vsel %vm1298_vm1, %v7830_v29, 0  ;;  %v7991_v39 = vld [vmem:[%s8304_s14 + $0x90] sm:$0xff]  }
 0xeae   :  { %v3708_v56 = vmul.f32 1.442695, %v3707_v55  ;;  %v7997_v55 = vld [vmem:[%s8304_s14 + $0xd8] sm:$0xff]  }
 0xeaf   :  { %v3613_v32 = vpop.xlane.xlu1 %3612 }
 0xeb0   :  { %6408 = vpow2.f32 %v3708_v56  ;;  %v8003_v56 = vld [vmem:[%s8304_s14 + $0x98] sm:$0xff]  }
 0xeb1   :  { %6410 = vrcp.f32 %v3613_v32  ;;  %v8009_v32 = vld [vmem:[%s8304_s14 + $0xe0] sm:$0xff]  }
 0xeb2   :  { %v6407_v17 = vpop.eup %6406 }
 0xeb3   :  { %v3516_v26 = vmul.f32 %v6407_v17, %v6403_v59  ;;  %v3805_v40 = vpop.xlane.xlu1 %3804  ;;  %v7956_v59 = vld [vmem:[%s8304_s14 + $0xc0] sm:$0xff]  }
 0xeb4   :  { %v3806_v41 = vsub.f32 %v3802_v31, %v3805_v40  ;;  %v8015_v17 = vld [vmem:[%s8304_s14 + $0xa0] sm:$0xff]  }
 0xeb5   :  { %v3517_v42 = vpack.c.bf16 %v3516_v26, %v3516_v26  ;;  %v8021_v26 = vld [vmem:[%s8304_s14 + $0xe8] sm:$0xff]  }
 0xeb6   :  { %v3807_v44 = vmul.f32 1.442695, %v3806_v41 }
 0xeb7   :  { %5920 = vmatmul.mubr.msk.bf16.vlgmr.msra.gmra.mrb[76].mxu1 %vm1282_vm3, %v3517_v42 }
 0xeb8   :  { %6412 = vpow2.f32 %v3807_v44  ;;  %5930 = vmatpush3.bf16.msra.mxu1 %v3621_v45  ;;  %5931 = vmatprep.mubr.msk.bf16.mxu1 %vm6443_vm0, %v6442_v0 }
 0xeb9   :  { %5941 = vmatprep.subr.bf16.mxu1 %v6442_v0 }
 0xeba   :  { %v6409_v47 = vpop.eup %6408 }
 0xebb   :  { %v6411_v21 = vpop.eup %6410  ;;  %v3710_v34 = vsel %vm1282_vm3, %v6409_v47, 0.0 }
 0xebc   :  { %v3615_v33 = vmul.f32 %v6411_v21, %v6405_v62  ;;  %3711 = vadd.xlane.f32.xlu0 %v3710_v34  ;;  %v7967_v62 = vld [vmem:[%s8304_s14 + $0x80] sm:$0xff]  }
 0xebe   :  { %v3616_v30 = vpack.c.bf16 %v3615_v33, %v3615_v33 }
 0xec0   :  { %5932 = vmatmul.mubr.msk.bf16.vlgmr.msra.gmra.mrb[80].mxu1 %vm1282_vm3, %v3616_v30  ;;  %v4212_v30 = vrot.slane %v7792_v3, 4  ;;  %v4316_v3 = vrot.slane %v7781_v51, 4  ;;  %v8050_v51 = vld [vmem:[%s8304_s14 + $0xf0] sm:$0xff]  }
 0xec1   :  { %5942 = vmatpush3.bf16.msra.mxu1 %v3720_v36  ;;  %5943 = vmatprep.mubr.msk.bf16.mxu1 %vm6443_vm0, %v6442_v0 }
 0xec2   :  { %v6413_v52 = vpop.eup %6412  ;;  %5953 = vmatprep.subr.bf16.mxu1 %v6442_v0 }
 0xec3   :  { %v3809_v57 = vsel %vm1282_vm3, %v6413_v52, 0.0 }
 0xec4   :  { %3810 = vadd.xlane.f32.xlu1 %v3809_v57  ;;  %v4319_v57 = vrot.slane %v7796_v24, 4  ;;  %v4423_v24 = vrot.slane %v7779_v1, 4  ;;  %v8071_v1 = vld [vmem:[%s8304_s14 + $0xb8] sm:$0xff]  }
 0xf49   :  { %v3712_v22 = vpop.xlane.xlu0 %3711 }
 0xf4a   :  { %6414 = vrcp.f32 %v3712_v22  ;;  %v4426_v22 = vrot.slane %v7794_v2, 4  ;;  %v8055_v2 = vld [vmem:[%s8304_s14 + $0xb0] sm:$0xff]  }
 0xf51   :  { %v3811_v10 = vpop.xlane.xlu1 %3810 }
 0xf52   :  { %6416 = vrcp.f32 %v3811_v10  ;;  %v4533_v10 = vrot.slane %v7798_v25, 4  ;;  %v4530_v25 = vrot.slane %v7783_v43, 4 }
 0xf54   :  { %v6415_v23 = vpop.eup %6414 }
 0xf55   :  { %v3714_v27 = vmul.f32 %v6415_v23, %v6409_v47  ;;  %v8060_v23 = vld [vmem:[%s8304_s14 + $0xf8] sm:$0xff]  }
 0xf57   :  { %v3715_v8 = vpack.c.bf16 %v3714_v27, %v3714_v27 }
 0xf59   :  { %5944 = vmatmul.mubr.msk.bf16.vlgmr.msra.gmra.mrb[84].mxu1 %vm1282_vm3, %v3715_v8 }
 0xf5a   :  { %5954 = vmatpush3.bf16.msra.mxu1 %v3819_v14  ;;  %5955 = vmatprep.mubr.msk.bf16.mxu1 %vm6443_vm0, %v6442_v0 }
 0xf5b   :  { %5666 = vmatprep.subr.bf16.mxu1 %v7956_v59 }
 0xf5c   :  { %v6417_v15 = vpop.eup %6416 }
 0xf5d   :  { %v3813_v13 = vmul.f32 %v6417_v15, %v6413_v52  ;;  %v4209_v52 = vrot.slane %v7777_v5, 4  ;;  %v8042_v5 = vld [vmem:[%s8304_s14 + $0xa8] sm:$0xff]  }
 0xf5f   :  { %v3814_v31 = vpack.c.bf16 %v3813_v13, %v3813_v13 }
 0xf61   :  { %5956 = vmatmul.mubr.msk.bf16.vlgmr.msra.gmra.mrb[88].mxu1 %vm1282_vm3, %v3814_v31 }
 0xf62   :  { %5667 = vmatpush3.bf16.msra.mxu1 %v7967_v62 }
 0xf63   :  { %5668 = vmatprep.subr.bf16.mxu1 %v7972_v35 }
 0xf66   :  { %5669 = vmatpush3.bf16.msra.mxu1 %v7979_v37 }
 0xf67   :  { %5670 = vmatprep.subr.bf16.mxu1 %v7985_v38 }
 0xf6a   :  { %5671 = vmatpush3.bf16.msra.mxu1 %v7991_v39 }
 0xf6b   :  { %5672 = vmatprep.subr.bf16.mxu1 %v7997_v55 }
 0xf6e   :  { %5673 = vmatpush3.bf16.msra.mxu1 %v8003_v56 }
 0xf6f   :  { %5674 = vmatprep.subr.bf16.mxu1 %v8009_v32 }
 0xf72   :  { %5675 = vmatpush3.bf16.msra.mxu1 %v8015_v17 }
 0xf73   :  { %5676 = vmatprep.subr.bf16.mxu1 %v8021_v26 }
 0xf76   :  { %5677 = vmatpush3.bf16.msra.mxu1 %v8042_v5 }
 0xf77   :  { %5678 = vmatprep.subr.bf16.mxu1 %v8050_v51 }
 0xf7a   :  { %5679 = vmatpush3.bf16.msra.mxu1 %v8055_v2 }
 0xf7b   :  { %5680 = vmatprep.subr.bf16.mxu1 %v8060_v23 }
 0xf7e   :  { %5681 = vmatpush3.bf16.msra.mxu1 %v8071_v1 }
 0xf7f   :  { %5965 = vmatprep.subr.bf16.mxu1 %v6442_v0 }
 0xf8a   :  { %v3558_v40 = vpop.f32.mrb[76].mxu1 }
 0xf8b   :  { %v5921_v41 = vpop.f32.mrb[77].mxu1  ;;  %v3861_v34 = vpack.c.bf16 %v3558_v40, %v3558_v40 }
 0xf8c   :  { %v3561_v42 = vpop.f32.mrb[78].mxu1 }
 0xf8d   :  { %v5922_v44 = vpop.f32.mrb[79].mxu1 }
 0xf93   :  { %v3657_v45 = vpop.f32.mrb[80].mxu1 }
 0xf94   :  { %v3862_v47 = vpack.c.bf16 %v3657_v45, %v3657_v45  ;;  %v5933_v21 = vpop.f32.mrb[81].mxu1 }
 0xf95   :  { %v3660_v33 = vpop.f32.mrb[82].mxu1 }
 0xf96   :  { %v5934_v36 = vpop.f32.mrb[83].mxu1  ;;  %4160 = vmatprep.mubr.bf16.mxu0 %v3862_v47 }
 0xf97   :  { %4161 = vmatmul.mubr.bf16.vlgmr.msra.gmra.mrb[76].mxu0 %v3861_v34 }
 0xf98   :  { %5960 = vmatpush3.bf16.xpose.msra.mxu0 %v4212_v30  ;;  %5961 = vmatprep.mubr.msk.bf16.mxu0 %vm6443_vm0, %v6442_v0 }
 0xf99   :  { %5971 = vmatprep.subr.bf16.mxu0 %v6442_v0 }
 0xf9f   :  { %5962 = vmatmul.mubr.bf16.vlgmr.msra.gmra.mrb[80].mxu0 %v4209_v52 }
 0xfa0   :  { %5972 = vmatpush3.bf16.xpose.msra.mxu0 %v4319_v57  ;;  %5973 = vmatprep.mubr.msk.bf16.mxu0 %vm6443_vm0, %v6442_v0 }
 0xfa1   :  { %5983 = vmatprep.subr.bf16.mxu0 %v6442_v0 }
 0xfa7   :  { %5974 = vmatmul.mubr.bf16.vlgmr.msra.gmra.mrb[84].mxu0 %v4316_v3 }
 0xfa8   :  { %5984 = vmatpush3.bf16.xpose.msra.mxu0 %v4426_v22  ;;  %5985 = vmatprep.mubr.msk.bf16.mxu0 %vm6443_vm0, %v6442_v0 }
 0xfa9   :  { %5995 = vmatprep.subr.bf16.mxu0 %v6442_v0 }
 0xfaf   :  { %5986 = vmatmul.mubr.bf16.vlgmr.msra.gmra.mrb[88].mxu0 %v4423_v24 }
 0xfb0   :  { %5996 = vmatpush3.bf16.xpose.msra.mxu0 %v4533_v10  ;;  %5997 = vmatprep.mubr.msk.bf16.mxu0 %vm6443_vm0, %v6442_v0 }
 0xfb1   :  { %5704 = vmatprep.subr.bf16.mxu0 %v7859_v49 }
 0xfb7   :  { %5998 = vmatmul.mubr.bf16.vlgmr.msra.gmra.mrb[92].mxu0 %v4530_v25 }
 0xfb8   :  { %5705 = vmatpush3.bf16.msra.mxu0 %v7864_v48 }
 0xfb9   :  { %5706 = vmatprep.subr.bf16.mxu0 %v7870_v50 }
 0xfbc   :  { %5707 = vmatpush3.bf16.msra.mxu0 %v7876_v53  ;;  %v4268_v53 = vrot.slane %v7824_v16, 4 }
 0xfbd   :  { %5708 = vmatprep.subr.bf16.mxu0 %v7882_v54 }
 0xfc0   :  { %5709 = vmatpush3.bf16.msra.mxu0 %v7888_v18 }
 0xfc1   :  { %5710 = vmatprep.subr.bf16.mxu0 %v7894_v60 }
 0xfc4   :  { %5711 = vmatpush3.bf16.msra.mxu0 %v7900_v19 }
 0xfc5   :  { %5712 = vmatprep.subr.bf16.mxu0 %v7906_v6 }
 0xfc8   :  { %5713 = vmatpush3.bf16.msra.mxu0 %v7911_v46 }
 0xfc9   :  { %5714 = vmatprep.subr.bf16.mxu0 %v7916_v4  ;;  %v4273_v4 = vsel %vm1298_vm1, %v4268_v53, 0 }
 0xfcc   :  { %5715 = vmatpush3.bf16.msra.mxu0 %v7923_v63 }
 0xfcd   :  { %5716 = vmatprep.subr.bf16.mxu0 %v7928_v58 }
 0xfd0   :  { %5717 = vmatpush3.bf16.msra.mxu0 %v7935_v7 }
 0xfd1   :  { %5718 = vmatprep.subr.bf16.mxu0 %v7943_v9 }
 0xfd4   :  { %5719 = vmatpush3.bf16.msra.mxu0 %v7948_v61 }
 0xfd5   :  { %6007 = vmatprep.subr.bf16.mxu0 %v6442_v0 }
0x102c   :  { %v3756_v43 = vpop.f32.mrb[84].mxu1 }
0x102d   :  { %v5945_v49 = vpop.f32.mrb[85].mxu1  ;;  %v3863_v19 = vpack.c.bf16 %v3756_v43, %v3756_v43 }
0x102e   :  { %v3759_v48 = vpop.f32.mrb[86].mxu1 }
0x102f   :  { %v5946_v50 = vpop.f32.mrb[87].mxu1  ;;  %v8104_v48 = vld [vmem:[%s8305_s15] ss:$0 sm:$0xff] }
0x1034   :  { %v3855_v54 = vpop.f32.mrb[88].mxu1 }
0x1035   :  { %v3864_v18 = vpack.c.bf16 %v3855_v54, %v3855_v54  ;;  %v5957_v60 = vpop.f32.mrb[89].mxu1 }
0x1036   :  { %v3858_v6 = vpop.f32.mrb[90].mxu1 }
0x1037   :  { %v5958_v46 = vpop.f32.mrb[91].mxu1  ;;  %4200 = vmatprep.mubr.bf16.mxu1 %v3864_v18 }
0x1038   :  { %4201 = vmatmul.mubr.bf16.vlgmr.msra.gmra.mrb[92].mxu1 %v3863_v19 }
0x1039   :  { %5966 = vmatpush3.bf16.msra.mxu1 %v4273_v4  ;;  %5967 = vmatprep.mubr.msk.bf16.mxu1 %vm6443_vm0, %v6442_v0 }
0x103a   :  { %5977 = vmatprep.subr.bf16.mxu1 %v6442_v0 }
0x106a   :  { %v5660_v63 = vpop.f32.mrb[76].mxu0 }
0x106b   :  { %v5661_v58 = vpop.f32.mrb[77].mxu0 }
0x106c   :  { %v5662_v7 = vadd.f32 %v5661_v58, %v5660_v63  ;;  %v5663_v16 = vpop.f32.mrb[78].mxu0 }
0x106d   :  { %v5664_v9 = vpop.f32.mrb[79].mxu0 }
0x106e   :  { %v4163_v60 = vadd.f32 %v5662_v7, %v8104_v48 }
0x1072   :  { %v4248_v61 = vpop.f32.mrb[80].mxu0 }
0x1073   :  { %v4254_v27 = vmul.f32 0.25, %v4248_v61  ;;  %v5963_v8 = vpop.f32.mrb[81].mxu0 }
0x1074   :  { %v4251_v14 = vpop.f32.mrb[82].mxu0 }
0x1075   :  { %v5964_v15 = vpop.f32.mrb[83].mxu0  ;;  %v4255_v13 = vsel %vm1282_vm3, %v4254_v27, -inf }
0x1076   :  { %4256 = vmax.xlane.f32.xlu0 %v4255_v13 }
0x107a   :  { %v4355_v31 = vpop.f32.mrb[84].mxu0 }
0x107b   :  { %v4361_v40 = vmul.f32 0.25, %v4355_v31  ;;  %v5975_v41 = vpop.f32.mrb[85].mxu0 }
0x107c   :  { %v4358_v42 = vpop.f32.mrb[86].mxu0 }
0x107d   :  { %v5976_v44 = vpop.f32.mrb[87].mxu0  ;;  %v4362_v45 = vsel %vm1282_vm3, %v4361_v40, -inf }
0x107e   :  { %4363 = vmax.xlane.f32.xlu1 %v4362_v45 }
0x1082   :  { %v4462_v47 = vpop.f32.mrb[88].mxu0 }
0x1083   :  { %v4468_v21 = vmul.f32 0.25, %v4462_v47  ;;  %v5987_v34 = vpop.f32.mrb[89].mxu0 }
0x1084   :  { %v4465_v33 = vpop.f32.mrb[90].mxu0 }
0x1085   :  { %v5988_v30 = vpop.f32.mrb[91].mxu0  ;;  %v4469_v36 = vsel %vm1282_vm3, %v4468_v21, -inf  ;;  %v4375_v33 = vrot.slane %v7828_v28, 4 }
0x1086   :  { %4470 = vmax.xlane.f32.xlu0 %v4469_v36 }
0x1087   :  { %v4380_v36 = vsel %vm1298_vm1, %v4375_v33, 0  ;;  %v6351_v33 = vld [vmem:[%s8307_s24 + $0x8] sm:$0xff]  }
0x108a   :  { %v4569_v52 = vpop.f32.mrb[92].mxu0 }
0x108b   :  { %v4575_v57 = vmul.f32 0.25, %v4569_v52  ;;  %v5999_v3 = vpop.f32.mrb[93].mxu0 }
0x108c   :  { %v4572_v22 = vpop.f32.mrb[94].mxu0  ;;  %v4482_v3 = vrot.slane %v7826_v20, 4 }
0x108d   :  { %v6000_v24 = vpop.f32.mrb[95].mxu0  ;;  %v4576_v10 = vsel %vm1282_vm3, %v4575_v57, -inf }
0x108e   :  { %4577 = vmax.xlane.f32.xlu1 %v4576_v10  ;;  %v4487_v28 = vsel %vm1298_vm1, %v4482_v3, 0 }
0x1103   :  { %v4257_v25 = vpop.xlane.xlu0 %4256 }
0x1104   :  { %v4258_v43 = vsub.f32 %v4254_v27, %v4257_v25 }
0x1106   :  { %v4259_v49 = vmul.f32 1.442695, %v4258_v43  ;;  %v4589_v43 = vrot.slane %v7830_v29, 4 }
0x1108   :  { %6418 = vpow2.f32 %v4259_v49  ;;  %v4594_v20 = vsel %vm1298_vm1, %v4589_v43, 0 }
0x110b   :  { %v4364_v50 = vpop.xlane.xlu1 %4363  ;;  %v5682_v53 = vpop.f32.mrb[92].mxu1 }
0x110c   :  { %v4365_v54 = vsub.f32 %v4361_v40, %v4364_v50  ;;  %v5683_v18 = vpop.f32.mrb[93].mxu1 }
0x110d   :  { %v5684_v19 = vadd.f32 %v5683_v18, %v5682_v53  ;;  %v5685_v6 = vpop.f32.mrb[94].mxu1 }
0x110e   :  { %v4366_v46 = vmul.f32 1.442695, %v4365_v54  ;;  %v5686_v4 = vpop.f32.mrb[95].mxu1 }
0x110f   :  { %v4203_v63 = vadd.f32 %v5684_v19, %v4163_v60 }
0x1110   :  { %6420 = vpow2.f32 %v4366_v46 }
0x1111   :  { %v8111_v41 = vadd.f32 %v4203_v63, %v7576_v11 }
0x1112   :  { %v6419_v58 = vpop.eup %6418 }
0x1113   :  { %v4471_v16 = vpop.xlane.xlu0 %4470  ;;  %v4261_v9 = vsel %vm1282_vm3, %v6419_v58, 0.0  ;;  %v4728_v44 = vmul.f32 %v8111_v41, %v8111_v41 }
0x1114   :  { %v4472_v61 = vsub.f32 %v4468_v21, %v4471_v16  ;;  %4262 = vadd.xlane.f32.xlu0 %v4261_v9 }
0x1116   :  { %v4473_v27 = vmul.f32 1.442695, %v4472_v61 }
0x1118   :  { %6422 = vpow2.f32 %v4473_v27 }
0x111a   :  { %v6421_v8 = vpop.eup %6420 }
0x111b   :  { %v4578_v14 = vpop.xlane.xlu1 %4577  ;;  %v4368_v15 = vsel %vm1282_vm3, %v6421_v8, 0.0 }
0x111c   :  { %v4579_v13 = vsub.f32 %v4575_v57, %v4578_v14  ;;  %4369 = vadd.xlane.f32.xlu1 %v4368_v15 }
0x111e   :  { %v4580_v7 = vmul.f32 1.442695, %v4579_v13 }
0x1120   :  { %6424 = vpow2.f32 %v4580_v7 }
0x1122   :  { %v6423_v31 = vpop.eup %6422 }
0x1123   :  { %v4475_v40 = vsel %vm1282_vm3, %v6423_v31, 0.0 }
0x1124   :  { %4476 = vadd.xlane.f32.xlu0 %v4475_v40  ;;  %v6342_v40 = vld [vmem:[%s8306_s22] sm:$0xff]  }
0x1128   :  { %4722 = vadd.xlane.f32.xlu0 %v8111_v41 }
0x112a   :  { %v6425_v42 = vpop.eup %6424 }
0x112b   :  { %v4582_v45 = vsel %vm1282_vm3, %v6425_v42, 0.0 }
0x112c   :  { %4583 = vadd.xlane.f32.xlu1 %v4582_v45  ;;  %4730 = vadd.xlane.f32.xlu0 %v4728_v44  ;;  %v6346_v44 = vld [vmem:[%s8306_s22 + $0x20] sm:$0xff]   ;;  %v6347_v45 = vld [vmem:[%s8306_s22 + $0x28] sm:$0xff]  }
0x11a1   :  { %v4263_v47 = vpop.xlane.xlu0 %4262 }
0x11a2   :  { %6426 = vrcp.f32 %v4263_v47  ;;  %v6348_v47 = vld [vmem:[%s8306_s22 + $0x30] sm:$0xff]  }
0x11a9   :  { %v4370_v21 = vpop.xlane.xlu1 %4369 }
0x11aa   :  { %6428 = vrcp.f32 %v4370_v21  ;;  %v6349_v21 = vld [vmem:[%s8306_s22 + $0x38] sm:$0xff]  }
0x11ac   :  { %v6427_v34 = vpop.eup %6426 }
0x11ad   :  { %v4265_v30 = vmul.f32 %v6427_v34, %v6419_v58  ;;  %v6350_v34 = vld [vmem:[%s8307_s24] sm:$0xff]  }
0x11af   :  { %v4266_v11 = vpack.c.bf16 %v4265_v30, %v4265_v30  ;;  %v6352_v30 = vld [vmem:[%s8307_s24 + $0x10] sm:$0xff]  }
0x11b1   :  { %5968 = vmatmul.mubr.msk.bf16.vlgmr.msra.gmra.mrb[96].mxu1 %vm1282_vm3, %v4266_v11  ;;  %v4477_v52 = vpop.xlane.xlu0 %4476  ;;  %v6353_v11 = vld [vmem:[%s8307_s24 + $0x18] sm:$0xff]  }
0x11b2   :  { %5978 = vmatpush3.bf16.msra.mxu1 %v4380_v36  ;;  %6430 = vrcp.f32 %v4477_v52  ;;  %5979 = vmatprep.mubr.msk.bf16.mxu1 %vm6443_vm0, %v6442_v0  ;;  %v6354_v36 = vld [vmem:[%s8307_s24 + $0x20] sm:$0xff]   ;;  %v6355_v52 = vld [vmem:[%s8307_s24 + $0x28] sm:$0xff]  }
0x11b3   :  { %5989 = vmatprep.subr.bf16.mxu1 %v6442_v0 }
0x11b4   :  { %v6429_v57 = vpop.eup %6428 }
0x11b5   :  { %v4372_v22 = vmul.f32 %v6429_v57, %v6421_v8  ;;  %v4723_v57 = vpop.xlane.xlu0 %4722 }
0x11b7   :  { %v4373_v24 = vpack.c.bf16 %v4372_v22, %v4372_v22  ;;  %v4726_v22 = vmul.f32 0.015625, %v4723_v57 }
0x11b9   :  { %5980 = vmatmul.mubr.msk.bf16.vlgmr.msra.gmra.mrb[100].mxu1 %vm1282_vm3, %v4373_v24  ;;  %v4584_v10 = vpop.xlane.xlu1 %4583  ;;  %v4731_v3 = vpop.xlane.xlu0 %4730 }
0x11ba   :  { %5990 = vmatpush3.bf16.msra.mxu1 %v4487_v28  ;;  %6432 = vrcp.f32 %v4584_v10  ;;  %5991 = vmatprep.mubr.msk.bf16.mxu1 %vm6443_vm0, %v6442_v0  ;;  %v4734_v24 = vmul.f32 0.015625, %v4731_v3  ;;  %v4736_v28 = vmul.f32 %v4726_v22, %v4726_v22 }
0x11bb   :  { %6001 = vmatprep.subr.bf16.mxu1 %v6442_v0 }
0x11bc   :  { %v6431_v25 = vpop.eup %6430  ;;  %v4738_v10 = vsub.f32 %v4734_v24, %v4736_v28 }
0x11bd   :  { %v4479_v49 = vmul.f32 %v6431_v25, %v6423_v31 }
0x11be   :  { %v4740_v25 = vmax.f32 %v4738_v10, 0.0 }
0x11bf   :  { %v4480_v50 = vpack.c.bf16 %v4479_v49, %v4479_v49 }
0x11c1   :  { %5992 = vmatmul.mubr.msk.bf16.vlgmr.msra.gmra.mrb[104].mxu1 %vm1282_vm3, %v4480_v50  ;;  %v4744_v50 = vadd.f32 1e-05, %v4740_v25 }
0x11c2   :  { %6002 = vmatpush3.bf16.msra.mxu1 %v4594_v20  ;;  %6003 = vmatprep.mubr.msk.bf16.mxu1 %vm6443_vm0, %v6442_v0 }
0x11c3   :  { %5726 = vmatprep.subr.bf16.mxu1 %v7956_v59  ;;  %6434 = vrsqrt.f32 %v4744_v50 }
0x11c4   :  { %v6433_v53 = vpop.eup %6432 }
0x11c5   :  { %v4586_v54 = vmul.f32 %v6433_v53, %v6425_v42  ;;  %v6345_v42 = vld [vmem:[%s8306_s22 + $0x18] sm:$0xff]  }
0x11c7   :  { %v4587_v18 = vpack.c.bf16 %v4586_v54, %v4586_v54 }
0x11c9   :  { %6004 = vmatmul.mubr.msk.bf16.vlgmr.msra.gmra.mrb[108].mxu1 %vm1282_vm3, %v4587_v18 }
0x11ca   :  { %5727 = vmatpush3.bf16.msra.mxu1 %v7967_v62 }
0x11cb   :  { %5728 = vmatprep.subr.bf16.mxu1 %v7972_v35 }
0x11ce   :  { %5729 = vmatpush3.bf16.msra.mxu1 %v7979_v37 }
0x11cf   :  { %5730 = vmatprep.subr.bf16.mxu1 %v7985_v38 }
0x11d2   :  { %5731 = vmatpush3.bf16.msra.mxu1 %v7991_v39 }
0x11d3   :  { %5732 = vmatprep.subr.bf16.mxu1 %v7997_v55 }
0x11d6   :  { %5733 = vmatpush3.bf16.msra.mxu1 %v8003_v56 }
0x11d7   :  { %5734 = vmatprep.subr.bf16.mxu1 %v8009_v32 }
0x11da   :  { %5735 = vmatpush3.bf16.msra.mxu1 %v8015_v17 }
0x11db   :  { %5736 = vmatprep.subr.bf16.mxu1 %v8021_v26 }
0x11de   :  { %5737 = vmatpush3.bf16.msra.mxu1 %v8042_v5 }
0x11df   :  { %5738 = vmatprep.subr.bf16.mxu1 %v8050_v51 }
0x11e2   :  { %5739 = vmatpush3.bf16.msra.mxu1 %v8055_v2 }
0x11e3   :  { %5740 = vmatprep.subr.bf16.mxu1 %v8060_v23 }
0x11e6   :  { %5741 = vmatpush3.bf16.msra.mxu1 %v8071_v1 }
0x11e7   :  { %6027 = vmatprep.subr.bf16.mxu1 %v6442_v0 }
0x1284   :  { %v4309_v29 = vpop.f32.mrb[96].mxu1 }
0x1285   :  { %v5969_v59 = vpop.f32.mrb[97].mxu1  ;;  %v4636_v55 = vpack.c.bf16 %v4309_v29, %v4309_v29 }
0x1286   :  { %v4312_v62 = vpop.f32.mrb[98].mxu1 }
0x1287   :  { %v5970_v35 = vpop.f32.mrb[99].mxu1  ;;  %v6435_v62 = vpop.eup %6434 }
0x1288   :  { %v4742_v35 = vsub.f32 %v8111_v41, %v4726_v22  ;;  %v6356_v41 = vld [vmem:[%s8307_s24 + $0x30] sm:$0xff]  }
0x128c   :  { %v4416_v37 = vpop.f32.mrb[100].mxu1 }
0x128d   :  { %v4637_v38 = vpack.c.bf16 %v4416_v37, %v4416_v37  ;;  %v5981_v39 = vpop.f32.mrb[101].mxu1  ;;  %v4748_v37 = vmul.f32 %v6435_v62, %v4742_v35 }
0x128e   :  { %v4419_v56 = vpop.f32.mrb[102].mxu1 }
0x128f   :  { %v5982_v32 = vpop.f32.mrb[103].mxu1  ;;  %4672 = vmatprep.mubr.bf16.mxu0 %v4637_v38  ;;  %v5459_v38 = vld [vmem:[%s8308_s18] ss:$0 sm:$0xff] }
0x1290   :  { %4673 = vmatmul.mubr.bf16.vlgmr.msra.gmra.mrb[96].mxu0 %v4636_v55  ;;  %v4757_v32 = vmul.f32 %v5459_v38, %v4748_v37 }
0x1291   :  { %6023 = vmatprep.mubr.msk.bf16.mxu0 %vm6443_vm0, %v6442_v0  ;;  %6008 = vmatpush3.bf16.msra.mxu0 %v6342_v40 }
0x1292   :  { %6009 = vmatprep.subr.bf16.mxu0 %v6442_v0 }
0x1294   :  { %v4523_v17 = vpop.f32.mrb[104].mxu1 }
0x1295   :  { %v5993_v26 = vpop.f32.mrb[105].mxu1  ;;  %v4638_v60 = vpack.c.bf16 %v4523_v17, %v4523_v17  ;;  %v5460_v17 = vld [vmem:[%s8309_s19] ss:$0 sm:$0xff] }
0x1296   :  { %v4526_v5 = vpop.f32.mrb[106].mxu1 }
0x1297   :  { %v5994_v51 = vpop.f32.mrb[107].mxu1  ;;  %v4766_v5 = vadd.f32 %v5460_v17, %v4757_v32 }
0x129c   :  { %v4630_v2 = vpop.f32.mrb[108].mxu1 }
0x129d   :  { %v4639_v23 = vpack.c.bf16 %v4630_v2, %v4630_v2  ;;  %v6005_v1 = vpop.f32.mrb[109].mxu1 }
0x129e   :  { %v4633_v19 = vpop.f32.mrb[110].mxu1  ;;  %v5461_v1 = vld [vmem:[%s8310_s23] ss:$0 sm:$0xff] }
0x129f   :  { %v6006_v6 = vpop.f32.mrb[111].mxu1  ;;  %4712 = vmatprep.mubr.bf16.mxu1 %v4639_v23  ;;  %v6357_v23 = vld [vmem:[%s8307_s24 + $0x38] sm:$0xff]  }
0x12a0   :  { %4713 = vmatmul.mubr.bf16.vlgmr.msra.gmra.mrb[112].mxu1 %v4638_v60 }
0x12a1   :  { %6043 = vmatprep.mubr.msk.bf16.mxu1 %vm6443_vm0, %v6442_v0  ;;  %6028 = vmatpush3.bf16.msra.mxu1 %v6350_v34  ;;  %v6363_v34 = vld [vmem:[%s8312_s26 + $0x28] sm:$0xff]  }
0x12a2   :  { %6029 = vmatprep.subr.bf16.mxu1 %v6442_v0 }
0x12a5   :  { %6030 = vmatpush3.bf16.msra.mxu1 %v6351_v33  ;;  %v6364_v33 = vld [vmem:[%s8312_s26 + $0x30] sm:$0xff]  }
0x12a6   :  { %6031 = vmatprep.subr.bf16.mxu1 %v6442_v0 }
0x12a9   :  { %6032 = vmatpush3.bf16.msra.mxu1 %v6352_v30  ;;  %v6365_v30 = vld [vmem:[%s8312_s26 + $0x38] sm:$0xff]  }
0x12aa   :  { %6033 = vmatprep.subr.bf16.mxu1 %v6442_v0 }
0x12ad   :  { %6034 = vmatpush3.bf16.msra.mxu1 %v6353_v11 }
0x12ae   :  { %6035 = vmatprep.subr.bf16.mxu1 %v6442_v0 }
0x12b1   :  { %6036 = vmatpush3.bf16.msra.mxu1 %v6354_v36 }
0x12b2   :  { %6037 = vmatprep.subr.bf16.mxu1 %v6442_v0 }
0x12b5   :  { %6038 = vmatpush3.bf16.msra.mxu1 %v6355_v52 }
0x12b6   :  { %6039 = vmatprep.subr.bf16.mxu1 %v6442_v0 }
0x12b9   :  { %6040 = vmatpush3.bf16.msra.mxu1 %v6356_v41 }
0x12ba   :  { %6041 = vmatprep.subr.bf16.mxu1 %v6442_v0 }
0x12bd   :  { %6042 = vmatpush3.bf16.msra.mxu1 %v6357_v23 }
0x1363   :  { %v5720_v46 = vpop.f32.mrb[96].mxu0 }
0x1364   :  { %v5721_v4 = vpop.f32.mrb[97].mxu0 }
0x1365   :  { %v5722_v63 = vadd.f32 %v5721_v4, %v5720_v46  ;;  %v5723_v58 = vpop.f32.mrb[98].mxu0 }
0x1366   :  { %v5724_v16 = vpop.f32.mrb[99].mxu0 }
0x1367   :  { %v4675_v27 = vadd.f32 %v5722_v63, %v8104_v48  ;;  %v6343_v48 = vld [vmem:[%s8306_s22 + $0x8] sm:$0xff]  }
0x1368   :  { %6010 = vmatpush3.bf16.msra.mxu0 %v6343_v48 }
0x1369   :  { %6011 = vmatprep.subr.bf16.mxu0 %v6442_v0 }
0x1373   :  { %v5742_v9 = vpop.f32.mrb[112].mxu1 }
0x1374   :  { %v5743_v61 = vpop.f32.mrb[113].mxu1 }
0x1375   :  { %v5744_v8 = vadd.f32 %v5743_v61, %v5742_v9  ;;  %v5745_v14 = vpop.f32.mrb[114].mxu1  ;;  %v5470_v61 = vld [vmem:[%s8311_s25] ss:$0 sm:$0xff] }
0x1376   :  { %v5746_v15 = vpop.f32.mrb[115].mxu1 }
0x1377   :  { %v4715_v13 = vadd.f32 %v5744_v8, %v4675_v27 }
0x1379   :  { %v8158_v7 = vadd.f32 %v4715_v13, %v7578_v12  ;;  %v6344_v12 = vld [vmem:[%s8306_s22 + $0x10] sm:$0xff]  }
0x137a   :  { %6012 = vmatpush3.bf16.msra.mxu0 %v6344_v12 }
0x137b   :  { %4724 = vadd.xlane.f32.xlu1 %v8158_v7  ;;  %v4729_v31 = vmul.f32 %v8158_v7, %v8158_v7  ;;  %6013 = vmatprep.subr.bf16.mxu0 %v6442_v0 }
0x137e   :  { %6014 = vmatpush3.bf16.msra.mxu0 %v6345_v42  ;;  %v6358_v42 = vld [vmem:[%s8312_s26] sm:$0xff]  }
0x137f   :  { %4732 = vadd.xlane.f32.xlu1 %v4729_v31  ;;  %6015 = vmatprep.subr.bf16.mxu0 %v6442_v0 }
0x1382   :  { %6016 = vmatpush3.bf16.msra.mxu0 %v6346_v44  ;;  %v6359_v44 = vld [vmem:[%s8312_s26 + $0x8] sm:$0xff]  }
0x1383   :  { %6017 = vmatprep.subr.bf16.mxu0 %v6442_v0 }
0x1386   :  { %6018 = vmatpush3.bf16.msra.mxu0 %v6347_v45  ;;  %v6360_v45 = vld [vmem:[%s8312_s26 + $0x10] sm:$0xff]  }
0x1387   :  { %6019 = vmatprep.subr.bf16.mxu0 %v6442_v0 }
0x138a   :  { %6020 = vmatpush3.bf16.msra.mxu0 %v6348_v47  ;;  %v6361_v47 = vld [vmem:[%s8312_s26 + $0x18] sm:$0xff]  }
0x138b   :  { %6021 = vmatprep.subr.bf16.mxu0 %v6442_v0 }
0x138e   :  { %6022 = vmatpush3.bf16.msra.mxu0 %v6349_v21  ;;  %v6362_v21 = vld [vmem:[%s8312_s26 + $0x20] sm:$0xff]  }
0x138f   :  { %6047 = vmatprep.subr.bf16.mxu0 %v6442_v0 }
0x1408   :  { %v4725_v43 = vpop.xlane.xlu1 %4724 }
0x1409   :  { %v4727_v49 = vmul.f32 0.015625, %v4725_v43 }
0x140b   :  { %v4737_v53 = vmul.f32 %v4727_v49, %v4727_v49  ;;  %v4743_v39 = vsub.f32 %v8158_v7, %v4727_v49 }
0x140c   :  { %v4733_v20 = vpop.xlane.xlu1 %4732 }
0x140d   :  { %v4735_v54 = vmul.f32 0.015625, %v4733_v20 }
0x140f   :  { %v4739_v18 = vsub.f32 %v4735_v54, %v4737_v53 }
0x1411   :  { %v4741_v29 = vmax.f32 %v4739_v18, 0.0 }
0x1413   :  { %v4745_v59 = vadd.f32 1e-05, %v4741_v29  ;;  %v5479_v29 = vld [vmem:[%s8313_s20] ss:$0 sm:$0xff] }
0x1415   :  { %6436 = vrsqrt.f32 %v4745_v59 }
0x141f   :  { %v6437_v55 = vpop.eup %6436 }
0x1420   :  { %v4749_v56 = vmul.f32 %v6437_v55, %v4743_v39  ;;  %v5480_v39 = vld [vmem:[%s8314_s21] ss:$0 sm:$0xff] }
0x1422   :  { %v4758_v26 = vmul.f32 %v5459_v38, %v4749_v56 }
0x1424   :  { %v4767_v51 = vadd.f32 %v5460_v17, %v4758_v26  ;;  %v5481_v26 = vld [vmem:[%s8315_s27] ss:$0 sm:$0xff] }
0x1426   :  { %v4768_v2 = vpack.c.bf16 %v4767_v51, %v4766_v5 }
0x1428   :  { %6024 = vmatmul.mubr.bf16.vlgmr.msra.gmra.mrb[100].mxu0 %v4768_v2 }
0x1429   :  { %6063 = vmatprep.mubr.msk.bf16.mxu0 %vm6443_vm0, %v6442_v0  ;;  %6048 = vmatpush3.bf16.msra.mxu0 %v6358_v42 }
0x142a   :  { %6049 = vmatprep.subr.bf16.mxu0 %v6442_v0 }
0x142d   :  { %6050 = vmatpush3.bf16.msra.mxu0 %v6359_v44 }
0x142e   :  { %6051 = vmatprep.subr.bf16.mxu0 %v6442_v0 }
0x1431   :  { %6052 = vmatpush3.bf16.msra.mxu0 %v6360_v45 }
0x1432   :  { %6053 = vmatprep.subr.bf16.mxu0 %v6442_v0 }
0x1435   :  { %6054 = vmatpush3.bf16.msra.mxu0 %v6361_v47 }
0x1436   :  { %6055 = vmatprep.subr.bf16.mxu0 %v6442_v0 }
0x1439   :  { %6056 = vmatpush3.bf16.msra.mxu0 %v6362_v21 }
0x143a   :  { %6057 = vmatprep.subr.bf16.mxu0 %v6442_v0 }
0x143d   :  { %6058 = vmatpush3.bf16.msra.mxu0 %v6363_v34 }
0x143e   :  { %6059 = vmatprep.subr.bf16.mxu0 %v6442_v0 }
0x1441   :  { %6060 = vmatpush3.bf16.msra.mxu0 %v6364_v33 }
0x1442   :  { %6061 = vmatprep.subr.bf16.mxu0 %v6442_v0 }
0x1445   :  { %6062 = vmatpush3.bf16.msra.mxu0 %v6365_v30 }
0x14fb   :  { %v4874_v60 = vpop.f32.mrb[100].mxu0 }
0x14fc   :  { %v4875_v19 = vadd.f32 %v5461_v1, %v4874_v60  ;;  %v6025_v6 = vpop.f32.mrb[101].mxu0 }
0x14fd   :  { %v4877_v46 = vpop.f32.mrb[102].mxu0 }
0x14fe   :  { %v4878_v4 = vadd.f32 %v5461_v1, %v4877_v46  ;;  %v6026_v63 = vpop.f32.mrb[103].mxu0  ;;  %v4881_v58 = vmax.f32 %v4875_v19, 0.0 }
0x1500   :  { %v4882_v16 = vmax.f32 %v4878_v4, 0.0 }
0x1502   :  { %v4883_v9 = vpack.c.bf16 %v4882_v16, %v4881_v58 }
0x1504   :  { %6044 = vmatmul.mubr.bf16.vlgmr.msra.gmra.mrb[116].mxu1 %v4883_v9 }
0x15d7   :  { %v4989_v27 = vpop.f32.mrb[116].mxu1 }
0x15d8   :  { %v4990_v8 = vadd.f32 %v5470_v61, %v4989_v27  ;;  %v6045_v14 = vpop.f32.mrb[117].mxu1 }
0x15d9   :  { %v4992_v15 = vpop.f32.mrb[118].mxu1 }
0x15da   :  { %v4996_v13 = vadd.f32 %v4990_v8, %v4766_v5  ;;  %v4993_v7 = vadd.f32 %v5470_v61, %v4992_v15  ;;  %v6046_v31 = vpop.f32.mrb[119].mxu1 }
0x15dc   :  { %v4997_v40 = vadd.f32 %v4993_v7, %v4767_v51  ;;  %4998 = vadd.xlane.f32.xlu0 %v4996_v13  ;;  %v5004_v48 = vmul.f32 %v4996_v13, %v4996_v13 }
0x15de   :  { %5000 = vadd.xlane.f32.xlu1 %v4997_v40  ;;  %v5005_v12 = vmul.f32 %v4997_v40, %v4997_v40 }
0x15e0   :  { %5006 = vadd.xlane.f32.xlu0 %v5004_v48 }
0x15e2   :  { %5008 = vadd.xlane.f32.xlu1 %v5005_v12 }
0x1669   :  { %v4999_v11 = vpop.xlane.xlu0 %4998 }
0x166a   :  { %v5002_v36 = vmul.f32 0.015625, %v4999_v11 }
0x166b   :  { %v5001_v52 = vpop.xlane.xlu1 %5000 }
0x166c   :  { %v5003_v57 = vmul.f32 0.015625, %v5001_v52  ;;  %v5012_v22 = vmul.f32 %v5002_v36, %v5002_v36  ;;  %v5018_v0 = vsub.f32 %v4996_v13, %v5002_v36 }
0x166d   :  { %v5007_v3 = vpop.xlane.xlu0 %5006 }
0x166e   :  { %v5010_v24 = vmul.f32 0.015625, %v5007_v3  ;;  %v5013_v10 = vmul.f32 %v5003_v57, %v5003_v57  ;;  %v5019_v59 = vsub.f32 %v4997_v40, %v5003_v57 }
0x166f   :  { %v5009_v28 = vpop.xlane.xlu1 %5008 }
0x1670   :  { %v5014_v25 = vsub.f32 %v5010_v24, %v5012_v22  ;;  %v5011_v43 = vmul.f32 0.015625, %v5009_v28 }
0x1672   :  { %v5016_v49 = vmax.f32 %v5014_v25, 0.0  ;;  %v5015_v50 = vsub.f32 %v5011_v43, %v5013_v10 }
0x1674   :  { %v5020_v20 = vadd.f32 1e-05, %v5016_v49  ;;  %v5017_v53 = vmax.f32 %v5015_v50, 0.0 }
0x1676   :  { %6438 = vrsqrt.f32 %v5020_v20  ;;  %v5021_v54 = vadd.f32 1e-05, %v5017_v53 }
0x1678   :  { %6440 = vrsqrt.f32 %v5021_v54 }
0x1680   :  { %v6439_v18 = vpop.eup %6438 }
0x1681   :  { %v5024_v62 = vmul.f32 %v6439_v18, %v5018_v0 }
0x1682   :  { %v6441_v35 = vpop.eup %6440 }
0x1683   :  { %v5025_v37 = vmul.f32 %v6441_v35, %v5019_v59  ;;  %v5033_v38 = vmul.f32 %v5479_v29, %v5024_v62 }
0x1685   :  { %v5034_v55 = vmul.f32 %v5479_v29, %v5025_v37  ;;  %v5042_v56 = vadd.f32 %v5480_v39, %v5033_v38 }
0x1687   :  { %v5043_v32 = vadd.f32 %v5480_v39, %v5034_v55 }
0x1689   :  { %v5044_v17 = vpack.c.bf16 %v5043_v32, %v5042_v56 }
0x168b   :  { %6064 = vmatmul.mubr.bf16.vlgmr.msra.gmra.mrb[104].mxu0 %v5044_v17 }
0x175e   :  { %v5150_v5 = vpop.f32.mrb[104].mxu0 }
0x175f   :  { %v5151_v51 = vadd.f32 %v5481_v26, %v5150_v5  ;;  %v6065_v2 = vpop.f32.mrb[105].mxu0 }
0x1760   :  { %v5153_v41 = vpop.f32.mrb[106].mxu0 }
0x1761   :  { %v5157_v23 = vmax.f32 %v5151_v51, 0.0  ;;  %v5154_v1 = vadd.f32 %v5481_v26, %v5153_v41  ;;  %v6066_v60 = vpop.f32.mrb[107].mxu0 }
0x1763   :  { %5159 = vst [vmem:[%s8316_s28] sm:$0xff] %v5157_v23  ;;  %v5158_v19 = vmax.f32 %v5154_v1, 0.0 }
0x1765   :  { %5160 = vst [vmem:[%s8316_s28 + $0x8] sm:$0xff] %v5158_v19 }

// kernel: _lambda_.3
= control target key start
LH: loop header
LB: loop body
LE: loop exit
PB: predicated region body
PF: predicated region fallthrough
CT: control target
= control target key end

     0   :  { %s8662_s0 = inlined_call_operand.vmem [shape: f32[2,8,128], index: 0, kind: input, shape index: {}]   ;;  %s8663_s1 = inlined_call_operand.vmem [shape: f32[2,8,128], index: 1, kind: input, shape index: {}]   ;;  %s8664_s2 = inlined_call_operand.vmem [shape: bf16[128,128], index: 2, kind: input, shape index: {}]   ;;  %s8665_s3 = inlined_call_operand.hbm [shape: f32[1,128], index: 3, kind: input, shape index: {}]   ;;  %s8666_s4 = inlined_call_operand.hbm [shape: bf16[128,128], index: 4, kind: input, shape index: {}]   ;;  %s8667_s5 = inlined_call_operand.hbm [shape: f32[1,128], index: 5, kind: input, shape index: {}]   ;;  %s8668_s6 = inlined_call_operand.hbm [shape: bf16[128,1536], index: 6, kind: input, shape index: {}]   ;;  %s8669_s7 = inlined_call_operand.hbm [shape: f32[1,1536], index: 7, kind: input, shape index: {}]   ;;  %s8670_s8 = inlined_call_operand.vmem [shape: bf16[512,128], index: 8, kind: input, shape index: {}]   ;;  %s8671_s9 = inlined_call_operand.hbm [shape: f32[1,128], index: 9, kind: input, shape index: {}]   ;;  %s8672_s10 = inlined_call_operand.hbm [shape: bf16[128,512], index: 10, kind: input, shape index: {}]   ;;  %s8673_s11 = inlined_call_operand.vmem [shape: f32[1,512], index: 11, kind: input, shape index: {}]   ;;  %s8674_s12 = inlined_call_operand.hbm [shape: bf16[128,1024], index: 12, kind: input, shape index: {}]   ;;  %s8675_s13 = inlined_call_operand.hbm [shape: f32[1,1024], index: 13, kind: input, shape index: {}]   ;;  %s8676_s14 = inlined_call_operand.hbm [shape: bf16[512,128], index: 14, kind: input, shape index: {}]   ;;  %s8677_s15 = inlined_call_operand.hbm [shape: f32[1,128], index: 15, kind: input, shape index: {}]   ;;  %s8678_s16 = inlined_call_operand.hbm [shape: f32[1,128], index: 16, kind: input, shape index: {}]   ;;  %s8679_s17 = inlined_call_operand.hbm [shape: f32[1,128], index: 17, kind: input, shape index: {}]   ;;  %s8680_s18 = inlined_call_operand.hbm [shape: f32[1,128], index: 18, kind: input, shape index: {}]   ;;  %s8681_s19 = inlined_call_operand.hbm [shape: f32[1,128], index: 19, kind: input, shape index: {}]   ;;  %s8682_s20 = inlined_call_operand.hbm [shape: f32[1,128], index: 20, kind: input, shape index: {}]   ;;  %s8683_s21 = inlined_call_operand.hbm [shape: f32[1,128], index: 21, kind: input, shape index: {}]   ;;  %s8684_s22 = inlined_call_operand.hbm [shape: bf16[128,128], index: 22, kind: input, shape index: {}]   ;;  %s8685_s23 = inlined_call_operand.hbm [shape: f32[1,128], index: 23, kind: input, shape index: {}]   ;;  %s8686_s24 = inlined_call_operand.hbm [shape: bf16[128,128], index: 24, kind: input, shape index: {}]   ;;  %s8687_s25 = inlined_call_operand.hbm [shape: f32[1,128], index: 25, kind: input, shape index: {}]   ;;  %s8688_s26 = inlined_call_operand.hbm [shape: bf16[128,128], index: 26, kind: input, shape index: {}]   ;;  %s8689_s27 = inlined_call_operand.hbm [shape: f32[1,128], index: 27, kind: input, shape index: {}]   ;;  %s8690_s28 = inlined_call_operand.vmem [shape: f32[2,8,128], index: 28, kind: output, shape index: {}]  }
   0x1   :  { %8718 = sst [smem:[#allocation49_spill]] %s8662_s0 }
   0x2   :  { %8719 = sst [smem:[#allocation50_spill]] %s8663_s1 }
   0x3   :  { %8720 = sst [smem:[#allocation51_spill]] %s8664_s2 }
   0x4   :  { %8721 = sst [smem:[#allocation52_spill]] %s8665_s3 }
   0x5   :  { %8722 = sst [smem:[#allocation53_spill]] %s8666_s4 }
   0x6   :  { %8723 = sst [smem:[#allocation54_spill]] %s8667_s5 }
   0x7   :  { %8724 = sst [smem:[#allocation55_spill]] %s8668_s6 }
   0x8   :  { %8725 = sst [smem:[#allocation56_spill]] %s8669_s7 }
   0x9   :  { %8726 = sst [smem:[#allocation57_spill]] %s8670_s8 }
   0xa   :  { %8727 = sst [smem:[#allocation58_spill]] %s8671_s9 }
   0xb   :  { %8728 = sst [smem:[#allocation59_spill]] %s8672_s10 }
   0xc   :  { %8729 = sst [smem:[#allocation60_spill]] %s8673_s11 }
   0xd   :  { %8730 = sst [smem:[#allocation61_spill]] %s8674_s12 }
   0xe   :  { %8731 = sst [smem:[#allocation62_spill]] %s8687_s25 }
   0xf   :  { %8732 = sst [smem:[#allocation63_spill]] %s8689_s27 }
  0x10   :  { %8733 = sst [smem:[#allocation64_spill]] %s8690_s28 }
  0x11   :  { %33 = vsyncpa [#allocation3], 0 }
  0x12   :  { %34 = vsyncpa [#allocation5], 0 }
  0x13   :  { %35 = vsyncpa [#allocation8], 0 }
  0x14   :  { %36 = vsyncpa [#allocation11], 0 }
  0x15   :  { %37 = vsyncpa [#allocation14], 0 }
  0x16   :  { %38 = vsyncpa [#allocation17], 0 }
  0x17   :  { %39 = vsyncpa [#allocation20], 0 }
  0x18   :  { %40 = vsyncpa [#allocation23], 0 }
  0x19   :  { %41 = vsyncpa [#allocation26], 0 }
  0x1a   :  { %42 = vsyncpa [#allocation29], 0 }
  0x1b   :  { %43 = vsyncpa [#allocation32], 0 }
  0x1c   :  { %44 = vsyncpa [#allocation35], 0  ;;  %s7296_s8 = smov [#allocation4]   ;;  %s8734_s3 = sld [smem:[#allocation53_spill]] }
  0x1d   :  { %s66_s5 = sshll.u32 %s7296_s8, 4  ;;  %s67_s5 = int_to_ptr.vmem [resolvable:$true] %s66_s5 }
  0x22   :  { %s6766_s6 = scalar_lea.hbm %s8734_s3, 1024 }
  0x23   :  { %p6767_p0 = scmp.ne.s32.totalorder %s8734_s3, %s6766_s6  ;;  %p6770_p1 = scmp.lt.u32.totalorder %s6766_s6, %s8734_s3 }
  0x25   :  { %p6772_p2 = pnand %p6770_p1, %p6767_p0 }
  0x27   :  { %6775 = shalt.err (!%p6772_p2)
}
  0x28   :  { %s6776_s2 = scalar_lea.vmem %s67_s5, 1024  ;;  %p6781_p4 = scmp.lt.s32.totalorder %s67_s5, %s67_s5 }
  0x29   :  { %p6777_p3 = scmp.ne.s32.totalorder %s67_s5, %s6776_s2  ;;  %p6782_p5 = scmp.lt.s32.totalorder %s6776_s2, %s6776_s2 }
  0x2b   :  { %p6783_p6 = por %p6782_p5, %p6781_p4 }
  0x2d   :  { %p6784_p7 = pnand %p6783_p6, %p6777_p3 }
  0x2f   :  { %6787 = shalt.err (!%p6784_p7)
}
  0x30   :  { %s8705_s7 = smov 64   ;;  %s8707_s12 = smov 4  }
  0x31   :  { %72 = dma.hbm_to_vmem [thread:$0]  %s8734_s3, 1024, %s67_s5, [#allocation5], %s8705_s7, %s8705_s7, %s8707_s12  }
  0x32   :  { %s7299_s8 = smov [#allocation7]   ;;  %s8735_s10 = sld [smem:[#allocation55_spill]] }
  0x33   :  { %s88_s9 = sshll.u32 %s7299_s8, 4  ;;  %s89_s9 = int_to_ptr.vmem [resolvable:$true] %s88_s9 }
  0x38   :  { %s6788_s0 = scalar_lea.hbm %s8735_s10, 12288 }
  0x39   :  { %p6789_p8 = scmp.ne.s32.totalorder %s8735_s10, %s6788_s0  ;;  %p6792_p9 = scmp.lt.u32.totalorder %s6788_s0, %s8735_s10 }
  0x3b   :  { %p6794_p10 = pnand %p6792_p9, %p6789_p8 }
  0x3d   :  { %6797 = shalt.err (!%p6794_p10)
}
  0x3e   :  { %s6798_s27 = scalar_lea.vmem %s89_s9, 12288  ;;  %p6803_p12 = scmp.lt.s32.totalorder %s89_s9, %s89_s9 }
  0x3f   :  { %p6799_p11 = scmp.ne.s32.totalorder %s89_s9, %s6798_s27  ;;  %p6804_p13 = scmp.lt.s32.totalorder %s6798_s27, %s6798_s27 }
  0x41   :  { %p6805_p0 = por %p6804_p13, %p6803_p12 }
  0x43   :  { %p6806_p1 = pnand %p6805_p0, %p6799_p11 }
  0x45   :  { %6809 = shalt.err (!%p6806_p1)
}
  0x46   :  { %s7300_s5 = smov 768   ;;  %s7301_s3 = smov 48  }
  0x47   :  { %94 = dma.hbm_to_vmem [thread:$0]  %s8735_s10, 12288, %s89_s9, [#allocation8], %s7300_s5, %s7300_s5, %s7301_s3  }
  0x48   :  { %s7302_s8 = smov [#allocation10]   ;;  %s7303_s6 = smov [#allocation13]  }
  0x49   :  { %s113_s30 = sshll.u32 %s7302_s8, 4  ;;  %s136_s28 = sshll.u32 %s7303_s6, 4  ;;  %s114_s30 = int_to_ptr.vmem [resolvable:$true] %s113_s30  ;;  %s7502_s28 = int_to_ptr.vmem [resolvable:$true] %s136_s28 }
  0x4a   :  { %s8736_s29 = sld [smem:[#allocation58_spill]] }
  0x50   :  { %s6810_s27 = scalar_lea.hbm %s8736_s29, 16 }
  0x51   :  { %p6811_p2 = scmp.ne.s32.totalorder %s8736_s29, %s6810_s27  ;;  %p6814_p3 = scmp.lt.u32.totalorder %s6810_s27, %s8736_s29 }
  0x53   :  { %p6816_p4 = pnand %p6814_p3, %p6811_p2 }
  0x55   :  { %6819 = shalt.err (!%p6816_p4)
}
  0x56   :  { %s6820_s9 = scalar_lea.vmem %s114_s30, 16  ;;  %s6824_s10 = scalar_lea.vmem %s114_s30, 32 }
  0x57   :  { %p6821_p5 = scmp.ne.s32.totalorder %s114_s30, %s6820_s9  ;;  %p6825_p6 = scmp.lt.s32.totalorder %s114_s30, %s114_s30 }
  0x58   :  { %p6826_p7 = scmp.lt.s32.totalorder %s6824_s10, %s6820_s9 }
  0x5a   :  { %p6827_p8 = por %p6826_p7, %p6825_p6 }
  0x5c   :  { %p6828_p9 = pnand %p6827_p8, %p6821_p5 }
  0x5e   :  { %6831 = shalt.err (!%p6828_p9)
}
  0x5f   :  { %116 = dma.hbm_to_vmem [thread:$0]  %s8736_s29, 16, %s114_s30, [#allocation11]  }
  0x60   :  { %s8737_s4 = sld [smem:[#allocation61_spill]] }
  0x66   :  { %s6832_s8 = scalar_lea.hbm %s8737_s4, 8192 }
  0x67   :  { %p6833_p10 = scmp.ne.s32.totalorder %s8737_s4, %s6832_s8  ;;  %p6836_p11 = scmp.lt.u32.totalorder %s6832_s8, %s8737_s4 }
  0x69   :  { %p6838_p12 = pnand %p6836_p11, %p6833_p10 }
  0x6b   :  { %6841 = shalt.err (!%p6838_p12)
}
  0x6c   :  { %s6842_s11 = scalar_lea.vmem %s7502_s28, 8192  ;;  %p6847_p0 = scmp.lt.s32.totalorder %s7502_s28, %s7502_s28 }
  0x6d   :  { %p6843_p13 = scmp.ne.s32.totalorder %s7502_s28, %s6842_s11  ;;  %p6848_p1 = scmp.lt.s32.totalorder %s6842_s11, %s6842_s11 }
  0x6f   :  { %p6849_p2 = por %p6848_p1, %p6847_p0 }
  0x71   :  { %p6850_p3 = pnand %p6849_p2, %p6843_p13 }
  0x73   :  { %6853 = shalt.err (!%p6850_p3)
}
  0x74   :  { %s7304_s30 = smov 512   ;;  %s7305_s29 = smov 32  }
  0x75   :  { %142 = dma.hbm_to_vmem [thread:$0]  %s8737_s4, 8192, %s7502_s28, [#allocation14], %s7304_s30, %s7304_s30, %s7305_s29  }
  0x76   :  { %s7306_s9 = smov [#allocation16]   ;;  %s7307_s5 = smov [#allocation19]  }
  0x77   :  { %s158_s10 = sshll.u32 %s7306_s9, 4  ;;  %s181_s3 = sshll.u32 %s7307_s5, 4  ;;  %s159_s10 = int_to_ptr.vmem [resolvable:$true] %s158_s10  ;;  %s182_s3 = int_to_ptr.vmem [resolvable:$true] %s181_s3 }
  0x78   :  { %s6854_s8 = scalar_lea.hbm %s8676_s14, 4096 }
  0x79   :  { %p6855_p4 = scmp.ne.s32.totalorder %s8676_s14, %s6854_s8  ;;  %p6858_p5 = scmp.lt.u32.totalorder %s6854_s8, %s8676_s14 }
  0x7b   :  { %p6860_p6 = pnand %p6858_p5, %p6855_p4 }
  0x7d   :  { %6863 = shalt.err (!%p6860_p6)
}
  0x7e   :  { %s6864_s28 = scalar_lea.vmem %s159_s10, 4096  ;;  %p6869_p8 = scmp.lt.s32.totalorder %s159_s10, %s159_s10 }
  0x7f   :  { %p6865_p7 = scmp.ne.s32.totalorder %s159_s10, %s6864_s28  ;;  %p6870_p9 = scmp.lt.s32.totalorder %s6864_s28, %s6864_s28 }
  0x81   :  { %p6871_p10 = por %p6870_p9, %p6869_p8 }
  0x83   :  { %p6872_p11 = pnand %p6871_p10, %p6865_p7 }
  0x85   :  { %6875 = shalt.err (!%p6872_p11)
}
  0x86   :  { %s8738_s4 = smov 4   ;;  %s8739_s11 = smov 64  }
  0x87   :  { %164 = dma.hbm_to_vmem [thread:$0]  %s8676_s14, 4096, %s159_s10, [#allocation17], %s8739_s11, %s8739_s11, %s8738_s4  }
  0x88   :  { %s6876_s9 = scalar_lea.hbm %s8678_s16, 16 }
  0x89   :  { %p6877_p12 = scmp.ne.s32.totalorder %s8678_s16, %s6876_s9  ;;  %p6880_p13 = scmp.lt.u32.totalorder %s6876_s9, %s8678_s16 }
  0x8b   :  { %p6882_p0 = pnand %p6880_p13, %p6877_p12 }
  0x8d   :  { %6885 = shalt.err (!%p6882_p0)
}
  0x8e   :  { %s6886_s25 = scalar_lea.vmem %s182_s3, 16  ;;  %s6890_s12 = scalar_lea.vmem %s182_s3, 32 }
  0x8f   :  { %p6887_p1 = scmp.ne.s32.totalorder %s182_s3, %s6886_s25  ;;  %p6891_p2 = scmp.lt.s32.totalorder %s182_s3, %s182_s3 }
  0x90   :  { %p6892_p3 = scmp.lt.s32.totalorder %s6890_s12, %s6886_s25 }
  0x92   :  { %p6893_p4 = por %p6892_p3, %p6891_p2 }
  0x94   :  { %p6894_p5 = pnand %p6893_p4, %p6887_p1 }
  0x96   :  { %6897 = shalt.err (!%p6894_p5)
}
  0x97   :  { %184 = dma.hbm_to_vmem [thread:$0]  %s8678_s16, 16, %s182_s3, [#allocation20]  }
  0x98   :  { %s7308_s6 = smov [#allocation22]   ;;  %s7309_s28 = smov [#allocation25]  }
  0x99   :  { %s201_s0 = sshll.u32 %s7308_s6, 4  ;;  %s221_s30 = sshll.u32 %s7309_s28, 4  ;;  %s202_s0 = int_to_ptr.vmem [resolvable:$true] %s201_s0  ;;  %s222_s30 = int_to_ptr.vmem [resolvable:$true] %s221_s30 }
  0x9a   :  { %s6898_s2 = scalar_lea.hbm %s8680_s18, 16 }
  0x9b   :  { %p6899_p6 = scmp.ne.s32.totalorder %s8680_s18, %s6898_s2  ;;  %p6902_p7 = scmp.lt.u32.totalorder %s6898_s2, %s8680_s18 }
  0x9d   :  { %p6904_p8 = pnand %p6902_p7, %p6899_p6 }
  0x9f   :  { %6907 = shalt.err (!%p6904_p8)
}
  0xa0   :  { %s6908_s16 = scalar_lea.vmem %s202_s0, 16  ;;  %s6912_s3 = scalar_lea.vmem %s202_s0, 32 }
  0xa1   :  { %p6909_p9 = scmp.ne.s32.totalorder %s202_s0, %s6908_s16  ;;  %p6913_p10 = scmp.lt.s32.totalorder %s202_s0, %s202_s0 }
  0xa2   :  { %p6914_p11 = scmp.lt.s32.totalorder %s6912_s3, %s6908_s16 }
  0xa4   :  { %p6915_p12 = por %p6914_p11, %p6913_p10 }
  0xa6   :  { %p6916_p13 = pnand %p6915_p12, %p6909_p9 }
  0xa8   :  { %6919 = shalt.err (!%p6916_p13)
}
  0xa9   :  { %204 = dma.hbm_to_vmem [thread:$0]  %s8680_s18, 16, %s202_s0, [#allocation23]  }
  0xaa   :  { %s6920_s10 = scalar_lea.hbm %s8682_s20, 16 }
  0xab   :  { %p6921_p0 = scmp.ne.s32.totalorder %s8682_s20, %s6920_s10  ;;  %p6924_p1 = scmp.lt.u32.totalorder %s6920_s10, %s8682_s20 }
  0xad   :  { %p6926_p2 = pnand %p6924_p1, %p6921_p0 }
  0xaf   :  { %6929 = shalt.err (!%p6926_p2)
}
  0xb0   :  { %s6930_s2 = scalar_lea.vmem %s222_s30, 16  ;;  %s6934_s9 = scalar_lea.vmem %s222_s30, 32 }
  0xb1   :  { %p6931_p3 = scmp.ne.s32.totalorder %s222_s30, %s6930_s2  ;;  %p6935_p4 = scmp.lt.s32.totalorder %s222_s30, %s222_s30 }
  0xb2   :  { %p6936_p5 = scmp.lt.s32.totalorder %s6934_s9, %s6930_s2 }
  0xb4   :  { %p6937_p6 = por %p6936_p5, %p6935_p4 }
  0xb6   :  { %p6938_p7 = pnand %p6937_p6, %p6931_p3 }
  0xb8   :  { %6941 = shalt.err (!%p6938_p7)
}
  0xb9   :  { %224 = dma.hbm_to_vmem [thread:$0]  %s8682_s20, 16, %s222_s30, [#allocation26]  }
  0xba   :  { %s7310_s5 = smov [#allocation28]   ;;  %s7311_s1 = smov [#allocation31]  }
  0xbb   :  { %s240_s7 = sshll.u32 %s7310_s5, 4  ;;  %s262_s16 = sshll.u32 %s7311_s1, 4  ;;  %s241_s7 = int_to_ptr.vmem [resolvable:$true] %s240_s7  ;;  %s7584_s16 = int_to_ptr.vmem [resolvable:$true] %s262_s16 }
  0xbc   :  { %s6942_s25 = scalar_lea.hbm %s8684_s22, 1024 }
  0xbd   :  { %p6943_p8 = scmp.ne.s32.totalorder %s8684_s22, %s6942_s25  ;;  %p6946_p9 = scmp.lt.u32.totalorder %s6942_s25, %s8684_s22 }
  0xbf   :  { %p6948_p10 = pnand %p6946_p9, %p6943_p8 }
  0xc1   :  { %6951 = shalt.err (!%p6948_p10)
}
  0xc2   :  { %s6952_s20 = scalar_lea.vmem %s241_s7, 1024  ;;  %p6957_p12 = scmp.lt.s32.totalorder %s241_s7, %s241_s7 }
  0xc3   :  { %p6953_p11 = scmp.ne.s32.totalorder %s241_s7, %s6952_s20  ;;  %p6958_p13 = scmp.lt.s32.totalorder %s6952_s20, %s6952_s20 }
  0xc5   :  { %p6959_p0 = por %p6958_p13, %p6957_p12 }
  0xc7   :  { %p6960_p1 = pnand %p6959_p0, %p6953_p11 }
  0xc9   :  { %6963 = shalt.err (!%p6960_p1)
}
  0xca   :  { %246 = dma.hbm_to_vmem [thread:$0]  %s8684_s22, 1024, %s241_s7, [#allocation29], %s8739_s11, %s8739_s11, %s8738_s4  }
  0xcb   :  { %s6964_s2 = scalar_lea.hbm %s8686_s24, 1024 }
  0xcc   :  { %p6965_p2 = scmp.ne.s32.totalorder %s8686_s24, %s6964_s2  ;;  %p6968_p3 = scmp.lt.u32.totalorder %s6964_s2, %s8686_s24 }
  0xce   :  { %p6970_p4 = pnand %p6968_p3, %p6965_p2 }
  0xd0   :  { %6973 = shalt.err (!%p6970_p4)
}
  0xd1   :  { %s6974_s1 = scalar_lea.vmem %s7584_s16, 1024  ;;  %p6979_p6 = scmp.lt.s32.totalorder %s7584_s16, %s7584_s16 }
  0xd2   :  { %p6975_p5 = scmp.ne.s32.totalorder %s7584_s16, %s6974_s1  ;;  %p6980_p7 = scmp.lt.s32.totalorder %s6974_s1, %s6974_s1 }
  0xd4   :  { %p6981_p8 = por %p6980_p7, %p6979_p6 }
  0xd6   :  { %p6982_p9 = pnand %p6981_p8, %p6975_p5 }
  0xd8   :  { %6985 = shalt.err (!%p6982_p9)
}
  0xd9   :  { %268 = dma.hbm_to_vmem [thread:$0]  %s8686_s24, 1024, %s7584_s16, [#allocation32], %s8739_s11, %s8739_s11, %s8738_s4  }
  0xda   :  { %s7312_s3 = smov [#allocation34]   ;;  %s7313_s25 = smov [#allocation2]  }
  0xdb   :  { %s284_s8 = sshll.u32 %s7312_s3, 4  ;;  %s57_s12 = sshll.u32 %s7313_s25, 4  ;;  %s285_s8 = int_to_ptr.vmem [resolvable:$true] %s284_s8  ;;  %s58_s12 = int_to_ptr.vmem [resolvable:$true] %s57_s12 }
  0xdc   :  { %s6986_s6 = scalar_lea.hbm %s8688_s26, 1024 }
  0xdd   :  { %p6987_p10 = scmp.ne.s32.totalorder %s8688_s26, %s6986_s6  ;;  %p6990_p11 = scmp.lt.u32.totalorder %s6986_s6, %s8688_s26 }
  0xdf   :  { %p6992_p12 = pnand %p6990_p11, %p6987_p10 }
  0xe1   :  { %6995 = shalt.err (!%p6992_p12)
}
  0xe2   :  { %s6996_s24 = scalar_lea.vmem %s285_s8, 1024  ;;  %p7001_p0 = scmp.lt.s32.totalorder %s285_s8, %s285_s8 }
  0xe3   :  { %p6997_p13 = scmp.ne.s32.totalorder %s285_s8, %s6996_s24  ;;  %p7002_p1 = scmp.lt.s32.totalorder %s6996_s24, %s6996_s24 }
  0xe5   :  { %p7003_p2 = por %p7002_p1, %p7001_p0 }
  0xe7   :  { %p7004_p3 = pnand %p7003_p2, %p6997_p13 }
  0xe9   :  { %7007 = shalt.err (!%p7004_p3)
}
  0xea   :  { %290 = dma.hbm_to_vmem [thread:$0]  %s8688_s26, 1024, %s285_s8, [#allocation35], %s8739_s11, %s8739_s11, %s8738_s4  }
  0xeb   :  { %s8740_s18 = sld [smem:[#allocation52_spill]] }
  0xf1   :  { %s7008_s0 = scalar_lea.hbm %s8740_s18, 16 }
  0xf2   :  { %p7009_p4 = scmp.ne.s32.totalorder %s8740_s18, %s7008_s0  ;;  %p7012_p5 = scmp.lt.u32.totalorder %s7008_s0, %s8740_s18 }
  0xf4   :  { %p7014_p6 = pnand %p7012_p5, %p7009_p4 }
  0xf6   :  { %7017 = shalt.err (!%p7014_p6)
}
  0xf7   :  { %s7018_s3 = scalar_lea.vmem %s58_s12, 16  ;;  %s7022_s25 = scalar_lea.vmem %s58_s12, 32 }
  0xf8   :  { %p7019_p7 = scmp.ne.s32.totalorder %s58_s12, %s7018_s3  ;;  %p7023_p8 = scmp.lt.s32.totalorder %s58_s12, %s58_s12 }
  0xf9   :  { %p7024_p9 = scmp.lt.s32.totalorder %s7022_s25, %s7018_s3 }
  0xfb   :  { %p7025_p10 = por %p7024_p9, %p7023_p8 }
  0xfd   :  { %p7026_p11 = pnand %p7025_p10, %p7019_p7 }
  0xff   :  { %7029 = shalt.err (!%p7026_p11)
}
 0x100   :  { %60 = dma.hbm_to_vmem [thread:$0]  %s8740_s18, 16, %s58_s12, [#allocation3]  }
 0x101   :  { %s7314_s11 = smov [#allocation6]   ;;  %s7315_s14 = smov [#allocation9]  }
 0x102   :  { %s79_s8 = sshll.u32 %s7314_s11, 4  ;;  %s101_s10 = sshll.u32 %s7315_s14, 4  ;;  %s80_s8 = int_to_ptr.vmem [resolvable:$true] %s79_s8  ;;  %s102_s10 = int_to_ptr.vmem [resolvable:$true] %s101_s10 }
 0x103   :  { %s8741_s30 = sld [smem:[#allocation54_spill]] }
 0x109   :  { %s7030_s28 = scalar_lea.hbm %s8741_s30, 16 }
 0x10a   :  { %p7031_p12 = scmp.ne.s32.totalorder %s8741_s30, %s7030_s28  ;;  %p7034_p13 = scmp.lt.u32.totalorder %s7030_s28, %s8741_s30 }
 0x10c   :  { %p7036_p0 = pnand %p7034_p13, %p7031_p12 }
 0x10e   :  { %7039 = shalt.err (!%p7036_p0)
}
 0x10f   :  { %s7040_s12 = scalar_lea.vmem %s80_s8, 16  ;;  %s7044_s2 = scalar_lea.vmem %s80_s8, 32 }
 0x110   :  { %p7041_p1 = scmp.ne.s32.totalorder %s80_s8, %s7040_s12  ;;  %p7045_p2 = scmp.lt.s32.totalorder %s80_s8, %s80_s8 }
 0x111   :  { %p7046_p3 = scmp.lt.s32.totalorder %s7044_s2, %s7040_s12 }
 0x113   :  { %p7047_p4 = por %p7046_p3, %p7045_p2 }
 0x115   :  { %p7048_p5 = pnand %p7047_p4, %p7041_p1 }
 0x117   :  { %7051 = shalt.err (!%p7048_p5)
}
 0x118   :  { %82 = dma.hbm_to_vmem [thread:$0]  %s8741_s30, 16, %s80_s8, [#allocation5]  }
 0x119   :  { %s8742_s1 = sld [smem:[#allocation56_spill]] }
 0x11f   :  { %s7052_s22 = scalar_lea.hbm %s8742_s1, 192 }
 0x120   :  { %p7053_p6 = scmp.ne.s32.totalorder %s8742_s1, %s7052_s22  ;;  %p7056_p7 = scmp.lt.u32.totalorder %s7052_s22, %s8742_s1 }
 0x122   :  { %p7058_p8 = pnand %p7056_p7, %p7053_p6 }
 0x124   :  { %7061 = shalt.err (!%p7058_p8)
}
 0x125   :  { %s7062_s4 = scalar_lea.vmem %s102_s10, 192  ;;  %p7067_p10 = scmp.lt.s32.totalorder %s102_s10, %s102_s10 }
 0x126   :  { %p7063_p9 = scmp.ne.s32.totalorder %s102_s10, %s7062_s4  ;;  %p7068_p11 = scmp.lt.s32.totalorder %s7062_s4, %s7062_s4 }
 0x128   :  { %p7069_p12 = por %p7068_p11, %p7067_p10 }
 0x12a   :  { %p7070_p13 = pnand %p7069_p12, %p7063_p9 }
 0x12c   :  { %7073 = shalt.err (!%p7070_p13)
}
 0x12d   :  { %104 = dma.hbm_to_vmem [thread:$0]  %s8742_s1, 192, %s102_s10, [#allocation8]  }
 0x12e   :  { %s7316_s14 = smov [#allocation12]   ;;  %s8743_s28 = sld [smem:[#allocation59_spill]] }
 0x12f   :  { %s122_s6 = sshll.u32 %s7316_s14, 4  ;;  %s123_s6 = int_to_ptr.vmem [resolvable:$true] %s122_s6 }
 0x134   :  { %s7074_s29 = scalar_lea.hbm %s8743_s28, 4096 }
 0x135   :  { %p7075_p0 = scmp.ne.s32.totalorder %s8743_s28, %s7074_s29  ;;  %p7078_p1 = scmp.lt.u32.totalorder %s7074_s29, %s8743_s28 }
 0x137   :  { %p7080_p2 = pnand %p7078_p1, %p7075_p0 }
 0x139   :  { %7083 = shalt.err (!%p7080_p2)
}
 0x13a   :  { %s7084_s2 = scalar_lea.vmem %s123_s6, 4096  ;;  %p7089_p4 = scmp.lt.s32.totalorder %s123_s6, %s123_s6 }
 0x13b   :  { %p7085_p3 = scmp.ne.s32.totalorder %s123_s6, %s7084_s2  ;;  %p7090_p5 = scmp.lt.s32.totalorder %s7084_s2, %s7084_s2 }
 0x13d   :  { %p7091_p6 = por %p7090_p5, %p7089_p4 }
 0x13f   :  { %p7092_p7 = pnand %p7091_p6, %p7085_p3 }
 0x141   :  { %7095 = shalt.err (!%p7092_p7)
}
 0x142   :  { %s7317_s10 = smov 256   ;;  %s7318_s9 = smov 16  }
 0x143   :  { %128 = dma.hbm_to_vmem [thread:$0]  %s8743_s28, 4096, %s123_s6, [#allocation11], %s7317_s10, %s7317_s10, %s7318_s9  }
 0x144   :  { %s7319_s5 = smov [#allocation15]   ;;  %s7320_s22 = smov [#allocation18]  }
 0x145   :  { %s149_s1 = sshll.u32 %s7319_s5, 4  ;;  %s171_s7 = sshll.u32 %s7320_s22, 4  ;;  %s150_s1 = int_to_ptr.vmem [resolvable:$true] %s149_s1  ;;  %s172_s7 = int_to_ptr.vmem [resolvable:$true] %s171_s7 }
 0x146   :  { %s7096_s26 = scalar_lea.hbm %s8675_s13, 128 }
 0x147   :  { %p7097_p8 = scmp.ne.s32.totalorder %s8675_s13, %s7096_s26  ;;  %p7100_p9 = scmp.lt.u32.totalorder %s7096_s26, %s8675_s13 }
 0x149   :  { %p7102_p10 = pnand %p7100_p9, %p7097_p8 }
 0x14b   :  { %7105 = shalt.err (!%p7102_p10)
}
 0x14c   :  { %s7106_s6 = scalar_lea.vmem %s150_s1, 128  ;;  %p7111_p12 = scmp.lt.s32.totalorder %s150_s1, %s150_s1 }
 0x14d   :  { %p7107_p11 = scmp.ne.s32.totalorder %s150_s1, %s7106_s6  ;;  %p7112_p13 = scmp.lt.s32.totalorder %s7106_s6, %s7106_s6 }
 0x14f   :  { %p7113_p0 = por %p7112_p13, %p7111_p12 }
 0x151   :  { %p7114_p1 = pnand %p7113_p0, %p7107_p11 }
 0x153   :  { %7117 = shalt.err (!%p7114_p1)
}
 0x154   :  { %152 = dma.hbm_to_vmem [thread:$0]  %s8675_s13, 128, %s150_s1, [#allocation14]  }
 0x155   :  { %s7118_s24 = scalar_lea.hbm %s8677_s15, 16 }
 0x156   :  { %p7119_p2 = scmp.ne.s32.totalorder %s8677_s15, %s7118_s24  ;;  %p7122_p3 = scmp.lt.u32.totalorder %s7118_s24, %s8677_s15 }
 0x158   :  { %p7124_p4 = pnand %p7122_p3, %p7119_p2 }
 0x15a   :  { %7127 = shalt.err (!%p7124_p4)
}
 0x15b   :  { %s7128_s10 = scalar_lea.vmem %s172_s7, 16  ;;  %s7132_s9 = scalar_lea.vmem %s172_s7, 32 }
 0x15c   :  { %p7129_p5 = scmp.ne.s32.totalorder %s172_s7, %s7128_s10  ;;  %p7133_p6 = scmp.lt.s32.totalorder %s172_s7, %s172_s7 }
 0x15d   :  { %p7134_p7 = scmp.lt.s32.totalorder %s7132_s9, %s7128_s10 }
 0x15f   :  { %p7135_p8 = por %p7134_p7, %p7133_p6 }
 0x161   :  { %p7136_p9 = pnand %p7135_p8, %p7129_p5 }
 0x163   :  { %7139 = shalt.err (!%p7136_p9)
}
 0x164   :  { %174 = dma.hbm_to_vmem [thread:$0]  %s8677_s15, 16, %s172_s7, [#allocation17]  }
 0x165   :  { %s7321_s0 = smov [#allocation21]   ;;  %s7322_s1 = smov [#allocation24]  }
 0x166   :  { %s191_s5 = sshll.u32 %s7321_s0, 4  ;;  %s211_s22 = sshll.u32 %s7322_s1, 4  ;;  %s192_s5 = int_to_ptr.vmem [resolvable:$true] %s191_s5  ;;  %s212_s22 = int_to_ptr.vmem [resolvable:$true] %s211_s22 }
 0x167   :  { %s7140_s26 = scalar_lea.hbm %s8679_s17, 16 }
 0x168   :  { %p7141_p10 = scmp.ne.s32.totalorder %s8679_s17, %s7140_s26  ;;  %p7144_p11 = scmp.lt.u32.totalorder %s7140_s26, %s8679_s17 }
 0x16a   :  { %p7146_p12 = pnand %p7144_p11, %p7141_p10 }
 0x16c   :  { %7149 = shalt.err (!%p7146_p12)
}
 0x16d   :  { %s7150_s15 = scalar_lea.vmem %s192_s5, 16  ;;  %s7154_s7 = scalar_lea.vmem %s192_s5, 32 }
 0x16e   :  { %p7151_p13 = scmp.ne.s32.totalorder %s192_s5, %s7150_s15  ;;  %p7155_p0 = scmp.lt.s32.totalorder %s192_s5, %s192_s5 }
 0x16f   :  { %p7156_p1 = scmp.lt.s32.totalorder %s7154_s7, %s7150_s15 }
 0x171   :  { %p7157_p2 = por %p7156_p1, %p7155_p0 }
 0x173   :  { %p7158_p3 = pnand %p7157_p2, %p7151_p13 }
 0x175   :  { %7161 = shalt.err (!%p7158_p3)
}
 0x176   :  { %194 = dma.hbm_to_vmem [thread:$0]  %s8679_s17, 16, %s192_s5, [#allocation20]  }
 0x177   :  { %s7162_s29 = scalar_lea.hbm %s8681_s19, 16 }
 0x178   :  { %p7163_p4 = scmp.ne.s32.totalorder %s8681_s19, %s7162_s29  ;;  %p7166_p5 = scmp.lt.u32.totalorder %s7162_s29, %s8681_s19 }
 0x17a   :  { %p7168_p6 = pnand %p7166_p5, %p7163_p4 }
 0x17c   :  { %7171 = shalt.err (!%p7168_p6)
}
 0x17d   :  { %s7172_s2 = scalar_lea.vmem %s212_s22, 16  ;;  %s7176_s10 = scalar_lea.vmem %s212_s22, 32 }
 0x17e   :  { %p7173_p7 = scmp.ne.s32.totalorder %s212_s22, %s7172_s2  ;;  %p7177_p8 = scmp.lt.s32.totalorder %s212_s22, %s212_s22 }
 0x17f   :  { %p7178_p9 = scmp.lt.s32.totalorder %s7176_s10, %s7172_s2 }
 0x181   :  { %p7179_p10 = por %p7178_p9, %p7177_p8 }
 0x183   :  { %p7180_p11 = pnand %p7179_p10, %p7173_p7 }
 0x185   :  { %7183 = shalt.err (!%p7180_p11)
}
 0x186   :  { %214 = dma.hbm_to_vmem [thread:$0]  %s8681_s19, 16, %s212_s22, [#allocation23]  }
 0x187   :  { %s7323_s13 = smov [#allocation27]   ;;  %s7324_s0 = smov [#allocation30]  }
 0x188   :  { %s231_s18 = sshll.u32 %s7323_s13, 4  ;;  %s253_s5 = sshll.u32 %s7324_s0, 4  ;;  %s232_s18 = int_to_ptr.vmem [resolvable:$true] %s231_s18  ;;  %s254_s5 = int_to_ptr.vmem [resolvable:$true] %s253_s5 }
 0x189   :  { %s7184_s25 = scalar_lea.hbm %s8683_s21, 16 }
 0x18a   :  { %p7185_p12 = scmp.ne.s32.totalorder %s8683_s21, %s7184_s25  ;;  %p7188_p13 = scmp.lt.u32.totalorder %s7184_s25, %s8683_s21 }
 0x18c   :  { %p7190_p0 = pnand %p7188_p13, %p7185_p12 }
 0x18e   :  { %7193 = shalt.err (!%p7190_p0)
}
 0x18f   :  { %s7194_s19 = scalar_lea.vmem %s232_s18, 16  ;;  %s7198_s22 = scalar_lea.vmem %s232_s18, 32 }
 0x190   :  { %p7195_p1 = scmp.ne.s32.totalorder %s232_s18, %s7194_s19  ;;  %p7199_p2 = scmp.lt.s32.totalorder %s232_s18, %s232_s18 }
 0x191   :  { %p7200_p3 = scmp.lt.s32.totalorder %s7198_s22, %s7194_s19 }
 0x193   :  { %p7201_p4 = por %p7200_p3, %p7199_p2 }
 0x195   :  { %p7202_p5 = pnand %p7201_p4, %p7195_p1 }
 0x197   :  { %7205 = shalt.err (!%p7202_p5)
}
 0x198   :  { %234 = dma.hbm_to_vmem [thread:$0]  %s8683_s21, 16, %s232_s18, [#allocation26]  }
 0x199   :  { %s7206_s20 = scalar_lea.hbm %s8685_s23, 16 }
 0x19a   :  { %p7207_p6 = scmp.ne.s32.totalorder %s8685_s23, %s7206_s20  ;;  %p7210_p7 = scmp.lt.u32.totalorder %s7206_s20, %s8685_s23 }
 0x19c   :  { %p7212_p8 = pnand %p7210_p7, %p7207_p6 }
 0x19e   :  { %7215 = shalt.err (!%p7212_p8)
}
 0x19f   :  { %s7216_s16 = scalar_lea.vmem %s254_s5, 16  ;;  %s7220_s27 = scalar_lea.vmem %s254_s5, 32 }
 0x1a0   :  { %p7217_p9 = scmp.ne.s32.totalorder %s254_s5, %s7216_s16  ;;  %p7221_p10 = scmp.lt.s32.totalorder %s254_s5, %s254_s5 }
 0x1a1   :  { %p7222_p11 = scmp.lt.s32.totalorder %s7220_s27, %s7216_s16 }
 0x1a3   :  { %p7223_p12 = por %p7222_p11, %p7221_p10 }
 0x1a5   :  { %p7224_p13 = pnand %p7223_p12, %p7217_p9 }
 0x1a7   :  { %7227 = shalt.err (!%p7224_p13)
}
 0x1a8   :  { %256 = dma.hbm_to_vmem [thread:$0]  %s8685_s23, 16, %s254_s5, [#allocation29]  }
 0x1a9   :  { %s7325_s2 = smov [#allocation33]   ;;  %s7326_s17 = smov [#allocation36]  }
 0x1aa   :  { %s275_s10 = sshll.u32 %s7325_s2, 4  ;;  %s297_s9 = sshll.u32 %s7326_s17, 4  ;;  %s276_s10 = int_to_ptr.vmem [resolvable:$true] %s275_s10  ;;  %s298_s9 = int_to_ptr.vmem [resolvable:$true] %s297_s9 }
 0x1ab   :  { %s8744_s0 = sld [smem:[#allocation62_spill]] }
 0x1b1   :  { %s7228_s1 = scalar_lea.hbm %s8744_s0, 16 }
 0x1b2   :  { %p7229_p0 = scmp.ne.s32.totalorder %s8744_s0, %s7228_s1  ;;  %p7232_p1 = scmp.lt.u32.totalorder %s7228_s1, %s8744_s0 }
 0x1b4   :  { %p7234_p2 = pnand %p7232_p1, %p7229_p0 }
 0x1b6   :  { %7237 = shalt.err (!%p7234_p2)
}
 0x1b7   :  { %s7238_s23 = scalar_lea.vmem %s276_s10, 16  ;;  %s7242_s5 = scalar_lea.vmem %s276_s10, 32 }
 0x1b8   :  { %p7239_p3 = scmp.ne.s32.totalorder %s276_s10, %s7238_s23  ;;  %p7243_p4 = scmp.lt.s32.totalorder %s276_s10, %s276_s10 }
 0x1b9   :  { %p7244_p5 = scmp.lt.s32.totalorder %s7242_s5, %s7238_s23 }
 0x1bb   :  { %p7245_p6 = por %p7244_p5, %p7243_p4 }
 0x1bd   :  { %p7246_p7 = pnand %p7245_p6, %p7239_p3 }
 0x1bf   :  { %7249 = shalt.err (!%p7246_p7)
}
 0x1c0   :  { %278 = dma.hbm_to_vmem [thread:$0]  %s8744_s0, 16, %s276_s10, [#allocation32]  }
 0x1c1   :  { %s8745_s14 = sld [smem:[#allocation63_spill]] }
 0x1c7   :  { %s7250_s15 = scalar_lea.hbm %s8745_s14, 16 }
 0x1c8   :  { %p7251_p8 = scmp.ne.s32.totalorder %s8745_s14, %s7250_s15  ;;  %p7254_p9 = scmp.lt.u32.totalorder %s7250_s15, %s8745_s14 }
 0x1ca   :  { %p7256_p10 = pnand %p7254_p9, %p7251_p8 }
 0x1cc   :  { %7259 = shalt.err (!%p7256_p10)
}
 0x1cd   :  { %s7260_s28 = scalar_lea.vmem %s298_s9, 16  ;;  %s7264_s29 = scalar_lea.vmem %s298_s9, 32 }
 0x1ce   :  { %p7261_p11 = scmp.ne.s32.totalorder %s298_s9, %s7260_s28  ;;  %p7265_p12 = scmp.lt.s32.totalorder %s298_s9, %s298_s9 }
 0x1cf   :  { %p7266_p13 = scmp.lt.s32.totalorder %s7264_s29, %s7260_s28 }
 0x1d1   :  { %p7267_p0 = por %p7266_p13, %p7265_p12 }
 0x1d3   :  { %p7268_p1 = pnand %p7267_p0, %p7261_p11 }
 0x1d5   :  { %7271 = shalt.err (!%p7268_p1)
}
 0x1d6   :  { %300 = dma.hbm_to_vmem [thread:$0]  %s8745_s14, 16, %s298_s9, [#allocation35]  }
 0x1d7   :  { %7272 = dma.done.wait [#allocation3], 16  }
 0x1d8   :  { %7273 = vsyncadd [#allocation3], 4294967280 }
 0x1d9   :  { %7274 = dma.done.wait [#allocation5], 1040  }
 0x1da   :  { %7275 = vsyncadd [#allocation5], 4294966256 }
 0x1db   :  { %7276 = dma.done.wait [#allocation8], 12480  }
 0x1dc   :  { %7277 = vsyncadd [#allocation8], 4294954816 }
 0x1dd   :  { %7278 = dma.done.wait [#allocation11], 4112  }
 0x1de   :  { %7279 = vsyncadd [#allocation11], 4294963184 }
 0x1df   :  { %7280 = dma.done.wait [#allocation14], 8320  }
 0x1e0   :  { %7281 = vsyncadd [#allocation14], 4294958976 }
 0x1e1   :  { %7282 = dma.done.wait [#allocation17], 4112  }
 0x1e2   :  { %7283 = vsyncadd [#allocation17], 4294963184 }
 0x1e3   :  { %7284 = dma.done.wait [#allocation20], 32  }
 0x1e4   :  { %7285 = vsyncadd [#allocation20], 4294967264 }
 0x1e5   :  { %7286 = dma.done.wait [#allocation23], 32  }
 0x1e6   :  { %7287 = vsyncadd [#allocation23], 4294967264 }
 0x1e7   :  { %7288 = dma.done.wait [#allocation26], 32  }
 0x1e8   :  { %7289 = vsyncadd [#allocation26], 4294967264 }
 0x1e9   :  { %7290 = dma.done.wait [#allocation29], 1040  }
 0x1ea   :  { %7291 = vsyncadd [#allocation29], 4294966256 }
 0x1eb   :  { %7292 = dma.done.wait [#allocation32], 1040  }
 0x1ec   :  { %7293 = vsyncadd [#allocation32], 4294966256 }
 0x1ed   :  { %7294 = dma.done.wait [#allocation35], 1040  }
 0x1ee   :  { %7295 = vsyncadd [#allocation35], 4294966256  ;;  %v7327_v0 = vmov 0.0   ;;  %vm7328_vm0 = vmmov 0   ;;  %s8746_s12 = sld [smem:[#allocation51_spill]]  ;;  %v6402_v4 = vld [vmem:[#allocation4] sm:$0xff]  }
 0x1ef   :  { %6068 = vmatprep.subr.bf16.mxu0 %v7327_v0  ;;  %6084 = vmatprep.mubr.msk.bf16.mxu0 %vm7328_vm0, %v7327_v0  ;;  %v6403_v6 = vld [vmem:[#allocation4 + $0x8] sm:$0xff]   ;;  %v6404_v8 = vld [vmem:[#allocation4 + $0x10] sm:$0xff]   ;;  %v6405_v10 = vld [vmem:[#allocation4 + $0x18] sm:$0xff]   ;;  %s8747_s19 = sld [smem:[#allocation49_spill]]  ;;  %s8748_s6 = sld [smem:[#allocation50_spill]]  ;;  %v8715_v57 = vmov 0  }
 0x1f0   :  { %6088 = vmatprep.subr.bf16.mxu1 %v7327_v0  ;;  %6104 = vmatprep.mubr.msk.bf16.mxu1 %vm7328_vm0, %v7327_v0  ;;  %v6406_v12 = vld [vmem:[#allocation4 + $0x20] sm:$0xff]   ;;  %v6407_v16 = vld [vmem:[#allocation4 + $0x28] sm:$0xff]   ;;  %v6408_v20 = vld [vmem:[#allocation4 + $0x30] sm:$0xff]   ;;  %vm1579_vm1 = vcmask 1043456   ;;  %vm1563_vm3 = vcmask 64512   ;;  %s8751_s24 = sld [smem:[#allocation57_spill]] }
 0x1f1   :  { %6089 = vmatpush3.bf16.msra.mxu1 %v6402_v4  ;;  %v6412_v17 = vld [vmem:[#allocation7 + $0x4] ss:$48 sps:$4 sm:$0xff]   ;;  %v6410_v19 = vld [vmem:[#allocation7] ss:$48 sps:$4 sm:$0xff]   ;;  %v6415_v27 = vld [vmem:[#allocation7 + $0xc] ss:$48 sps:$4 sm:$0xff]  }
 0x1f2   :  { %6090 = vmatprep.subr.bf16.mxu1 %v7327_v0  ;;  %v6418_v21 = vld [vmem:[#allocation7 + $0x64] ss:$48 sps:$4 sm:$0xff]   ;;  %v6416_v25 = vld [vmem:[#allocation7 + $0x60] ss:$48 sps:$4 sm:$0xff]   ;;  %v6413_v29 = vld [vmem:[#allocation7 + $0x8] ss:$48 sps:$4 sm:$0xff]  }
 0x1f3   :  { %v6409_v22 = vld [vmem:[#allocation4 + $0x38] sm:$0xff]   ;;  %v6422_v28 = vld [vmem:[#allocation7 + $0xc0] ss:$48 sps:$4 sm:$0xff]   ;;  %s8760_s17 = sld [smem:[#allocation64_spill]] }
 0x1f4   :  { %v6394_v1 = vld [vmem:[%s8746_s12] sm:$0xff]   ;;  %v6395_v2 = vld [vmem:[%s8746_s12 + $0x8] sm:$0xff]   ;;  %v6396_v3 = vld [vmem:[%s8746_s12 + $0x10] sm:$0xff]  }
 0x1f5   :  { %6069 = vmatpush3.bf16.msra.mxu0 %v6394_v1  ;;  %v6397_v5 = vld [vmem:[%s8746_s12 + $0x18] sm:$0xff]   ;;  %v6398_v7 = vld [vmem:[%s8746_s12 + $0x20] sm:$0xff]   ;;  %6091 = vmatpush3.bf16.msra.mxu1 %v6403_v6  ;;  %v6399_v9 = vld [vmem:[%s8746_s12 + $0x28] sm:$0xff]  }
 0x1f6   :  { %6070 = vmatprep.subr.bf16.mxu0 %v7327_v0  ;;  %6092 = vmatprep.subr.bf16.mxu1 %v7327_v0  ;;  %v6400_v11 = vld [vmem:[%s8746_s12 + $0x30] sm:$0xff]   ;;  %v6401_v13 = vld [vmem:[%s8746_s12 + $0x38] sm:$0xff]   ;;  %v376_v14 = vld [vmem:[%s8747_s19] sm:$0xff]  ;;  %s8755_s12 = sld [smem:[#allocation60_spill]] }
 0x1f7   :  { %v377_v15 = vld [vmem:[%s8747_s19 + $0x8] sm:$0xff]  ;;  %v378_v23 = vld [vmem:[%s8748_s6] sm:$0xff] }
 0x1f8   :  { %v380_v18 = vpack.c.bf16 %v377_v15, %v376_v14  ;;  %v379_v24 = vld [vmem:[%s8748_s6 + $0x8] sm:$0xff]  ;;  %v6421_v32 = vld [vmem:[#allocation7 + $0x6c] ss:$48 sps:$4 sm:$0xff]   ;;  %v6428_v33 = vld [vmem:[#allocation7 + $0x120] ss:$48 sps:$4 sm:$0xff]  }
 0x1f9   :  { %6071 = vmatpush3.bf16.msra.mxu0 %v6395_v2  ;;  %6093 = vmatpush3.bf16.msra.mxu1 %v6404_v8  ;;  %v6424_v26 = vld [vmem:[#allocation7 + $0xc4] ss:$48 sps:$4 sm:$0xff]   ;;  %v495_v31 = vpack.c.bf16 %v379_v24, %v378_v23  ;;  %v6419_v34 = vld [vmem:[#allocation7 + $0x68] ss:$48 sps:$4 sm:$0xff]   ;;  %v6427_v36 = vld [vmem:[#allocation7 + $0xcc] ss:$48 sps:$4 sm:$0xff]  }
 0x1fa   :  { %6072 = vmatprep.subr.bf16.mxu0 %v7327_v0  ;;  %6094 = vmatprep.subr.bf16.mxu1 %v7327_v0  ;;  %v6430_v30 = vld [vmem:[#allocation7 + $0x124] ss:$48 sps:$4 sm:$0xff]   ;;  %v6434_v37 = vld [vmem:[#allocation7 + $0x180] ss:$48 sps:$4 sm:$0xff]   ;;  %v6425_v38 = vld [vmem:[#allocation7 + $0xc8] ss:$48 sps:$4 sm:$0xff]  }
 0x1fb   :  { %v6436_v35 = vld [vmem:[#allocation7 + $0x184] ss:$48 sps:$4 sm:$0xff]   ;;  %v6433_v40 = vld [vmem:[#allocation7 + $0x12c] ss:$48 sps:$4 sm:$0xff]   ;;  %v6440_v41 = vld [vmem:[#allocation7 + $0x1e0] ss:$48 sps:$4 sm:$0xff]  }
 0x1fc   :  { %v6442_v39 = vld [vmem:[#allocation7 + $0x1e4] ss:$48 sps:$4 sm:$0xff]   ;;  %v6431_v42 = vld [vmem:[#allocation7 + $0x128] ss:$48 sps:$4 sm:$0xff]   ;;  %v6439_v43 = vld [vmem:[#allocation7 + $0x18c] ss:$48 sps:$4 sm:$0xff]  }
 0x1fd   :  { %6073 = vmatpush3.bf16.msra.mxu0 %v6396_v3  ;;  %6095 = vmatpush3.bf16.msra.mxu1 %v6405_v10  ;;  %v6437_v44 = vld [vmem:[#allocation7 + $0x188] ss:$48 sps:$4 sm:$0xff]   ;;  %v6445_v45 = vld [vmem:[#allocation7 + $0x1ec] ss:$48 sps:$4 sm:$0xff]   ;;  %v6448_v47 = vld [vmem:[#allocation7 + $0x244] ss:$48 sps:$4 sm:$0xff]  }
 0x1fe   :  { %6074 = vmatprep.subr.bf16.mxu0 %v7327_v0  ;;  %6096 = vmatprep.subr.bf16.mxu1 %v7327_v0  ;;  %v6443_v46 = vld [vmem:[#allocation7 + $0x1e8] ss:$48 sps:$4 sm:$0xff]   ;;  %v6451_v48 = vld [vmem:[#allocation7 + $0x24c] ss:$48 sps:$4 sm:$0xff]   ;;  %v6446_v49 = vld [vmem:[#allocation7 + $0x240] ss:$48 sps:$4 sm:$0xff]  }
 0x1ff   :  { %v6449_v50 = vld [vmem:[#allocation7 + $0x248] ss:$48 sps:$4 sm:$0xff]   ;;  %v6454_v51 = vld [vmem:[#allocation7 + $0x2a4] ss:$48 sps:$4 sm:$0xff]   ;;  %v6457_v52 = vld [vmem:[#allocation7 + $0x2ac] ss:$48 sps:$4 sm:$0xff]  }
 0x200   :  { %v6452_v53 = vld [vmem:[#allocation7 + $0x2a0] ss:$48 sps:$4 sm:$0xff]   ;;  %v6455_v54 = vld [vmem:[#allocation7 + $0x2a8] ss:$48 sps:$4 sm:$0xff]   ;;  %v6460_v55 = vld [vmem:[#allocation7 + $0x14] ss:$48 sps:$4 sm:$0xff]  }
 0x201   :  { %6075 = vmatpush3.bf16.msra.mxu0 %v6397_v5  ;;  %6097 = vmatpush3.bf16.msra.mxu1 %v6406_v12  ;;  %v6463_v56 = vld [vmem:[#allocation7 + $0x1c] ss:$48 sps:$4 sm:$0xff]   ;;  %v6458_v4 = vld [vmem:[#allocation7 + $0x10] ss:$48 sps:$4 sm:$0xff]   ;;  %v6461_v5 = vld [vmem:[#allocation7 + $0x18] ss:$48 sps:$4 sm:$0xff]  }
 0x202   :  { %6076 = vmatprep.subr.bf16.mxu0 %v7327_v0  ;;  %6098 = vmatprep.subr.bf16.mxu1 %v7327_v0  ;;  %v5458_v58 = vld [vmem:[#allocation2] ss:$0 sm:$0xff]  ;;  %v6467_v12 = vld [vmem:[#allocation7 + $0x78] ss:$48 sps:$4 sm:$0xff]   ;;  %v6472_v15 = vld [vmem:[#allocation7 + $0xd4] ss:$48 sps:$4 sm:$0xff]  }
 0x203   :  { %v6469_v8 = vld [vmem:[#allocation7 + $0x7c] ss:$48 sps:$4 sm:$0xff]   ;;  %v6478_v24 = vld [vmem:[#allocation7 + $0x134] ss:$48 sps:$4 sm:$0xff]  }
 0x205   :  { %6077 = vmatpush3.bf16.msra.mxu0 %v6398_v7  ;;  %6099 = vmatpush3.bf16.msra.mxu1 %v6407_v16  ;;  %v6466_v7 = vld [vmem:[#allocation7 + $0x74] ss:$48 sps:$4 sm:$0xff]   ;;  %v6475_v16 = vld [vmem:[#allocation7 + $0xdc] ss:$48 sps:$4 sm:$0xff]  }
 0x206   :  { %6078 = vmatprep.subr.bf16.mxu0 %v7327_v0  ;;  %6100 = vmatprep.subr.bf16.mxu1 %v7327_v0 }
 0x209   :  { %6079 = vmatpush3.bf16.msra.mxu0 %v6399_v9  ;;  %6101 = vmatpush3.bf16.msra.mxu1 %v6408_v20  ;;  %v5467_v9 = vld [vmem:[#allocation6] ss:$0 sm:$0xff] }
 0x20a   :  { %6080 = vmatprep.subr.bf16.mxu0 %v7327_v0  ;;  %6102 = vmatprep.subr.bf16.mxu1 %v7327_v0 }
 0x20d   :  { %6081 = vmatpush3.bf16.msra.mxu0 %v6400_v11  ;;  %6103 = vmatpush3.bf16.msra.mxu1 %v6409_v22  ;;  %v6464_v11 = vld [vmem:[#allocation7 + $0x70] ss:$48 sps:$4 sm:$0xff]   ;;  %v6473_v22 = vld [vmem:[#allocation7 + $0xd8] ss:$48 sps:$4 sm:$0xff]  }
 0x20e   :  { %6082 = vmatprep.subr.bf16.mxu0 %v7327_v0  ;;  %1294 = vmatprep.subr.bf16.mxu1 %v6415_v27  ;;  %v6476_v27 = vld [vmem:[#allocation7 + $0x130] ss:$48 sps:$4 sm:$0xff]  }
 0x210   :  { %6105 = vmatmul.mubr.bf16.vlgmr.msra.gmra.mrb[0].mxu1 %v495_v31  ;;  %v6482_v31 = vld [vmem:[#allocation7 + $0x190] ss:$48 sps:$4 sm:$0xff]  }
 0x211   :  { %6083 = vmatpush3.bf16.msra.mxu0 %v6401_v13  ;;  %1295 = vmatpush1.bf16.msra.mxu1 %v6413_v29  ;;  %v6484_v29 = vld [vmem:[#allocation7 + $0x194] ss:$48 sps:$4 sm:$0xff]  }
 0x212   :  { %1251 = vmatprep.subr.bf16.mxu0 %v6412_v17  ;;  %1296 = vmatprep.subr.bf16.mxu1 %v6421_v32  ;;  %v6485_v32 = vld [vmem:[#allocation7 + $0x198] ss:$48 sps:$4 sm:$0xff]  }
 0x213   :  { %1326 = vmatprep.mubr.bf16.mxu1 %v8715_v57 }
 0x214   :  { %6085 = vmatmul.mubr.bf16.vlgmr.msra.gmra.mrb[0].mxu0 %v380_v18 }
 0x215   :  { %1252 = vmatpush1.bf16.msra.mxu0 %v6410_v19  ;;  %1297 = vmatpush1.bf16.msra.mxu1 %v6419_v34  ;;  %v6493_v34 = vld [vmem:[#allocation7 + $0x1fc] ss:$48 sps:$4 sm:$0xff]  }
 0x216   :  { %1253 = vmatprep.subr.bf16.mxu0 %v6418_v21  ;;  %1298 = vmatprep.subr.bf16.mxu1 %v6427_v36  ;;  %v6470_v21 = vld [vmem:[#allocation7 + $0xd0] ss:$48 sps:$4 sm:$0xff]   ;;  %v6491_v36 = vld [vmem:[#allocation7 + $0x1f8] ss:$48 sps:$4 sm:$0xff]  }
 0x217   :  { %1283 = vmatprep.mubr.bf16.mxu0 %v8715_v57 }
 0x219   :  { %1254 = vmatpush1.bf16.msra.mxu0 %v6416_v25  ;;  %1299 = vmatpush1.bf16.msra.mxu1 %v6425_v38  ;;  %v6481_v25 = vld [vmem:[#allocation7 + $0x13c] ss:$48 sps:$4 sm:$0xff]  }
 0x21a   :  { %1255 = vmatprep.subr.bf16.mxu0 %v6424_v26  ;;  %1300 = vmatprep.subr.bf16.mxu1 %v6433_v40  ;;  %v6499_v38 = vld [vmem:[#allocation7 + $0x25c] ss:$48 sps:$4 sm:$0xff]   ;;  %v6497_v40 = vld [vmem:[#allocation7 + $0x258] ss:$48 sps:$4 sm:$0xff]  }
 0x21d   :  { %1256 = vmatpush1.bf16.msra.mxu0 %v6422_v28  ;;  %1301 = vmatpush1.bf16.msra.mxu1 %v6431_v42  ;;  %v6479_v28 = vld [vmem:[#allocation7 + $0x138] ss:$48 sps:$4 sm:$0xff]   ;;  %v6505_v42 = vld [vmem:[#allocation7 + $0x2bc] ss:$48 sps:$4 sm:$0xff]  }
 0x21e   :  { %1257 = vmatprep.subr.bf16.mxu0 %v6430_v30  ;;  %1302 = vmatprep.subr.bf16.mxu1 %v6439_v43  ;;  %v6487_v30 = vld [vmem:[#allocation7 + $0x19c] ss:$48 sps:$4 sm:$0xff]   ;;  %v6500_v43 = vld [vmem:[#allocation7 + $0x2b0] ss:$48 sps:$4 sm:$0xff]  }
 0x221   :  { %1258 = vmatpush1.bf16.msra.mxu0 %v6428_v33  ;;  %1303 = vmatpush1.bf16.msra.mxu1 %v6437_v44  ;;  %v6490_v33 = vld [vmem:[#allocation7 + $0x1f4] ss:$48 sps:$4 sm:$0xff]   ;;  %v6503_v44 = vld [vmem:[#allocation7 + $0x2b8] ss:$48 sps:$4 sm:$0xff]  }
 0x222   :  { %1259 = vmatprep.subr.bf16.mxu0 %v6436_v35  ;;  %1304 = vmatprep.subr.bf16.mxu1 %v6445_v45  ;;  %v6488_v35 = vld [vmem:[#allocation7 + $0x1f0] ss:$48 sps:$4 sm:$0xff]   ;;  %v6508_v45 = vld [vmem:[#allocation7 + $0x24] ss:$48 sps:$4 sm:$0xff]  }
 0x225   :  { %1260 = vmatpush1.bf16.msra.mxu0 %v6434_v37  ;;  %1305 = vmatpush1.bf16.msra.mxu1 %v6443_v46  ;;  %v6496_v37 = vld [vmem:[#allocation7 + $0x254] ss:$48 sps:$4 sm:$0xff]   ;;  %v6511_v46 = vld [vmem:[#allocation7 + $0x2c] ss:$48 sps:$4 sm:$0xff]  }
 0x226   :  { %1261 = vmatprep.subr.bf16.mxu0 %v6442_v39  ;;  %1306 = vmatprep.subr.bf16.mxu1 %v6451_v48  ;;  %v6494_v39 = vld [vmem:[#allocation7 + $0x250] ss:$48 sps:$4 sm:$0xff]   ;;  %v6509_v48 = vld [vmem:[#allocation7 + $0x28] ss:$48 sps:$4 sm:$0xff]  }
 0x229   :  { %1262 = vmatpush1.bf16.msra.mxu0 %v6440_v41  ;;  %1307 = vmatpush1.bf16.msra.mxu1 %v6449_v50  ;;  %v6502_v41 = vld [vmem:[#allocation7 + $0x2b4] ss:$48 sps:$4 sm:$0xff]   ;;  %v6517_v50 = vld [vmem:[#allocation7 + $0x8c] ss:$48 sps:$4 sm:$0xff]  }
 0x22a   :  { %1263 = vmatprep.subr.bf16.mxu0 %v6448_v47  ;;  %1308 = vmatprep.subr.bf16.mxu1 %v6457_v52  ;;  %v6506_v47 = vld [vmem:[#allocation7 + $0x20] ss:$48 sps:$4 sm:$0xff]   ;;  %v6515_v52 = vld [vmem:[#allocation7 + $0x88] ss:$48 sps:$4 sm:$0xff]  }
 0x22d   :  { %1264 = vmatpush1.bf16.msra.mxu0 %v6446_v49  ;;  %1309 = vmatpush1.bf16.msra.mxu1 %v6455_v54  ;;  %v6514_v49 = vld [vmem:[#allocation7 + $0x84] ss:$48 sps:$4 sm:$0xff]   ;;  %v6523_v54 = vld [vmem:[#allocation7 + $0xec] ss:$48 sps:$4 sm:$0xff]  }
 0x22e   :  { %1265 = vmatprep.subr.bf16.mxu0 %v6454_v51  ;;  %1380 = vmatprep.subr.bf16.mxu1 %v6463_v56  ;;  %v6512_v51 = vld [vmem:[#allocation7 + $0x80] ss:$48 sps:$4 sm:$0xff]   ;;  %v6521_v56 = vld [vmem:[#allocation7 + $0xe8] ss:$48 sps:$4 sm:$0xff]  }
 0x231   :  { %1266 = vmatpush1.bf16.msra.mxu0 %v6452_v53  ;;  %v6520_v53 = vld [vmem:[#allocation7 + $0xe4] ss:$48 sps:$4 sm:$0xff]  }
 0x232   :  { %1337 = vmatprep.subr.bf16.mxu0 %v6460_v55  ;;  %v6518_v55 = vld [vmem:[#allocation7 + $0xe0] ss:$48 sps:$4 sm:$0xff]  }
 0x2e3   :  { %v601_v10 = vpop.f32.mrb[0].mxu1 }
 0x2e4   :  { %v602_v13 = vadd.f32 %v5467_v9, %v601_v10  ;;  %v6106_v14 = vpop.f32.mrb[1].mxu1  ;;  %v6536_v10 = vld [vmem:[#allocation7 + $0x200] ss:$48 sps:$4 sm:$0xff]  }
 0x2e5   :  { %v604_v17 = vpop.f32.mrb[2].mxu1  ;;  %v6542_v14 = vld [vmem:[#allocation7 + $0x260] ss:$48 sps:$4 sm:$0xff]  }
 0x2e6   :  { %v608_v18 = vmax.f32 %v602_v13, 0.0  ;;  %v605_v19 = vadd.f32 %v5467_v9, %v604_v17  ;;  %v6107_v20 = vpop.f32.mrb[3].mxu1  ;;  %v6541_v9 = vld [vmem:[#allocation7 + $0x20c] ss:$48 sps:$4 sm:$0xff]  }
 0x2e7   :  { %v486_v59 = vpop.f32.mrb[0].mxu0  ;;  %v6547_v13 = vld [vmem:[#allocation7 + $0x26c] ss:$48 sps:$4 sm:$0xff]   ;;  %v371_v20 = vlaneseq }
 0x2e8   :  { %v7838_v60 = vadd.f32 %v5458_v58, %v486_v59  ;;  %v6086_v61 = vpop.f32.mrb[1].mxu0  ;;  %v609_v23 = vmax.f32 %v605_v19, 0.0  ;;  %v6529_v59 = vld [vmem:[#allocation7 + $0x14c] ss:$48 sps:$4 sm:$0xff]   ;;  %v6551_v19 = vld [vmem:[#allocation7 + $0x2c8] ss:$48 sps:$4 sm:$0xff]  }
 0x2e9   :  { %v489_v62 = vpop.f32.mrb[2].mxu0  ;;  %v6524_v61 = vld [vmem:[#allocation7 + $0x140] ss:$48 sps:$4 sm:$0xff]   ;;  %v6553_v17 = vld [vmem:[#allocation7 + $0x2cc] ss:$48 sps:$4 sm:$0xff]  }
 0x2ea   :  { %v7840_v63 = vadd.f32 %v5458_v58, %v489_v62  ;;  %v6087_v1 = vpop.f32.mrb[3].mxu0  ;;  %v8717_v2 = vmax.f32 %v7838_v60, 0.0  ;;  %v7854_v26 = vpack.c.bf16 %v609_v23, %v608_v18  ;;  %v6526_v58 = vld [vmem:[#allocation7 + $0x144] ss:$48 sps:$4 sm:$0xff]   ;;  %v6527_v62 = vld [vmem:[#allocation7 + $0x148] ss:$48 sps:$4 sm:$0xff]  }
 0x2eb   :  { %v6532_v1 = vld [vmem:[#allocation7 + $0x1a4] ss:$48 sps:$4 sm:$0xff]   ;;  %v6548_v18 = vld [vmem:[#allocation7 + $0x2c0] ss:$48 sps:$4 sm:$0xff]  }
 0x2ec   :  { %v8714_v3 = vmax.f32 %v7840_v63, 0.0 }
 0x2ee   :  { %v7848_v6 = vpack.c.bf16 %v8714_v3, %v8717_v2 }
 0x2f0   :  { %1284 = vmatmul.mubr.bf16.vlgmr.msra.gmra.mrb[4].mxu0 %v7848_v6  ;;  %1327 = vmatmul.mubr.bf16.vlgmr.msra.gmra.mrb[4].mxu1 %v7848_v6 }
 0x2f1   :  { %1338 = vmatpush1.bf16.msra.mxu0 %v6458_v4  ;;  %1381 = vmatpush1.bf16.msra.mxu1 %v6461_v5  ;;  %v6535_v4 = vld [vmem:[#allocation7 + $0x1ac] ss:$48 sps:$4 sm:$0xff]   ;;  %v6530_v5 = vld [vmem:[#allocation7 + $0x1a0] ss:$48 sps:$4 sm:$0xff]  }
 0x2f2   :  { %1339 = vmatprep.subr.bf16.mxu0 %v6466_v7  ;;  %1382 = vmatprep.subr.bf16.mxu1 %v6469_v8  ;;  %v6533_v7 = vld [vmem:[#allocation7 + $0x1a8] ss:$48 sps:$4 sm:$0xff]   ;;  %v6538_v8 = vld [vmem:[#allocation7 + $0x204] ss:$48 sps:$4 sm:$0xff]  }
 0x2f3   :  { %1369 = vmatprep.mubr.bf16.mxu0 %v8715_v57  ;;  %1412 = vmatprep.mubr.bf16.mxu1 %v8715_v57 }
 0x2f5   :  { %1340 = vmatpush1.bf16.msra.mxu0 %v6464_v11  ;;  %1383 = vmatpush1.bf16.msra.mxu1 %v6467_v12  ;;  %v6539_v11 = vld [vmem:[#allocation7 + $0x208] ss:$48 sps:$4 sm:$0xff]   ;;  %v6544_v12 = vld [vmem:[#allocation7 + $0x264] ss:$48 sps:$4 sm:$0xff]  }
 0x2f6   :  { %1341 = vmatprep.subr.bf16.mxu0 %v6472_v15  ;;  %1384 = vmatprep.subr.bf16.mxu1 %v6475_v16  ;;  %v6545_v15 = vld [vmem:[#allocation7 + $0x268] ss:$48 sps:$4 sm:$0xff]   ;;  %v6550_v16 = vld [vmem:[#allocation7 + $0x2c4] ss:$48 sps:$4 sm:$0xff]  }
 0x2f9   :  { %1342 = vmatpush1.bf16.msra.mxu0 %v6470_v21  ;;  %1385 = vmatpush1.bf16.msra.mxu1 %v6473_v22  ;;  %v7869_v21 = vshrl.u32 %v371_v20, 7 }
 0x2fa   :  { %1343 = vmatprep.subr.bf16.mxu0 %v6478_v24  ;;  %1386 = vmatprep.subr.bf16.mxu1 %v6481_v25  ;;  %v707_v24 = vld [vmem:[#allocation9] sm:$0xff] }
 0x2fb   :  { %v7872_v22 = vsub.s32 0, %v7869_v21  ;;  %v7875_v23 = vsub.s32 2, %v7869_v21  ;;  %v7878_v25 = vsub.s32 1, %v7869_v21 }
 0x2fd   :  { %1344 = vmatpush1.bf16.msra.mxu0 %v6476_v27  ;;  %1387 = vmatpush1.bf16.msra.mxu1 %v6479_v28  ;;  %v714_v27 = vrot.slane %v707_v24, %v7872_v22  ;;  %v722_v28 = vrot.slane %v707_v24, %v7875_v23 }
 0x2fe   :  { %1345 = vmatprep.subr.bf16.mxu0 %v6484_v29  ;;  %1388 = vmatprep.subr.bf16.mxu1 %v6487_v30 }
 0x301   :  { %1346 = vmatpush1.bf16.msra.mxu0 %v6482_v31  ;;  %1389 = vmatpush1.bf16.msra.mxu1 %v6485_v32  ;;  %v718_v31 = vrot.slane %v707_v24, %v7878_v25 }
 0x302   :  { %1347 = vmatprep.subr.bf16.mxu0 %v6490_v33  ;;  %1390 = vmatprep.subr.bf16.mxu1 %v6493_v34 }
 0x305   :  { %1348 = vmatpush1.bf16.msra.mxu0 %v6488_v35  ;;  %1391 = vmatpush1.bf16.msra.mxu1 %v6491_v36 }
 0x306   :  { %1349 = vmatprep.subr.bf16.mxu0 %v6496_v37  ;;  %1392 = vmatprep.subr.bf16.mxu1 %v6499_v38 }
 0x309   :  { %1350 = vmatpush1.bf16.msra.mxu0 %v6494_v39  ;;  %1393 = vmatpush1.bf16.msra.mxu1 %v6497_v40 }
 0x30a   :  { %1351 = vmatprep.subr.bf16.mxu0 %v6502_v41  ;;  %1394 = vmatprep.subr.bf16.mxu1 %v6505_v42 }
 0x30d   :  { %1352 = vmatpush1.bf16.msra.mxu0 %v6500_v43  ;;  %1395 = vmatpush1.bf16.msra.mxu1 %v6503_v44 }
 0x30e   :  { %1423 = vmatprep.subr.bf16.mxu0 %v6508_v45  ;;  %1466 = vmatprep.subr.bf16.mxu1 %v6511_v46 }
 0x310   :  { %1370 = vmatmul.mubr.bf16.vlgmr.msra.gmra.mrb[8].mxu0 %v7848_v6  ;;  %1413 = vmatmul.mubr.bf16.vlgmr.msra.gmra.mrb[8].mxu1 %v7848_v6 }
 0x311   :  { %1424 = vmatpush1.bf16.msra.mxu0 %v6506_v47  ;;  %1467 = vmatpush1.bf16.msra.mxu1 %v6509_v48 }
 0x312   :  { %1425 = vmatprep.subr.bf16.mxu0 %v6514_v49  ;;  %1468 = vmatprep.subr.bf16.mxu1 %v6517_v50 }
 0x313   :  { %1455 = vmatprep.mubr.bf16.mxu0 %v8715_v57  ;;  %1498 = vmatprep.mubr.bf16.mxu1 %v8715_v57 }
 0x315   :  { %1426 = vmatpush1.bf16.msra.mxu0 %v6512_v51  ;;  %1469 = vmatpush1.bf16.msra.mxu1 %v6515_v52  ;;  %v8710_v51 = vsub.s32 4, %v7869_v21  ;;  %v8713_v52 = vsub.s32 6, %v7869_v21 }
 0x316   :  { %1427 = vmatprep.subr.bf16.mxu0 %v6520_v53  ;;  %1470 = vmatprep.subr.bf16.mxu1 %v6523_v54  ;;  %v8712_v53 = vsub.s32 5, %v7869_v21  ;;  %v8711_v54 = vsub.s32 7, %v7869_v21 }
 0x319   :  { %1428 = vmatpush1.bf16.msra.mxu0 %v6518_v55  ;;  %1471 = vmatpush1.bf16.msra.mxu1 %v6521_v56  ;;  %v730_v55 = vrot.slane %v707_v24, %v8710_v51  ;;  %v738_v56 = vrot.slane %v707_v24, %v8713_v52 }
 0x31a   :  { %1429 = vmatprep.subr.bf16.mxu0 %v6526_v58  ;;  %1472 = vmatprep.subr.bf16.mxu1 %v6529_v59 }
 0x31d   :  { %1430 = vmatpush1.bf16.msra.mxu0 %v6524_v61  ;;  %1473 = vmatpush1.bf16.msra.mxu1 %v6527_v62  ;;  %v734_v61 = vrot.slane %v707_v24, %v8712_v53  ;;  %v742_v62 = vrot.slane %v707_v24, %v8711_v54 }
 0x31e   :  { %1431 = vmatprep.subr.bf16.mxu0 %v6532_v1  ;;  %1474 = vmatprep.subr.bf16.mxu1 %v6535_v4 }
 0x321   :  { %1432 = vmatpush1.bf16.msra.mxu0 %v6530_v5  ;;  %1475 = vmatpush1.bf16.msra.mxu1 %v6533_v7 }
 0x322   :  { %1433 = vmatprep.subr.bf16.mxu0 %v6538_v8  ;;  %1476 = vmatprep.subr.bf16.mxu1 %v6541_v9 }
 0x325   :  { %1434 = vmatpush1.bf16.msra.mxu0 %v6536_v10  ;;  %1477 = vmatpush1.bf16.msra.mxu1 %v6539_v11 }
 0x326   :  { %1435 = vmatprep.subr.bf16.mxu0 %v6544_v12  ;;  %1478 = vmatprep.subr.bf16.mxu1 %v6547_v13 }
 0x329   :  { %1436 = vmatpush1.bf16.msra.mxu0 %v6542_v14  ;;  %1479 = vmatpush1.bf16.msra.mxu1 %v6545_v15 }
 0x32a   :  { %1437 = vmatprep.subr.bf16.mxu0 %v6550_v16  ;;  %1480 = vmatprep.subr.bf16.mxu1 %v6553_v17 }
 0x32d   :  { %1438 = vmatpush1.bf16.msra.mxu0 %v6548_v18  ;;  %1481 = vmatpush1.bf16.msra.mxu1 %v6551_v19 }
 0x32e   :  { %6108 = vmatprep.subr.bf16.mxu1 %v7327_v0  ;;  %6132 = vmatprep.subr.bf16.mxu0 %v7327_v0 }
 0x330   :  { %1456 = vmatmul.mubr.bf16.vlgmr.msra.gmra.mrb[12].mxu0 %v7848_v6  ;;  %1499 = vmatmul.mubr.bf16.vlgmr.msra.gmra.mrb[12].mxu1 %v7848_v6  ;;  %v7881_v6 = vsub.s32 3, %v7869_v21 }
 0x331   :  { %6110 = vmatprep.mubr.msk.bf16.mxu1 %vm7328_vm0, %v7327_v0  ;;  %6134 = vmatprep.mubr.msk.bf16.mxu0 %vm7328_vm0, %v7327_v0 }
 0x332   :  { %v726_v32 = vrot.slane %v707_v24, %v7881_v6 }
 0x3c3   :  { %v1285_v29 = vpop.f32.mrb[4].mxu0  ;;  %v1328_v30 = vpop.f32.mrb[4].mxu1 }
 0x3c4   :  { %v1287_v33 = vpop.f32.mrb[5].mxu0  ;;  %v1330_v34 = vpop.f32.mrb[5].mxu1  ;;  %v1286_v37 = vadd.f32 %v1285_v29, %v714_v27  ;;  %v1329_v38 = vadd.f32 %v1328_v30, %v722_v28 }
 0x3c5   :  { %v1289_v35 = vpop.f32.mrb[6].mxu0  ;;  %v1332_v36 = vpop.f32.mrb[6].mxu1  ;;  %v1288_v43 = vadd.f32 %v1287_v33, %v718_v31  ;;  %v1331_v44 = vadd.f32 %v1330_v34, %v726_v32 }
 0x3c6   :  { %v1290_v39 = vadd.f32 %v1289_v35, %v714_v27  ;;  %v1333_v40 = vadd.f32 %v1332_v36, %v722_v28  ;;  %v1291_v41 = vpop.f32.mrb[7].mxu0  ;;  %v1334_v42 = vpop.f32.mrb[7].mxu1  ;;  %v708_v28 = vld [vmem:[#allocation9 + $0x8] sm:$0xf] }
 0x3c7   :  { %v1292_v45 = vadd.f32 %v1291_v41, %v718_v31  ;;  %v1335_v46 = vadd.f32 %v1334_v42, %v726_v32  ;;  %v754_v29 = vrot.slane %v708_v28, %v7875_v23  ;;  %v750_v30 = vrot.slane %v708_v28, %v7878_v25 }
 0x3c8   :  { %v7887_v47 = vpack.c.bf16 %v1290_v39, %v1286_v37  ;;  %v7889_v48 = vpack.c.bf16 %v1333_v40, %v1329_v38  ;;  %v758_v31 = vrot.slane %v708_v28, %v7881_v6  ;;  %v746_v32 = vrot.slane %v708_v28, %v7872_v22 }
 0x3c9   :  { %v7891_v49 = vpack.c.bf16 %v1292_v45, %v1288_v43  ;;  %v7893_v50 = vpack.c.bf16 %v1335_v46, %v1331_v44 }
 0x3e3   :  { %v1371_v58 = vpop.f32.mrb[8].mxu0  ;;  %v1414_v59 = vpop.f32.mrb[8].mxu1 }
 0x3e4   :  { %v1373_v1 = vpop.f32.mrb[9].mxu0  ;;  %v1416_v4 = vpop.f32.mrb[9].mxu1  ;;  %v1372_v8 = vadd.f32 %v1371_v58, %v730_v55  ;;  %v1415_v9 = vadd.f32 %v1414_v59, %v738_v56 }
 0x3e5   :  { %v1375_v5 = vpop.f32.mrb[10].mxu0  ;;  %v1418_v7 = vpop.f32.mrb[10].mxu1  ;;  %v1374_v14 = vadd.f32 %v1373_v1, %v734_v61  ;;  %v1417_v15 = vadd.f32 %v1416_v4, %v742_v62  ;;  %v374_v4 = vand.u32 127, %v371_v20 }
 0x3e6   :  { %v1376_v10 = vadd.f32 %v1375_v5, %v730_v55  ;;  %v1419_v11 = vadd.f32 %v1418_v7, %v738_v56  ;;  %v1377_v12 = vpop.f32.mrb[11].mxu0  ;;  %v1420_v13 = vpop.f32.mrb[11].mxu1 }
 0x3e7   :  { %v1378_v16 = vadd.f32 %v1377_v12, %v734_v61  ;;  %v1421_v17 = vadd.f32 %v1420_v13, %v742_v62  ;;  %vm7944_vm2 = vcmp.le.s32.totalorder %v374_v4, %v7869_v21 }
 0x3e8   :  { %v7907_v18 = vpack.c.bf16 %v1376_v10, %v1372_v8  ;;  %v7909_v19 = vpack.c.bf16 %v1419_v11, %v1415_v9 }
 0x3e9   :  { %v7911_v27 = vpack.c.bf16 %v1378_v16, %v1374_v14  ;;  %v7913_v24 = vpack.c.bf16 %v1421_v17, %v1417_v15 }
 0x3ea   :  { %6109 = vmatpush3.bf16.xpose.msra.mxu1 %v7907_v18  ;;  %6133 = vmatpush3.bf16.xpose.msra.mxu0 %v7909_v19  ;;  %v2274_v53 = vrot.slane %v7907_v18, 4 }
 0x3eb   :  { %6144 = vmatprep.subr.bf16.mxu0 %v7327_v0  ;;  %6114 = vmatprep.subr.bf16.mxu1 %v7327_v0  ;;  %v2382_v2 = vrot.slane %v7911_v27, 4 }
 0x3f1   :  { %6111 = vmatmul.mubr.bf16.vlgmr.msra.gmra.mrb[16].mxu1 %v7887_v47  ;;  %6135 = vmatmul.mubr.bf16.vlgmr.msra.gmra.mrb[16].mxu0 %v7889_v48 }
 0x3f2   :  { %6145 = vmatpush3.bf16.xpose.msra.mxu0 %v7913_v24  ;;  %6146 = vmatprep.mubr.msk.bf16.mxu0 %vm7328_vm0, %v7327_v0 }
 0x3f3   :  { %6116 = vmatprep.mubr.msk.bf16.mxu1 %vm7328_vm0, %v7327_v0 }
 0x3f9   :  { %6147 = vmatmul.mubr.bf16.vlgmr.msra.gmra.mrb[20].mxu0 %v7893_v50 }
 0x403   :  { %v1457_v33 = vpop.f32.mrb[12].mxu0  ;;  %v1500_v34 = vpop.f32.mrb[12].mxu1 }
 0x404   :  { %v1501_v35 = vadd.f32 %v1500_v34, %v754_v29  ;;  %v1459_v36 = vpop.f32.mrb[13].mxu0  ;;  %v1502_v37 = vpop.f32.mrb[13].mxu1  ;;  %v1458_v42 = vadd.f32 %v1457_v33, %v746_v32 }
 0x405   :  { %v1460_v38 = vadd.f32 %v1459_v36, %v750_v30  ;;  %v1503_v39 = vadd.f32 %v1502_v37, %v758_v31  ;;  %v1461_v40 = vpop.f32.mrb[14].mxu0  ;;  %v1504_v41 = vpop.f32.mrb[14].mxu1 }
 0x406   :  { %v1462_v43 = vadd.f32 %v1461_v40, %v746_v32  ;;  %v1505_v44 = vadd.f32 %v1504_v41, %v754_v29  ;;  %v1463_v45 = vpop.f32.mrb[15].mxu0  ;;  %v1506_v46 = vpop.f32.mrb[15].mxu1 }
 0x407   :  { %v1464_v55 = vadd.f32 %v1463_v45, %v750_v30  ;;  %v1507_v56 = vadd.f32 %v1506_v46, %v758_v31 }
 0x408   :  { %v7931_v58 = vpack.c.bf16 %v1462_v43, %v1458_v42  ;;  %v7933_v59 = vpack.c.bf16 %v1505_v44, %v1501_v35 }
 0x409   :  { %v7935_v61 = vpack.c.bf16 %v1464_v55, %v1460_v38  ;;  %v7937_v62 = vpack.c.bf16 %v1507_v56, %v1503_v39 }
 0x40a   :  { %v1581_v1 = vsel %vm1579_vm1, %v7931_v58, 0 }
 0x40b   :  { %6115 = vmatpush3.bf16.msra.mxu1 %v1581_v1  ;;  %v1681_v56 = vsel %vm1579_vm1, %v7935_v61, 0 }
 0x40c   :  { %6120 = vmatprep.subr.bf16.mxu1 %v7327_v0 }
 0x4c4   :  { %v1555_v5 = vpop.f32.mrb[16].mxu1  ;;  %v1757_v7 = vpop.f32.mrb[16].mxu0 }
 0x4c5   :  { %v1561_v9 = vmul.f32 0.25, %v1555_v5  ;;  %v6112_v10 = vpop.f32.mrb[17].mxu1  ;;  %v6136_v11 = vpop.f32.mrb[17].mxu0  ;;  %v1763_v34 = vmul.f32 0.25, %v1757_v7 }
 0x4c6   :  { %v1558_v12 = vpop.f32.mrb[18].mxu1  ;;  %v1760_v13 = vpop.f32.mrb[18].mxu0 }
 0x4c7   :  { %v6113_v14 = vpop.f32.mrb[19].mxu1  ;;  %v6137_v15 = vpop.f32.mrb[19].mxu0  ;;  %v1562_v16 = vsel %vm7944_vm2, %v1561_v9, -1e+30  ;;  %v1764_v37 = vsel %vm7944_vm2, %v1763_v34, -1e+30 }
 0x4c8   :  { %v1564_v20 = vsel %vm1563_vm3, %v1562_v16, -inf  ;;  %v1765_v38 = vsel %vm1563_vm3, %v1764_v37, -inf }
 0x4c9   :  { %1565 = vmax.xlane.f32.xlu0 %v1564_v20 }
 0x4cc   :  { %v1857_v17 = vpop.f32.mrb[20].mxu0 }
 0x4cd   :  { %v6148_v28 = vpop.f32.mrb[21].mxu0 }
 0x4ce   :  { %v1860_v29 = vpop.f32.mrb[22].mxu0 }
 0x4cf   :  { %v6149_v30 = vpop.f32.mrb[23].mxu0  ;;  %v1863_v29 = vmul.f32 0.25, %v1857_v17 }
 0x556   :  { %v1566_v31 = vpop.xlane.xlu0 %1565 }
 0x557   :  { %v1567_v32 = vsub.f32 %v1562_v16, %v1566_v31 }
 0x559   :  { %v1568_v33 = vmul.f32 1.442695, %v1567_v32  ;;  %v1864_v32 = vsel %vm7944_vm2, %v1863_v29, -1e+30  ;;  %v8074_v29 = vld [vmem:[%s8751_s24 + $0x78] sm:$0xff]  }
 0x55b   :  { %6690 = vpow2.f32 %v1568_v33  ;;  %v1865_v33 = vsel %vm1563_vm3, %v1864_v32, -inf }
 0x565   :  { %v6691_v35 = vpop.eup %6690 }
 0x566   :  { %v1570_v36 = vsel %vm1563_vm3, %v6691_v35, 0.0 }
 0x567   :  { %1571 = vadd.xlane.f32.xlu0 %v1570_v36 }
 0x56b   :  { %1766 = vmax.xlane.f32.xlu0 %v1765_v38 }
 0x5f4   :  { %v1572_v39 = vpop.xlane.xlu0 %1571 }
 0x5f5   :  { %6692 = vrcp.f32 %v1572_v39 }
 0x5f8   :  { %v1767_v40 = vpop.xlane.xlu0 %1766 }
 0x5f9   :  { %v1768_v41 = vsub.f32 %v1764_v37, %v1767_v40 }
 0x5fb   :  { %v1769_v42 = vmul.f32 1.442695, %v1768_v41 }
 0x5fd   :  { %6694 = vpow2.f32 %v1769_v42  ;;  %v1781_v42 = vsel %vm1579_vm1, %v7933_v59, 0 }
 0x5ff   :  { %v6693_v43 = vpop.eup %6692 }
 0x600   :  { %v1574_v44 = vmul.f32 %v6693_v43, %v6691_v35 }
 0x602   :  { %v1575_v45 = vpack.c.bf16 %v1574_v44, %v1574_v44 }
 0x604   :  { %6117 = vmatmul.mubr.msk.bf16.vlgmr.msra.gmra.mrb[20].mxu1 %vm1563_vm3, %v1575_v45 }
 0x605   :  { %6121 = vmatpush3.bf16.xpose.msra.mxu1 %v7911_v27  ;;  %6122 = vmatprep.mubr.msk.bf16.mxu1 %vm7328_vm0, %v7327_v0 }
 0x606   :  { %6126 = vmatprep.subr.bf16.mxu1 %v7327_v0 }
 0x607   :  { %v6695_v46 = vpop.eup %6694 }
 0x608   :  { %v1771_v55 = vsel %vm1563_vm3, %v6695_v46, 0.0 }
 0x609   :  { %1772 = vadd.xlane.f32.xlu0 %v1771_v55 }
 0x60c   :  { %6123 = vmatmul.mubr.bf16.vlgmr.msra.gmra.mrb[24].mxu1 %v7891_v49 }
 0x60d   :  { %6127 = vmatpush3.bf16.msra.mxu1 %v1681_v56  ;;  %6128 = vmatprep.mubr.msk.bf16.mxu1 %vm7328_vm0, %v7327_v0  ;;  %v1881_v56 = vsel %vm1579_vm1, %v7937_v62, 0 }
 0x60e   :  { %6138 = vmatprep.subr.bf16.mxu1 %v7327_v0 }
 0x696   :  { %v1773_v35 = vpop.xlane.xlu0 %1772 }
 0x6d7   :  { %v7967_v1 = vpop.f32.mrb[20].mxu1 }
 0x6d8   :  { %v6118_v4 = vpop.f32.mrb[21].mxu1  ;;  %v1923_v51 = vpack.c.bf16 %v7967_v1, %v7967_v1 }
 0x6d9   :  { %v1620_v5 = vpop.f32.mrb[22].mxu1  ;;  %v7996_v4 = vld [vmem:[%s8751_s24] sm:$0xff]  }
 0x6da   :  { %v6119_v7 = vpop.f32.mrb[23].mxu1  ;;  %v8001_v5 = vld [vmem:[%s8751_s24 + $0x48] sm:$0xff]  }
 0x6db   :  { %v8008_v7 = vld [vmem:[%s8751_s24 + $0x8] sm:$0xff]  }
 0x6df   :  { %v1657_v9 = vpop.f32.mrb[24].mxu1 }
 0x6e0   :  { %v1663_v10 = vmul.f32 0.25, %v1657_v9  ;;  %v6124_v11 = vpop.f32.mrb[25].mxu1  ;;  %v8014_v9 = vld [vmem:[%s8751_s24 + $0x50] sm:$0xff]  }
 0x6e1   :  { %v1660_v12 = vpop.f32.mrb[26].mxu1  ;;  %v8026_v11 = vld [vmem:[%s8751_s24 + $0x58] sm:$0xff]  }
 0x6e2   :  { %v6125_v13 = vpop.f32.mrb[27].mxu1  ;;  %v1664_v14 = vsel %vm7944_vm2, %v1663_v10, -1e+30  ;;  %v8020_v10 = vld [vmem:[%s8751_s24 + $0x10] sm:$0xff]   ;;  %v8032_v12 = vld [vmem:[%s8751_s24 + $0x18] sm:$0xff]  }
 0x6e3   :  { %v1665_v15 = vsel %vm1563_vm3, %v1664_v14, -inf  ;;  %v8038_v13 = vld [vmem:[%s8751_s24 + $0x60] sm:$0xff]  }
 0x6e4   :  { %1666 = vmax.xlane.f32.xlu1 %v1665_v15  ;;  %v8050_v15 = vld [vmem:[%s8751_s24 + $0x68] sm:$0xff]  }
 0x771   :  { %v1667_v16 = vpop.xlane.xlu1 %1666 }
 0x772   :  { %v1668_v20 = vsub.f32 %v1664_v14, %v1667_v16  ;;  %v8044_v14 = vld [vmem:[%s8751_s24 + $0x20] sm:$0xff]   ;;  %v8056_v16 = vld [vmem:[%s8751_s24 + $0x28] sm:$0xff]  }
 0x774   :  { %v1669_v28 = vmul.f32 1.442695, %v1668_v20  ;;  %v8062_v20 = vld [vmem:[%s8751_s24 + $0x70] sm:$0xff]  }
 0x776   :  { %6696 = vpow2.f32 %v1669_v28  ;;  %v8068_v28 = vld [vmem:[%s8751_s24 + $0x30] sm:$0xff]  }
 0x780   :  { %v6697_v30 = vpop.eup %6696 }
 0x781   :  { %v1671_v31 = vsel %vm1563_vm3, %v6697_v30, 0.0 }
 0x782   :  { %1672 = vadd.xlane.f32.xlu1 %v1671_v31  ;;  %v8088_v31 = vld [vmem:[%s8751_s24 + $0xc0] sm:$0xff]  }
 0x786   :  { %1866 = vmax.xlane.f32.xlu1 %v1865_v33 }
 0x80f   :  { %v1673_v34 = vpop.xlane.xlu1 %1672 }
 0x810   :  { %6698 = vrcp.f32 %v1673_v34 }
 0x811   :  { %6700 = vrcp.f32 %v1773_v35  ;;  %v8094_v35 = vld [vmem:[%s8751_s24 + $0x80] sm:$0xff]  }
 0x813   :  { %v1867_v36 = vpop.xlane.xlu1 %1866 }
 0x814   :  { %v1868_v37 = vsub.f32 %v1864_v32, %v1867_v36 }
 0x816   :  { %v1869_v38 = vmul.f32 1.442695, %v1868_v37  ;;  %v8099_v37 = vld [vmem:[%s8751_s24 + $0xc8] sm:$0xff]  }
 0x818   :  { %6702 = vpow2.f32 %v1869_v38  ;;  %v8106_v38 = vld [vmem:[%s8751_s24 + $0x88] sm:$0xff]  }
 0x81a   :  { %v6699_v39 = vpop.eup %6698 }
 0x81b   :  { %v1675_v17 = vmul.f32 %v6699_v39, %v6697_v30  ;;  %v6701_v41 = vpop.eup %6700  ;;  %v8080_v30 = vld [vmem:[%s8751_s24 + $0x38] sm:$0xff]   ;;  %v8112_v39 = vld [vmem:[%s8751_s24 + $0xd0] sm:$0xff]  }
 0x81c   :  { %v1775_v43 = vmul.f32 %v6701_v41, %v6695_v46  ;;  %v7991_v46 = vld [vmem:[%s8751_s24 + $0x40] sm:$0xff]   ;;  %v8130_v41 = vld [vmem:[%s8751_s24 + $0x98] sm:$0xff]  }
 0x81d   :  { %v1676_v40 = vpack.c.bf16 %v1675_v17, %v1675_v17  ;;  %5817 = vmatprep.subr.bf16.mxu0 %v7991_v46  ;;  %v8118_v17 = vld [vmem:[%s8751_s24 + $0x90] sm:$0xff]  }
 0x81e   :  { %v1776_v55 = vpack.c.bf16 %v1775_v43, %v1775_v43  ;;  %5818 = vmatpush3.bf16.msra.mxu0 %v7996_v4  ;;  %v8142_v43 = vld [vmem:[%s8751_s24 + $0xa0] sm:$0xff]  }
 0x81f   :  { %6129 = vmatmul.mubr.msk.bf16.vlgmr.msra.gmra.mrb[28].mxu1 %vm1563_vm3, %v1676_v40  ;;  %5819 = vmatprep.subr.bf16.mxu0 %v8001_v5  ;;  %v8124_v40 = vld [vmem:[%s8751_s24 + $0xd8] sm:$0xff]  }
 0x820   :  { %6139 = vmatpush3.bf16.msra.mxu1 %v1781_v42  ;;  %6140 = vmatprep.mubr.msk.bf16.mxu1 %vm7328_vm0, %v7327_v0  ;;  %v8136_v42 = vld [vmem:[%s8751_s24 + $0xe0] sm:$0xff]  }
 0x821   :  { %6150 = vmatprep.subr.bf16.mxu1 %v7327_v0 }
 0x822   :  { %v6703_v44 = vpop.eup %6702  ;;  %5820 = vmatpush3.bf16.msra.mxu0 %v8008_v7 }
 0x823   :  { %v1871_v45 = vsel %vm1563_vm3, %v6703_v44, 0.0  ;;  %5821 = vmatprep.subr.bf16.mxu0 %v8014_v9 }
 0x824   :  { %1872 = vadd.xlane.f32.xlu1 %v1871_v45  ;;  %v8154_v45 = vld [vmem:[%s8751_s24 + $0xa8] sm:$0xff]  }
 0x826   :  { %5822 = vmatpush3.bf16.msra.mxu0 %v8020_v10 }
 0x827   :  { %6141 = vmatmul.mubr.msk.bf16.vlgmr.msra.gmra.mrb[32].mxu1 %vm1563_vm3, %v1776_v55  ;;  %5823 = vmatprep.subr.bf16.mxu0 %v8026_v11  ;;  %v8160_v55 = vld [vmem:[%s8751_s24 + $0xf0] sm:$0xff]  }
 0x828   :  { %6151 = vmatpush3.bf16.msra.mxu1 %v1881_v56  ;;  %6152 = vmatprep.mubr.msk.bf16.mxu1 %vm7328_vm0, %v7327_v0  ;;  %v8166_v56 = vld [vmem:[%s8751_s24 + $0xb0] sm:$0xff]  }
 0x829   :  { %5839 = vmatprep.subr.bf16.mxu1 %v8088_v31 }
 0x82a   :  { %5824 = vmatpush3.bf16.msra.mxu0 %v8032_v12 }
 0x82b   :  { %5825 = vmatprep.subr.bf16.mxu0 %v8038_v13 }
 0x82e   :  { %5826 = vmatpush3.bf16.msra.mxu0 %v8044_v14 }
 0x82f   :  { %5827 = vmatprep.subr.bf16.mxu0 %v8050_v15 }
 0x832   :  { %5828 = vmatpush3.bf16.msra.mxu0 %v8056_v16 }
 0x833   :  { %5829 = vmatprep.subr.bf16.mxu0 %v8062_v20 }
 0x836   :  { %5830 = vmatpush3.bf16.msra.mxu0 %v8068_v28 }
 0x837   :  { %5831 = vmatprep.subr.bf16.mxu0 %v8074_v29 }
 0x83a   :  { %5832 = vmatpush3.bf16.msra.mxu0 %v8080_v30 }
 0x83b   :  { %6156 = vmatprep.subr.bf16.mxu0 %v7327_v0 }
 0x8b1   :  { %v1873_v32 = vpop.xlane.xlu1 %1872 }
 0x8b2   :  { %6704 = vrcp.f32 %v1873_v32  ;;  %v8172_v32 = vld [vmem:[%s8751_s24 + $0xf8] sm:$0xff]  }
 0x8bc   :  { %v6705_v33 = vpop.eup %6704 }
 0x8bd   :  { %v1875_v34 = vmul.f32 %v6705_v33, %v6703_v44  ;;  %v8148_v44 = vld [vmem:[%s8751_s24 + $0xe8] sm:$0xff]  }
 0x8bf   :  { %v1876_v36 = vpack.c.bf16 %v1875_v34, %v1875_v34 }
 0x8c1   :  { %6153 = vmatmul.mubr.msk.bf16.vlgmr.msra.gmra.mrb[36].mxu1 %vm1563_vm3, %v1876_v36 }
 0x8c2   :  { %5840 = vmatpush3.bf16.msra.mxu1 %v8094_v35 }
 0x8c3   :  { %5841 = vmatprep.subr.bf16.mxu1 %v8099_v37 }
 0x8c6   :  { %5842 = vmatpush3.bf16.msra.mxu1 %v8106_v38 }
 0x8c7   :  { %5843 = vmatprep.subr.bf16.mxu1 %v8112_v39 }
 0x8ca   :  { %5844 = vmatpush3.bf16.msra.mxu1 %v8118_v17 }
 0x8cb   :  { %5845 = vmatprep.subr.bf16.mxu1 %v8124_v40 }
 0x8ce   :  { %5846 = vmatpush3.bf16.msra.mxu1 %v8130_v41 }
 0x8cf   :  { %5847 = vmatprep.subr.bf16.mxu1 %v8136_v42 }
 0x8d2   :  { %5848 = vmatpush3.bf16.msra.mxu1 %v8142_v43 }
 0x8d3   :  { %5849 = vmatprep.subr.bf16.mxu1 %v8148_v44 }
 0x8d6   :  { %5850 = vmatpush3.bf16.msra.mxu1 %v8154_v45 }
 0x8d7   :  { %5851 = vmatprep.subr.bf16.mxu1 %v8160_v55 }
 0x8da   :  { %5852 = vmatpush3.bf16.msra.mxu1 %v8166_v56 }
 0x8db   :  { %5853 = vmatprep.subr.bf16.mxu1 %v8172_v32 }
 0x8f2   :  { %v1717_v33 = vpop.f32.mrb[28].mxu1 }
 0x8f3   :  { %v1924_v34 = vpack.c.bf16 %v1717_v33, %v1717_v33  ;;  %v6130_v36 = vpop.f32.mrb[29].mxu1  ;;  %v2271_v33 = vrot.slane %v7887_v47, 4  ;;  %v8200_v47 = vld [vmem:[%s8751_s24 + $0xb8] sm:$0xff]  }
 0x8f4   :  { %v1720_v54 = vpop.f32.mrb[30].mxu1  ;;  %5854 = vmatpush3.bf16.msra.mxu1 %v8200_v47 }
 0x8f5   :  { %v6131_v52 = vpop.f32.mrb[31].mxu1  ;;  %2222 = vmatprep.mubr.bf16.mxu0 %v1924_v34  ;;  %6162 = vmatprep.subr.bf16.mxu1 %v7327_v0 }
 0x8f6   :  { %2223 = vmatmul.mubr.bf16.vlgmr.msra.gmra.mrb[24].mxu0 %v1923_v51  ;;  %v2379_v51 = vrot.slane %v7891_v49, 4  ;;  %v2490_v52 = vrot.slane %v7909_v19, 4  ;;  %v2595_v49 = vrot.slane %v7893_v50, 4 }
 0x8f7   :  { %6157 = vmatpush3.bf16.xpose.msra.mxu0 %v2274_v53  ;;  %6158 = vmatprep.mubr.msk.bf16.mxu0 %vm7328_vm0, %v7327_v0 }
 0x8f8   :  { %6168 = vmatprep.subr.bf16.mxu0 %v7327_v0 }
 0x8fa   :  { %v1817_v3 = vpop.f32.mrb[32].mxu1 }
 0x8fb   :  { %v6142_v57 = vpop.f32.mrb[33].mxu1  ;;  %v1925_v18 = vpack.c.bf16 %v1817_v3, %v1817_v3 }
 0x8fc   :  { %v1820_v36 = vpop.f32.mrb[34].mxu1  ;;  %v2487_v57 = vrot.slane %v7889_v48, 4  ;;  %v2331_v48 = vrot.slane %v7931_v58, 4 }
 0x8fd   :  { %v6143_v1 = vpop.f32.mrb[35].mxu1 }
 0x8fe   :  { %6159 = vmatmul.mubr.bf16.vlgmr.msra.gmra.mrb[28].mxu0 %v2271_v33 }
 0x8ff   :  { %6169 = vmatpush3.bf16.xpose.msra.mxu0 %v2382_v2  ;;  %6170 = vmatprep.mubr.msk.bf16.mxu0 %vm7328_vm0, %v7327_v0  ;;  %v2598_v2 = vrot.slane %v7913_v24, 4  ;;  %v2336_v24 = vsel %vm1579_vm1, %v2331_v48, 0 }
 0x900   :  { %6180 = vmatprep.subr.bf16.mxu0 %v7327_v0 }
 0x906   :  { %6171 = vmatmul.mubr.bf16.vlgmr.msra.gmra.mrb[32].mxu0 %v2379_v51 }
 0x907   :  { %6181 = vmatpush3.bf16.xpose.msra.mxu0 %v2490_v52  ;;  %6182 = vmatprep.mubr.msk.bf16.mxu0 %vm7328_vm0, %v7327_v0 }
 0x908   :  { %6192 = vmatprep.subr.bf16.mxu0 %v7327_v0 }
 0x90e   :  { %6183 = vmatmul.mubr.bf16.vlgmr.msra.gmra.mrb[36].mxu0 %v2487_v57 }
 0x90f   :  { %6193 = vmatpush3.bf16.xpose.msra.mxu0 %v2598_v2  ;;  %6194 = vmatprep.mubr.msk.bf16.mxu0 %vm7328_vm0, %v7327_v0 }
 0x910   :  { %5877 = vmatprep.subr.bf16.mxu0 %v7991_v46 }
 0x916   :  { %6195 = vmatmul.mubr.bf16.vlgmr.msra.gmra.mrb[40].mxu0 %v2595_v49 }
 0x917   :  { %5878 = vmatpush3.bf16.msra.mxu0 %v7996_v4 }
 0x918   :  { %5879 = vmatprep.subr.bf16.mxu0 %v8001_v5 }
 0x91b   :  { %5880 = vmatpush3.bf16.msra.mxu0 %v8008_v7 }
 0x91c   :  { %5881 = vmatprep.subr.bf16.mxu0 %v8014_v9 }
 0x91f   :  { %5882 = vmatpush3.bf16.msra.mxu0 %v8020_v10 }
 0x920   :  { %5883 = vmatprep.subr.bf16.mxu0 %v8026_v11 }
 0x923   :  { %5884 = vmatpush3.bf16.msra.mxu0 %v8032_v12 }
 0x924   :  { %5885 = vmatprep.subr.bf16.mxu0 %v8038_v13 }
 0x927   :  { %5886 = vmatpush3.bf16.msra.mxu0 %v8044_v14 }
 0x928   :  { %5887 = vmatprep.subr.bf16.mxu0 %v8050_v15 }
 0x92b   :  { %5888 = vmatpush3.bf16.msra.mxu0 %v8056_v16 }
 0x92c   :  { %5889 = vmatprep.subr.bf16.mxu0 %v8062_v20 }
 0x92f   :  { %5890 = vmatpush3.bf16.msra.mxu0 %v8068_v28 }
 0x930   :  { %5891 = vmatprep.subr.bf16.mxu0 %v8074_v29 }
 0x933   :  { %5892 = vmatpush3.bf16.msra.mxu0 %v8080_v30 }
 0x994   :  { %v1917_v50 = vpop.f32.mrb[36].mxu1 }
 0x995   :  { %v1926_v53 = vpack.c.bf16 %v1917_v50, %v1917_v50  ;;  %v6154_v54 = vpop.f32.mrb[37].mxu1 }
 0x996   :  { %v1920_v19 = vpop.f32.mrb[38].mxu1 }
 0x997   :  { %v6155_v27 = vpop.f32.mrb[39].mxu1  ;;  %2262 = vmatprep.mubr.bf16.mxu1 %v1926_v53 }
 0x998   :  { %2263 = vmatmul.mubr.bf16.vlgmr.msra.gmra.mrb[40].mxu1 %v1925_v18 }
 0x999   :  { %6163 = vmatpush3.bf16.msra.mxu1 %v2336_v24  ;;  %6164 = vmatprep.mubr.msk.bf16.mxu1 %vm7328_vm0, %v7327_v0 }
 0x99a   :  { %6174 = vmatprep.subr.bf16.mxu1 %v7327_v0 }
 0x9c9   :  { %v5833_v46 = vpop.f32.mrb[24].mxu0 }
 0x9ca   :  { %v5834_v4 = vpop.f32.mrb[25].mxu0 }
 0x9cb   :  { %v5835_v5 = vadd.f32 %v5834_v4, %v5833_v46  ;;  %v5836_v58 = vpop.f32.mrb[26].mxu0  ;;  %v8237_v4 = vld [vmem:[#allocation10] ss:$0 sm:$0xff] }
 0x9cc   :  { %v5837_v7 = vpop.f32.mrb[27].mxu0 }
 0x9d1   :  { %v2310_v9 = vpop.f32.mrb[28].mxu0 }
 0x9d2   :  { %v2316_v10 = vmul.f32 0.25, %v2310_v9  ;;  %v6160_v3 = vpop.f32.mrb[29].mxu0 }
 0x9d3   :  { %v2313_v11 = vpop.f32.mrb[30].mxu0  ;;  %v2225_v3 = vadd.f32 %v5835_v5, %v8237_v4 }
 0x9d4   :  { %v6161_v12 = vpop.f32.mrb[31].mxu0  ;;  %v2317_v13 = vsel %vm7944_vm2, %v2316_v10, -1e+30 }
 0x9d5   :  { %v2318_v14 = vsel %vm1563_vm3, %v2317_v13, -inf }
 0x9d6   :  { %2319 = vmax.xlane.f32.xlu0 %v2318_v14 }
 0x9d9   :  { %v2418_v15 = vpop.f32.mrb[32].mxu0 }
 0x9da   :  { %v2424_v16 = vmul.f32 0.25, %v2418_v15  ;;  %v6172_v20 = vpop.f32.mrb[33].mxu0 }
 0x9db   :  { %v2421_v28 = vpop.f32.mrb[34].mxu0 }
 0x9dc   :  { %v6173_v29 = vpop.f32.mrb[35].mxu0  ;;  %v2425_v30 = vsel %vm7944_vm2, %v2424_v16, -1e+30 }
 0x9dd   :  { %v2426_v34 = vsel %vm1563_vm3, %v2425_v30, -inf }
 0x9de   :  { %2427 = vmax.xlane.f32.xlu1 %v2426_v34 }
 0x9e1   :  { %v2526_v33 = vpop.f32.mrb[36].mxu0 }
 0x9e2   :  { %v2532_v36 = vmul.f32 0.25, %v2526_v33  ;;  %v6184_v1 = vpop.f32.mrb[37].mxu0 }
 0x9e3   :  { %v2529_v51 = vpop.f32.mrb[38].mxu0 }
 0x9e4   :  { %v6185_v52 = vpop.f32.mrb[39].mxu0  ;;  %v2533_v57 = vsel %vm7944_vm2, %v2532_v36, -1e+30 }
 0x9e5   :  { %v2534_v2 = vsel %vm1563_vm3, %v2533_v57, -inf  ;;  %v8752_v52 = vmax.f32 %v7838_v60, 0.0 }
 0x9e6   :  { %2535 = vmax.xlane.f32.xlu0 %v2534_v2 }
 0x9e9   :  { %v2634_v49 = vpop.f32.mrb[40].mxu0 }
 0x9ea   :  { %v2640_v48 = vmul.f32 0.25, %v2634_v49  ;;  %v6196_v50 = vpop.f32.mrb[41].mxu0 }
 0x9eb   :  { %v2637_v53 = vpop.f32.mrb[42].mxu0 }
 0x9ec   :  { %v6197_v54 = vpop.f32.mrb[43].mxu0  ;;  %v2641_v18 = vsel %vm7944_vm2, %v2640_v48, -1e+30 }
 0x9ed   :  { %v2642_v19 = vsel %vm1563_vm3, %v2641_v18, -inf }
 0x9ee   :  { %2643 = vmax.xlane.f32.xlu1 %v2642_v19 }
 0xa63   :  { %v2320_v27 = vpop.xlane.xlu0 %2319 }
 0xa64   :  { %v2321_v24 = vsub.f32 %v2317_v13, %v2320_v27 }
 0xa66   :  { %v2322_v46 = vmul.f32 1.442695, %v2321_v24 }
 0xa68   :  { %6706 = vpow2.f32 %v2322_v46 }
 0xa6b   :  { %v2428_v58 = vpop.xlane.xlu1 %2427  ;;  %v5855_v7 = vpop.f32.mrb[40].mxu1 }
 0xa6c   :  { %v2429_v9 = vsub.f32 %v2425_v30, %v2428_v58  ;;  %v5856_v10 = vpop.f32.mrb[41].mxu1  ;;  %v2547_v58 = vrot.slane %v7933_v59, 4 }
 0xa6d   :  { %v5857_v11 = vadd.f32 %v5856_v10, %v5855_v7  ;;  %v5858_v12 = vpop.f32.mrb[42].mxu1 }
 0xa6e   :  { %v2430_v14 = vmul.f32 1.442695, %v2429_v9  ;;  %v5859_v8 = vpop.f32.mrb[43].mxu1  ;;  %v2552_v10 = vsel %vm1579_vm1, %v2547_v58, 0  ;;  %v6597_v58 = vld [vmem:[#allocation12 + $0x2c] ss:$16 sps:$4 sm:$0xff]  }
 0xa6f   :  { %v2265_v15 = vadd.f32 %v5857_v11, %v2225_v3  ;;  %v2655_v11 = vrot.slane %v7937_v62, 4 }
 0xa70   :  { %6708 = vpow2.f32 %v2430_v14 }
 0xa71   :  { %v8245_v2 = vadd.f32 %v2265_v15, %v8752_v52  ;;  %v2660_v59 = vsel %vm1579_vm1, %v2655_v11, 0  ;;  %v6609_v11 = vld [vmem:[#allocation12 + $0x6c] ss:$16 sps:$4 sm:$0xff]  }
 0xa72   :  { %v6707_v16 = vpop.eup %6706 }
 0xa73   :  { %v2536_v20 = vpop.xlane.xlu0 %2535  ;;  %v2324_v13 = vsel %vm1563_vm3, %v6707_v16, 0.0  ;;  %v2794_v49 = vmul.f32 %v8245_v2, %v8245_v2 }
 0xa74   :  { %v2537_v28 = vsub.f32 %v2533_v57, %v2536_v20  ;;  %2325 = vadd.xlane.f32.xlu0 %v2324_v13 }
 0xa76   :  { %v2538_v29 = vmul.f32 1.442695, %v2537_v28 }
 0xa78   :  { %6710 = vpow2.f32 %v2538_v29 }
 0xa7a   :  { %v6709_v34 = vpop.eup %6708 }
 0xa7b   :  { %v2644_v33 = vpop.xlane.xlu1 %2643  ;;  %v2432_v30 = vsel %vm1563_vm3, %v6709_v34, 0.0 }
 0xa7c   :  { %v2645_v36 = vsub.f32 %v2641_v18, %v2644_v33  ;;  %2433 = vadd.xlane.f32.xlu1 %v2432_v30  ;;  %v2439_v18 = vrot.slane %v7935_v61, 4  ;;  %v6588_v33 = vld [vmem:[#allocation12 + $0x4] ss:$16 sps:$4 sm:$0xff]   ;;  %v6589_v30 = vld [vmem:[#allocation12 + $0x8] ss:$16 sps:$4 sm:$0xff]  }
 0xa7d   :  { %3049 = vmatprep.subr.bf16.mxu0 %v6588_v33 }
 0xa7e   :  { %v2646_v5 = vmul.f32 1.442695, %v2645_v36  ;;  %v2444_v24 = vsel %vm1579_vm1, %v2439_v18, 0  ;;  %v6591_v36 = vld [vmem:[#allocation12 + $0xc] ss:$16 sps:$4 sm:$0xff]  }
 0xa80   :  { %6712 = vpow2.f32 %v2646_v5 }
 0xa82   :  { %v6711_v1 = vpop.eup %6710 }
 0xa83   :  { %v2540_v51 = vsel %vm1563_vm3, %v6711_v1, 0.0 }
 0xa84   :  { %2541 = vadd.xlane.f32.xlu0 %v2540_v51 }
 0xa88   :  { %2788 = vadd.xlane.f32.xlu0 %v8245_v2 }
 0xa8a   :  { %v6713_v57 = vpop.eup %6712 }
 0xa8b   :  { %v2648_v48 = vsel %vm1563_vm3, %v6713_v57, 0.0 }
 0xa8c   :  { %2649 = vadd.xlane.f32.xlu1 %v2648_v48  ;;  %2796 = vadd.xlane.f32.xlu0 %v2794_v49 }
 0xb01   :  { %v2326_v50 = vpop.xlane.xlu0 %2325 }
 0xb02   :  { %6714 = vrcp.f32 %v2326_v50 }
 0xb09   :  { %v2434_v53 = vpop.xlane.xlu1 %2433 }
 0xb0a   :  { %6716 = vrcp.f32 %v2434_v53 }
 0xb0c   :  { %v6715_v54 = vpop.eup %6714 }
 0xb0d   :  { %v2328_v60 = vmul.f32 %v6715_v54, %v6707_v16 }
 0xb0f   :  { %v2329_v19 = vpack.c.bf16 %v2328_v60, %v2328_v60 }
 0xb11   :  { %v2542_v27 = vpop.xlane.xlu0 %2541  ;;  %6165 = vmatmul.mubr.msk.bf16.vlgmr.msra.gmra.mrb[44].mxu1 %vm1563_vm3, %v2329_v19  ;;  %v8754_v19 = vmax.f32 %v7840_v63, 0.0  ;;  %v6601_v63 = vld [vmem:[#allocation12 + $0x48] ss:$16 sps:$4 sm:$0xff]  }
 0xb12   :  { %6718 = vrcp.f32 %v2542_v27  ;;  %6175 = vmatpush3.bf16.msra.mxu1 %v2444_v24  ;;  %6176 = vmatprep.mubr.msk.bf16.mxu1 %vm7328_vm0, %v7327_v0 }
 0xb13   :  { %6186 = vmatprep.subr.bf16.mxu1 %v7327_v0 }
 0xb14   :  { %v6717_v46 = vpop.eup %6716 }
 0xb15   :  { %v2436_v7 = vmul.f32 %v6717_v46, %v6709_v34  ;;  %v6586_v34 = vld [vmem:[#allocation12] ss:$16 sps:$4 sm:$0xff]   ;;  %v6594_v46 = vld [vmem:[#allocation12 + $0x24] ss:$16 sps:$4 sm:$0xff]  }
 0xb17   :  { %v2437_v9 = vpack.c.bf16 %v2436_v7, %v2436_v7  ;;  %v6592_v7 = vld [vmem:[#allocation12 + $0x20] ss:$16 sps:$4 sm:$0xff]  }
 0xb19   :  { %v2650_v61 = vpop.xlane.xlu1 %2649  ;;  %6177 = vmatmul.mubr.msk.bf16.vlgmr.msra.gmra.mrb[48].mxu1 %vm1563_vm3, %v2437_v9  ;;  %v6595_v9 = vld [vmem:[#allocation12 + $0x28] ss:$16 sps:$4 sm:$0xff]  }
 0xb1a   :  { %6720 = vrcp.f32 %v2650_v61  ;;  %6187 = vmatpush3.bf16.msra.mxu1 %v2552_v10  ;;  %6188 = vmatprep.mubr.msk.bf16.mxu1 %vm7328_vm0, %v7327_v0  ;;  %v6603_v61 = vld [vmem:[#allocation12 + $0x4c] ss:$16 sps:$4 sm:$0xff]   ;;  %v6598_v10 = vld [vmem:[#allocation12 + $0x40] ss:$16 sps:$4 sm:$0xff]  }
 0xb1b   :  { %6198 = vmatprep.subr.bf16.mxu1 %v7327_v0 }
 0xb1c   :  { %v6719_v3 = vpop.eup %6718 }
 0xb1d   :  { %v2544_v12 = vmul.f32 %v6719_v3, %v6711_v1  ;;  %v6606_v3 = vld [vmem:[#allocation12 + $0x64] ss:$16 sps:$4 sm:$0xff]  }
 0xb1f   :  { %v2545_v14 = vpack.c.bf16 %v2544_v12, %v2544_v12  ;;  %v6604_v12 = vld [vmem:[#allocation12 + $0x60] ss:$16 sps:$4 sm:$0xff]  }
 0xb21   :  { %6189 = vmatmul.mubr.msk.bf16.vlgmr.msra.gmra.mrb[52].mxu1 %vm1563_vm3, %v2545_v14  ;;  %v6607_v14 = vld [vmem:[#allocation12 + $0x68] ss:$16 sps:$4 sm:$0xff]  }
 0xb22   :  { %6199 = vmatpush3.bf16.msra.mxu1 %v2660_v59  ;;  %6200 = vmatprep.mubr.msk.bf16.mxu1 %vm7328_vm0, %v7327_v0  ;;  %v6610_v59 = vld [vmem:[#allocation12 + $0x80] ss:$16 sps:$4 sm:$0xff]  }
 0xb23   :  { %5899 = vmatprep.subr.bf16.mxu1 %v8088_v31 }
 0xb24   :  { %v6721_v8 = vpop.eup %6720 }
 0xb25   :  { %v2652_v15 = vmul.f32 %v6721_v8, %v6713_v57  ;;  %v6612_v8 = vld [vmem:[#allocation12 + $0x84] ss:$16 sps:$4 sm:$0xff]  }
 0xb27   :  { %v2653_v16 = vpack.c.bf16 %v2652_v15, %v2652_v15  ;;  %v6613_v15 = vld [vmem:[#allocation12 + $0x88] ss:$16 sps:$4 sm:$0xff]  }
 0xb29   :  { %6201 = vmatmul.mubr.msk.bf16.vlgmr.msra.gmra.mrb[56].mxu1 %vm1563_vm3, %v2653_v16  ;;  %v6615_v16 = vld [vmem:[#allocation12 + $0x8c] ss:$16 sps:$4 sm:$0xff]  }
 0xb2a   :  { %5900 = vmatpush3.bf16.msra.mxu1 %v8094_v35 }
 0xb2b   :  { %5901 = vmatprep.subr.bf16.mxu1 %v8099_v37 }
 0xb2e   :  { %5902 = vmatpush3.bf16.msra.mxu1 %v8106_v38 }
 0xb2f   :  { %5903 = vmatprep.subr.bf16.mxu1 %v8112_v39 }
 0xb32   :  { %5904 = vmatpush3.bf16.msra.mxu1 %v8118_v17 }
 0xb33   :  { %5905 = vmatprep.subr.bf16.mxu1 %v8124_v40 }
 0xb36   :  { %5906 = vmatpush3.bf16.msra.mxu1 %v8130_v41 }
 0xb37   :  { %5907 = vmatprep.subr.bf16.mxu1 %v8136_v42 }
 0xb3a   :  { %5908 = vmatpush3.bf16.msra.mxu1 %v8142_v43  ;;  %v8753_v43 = vmov 0  }
 0xb3b   :  { %5909 = vmatprep.subr.bf16.mxu1 %v8148_v44 }
 0xb3e   :  { %5910 = vmatpush3.bf16.msra.mxu1 %v8154_v45 }
 0xb3f   :  { %5911 = vmatprep.subr.bf16.mxu1 %v8160_v55 }
 0xb42   :  { %5912 = vmatpush3.bf16.msra.mxu1 %v8166_v56 }
 0xb43   :  { %5913 = vmatprep.subr.bf16.mxu1 %v8172_v32 }
 0xb46   :  { %5914 = vmatpush3.bf16.msra.mxu1 %v8200_v47 }
 0xb47   :  { %3092 = vmatprep.subr.bf16.mxu1 %v6591_v36 }
 0xbe4   :  { %v2372_v62 = vpop.f32.mrb[44].mxu1 }
 0xbe5   :  { %v6166_v31 = vpop.f32.mrb[45].mxu1  ;;  %v2702_v40 = vpack.c.bf16 %v2372_v62, %v2372_v62  ;;  %v6618_v62 = vld [vmem:[#allocation12 + $0xa4] ss:$16 sps:$4 sm:$0xff]  }
 0xbe6   :  { %v2375_v35 = vpop.f32.mrb[46].mxu1  ;;  %v6621_v31 = vld [vmem:[#allocation12 + $0xac] ss:$16 sps:$4 sm:$0xff]  }
 0xbe7   :  { %v6167_v37 = vpop.f32.mrb[47].mxu1  ;;  %v6616_v35 = vld [vmem:[#allocation12 + $0xa0] ss:$16 sps:$4 sm:$0xff]  }
 0xbe8   :  { %v6619_v37 = vld [vmem:[#allocation12 + $0xa8] ss:$16 sps:$4 sm:$0xff]  }
 0xbec   :  { %v2480_v38 = vpop.f32.mrb[48].mxu1 }
 0xbed   :  { %v2703_v39 = vpack.c.bf16 %v2480_v38, %v2480_v38  ;;  %v6178_v17 = vpop.f32.mrb[49].mxu1  ;;  %v6624_v38 = vld [vmem:[#allocation12 + $0xc4] ss:$16 sps:$4 sm:$0xff]  }
 0xbee   :  { %v2483_v41 = vpop.f32.mrb[50].mxu1  ;;  %v8295_v17 = vld [vmem:[#allocation13] sm:$0xff] }
 0xbef   :  { %v6179_v42 = vpop.f32.mrb[51].mxu1  ;;  %2738 = vmatprep.mubr.bf16.mxu0 %v2703_v39  ;;  %v6627_v39 = vld [vmem:[#allocation12 + $0xcc] ss:$16 sps:$4 sm:$0xff]  }
 0xbf0   :  { %2739 = vmatmul.mubr.bf16.vlgmr.msra.gmra.mrb[44].mxu0 %v2702_v40  ;;  %v8297_v40 = vld [vmem:[#allocation13 + $0x20] sm:$0xff]  ;;  %v8301_v42 = vld [vmem:[#allocation13 + $0x8] sm:$0xff] }
 0xbf1   :  { %3081 = vmatprep.mubr.bf16.mxu0 %v8753_v43  ;;  %3050 = vmatpush1.bf16.msra.mxu0 %v6586_v34  ;;  %v5647_v41 = vcombine.low %v8295_v17, %v8297_v40  ;;  %v2789_v34 = vpop.xlane.xlu0 %2788 }
 0xbf2   :  { %3051 = vmatprep.subr.bf16.mxu0 %v6594_v46 }
 0xbf4   :  { %v2588_v44 = vpop.f32.mrb[52].mxu1 }
 0xbf5   :  { %v6190_v45 = vpop.f32.mrb[53].mxu1  ;;  %v2704_v13 = vpack.c.bf16 %v2588_v44, %v2588_v44  ;;  %3052 = vmatpush1.bf16.msra.mxu0 %v6592_v7  ;;  %v8303_v44 = vld [vmem:[#allocation13 + $0x28] sm:$0xff]  ;;  %v2797_v33 = vpop.xlane.xlu0 %2796 }
 0xbf6   :  { %v2591_v55 = vpop.f32.mrb[54].mxu1  ;;  %v5649_v45 = vcombine.low %v8301_v42, %v8303_v44  ;;  %v2800_v36 = vmul.f32 0.015625, %v2797_v33 }
 0xbf7   :  { %v6191_v56 = vpop.f32.mrb[55].mxu1  ;;  %v6622_v55 = vld [vmem:[#allocation12 + $0xc0] ss:$16 sps:$4 sm:$0xff]  }
 0xbf8   :  { %v6625_v56 = vld [vmem:[#allocation12 + $0xc8] ss:$16 sps:$4 sm:$0xff]  }
 0xbfc   :  { %v2696_v32 = vpop.f32.mrb[56].mxu1 }
 0xbfd   :  { %v2705_v47 = vpack.c.bf16 %v2696_v32, %v2696_v32  ;;  %v6202_v20 = vpop.f32.mrb[57].mxu1  ;;  %v6630_v32 = vld [vmem:[#allocation12 + $0xe4] ss:$16 sps:$4 sm:$0xff]  }
 0xbfe   :  { %v2699_v28 = vpop.f32.mrb[58].mxu1  ;;  %v6628_v20 = vld [vmem:[#allocation12 + $0xe0] ss:$16 sps:$4 sm:$0xff]  }
 0xbff   :  { %v6203_v29 = vpop.f32.mrb[59].mxu1  ;;  %2778 = vmatprep.mubr.bf16.mxu1 %v2705_v47  ;;  %v6633_v47 = vld [vmem:[#allocation12 + $0xec] ss:$16 sps:$4 sm:$0xff]   ;;  %v5648_v28 = vcombine.high %v8295_v17, %v8297_v40 }
 0xc00   :  { %2779 = vmatmul.mubr.bf16.vlgmr.msra.gmra.mrb[60].mxu1 %v2704_v13  ;;  %v6631_v13 = vld [vmem:[#allocation12 + $0xe8] ss:$16 sps:$4 sm:$0xff]   ;;  %v5650_v29 = vcombine.high %v8301_v42, %v8303_v44  ;;  %v3172_v44 = vld [vmem:[#allocation13 + $0x100] sm:$0xff] }
 0xc01   :  { %3124 = vmatprep.mubr.bf16.mxu1 %v8753_v43  ;;  %3093 = vmatpush1.bf16.msra.mxu1 %v6589_v30  ;;  %v2792_v30 = vmul.f32 0.015625, %v2789_v34 }
 0xc02   :  { %3094 = vmatprep.subr.bf16.mxu1 %v6597_v58  ;;  %v5613_v58 = vld [vmem:[#allocation19] ss:$0 sm:$0xff] }
 0xc05   :  { %3095 = vmatpush1.bf16.msra.mxu1 %v6595_v9 }
 0xc06   :  { %3096 = vmatprep.subr.bf16.mxu1 %v6603_v61 }
 0xc09   :  { %3097 = vmatpush1.bf16.msra.mxu1 %v6601_v63 }
 0xc0a   :  { %3098 = vmatprep.subr.bf16.mxu1 %v6609_v11  ;;  %v3152_v11 = vld [vmem:[#allocation13 + $0x60] sm:$0xff] }
 0xc0d   :  { %3099 = vmatpush1.bf16.msra.mxu1 %v6607_v14  ;;  %v3153_v14 = vld [vmem:[#allocation13 + $0x68] sm:$0xff] }
 0xc0e   :  { %3100 = vmatprep.subr.bf16.mxu1 %v6615_v16 }
 0xc11   :  { %3101 = vmatpush1.bf16.msra.mxu1 %v6613_v15 }
 0xc12   :  { %3102 = vmatprep.subr.bf16.mxu1 %v6621_v31  ;;  %v3157_v31 = vld [vmem:[#allocation13 + $0x88] sm:$0xff] }
 0xc15   :  { %3103 = vmatpush1.bf16.msra.mxu1 %v6619_v37 }
 0xc16   :  { %3104 = vmatprep.subr.bf16.mxu1 %v6627_v39 }
 0xc19   :  { %3105 = vmatpush1.bf16.msra.mxu1 %v6625_v56  ;;  %v3164_v56 = vld [vmem:[#allocation13 + $0xc0] sm:$0xff] }
 0xc1a   :  { %3106 = vmatprep.subr.bf16.mxu1 %v6633_v47  ;;  %v3165_v47 = vld [vmem:[#allocation13 + $0xc8] sm:$0xff] }
 0xc1d   :  { %3107 = vmatpush1.bf16.msra.mxu1 %v6631_v13  ;;  %v3173_v13 = vld [vmem:[#allocation13 + $0x108] sm:$0xff] }
 0xc1e   :  { %3609 = vmatprep.subr.bf16.mxu1 %v5650_v29 }
 0xcc3   :  { %v5893_v5 = vpop.f32.mrb[44].mxu0 }
 0xcc4   :  { %v5894_v1 = vpop.f32.mrb[45].mxu0 }
 0xcc5   :  { %v5895_v51 = vadd.f32 %v5894_v1, %v5893_v5  ;;  %v5896_v52 = vpop.f32.mrb[46].mxu0  ;;  %v2802_v5 = vmul.f32 %v2792_v30, %v2792_v30 }
 0xcc6   :  { %v5897_v57 = vpop.f32.mrb[47].mxu0 }
 0xcc7   :  { %v2741_v50 = vadd.f32 %v5895_v51, %v8237_v4  ;;  %v6600_v4 = vld [vmem:[#allocation12 + $0x44] ss:$16 sps:$4 sm:$0xff]   ;;  %v2804_v1 = vsub.f32 %v2800_v36, %v2802_v5 }
 0xcc8   :  { %3053 = vmatprep.subr.bf16.mxu0 %v6600_v4  ;;  %v3180_v36 = vld [vmem:[#allocation13 + $0x140] sm:$0xff] }
 0xcc9   :  { %3054 = vmatpush1.bf16.msra.mxu0 %v6598_v10  ;;  %v2806_v51 = vmax.f32 %v2804_v1, 0.0  ;;  %v5614_v10 = vld [vmem:[#allocation21] ss:$0 sm:$0xff]  ;;  %v3184_v5 = vld [vmem:[#allocation13 + $0x160] sm:$0xff] }
 0xcca   :  { %3055 = vmatprep.subr.bf16.mxu0 %v6606_v3  ;;  %v3148_v3 = vld [vmem:[#allocation13 + $0x40] sm:$0xff]  ;;  %v3181_v1 = vld [vmem:[#allocation13 + $0x148] sm:$0xff] }
 0xccb   :  { %v5656_v15 = vcombine.high %v3148_v3, %v3152_v11  ;;  %v5655_v37 = vcombine.low %v3148_v3, %v3152_v11  ;;  %v3142_v11 = vld [vmem:[#allocation13 + $0x10] sm:$0xff] }
 0xccd   :  { %3056 = vmatpush1.bf16.msra.mxu0 %v6604_v12  ;;  %v3149_v12 = vld [vmem:[#allocation13 + $0x48] sm:$0xff] }
 0xcce   :  { %3057 = vmatprep.subr.bf16.mxu0 %v6612_v8  ;;  %v5658_v16 = vcombine.high %v3149_v12, %v3153_v14 }
 0xcd1   :  { %3058 = vmatpush1.bf16.msra.mxu0 %v6610_v59 }
 0xcd2   :  { %3059 = vmatprep.subr.bf16.mxu0 %v6618_v62  ;;  %v3156_v62 = vld [vmem:[#allocation13 + $0x80] sm:$0xff] }
 0xcd3   :  { %v5915_v49 = vpop.f32.mrb[60].mxu1 }
 0xcd4   :  { %v5916_v48 = vpop.f32.mrb[61].mxu1 }
 0xcd5   :  { %v5917_v53 = vadd.f32 %v5916_v48, %v5915_v49  ;;  %v5918_v54 = vpop.f32.mrb[62].mxu1  ;;  %3060 = vmatpush1.bf16.msra.mxu0 %v6616_v35  ;;  %v2810_v49 = vadd.f32 1e-05, %v2806_v51  ;;  %v3161_v35 = vld [vmem:[#allocation13 + $0xa8] sm:$0xff] }
 0xcd6   :  { %v5919_v18 = vpop.f32.mrb[63].mxu1  ;;  %3061 = vmatprep.subr.bf16.mxu0 %v6624_v38  ;;  %v5657_v38 = vcombine.low %v3149_v12, %v3153_v14  ;;  %v5665_v40 = vcombine.low %v3157_v31, %v3161_v35  ;;  %v3185_v51 = vld [vmem:[#allocation13 + $0x168] sm:$0xff]  ;;  %v3146_v12 = vld [vmem:[#allocation13 + $0x30] sm:$0xff]  ;;  %v3143_v14 = vld [vmem:[#allocation13 + $0x18] sm:$0xff] }
 0xcd7   :  { %v2781_v60 = vadd.f32 %v5917_v53, %v2741_v50  ;;  %6722 = vrsqrt.f32 %v2810_v49  ;;  %v5688_v49 = vcombine.high %v3180_v36, %v3184_v5 }
 0xcd9   :  { %v8290_v27 = vadd.f32 %v2781_v60, %v8754_v19  ;;  %3062 = vmatpush1.bf16.msra.mxu0 %v6622_v55  ;;  %v5666_v55 = vcombine.high %v3157_v31, %v3161_v35  ;;  %v3150_v31 = vld [vmem:[#allocation13 + $0x50] sm:$0xff] }
 0xcda   :  { %3063 = vmatprep.subr.bf16.mxu0 %v6630_v32  ;;  %v3168_v32 = vld [vmem:[#allocation13 + $0xe0] sm:$0xff]  ;;  %v3154_v35 = vld [vmem:[#allocation13 + $0x70] sm:$0xff] }
 0xcdb   :  { %2790 = vadd.xlane.f32.xlu1 %v8290_v27  ;;  %v2795_v24 = vmul.f32 %v8290_v27, %v8290_v27  ;;  %v5671_v29 = vcombine.low %v3164_v56, %v3168_v32 }
 0xcdd   :  { %3064 = vmatpush1.bf16.msra.mxu0 %v6628_v20  ;;  %v3169_v20 = vld [vmem:[#allocation13 + $0xe8] sm:$0xff] }
 0xcde   :  { %3566 = vmatprep.subr.bf16.mxu0 %v5648_v28  ;;  %v5674_v42 = vcombine.high %v3165_v47, %v3169_v20  ;;  %v3177_v28 = vld [vmem:[#allocation13 + $0x128] sm:$0xff]  ;;  %v5673_v34 = vcombine.low %v3165_v47, %v3169_v20  ;;  %v3158_v47 = vld [vmem:[#allocation13 + $0x90] sm:$0xff] }
 0xcdf   :  { %2798 = vadd.xlane.f32.xlu1 %v2795_v24  ;;  %v2808_v24 = vsub.f32 %v8245_v2, %v2792_v30  ;;  %v5682_v30 = vcombine.high %v3173_v13, %v3177_v28  ;;  %v3162_v20 = vld [vmem:[#allocation13 + $0xb0] sm:$0xff] }
 0xce1   :  { %v6723_v19 = vpop.eup %6722 }
 0xce2   :  { %v2814_v46 = vmul.f32 %v6723_v19, %v2808_v24  ;;  %v5689_v19 = vcombine.low %v3181_v1, %v3185_v51 }
 0xce4   :  { %v2823_v61 = vmul.f32 %v5613_v58, %v2814_v46 }
 0xce6   :  { %v8313_v59 = vadd.f32 %v5614_v10, %v2823_v61 }
 0xd68   :  { %v2791_v52 = vpop.xlane.xlu1 %2790 }
 0xd69   :  { %v2793_v57 = vmul.f32 0.015625, %v2791_v52 }
 0xd6b   :  { %v2803_v50 = vmul.f32 %v2793_v57, %v2793_v57  ;;  %v2809_v7 = vsub.f32 %v8290_v27, %v2793_v57  ;;  %v3160_v27 = vld [vmem:[#allocation13 + $0xa0] sm:$0xff]  ;;  %v5681_v57 = vcombine.low %v3173_v13, %v3177_v28  ;;  %v3166_v13 = vld [vmem:[#allocation13 + $0xd0] sm:$0xff] }
 0xd6c   :  { %v2799_v48 = vpop.xlane.xlu1 %2798  ;;  %v5664_v39 = vcombine.high %v3156_v62, %v3160_v27  ;;  %v5663_v17 = vcombine.low %v3156_v62, %v3160_v27  ;;  %v5652_v62 = vcombine.high %v3142_v11, %v3146_v12  ;;  %v3170_v28 = vld [vmem:[#allocation13 + $0xf0] sm:$0xff] }
 0xd6d   :  { %v2801_v53 = vmul.f32 0.015625, %v2799_v48  ;;  %v5690_v48 = vcombine.high %v3181_v1, %v3185_v51  ;;  %v3174_v1 = vld [vmem:[#allocation13 + $0x110] sm:$0xff] }
 0xd6e   :  { %v3178_v51 = vld [vmem:[#allocation13 + $0x130] sm:$0xff] }
 0xd6f   :  { %v2805_v54 = vsub.f32 %v2801_v53, %v2803_v50  ;;  %v3188_v50 = vld [vmem:[#allocation13 + $0x180] sm:$0xff] }
 0xd70   :  { %v3192_v53 = vld [vmem:[#allocation13 + $0x1a0] sm:$0xff] }
 0xd71   :  { %v2807_v18 = vmax.f32 %v2805_v54, 0.0  ;;  %v3189_v54 = vld [vmem:[#allocation13 + $0x188] sm:$0xff]  ;;  %v5696_v24 = vcombine.high %v3188_v50, %v3192_v53  ;;  %v5695_v61 = vcombine.low %v3188_v50, %v3192_v53  ;;  %v5684_v50 = vcombine.high %v3174_v1, %v3178_v51  ;;  %v3182_v53 = vld [vmem:[#allocation13 + $0x150] sm:$0xff] }
 0xd73   :  { %v2811_v60 = vadd.f32 1e-05, %v2807_v18  ;;  %v3193_v18 = vld [vmem:[#allocation13 + $0x1a8] sm:$0xff] }
 0xd74   :  { %v5698_v46 = vcombine.high %v3189_v54, %v3193_v18 }
 0xd75   :  { %6724 = vrsqrt.f32 %v2811_v60  ;;  %v5687_v60 = vcombine.low %v3180_v36, %v3184_v5  ;;  %v5676_v36 = vcombine.high %v3166_v13, %v3170_v28 }
 0xd7f   :  { %v6725_v9 = vpop.eup %6724 }
 0xd80   :  { %v2815_v4 = vmul.f32 %v6725_v9, %v2809_v7  ;;  %v3200_v7 = vld [vmem:[#allocation13 + $0x1e0] sm:$0xff]  ;;  %v3197_v9 = vld [vmem:[#allocation13 + $0x1c8] sm:$0xff] }
 0xd82   :  { %v2824_v63 = vmul.f32 %v5613_v58, %v2815_v4  ;;  %v3196_v58 = vld [vmem:[#allocation13 + $0x1c0] sm:$0xff]  ;;  %v3201_v4 = vld [vmem:[#allocation13 + $0x1e8] sm:$0xff] }
 0xd83   :  { %v5706_v3 = vcombine.high %v3197_v9, %v3201_v4 }
 0xd84   :  { %v8315_v8 = vadd.f32 %v5614_v10, %v2824_v63  ;;  %v5697_v10 = vcombine.low %v3189_v54, %v3193_v18  ;;  %v5704_v63 = vcombine.high %v3196_v58, %v3200_v7  ;;  %v3186_v54 = vld [vmem:[#allocation13 + $0x170] sm:$0xff]  ;;  %v3183_v18 = vld [vmem:[#allocation13 + $0x158] sm:$0xff] }
 0xd86   :  { %v2834_v2 = vpack.c.bf16 %v8315_v8, %v8313_v59 }
 0xd88   :  { %3082 = vmatmul.mubr.bf16.vlgmr.msra.gmra.mrb[48].mxu0 %v2834_v2  ;;  %3125 = vmatmul.mubr.bf16.vlgmr.msra.gmra.mrb[64].mxu1 %v2834_v2  ;;  %v3147_v2 = vld [vmem:[#allocation13 + $0x38] sm:$0xff] }
 0xd89   :  { %3567 = vmatpush1.bf16.msra.mxu0 %v5647_v41  ;;  %3610 = vmatpush1.bf16.msra.mxu1 %v5649_v45  ;;  %v5672_v41 = vcombine.high %v3164_v56, %v3168_v32  ;;  %v3176_v45 = vld [vmem:[#allocation13 + $0x120] sm:$0xff]  ;;  %v5654_v27 = vcombine.high %v3143_v14, %v3147_v2  ;;  %v5660_v56 = vcombine.high %v3150_v31, %v3154_v35 }
 0xd8a   :  { %3568 = vmatprep.subr.bf16.mxu0 %v5656_v15  ;;  %3611 = vmatprep.subr.bf16.mxu1 %v5658_v16  ;;  %v5680_v33 = vcombine.high %v3172_v44, %v3176_v45  ;;  %v5679_v52 = vcombine.low %v3172_v44, %v3176_v45  ;;  %v5703_v15 = vcombine.low %v3196_v58, %v3200_v7  ;;  %v3190_v7 = vld [vmem:[#allocation13 + $0x190] sm:$0xff] }
 0xd8b   :  { %3598 = vmatprep.mubr.bf16.mxu0 %v8753_v43  ;;  %3641 = vmatprep.mubr.bf16.mxu1 %v8753_v43  ;;  %v5705_v16 = vcombine.low %v3197_v9, %v3201_v4  ;;  %v5668_v44 = vcombine.high %v3158_v47, %v3162_v20  ;;  %v3194_v9 = vld [vmem:[#allocation13 + $0x1b0] sm:$0xff]  ;;  %v3191_v4 = vld [vmem:[#allocation13 + $0x198] sm:$0xff] }
 0xd8d   :  { %3569 = vmatpush1.bf16.msra.mxu0 %v5655_v37  ;;  %3612 = vmatpush1.bf16.msra.mxu1 %v5657_v38  ;;  %v3151_v37 = vld [vmem:[#allocation13 + $0x58] sm:$0xff] }
 0xd8e   :  { %3570 = vmatprep.subr.bf16.mxu0 %v5664_v39  ;;  %3613 = vmatprep.subr.bf16.mxu1 %v5666_v55  ;;  %v3155_v38 = vld [vmem:[#allocation13 + $0x78] sm:$0xff]  ;;  %v5651_v39 = vcombine.low %v3142_v11, %v3146_v12  ;;  %v5653_v55 = vcombine.low %v3143_v14, %v3147_v2  ;;  %v3198_v12 = vld [vmem:[#allocation13 + $0x1d0] sm:$0xff] }
 0xd8f   :  { %v5662_v32 = vcombine.high %v3151_v37, %v3155_v38  ;;  %v3202_v14 = vld [vmem:[#allocation13 + $0x1f0] sm:$0xff]  ;;  %v3199_v2 = vld [vmem:[#allocation13 + $0x1d8] sm:$0xff] }
 0xd91   :  { %3571 = vmatpush1.bf16.msra.mxu0 %v5663_v17  ;;  %3614 = vmatpush1.bf16.msra.mxu1 %v5665_v40  ;;  %v3159_v17 = vld [vmem:[#allocation13 + $0x98] sm:$0xff] }
 0xd92   :  { %3572 = vmatprep.subr.bf16.mxu0 %v5672_v41  ;;  %3615 = vmatprep.subr.bf16.mxu1 %v5674_v42  ;;  %v3163_v40 = vld [vmem:[#allocation13 + $0xb8] sm:$0xff]  ;;  %v5659_v41 = vcombine.low %v3150_v31, %v3154_v35  ;;  %v5661_v42 = vcombine.low %v3151_v37, %v3155_v38  ;;  %v5707_v35 = vcombine.low %v3198_v12, %v3202_v14  ;;  %v2867_v38 = vld [vmem:[%s8755_s12] sm:$0xf] }
 0xd93   :  { %v5670_v45 = vcombine.high %v3159_v17, %v3163_v40 }
 0xd95   :  { %3573 = vmatpush1.bf16.msra.mxu0 %v5671_v29  ;;  %3616 = vmatpush1.bf16.msra.mxu1 %v5673_v34  ;;  %v3167_v29 = vld [vmem:[#allocation13 + $0xd8] sm:$0xff] }
 0xd96   :  { %3574 = vmatprep.subr.bf16.mxu0 %v5680_v33  ;;  %3617 = vmatprep.subr.bf16.mxu1 %v5682_v30  ;;  %v3171_v34 = vld [vmem:[#allocation13 + $0xf8] sm:$0xff]  ;;  %v5667_v33 = vcombine.low %v3158_v47, %v3162_v20  ;;  %v5669_v30 = vcombine.low %v3159_v17, %v3163_v40  ;;  %v2876_v47 = vrot.slane %v2867_v38, %v7878_v25 }
 0xd97   :  { %v5678_v5 = vcombine.high %v3167_v29, %v3171_v34 }
 0xd99   :  { %3575 = vmatpush1.bf16.msra.mxu0 %v5679_v52  ;;  %3618 = vmatpush1.bf16.msra.mxu1 %v5681_v57  ;;  %v3175_v52 = vld [vmem:[#allocation13 + $0x118] sm:$0xff] }
 0xd9a   :  { %3576 = vmatprep.subr.bf16.mxu0 %v5688_v49  ;;  %3619 = vmatprep.subr.bf16.mxu1 %v5690_v48  ;;  %v3179_v57 = vld [vmem:[#allocation13 + $0x138] sm:$0xff]  ;;  %v5675_v49 = vcombine.low %v3166_v13, %v3170_v28  ;;  %v5677_v48 = vcombine.low %v3167_v29, %v3171_v34 }
 0xd9d   :  { %3577 = vmatpush1.bf16.msra.mxu0 %v5687_v60  ;;  %3620 = vmatpush1.bf16.msra.mxu1 %v5689_v19  ;;  %v3187_v60 = vld [vmem:[#allocation13 + $0x178] sm:$0xff]  ;;  %v5683_v19 = vcombine.low %v3174_v1, %v3178_v51 }
 0xd9e   :  { %3578 = vmatprep.subr.bf16.mxu0 %v5696_v24  ;;  %3621 = vmatprep.subr.bf16.mxu1 %v5698_v46  ;;  %v5685_v24 = vcombine.low %v3175_v52, %v3179_v57  ;;  %v5692_v46 = vcombine.high %v3182_v53, %v3186_v54  ;;  %v5694_v58 = vcombine.high %v3183_v18, %v3187_v60 }
 0xda1   :  { %3579 = vmatpush1.bf16.msra.mxu0 %v5695_v61  ;;  %3622 = vmatpush1.bf16.msra.mxu1 %v5697_v10  ;;  %v3195_v61 = vld [vmem:[#allocation13 + $0x1b8] sm:$0xff]  ;;  %v5691_v10 = vcombine.low %v3182_v53, %v3186_v54 }
 0xda2   :  { %3580 = vmatprep.subr.bf16.mxu0 %v5704_v63  ;;  %3623 = vmatprep.subr.bf16.mxu1 %v5706_v3  ;;  %v5693_v63 = vcombine.low %v3183_v18, %v3187_v60  ;;  %v5700_v3 = vcombine.high %v3190_v7, %v3194_v9  ;;  %v5702_v11 = vcombine.high %v3191_v4, %v3195_v61 }
 0xda5   :  { %3581 = vmatpush1.bf16.msra.mxu0 %v5703_v15  ;;  %3624 = vmatpush1.bf16.msra.mxu1 %v5705_v16  ;;  %v3203_v15 = vld [vmem:[#allocation13 + $0x1f8] sm:$0xff]  ;;  %v5699_v16 = vcombine.low %v3190_v7, %v3194_v9 }
 0xda6   :  { %3652 = vmatprep.subr.bf16.mxu0 %v5652_v62  ;;  %3695 = vmatprep.subr.bf16.mxu1 %v5654_v27  ;;  %v5701_v62 = vcombine.low %v3191_v4, %v3195_v61  ;;  %v5708_v27 = vcombine.high %v3198_v12, %v3202_v14  ;;  %v5710_v31 = vcombine.high %v3199_v2, %v3203_v15  ;;  %v8756_v12 = vsub.s32 6, %v7869_v21 }
 0xda7   :  { %v5709_v37 = vcombine.low %v3199_v2, %v3203_v15  ;;  %v8757_v2 = vsub.s32 5, %v7869_v21 }
 0xda8   :  { %3599 = vmatmul.mubr.bf16.vlgmr.msra.gmra.mrb[52].mxu0 %v7854_v26  ;;  %3642 = vmatmul.mubr.bf16.vlgmr.msra.gmra.mrb[68].mxu1 %v7854_v26 }
 0xda9   :  { %3653 = vmatpush1.bf16.msra.mxu0 %v5651_v39  ;;  %3696 = vmatpush1.bf16.msra.mxu1 %v5653_v55  ;;  %v2872_v39 = vrot.slane %v2867_v38, %v7872_v22  ;;  %v2880_v55 = vrot.slane %v2867_v38, %v7875_v23 }
 0xdaa   :  { %3654 = vmatprep.subr.bf16.mxu0 %v5660_v56  ;;  %3697 = vmatprep.subr.bf16.mxu1 %v5662_v32 }
 0xdab   :  { %3684 = vmatprep.mubr.bf16.mxu0 %v8753_v43  ;;  %3727 = vmatprep.mubr.bf16.mxu1 %v8753_v43  ;;  %v5686_v43 = vcombine.high %v3175_v52, %v3179_v57  ;;  %v3204_v57 = vld [vmem:[#allocation15] sm:$0xff] }
 0xdac   :  { %v3213_v53 = vrot.slane %v3204_v57, %v7878_v25  ;;  %v3221_v54 = vrot.slane %v3204_v57, %v7881_v6  ;;  %v3233_v14 = vrot.slane %v3204_v57, %v8756_v12  ;;  %v3229_v15 = vrot.slane %v3204_v57, %v8757_v2 }
 0xdad   :  { %3655 = vmatpush1.bf16.msra.mxu0 %v5659_v41  ;;  %3698 = vmatpush1.bf16.msra.mxu1 %v5661_v42 }
 0xdae   :  { %3656 = vmatprep.subr.bf16.mxu0 %v5668_v44  ;;  %3699 = vmatprep.subr.bf16.mxu1 %v5670_v45 }
 0xdb1   :  { %3657 = vmatpush1.bf16.msra.mxu0 %v5667_v33  ;;  %3700 = vmatpush1.bf16.msra.mxu1 %v5669_v30 }
 0xdb2   :  { %3658 = vmatprep.subr.bf16.mxu0 %v5676_v36  ;;  %3701 = vmatprep.subr.bf16.mxu1 %v5678_v5 }
 0xdb5   :  { %3659 = vmatpush1.bf16.msra.mxu0 %v5675_v49  ;;  %3702 = vmatpush1.bf16.msra.mxu1 %v5677_v48  ;;  %v3209_v49 = vrot.slane %v3204_v57, %v7872_v22  ;;  %v3217_v48 = vrot.slane %v3204_v57, %v7875_v23 }
 0xdb6   :  { %3660 = vmatprep.subr.bf16.mxu0 %v5684_v50  ;;  %3703 = vmatprep.subr.bf16.mxu1 %v5686_v43 }
 0xdb9   :  { %3661 = vmatpush1.bf16.msra.mxu0 %v5683_v19  ;;  %3704 = vmatpush1.bf16.msra.mxu1 %v5685_v24 }
 0xdba   :  { %3662 = vmatprep.subr.bf16.mxu0 %v5692_v46  ;;  %3705 = vmatprep.subr.bf16.mxu1 %v5694_v58 }
 0xdbd   :  { %3663 = vmatpush1.bf16.msra.mxu0 %v5691_v10  ;;  %3706 = vmatpush1.bf16.msra.mxu1 %v5693_v63 }
 0xdbe   :  { %3664 = vmatprep.subr.bf16.mxu0 %v5700_v3  ;;  %3707 = vmatprep.subr.bf16.mxu1 %v5702_v11 }
 0xdc1   :  { %3665 = vmatpush1.bf16.msra.mxu0 %v5699_v16  ;;  %3708 = vmatpush1.bf16.msra.mxu1 %v5701_v62  ;;  %v8758_v16 = vsub.s32 7, %v7869_v21 }
 0xdc2   :  { %3666 = vmatprep.subr.bf16.mxu0 %v5708_v27  ;;  %3709 = vmatprep.subr.bf16.mxu1 %v5710_v31  ;;  %v8759_v27 = vsub.s32 4, %v7869_v21 }
 0xdc3   :  { %v3237_v62 = vrot.slane %v3204_v57, %v8758_v16 }
 0xdc4   :  { %v3225_v31 = vrot.slane %v3204_v57, %v8759_v27 }
 0xdc5   :  { %3667 = vmatpush1.bf16.msra.mxu0 %v5707_v35  ;;  %3710 = vmatpush1.bf16.msra.mxu1 %v5709_v37 }
 0xdc6   :  { %6204 = vmatprep.subr.bf16.mxu0 %v7327_v0  ;;  %6210 = vmatprep.subr.bf16.mxu1 %v7327_v0 }
 0xdc8   :  { %3685 = vmatmul.mubr.bf16.vlgmr.msra.gmra.mrb[56].mxu0 %v7854_v26  ;;  %3728 = vmatmul.mubr.bf16.vlgmr.msra.gmra.mrb[72].mxu1 %v7854_v26  ;;  %v2884_v26 = vrot.slane %v2867_v38, %v7881_v6 }
 0xdc9   :  { %6206 = vmatprep.mubr.msk.bf16.mxu0 %vm7328_vm0, %v7327_v0  ;;  %6212 = vmatprep.mubr.msk.bf16.mxu1 %vm7328_vm0, %v7327_v0 }
 0xe5b   :  { %v3083_v56 = vpop.f32.mrb[48].mxu0  ;;  %v3126_v32 = vpop.f32.mrb[64].mxu1 }
 0xe5c   :  { %v3085_v20 = vpop.f32.mrb[49].mxu0  ;;  %v3128_v17 = vpop.f32.mrb[65].mxu1  ;;  %v3084_v42 = vadd.f32 %v3083_v56, %v2872_v39  ;;  %v3127_v44 = vadd.f32 %v3126_v32, %v2880_v55 }
 0xe5d   :  { %v3087_v40 = vpop.f32.mrb[50].mxu0  ;;  %v3130_v41 = vpop.f32.mrb[66].mxu1  ;;  %v3086_v34 = vadd.f32 %v3085_v20, %v2876_v47  ;;  %v3129_v33 = vadd.f32 %v3128_v17, %v2884_v26 }
 0xe5e   :  { %v3088_v45 = vadd.f32 %v3087_v40, %v2872_v39  ;;  %v3131_v13 = vadd.f32 %v3130_v41, %v2880_v55  ;;  %v3089_v28 = vpop.f32.mrb[51].mxu0  ;;  %v3132_v29 = vpop.f32.mrb[67].mxu1 }
 0xe5f   :  { %v3090_v30 = vadd.f32 %v3089_v28, %v2876_v47  ;;  %v3133_v36 = vadd.f32 %v3132_v29, %v2884_v26 }
 0xe60   :  { %v8346_v5 = vpack.c.bf16 %v3088_v45, %v3084_v42  ;;  %v8348_v1 = vpack.c.bf16 %v3131_v13, %v3127_v44 }
 0xe61   :  { %v8350_v51 = vpack.c.bf16 %v3090_v30, %v3086_v34  ;;  %v8352_v52 = vpack.c.bf16 %v3133_v36, %v3129_v33 }
 0xe7b   :  { %v3600_v50 = vpop.f32.mrb[52].mxu0  ;;  %v3643_v43 = vpop.f32.mrb[68].mxu1 }
 0xe7c   :  { %v3602_v18 = vpop.f32.mrb[53].mxu0  ;;  %v3645_v60 = vpop.f32.mrb[69].mxu1  ;;  %v3601_v46 = vadd.f32 %v3600_v50, %v3209_v49  ;;  %v3644_v58 = vadd.f32 %v3643_v43, %v3217_v48 }
 0xe7d   :  { %v3604_v19 = vpop.f32.mrb[54].mxu0  ;;  %v3647_v24 = vpop.f32.mrb[70].mxu1  ;;  %v3603_v10 = vadd.f32 %v3602_v18, %v3213_v53  ;;  %v3646_v22 = vadd.f32 %v3645_v60, %v3221_v54 }
 0xe7e   :  { %v3605_v7 = vadd.f32 %v3604_v19, %v3209_v49  ;;  %v3648_v9 = vadd.f32 %v3647_v24, %v3217_v48  ;;  %v3606_v4 = vpop.f32.mrb[55].mxu0  ;;  %v3649_v61 = vpop.f32.mrb[71].mxu1 }
 0xe7f   :  { %v3607_v63 = vadd.f32 %v3606_v4, %v3213_v53  ;;  %v3650_v23 = vadd.f32 %v3649_v61, %v3221_v54 }
 0xe80   :  { %v8358_v3 = vpack.c.bf16 %v3605_v7, %v3601_v46  ;;  %v8360_v11 = vpack.c.bf16 %v3648_v9, %v3644_v58 }
 0xe81   :  { %v8362_v25 = vpack.c.bf16 %v3607_v63, %v3603_v10  ;;  %v8364_v6 = vpack.c.bf16 %v3650_v23, %v3646_v22 }
 0xe82   :  { %6205 = vmatpush3.bf16.xpose.msra.mxu0 %v8358_v3 }
 0xe83   :  { %6216 = vmatprep.subr.bf16.mxu0 %v7327_v0 }
 0xe89   :  { %6207 = vmatmul.mubr.bf16.vlgmr.msra.gmra.mrb[60].mxu0 %v8346_v5 }
 0xe8a   :  { %6217 = vmatpush3.bf16.xpose.msra.mxu0 %v8362_v25  ;;  %6218 = vmatprep.mubr.msk.bf16.mxu0 %vm7328_vm0, %v7327_v0 }
 0xe8b   :  { %6228 = vmatprep.subr.bf16.mxu0 %v7327_v0 }
 0xe91   :  { %6219 = vmatmul.mubr.bf16.vlgmr.msra.gmra.mrb[64].mxu0 %v8350_v51 }
 0xe92   :  { %6229 = vmatpush3.bf16.xpose.msra.mxu0 %v8360_v11  ;;  %6230 = vmatprep.mubr.msk.bf16.mxu0 %vm7328_vm0, %v7327_v0 }
 0xe93   :  { %6240 = vmatprep.subr.bf16.mxu0 %v7327_v0 }
 0xe99   :  { %6231 = vmatmul.mubr.bf16.vlgmr.msra.gmra.mrb[68].mxu0 %v8348_v1 }
 0xe9a   :  { %6241 = vmatpush3.bf16.xpose.msra.mxu0 %v8364_v6  ;;  %6242 = vmatprep.mubr.msk.bf16.mxu0 %vm7328_vm0, %v7327_v0 }
 0xe9b   :  { %v3686_v35 = vpop.f32.mrb[56].mxu0  ;;  %v3729_v37 = vpop.f32.mrb[72].mxu1 }
 0xe9c   :  { %v3730_v38 = vadd.f32 %v3729_v37, %v3233_v14  ;;  %v3688_v39 = vpop.f32.mrb[57].mxu0  ;;  %v3731_v55 = vpop.f32.mrb[73].mxu1  ;;  %v3687_v20 = vadd.f32 %v3686_v35, %v3225_v31 }
 0xe9d   :  { %v3689_v56 = vadd.f32 %v3688_v39, %v3229_v15  ;;  %v3732_v32 = vadd.f32 %v3731_v55, %v3237_v62  ;;  %v3690_v47 = vpop.f32.mrb[58].mxu0  ;;  %v3733_v26 = vpop.f32.mrb[74].mxu1 }
 0xe9e   :  { %v3691_v17 = vadd.f32 %v3690_v47, %v3225_v31  ;;  %v3734_v40 = vadd.f32 %v3733_v26, %v3233_v14  ;;  %v3692_v41 = vpop.f32.mrb[59].mxu0  ;;  %v3735_v42 = vpop.f32.mrb[75].mxu1 }
 0xe9f   :  { %v3693_v44 = vadd.f32 %v3692_v41, %v3229_v15  ;;  %v3736_v21 = vadd.f32 %v3735_v42, %v3237_v62 }
 0xea0   :  { %v8390_v45 = vpack.c.bf16 %v3691_v17, %v3687_v20  ;;  %v8392_v13 = vpack.c.bf16 %v3734_v40, %v3730_v38 }
 0xea1   :  { %v8394_v28 = vpack.c.bf16 %v3693_v44, %v3689_v56  ;;  %v8396_v29 = vpack.c.bf16 %v3736_v21, %v3732_v32  ;;  %6243 = vmatmul.mubr.bf16.vlgmr.msra.gmra.mrb[72].mxu0 %v8352_v52 }
 0xea2   :  { %v3803_v34 = vsel %vm1579_vm1, %v8390_v45, 0 }
 0xea3   :  { %6211 = vmatpush3.bf16.msra.mxu1 %v3803_v34  ;;  %v3902_v42 = vsel %vm1579_vm1, %v8394_v28, 0 }
 0xea4   :  { %6222 = vmatprep.subr.bf16.mxu1 %v7327_v0 }
 0xf5c   :  { %v3780_v33 = vpop.f32.mrb[60].mxu0 }
 0xf5d   :  { %v3786_v30 = vmul.f32 0.25, %v3780_v33  ;;  %v6208_v36 = vpop.f32.mrb[61].mxu0 }
 0xf5e   :  { %v3783_v57 = vpop.f32.mrb[62].mxu0  ;;  %v4001_v36 = vsel %vm1579_vm1, %v8392_v13, 0 }
 0xf5f   :  { %v6209_v49 = vpop.f32.mrb[63].mxu0  ;;  %v3787_v48 = vsel %vm1563_vm3, %v3786_v30, -inf }
 0xf60   :  { %3788 = vmax.xlane.f32.xlu0 %v3787_v48  ;;  %v8422_v48 = vld [vmem:[#allocation16 + $0x40] sm:$0xff]  }
 0xf61   :  { %5937 = vmatprep.subr.bf16.mxu0 %v8422_v48 }
 0xf64   :  { %v3879_v50 = vpop.f32.mrb[64].mxu0 }
 0xf65   :  { %v3885_v43 = vmul.f32 0.25, %v3879_v50  ;;  %v6220_v53 = vpop.f32.mrb[65].mxu0  ;;  %v8424_v50 = vld [vmem:[#allocation16] sm:$0xff]  }
 0xf66   :  { %v3882_v54 = vpop.f32.mrb[66].mxu0  ;;  %5938 = vmatpush3.bf16.msra.mxu0 %v8424_v50  ;;  %v8430_v53 = vld [vmem:[#allocation16 + $0x8] sm:$0xff]  }
 0xf67   :  { %v6221_v18 = vpop.f32.mrb[67].mxu0  ;;  %v3886_v60 = vsel %vm1563_vm3, %v3885_v43, -inf  ;;  %v8433_v54 = vld [vmem:[#allocation16 + $0x50] sm:$0xff]  }
 0xf68   :  { %3887 = vmax.xlane.f32.xlu1 %v3886_v60  ;;  %v8436_v18 = vld [vmem:[#allocation16 + $0x10] sm:$0xff]   ;;  %v8439_v60 = vld [vmem:[#allocation16 + $0x58] sm:$0xff]  }
 0xf6c   :  { %v3978_v19 = vpop.f32.mrb[68].mxu0 }
 0xf6d   :  { %v6232_v24 = vpop.f32.mrb[69].mxu0  ;;  %v3984_v15 = vmul.f32 0.25, %v3978_v19  ;;  %v8442_v19 = vld [vmem:[#allocation16 + $0x18] sm:$0xff]  }
 0xf6e   :  { %v3981_v46 = vpop.f32.mrb[70].mxu0  ;;  %v8445_v24 = vld [vmem:[#allocation16 + $0x60] sm:$0xff]  }
 0xf6f   :  { %v6233_v58 = vpop.f32.mrb[71].mxu0  ;;  %v3985_v62 = vsel %vm1563_vm3, %v3984_v15, -inf  ;;  %v8448_v46 = vld [vmem:[#allocation16 + $0x20] sm:$0xff]  }
 0xf70   :  { %v8451_v58 = vld [vmem:[#allocation16 + $0x68] sm:$0xff]  }
 0xf74   :  { %v4077_v7 = vpop.f32.mrb[72].mxu0 }
 0xf75   :  { %v6244_v9 = vpop.f32.mrb[73].mxu0  ;;  %v4083_v31 = vmul.f32 0.25, %v4077_v7  ;;  %v8454_v7 = vld [vmem:[#allocation16 + $0x28] sm:$0xff]  }
 0xf76   :  { %v4080_v4 = vpop.f32.mrb[74].mxu0  ;;  %v8457_v9 = vld [vmem:[#allocation16 + $0x70] sm:$0xff]  }
 0xf77   :  { %v6245_v61 = vpop.f32.mrb[75].mxu0  ;;  %v4084_v37 = vsel %vm1563_vm3, %v4083_v31, -inf  ;;  %v8460_v4 = vld [vmem:[#allocation16 + $0x30] sm:$0xff]  }
 0xf78   :  { %v8464_v61 = vld [vmem:[#allocation16 + $0x78] sm:$0xff]  }
 0xfed   :  { %v3789_v10 = vpop.xlane.xlu0 %3788 }
 0xfee   :  { %v3790_v22 = vsub.f32 %v3786_v30, %v3789_v10  ;;  %v8466_v10 = vld [vmem:[#allocation16 + $0x38] sm:$0xff]  }
 0xff0   :  { %v3791_v63 = vmul.f32 1.442695, %v3790_v22 }
 0xff2   :  { %6726 = vpow2.f32 %v3791_v63 }
 0xff5   :  { %v3888_v23 = vpop.xlane.xlu1 %3887 }
 0xff6   :  { %v3889_v12 = vsub.f32 %v3885_v43, %v3888_v23  ;;  %v8426_v43 = vld [vmem:[#allocation16 + $0x48] sm:$0xff]  }
 0xff7   :  { %5939 = vmatprep.subr.bf16.mxu0 %v8426_v43 }
 0xff8   :  { %v3890_v14 = vmul.f32 1.442695, %v3889_v12  ;;  %5940 = vmatpush3.bf16.msra.mxu0 %v8430_v53 }
 0xff9   :  { %5941 = vmatprep.subr.bf16.mxu0 %v8433_v54 }
 0xffa   :  { %6728 = vpow2.f32 %v3890_v14 }
 0xffc   :  { %v6727_v2 = vpop.eup %6726  ;;  %5942 = vmatpush3.bf16.msra.mxu0 %v8436_v18 }
 0xffd   :  { %v3793_v16 = vsel %vm1563_vm3, %v6727_v2, 0.0  ;;  %5943 = vmatprep.subr.bf16.mxu0 %v8439_v60 }
 0xffe   :  { %3794 = vadd.xlane.f32.xlu0 %v3793_v16 }
0x1000   :  { %5944 = vmatpush3.bf16.msra.mxu0 %v8442_v19 }
0x1001   :  { %5945 = vmatprep.subr.bf16.mxu0 %v8445_v24 }
0x1002   :  { %3986 = vmax.xlane.f32.xlu0 %v3985_v62 }
0x1004   :  { %v6729_v27 = vpop.eup %6728  ;;  %5946 = vmatpush3.bf16.msra.mxu0 %v8448_v46 }
0x1005   :  { %v3892_v35 = vsel %vm1563_vm3, %v6729_v27, 0.0  ;;  %5947 = vmatprep.subr.bf16.mxu0 %v8451_v58 }
0x1006   :  { %3893 = vadd.xlane.f32.xlu1 %v3892_v35  ;;  %v8481_v35 = vld [vmem:[#allocation16 + $0xc8] sm:$0xff]  }
0x1008   :  { %5948 = vmatpush3.bf16.msra.mxu0 %v8454_v7 }
0x1009   :  { %5949 = vmatprep.subr.bf16.mxu0 %v8457_v9 }
0x100a   :  { %4085 = vmax.xlane.f32.xlu1 %v4084_v37  ;;  %v8485_v37 = vld [vmem:[#allocation16 + $0x88] sm:$0xff]  }
0x100c   :  { %5950 = vmatpush3.bf16.msra.mxu0 %v8460_v4 }
0x100d   :  { %5951 = vmatprep.subr.bf16.mxu0 %v8464_v61 }
0x1010   :  { %5952 = vmatpush3.bf16.msra.mxu0 %v8466_v10 }
0x1011   :  { %6252 = vmatprep.subr.bf16.mxu0 %v7327_v0 }
0x108b   :  { %v3795_v38 = vpop.xlane.xlu0 %3794 }
0x108c   :  { %6730 = vrcp.f32 %v3795_v38  ;;  %v8488_v38 = vld [vmem:[#allocation16 + $0xd0] sm:$0xff]  }
0x108f   :  { %v3987_v39 = vpop.xlane.xlu0 %3986 }
0x1090   :  { %v3988_v55 = vsub.f32 %v3984_v15, %v3987_v39  ;;  %v4100_v15 = vsel %vm1579_vm1, %v8396_v29, 0  ;;  %v8491_v39 = vld [vmem:[#allocation16 + $0x90] sm:$0xff]  }
0x1092   :  { %v3989_v56 = vmul.f32 1.442695, %v3988_v55  ;;  %v8494_v55 = vld [vmem:[#allocation16 + $0xd8] sm:$0xff]  }
0x1093   :  { %v3894_v32 = vpop.xlane.xlu1 %3893 }
0x1094   :  { %6732 = vpow2.f32 %v3989_v56  ;;  %v8497_v56 = vld [vmem:[#allocation16 + $0x98] sm:$0xff]  }
0x1095   :  { %6734 = vrcp.f32 %v3894_v32  ;;  %v8500_v32 = vld [vmem:[#allocation16 + $0xe0] sm:$0xff]  }
0x1096   :  { %v6731_v47 = vpop.eup %6730 }
0x1097   :  { %v3797_v26 = vmul.f32 %v6731_v47, %v6727_v2  ;;  %v4086_v20 = vpop.xlane.xlu1 %4085  ;;  %v8471_v2 = vld [vmem:[#allocation16 + $0xc0] sm:$0xff]  }
0x1098   :  { %v4087_v17 = vsub.f32 %v4083_v31, %v4086_v20  ;;  %v8503_v47 = vld [vmem:[#allocation16 + $0xa0] sm:$0xff]  }
0x1099   :  { %v3798_v40 = vpack.c.bf16 %v3797_v26, %v3797_v26  ;;  %v8506_v26 = vld [vmem:[#allocation16 + $0xe8] sm:$0xff]  }
0x109a   :  { %v4088_v41 = vmul.f32 1.442695, %v4087_v17 }
0x109b   :  { %6213 = vmatmul.mubr.msk.bf16.vlgmr.msra.gmra.mrb[76].mxu1 %vm1563_vm3, %v3798_v40 }
0x109c   :  { %6736 = vpow2.f32 %v4088_v41  ;;  %6223 = vmatpush3.bf16.msra.mxu1 %v3902_v42  ;;  %6224 = vmatprep.mubr.msk.bf16.mxu1 %vm7328_vm0, %v7327_v0 }
0x109d   :  { %6234 = vmatprep.subr.bf16.mxu1 %v7327_v0 }
0x109e   :  { %v6733_v44 = vpop.eup %6732 }
0x109f   :  { %v6735_v21 = vpop.eup %6734  ;;  %v3991_v34 = vsel %vm1563_vm3, %v6733_v44, 0.0 }
0x10a0   :  { %v3896_v33 = vmul.f32 %v6735_v21, %v6729_v27  ;;  %3992 = vadd.xlane.f32.xlu0 %v3991_v34  ;;  %v8479_v27 = vld [vmem:[#allocation16 + $0x80] sm:$0xff]  }
0x10a2   :  { %v3897_v30 = vpack.c.bf16 %v3896_v33, %v3896_v33 }
0x10a4   :  { %6225 = vmatmul.mubr.msk.bf16.vlgmr.msra.gmra.mrb[80].mxu1 %vm1563_vm3, %v3897_v30  ;;  %v4493_v30 = vrot.slane %v8358_v3, 4  ;;  %v4597_v3 = vrot.slane %v8350_v51, 4  ;;  %v8531_v51 = vld [vmem:[#allocation16 + $0xb0] sm:$0xff]  }
0x10a5   :  { %6235 = vmatpush3.bf16.msra.mxu1 %v4001_v36  ;;  %6236 = vmatprep.mubr.msk.bf16.mxu1 %vm7328_vm0, %v7327_v0 }
0x10a6   :  { %v6737_v57 = vpop.eup %6736  ;;  %6246 = vmatprep.subr.bf16.mxu1 %v7327_v0 }
0x10a7   :  { %v4090_v49 = vsel %vm1563_vm3, %v6737_v57, 0.0 }
0x10a8   :  { %4091 = vadd.xlane.f32.xlu1 %v4090_v49  ;;  %v4600_v49 = vrot.slane %v8362_v25, 4  ;;  %v4704_v25 = vrot.slane %v8348_v1, 4  ;;  %v8541_v1 = vld [vmem:[#allocation16 + $0xb8] sm:$0xff]  }
0x112d   :  { %v3993_v22 = vpop.xlane.xlu0 %3992 }
0x112e   :  { %6738 = vrcp.f32 %v3993_v22  ;;  %v4707_v22 = vrot.slane %v8360_v11, 4  ;;  %v8533_v11 = vld [vmem:[#allocation16 + $0xf8] sm:$0xff]  }
0x1135   :  { %v4092_v63 = vpop.xlane.xlu1 %4091 }
0x1136   :  { %6740 = vrcp.f32 %v4092_v63  ;;  %v4814_v63 = vrot.slane %v8364_v6, 4  ;;  %v4811_v6 = vrot.slane %v8352_v52, 4 }
0x1138   :  { %v6739_v23 = vpop.eup %6738 }
0x1139   :  { %v3995_v12 = vmul.f32 %v6739_v23, %v6733_v44  ;;  %v8529_v23 = vld [vmem:[#allocation16 + $0xf0] sm:$0xff]  }
0x113b   :  { %v3996_v14 = vpack.c.bf16 %v3995_v12, %v3995_v12 }
0x113d   :  { %6237 = vmatmul.mubr.msk.bf16.vlgmr.msra.gmra.mrb[84].mxu1 %vm1563_vm3, %v3996_v14 }
0x113e   :  { %6247 = vmatpush3.bf16.msra.mxu1 %v4100_v15  ;;  %6248 = vmatprep.mubr.msk.bf16.mxu1 %vm7328_vm0, %v7327_v0 }
0x113f   :  { %5959 = vmatprep.subr.bf16.mxu1 %v8471_v2 }
0x1140   :  { %v6741_v16 = vpop.eup %6740 }
0x1141   :  { %v4094_v62 = vmul.f32 %v6741_v16, %v6737_v57  ;;  %v4490_v57 = vrot.slane %v8346_v5, 4  ;;  %v8524_v5 = vld [vmem:[#allocation16 + $0xa8] sm:$0xff]  }
0x1143   :  { %v4095_v31 = vpack.c.bf16 %v4094_v62, %v4094_v62 }
0x1145   :  { %6249 = vmatmul.mubr.msk.bf16.vlgmr.msra.gmra.mrb[88].mxu1 %vm1563_vm3, %v4095_v31 }
0x1146   :  { %5960 = vmatpush3.bf16.msra.mxu1 %v8479_v27 }
0x1147   :  { %5961 = vmatprep.subr.bf16.mxu1 %v8481_v35 }
0x114a   :  { %5962 = vmatpush3.bf16.msra.mxu1 %v8485_v37 }
0x114b   :  { %5963 = vmatprep.subr.bf16.mxu1 %v8488_v38 }
0x114e   :  { %5964 = vmatpush3.bf16.msra.mxu1 %v8491_v39 }
0x114f   :  { %5965 = vmatprep.subr.bf16.mxu1 %v8494_v55 }
0x1152   :  { %5966 = vmatpush3.bf16.msra.mxu1 %v8497_v56 }
0x1153   :  { %5967 = vmatprep.subr.bf16.mxu1 %v8500_v32 }
0x1156   :  { %5968 = vmatpush3.bf16.msra.mxu1 %v8503_v47 }
0x1157   :  { %5969 = vmatprep.subr.bf16.mxu1 %v8506_v26 }
0x115a   :  { %5970 = vmatpush3.bf16.msra.mxu1 %v8524_v5 }
0x115b   :  { %5971 = vmatprep.subr.bf16.mxu1 %v8529_v23 }
0x115e   :  { %5972 = vmatpush3.bf16.msra.mxu1 %v8531_v51 }
0x115f   :  { %5973 = vmatprep.subr.bf16.mxu1 %v8533_v11 }
0x1162   :  { %5974 = vmatpush3.bf16.msra.mxu1 %v8541_v1 }
0x1163   :  { %6258 = vmatprep.subr.bf16.mxu1 %v7327_v0 }
0x116e   :  { %v3839_v20 = vpop.f32.mrb[76].mxu1 }
0x116f   :  { %v6214_v17 = vpop.f32.mrb[77].mxu1  ;;  %v4142_v34 = vpack.c.bf16 %v3839_v20, %v3839_v20 }
0x1170   :  { %v3842_v40 = vpop.f32.mrb[78].mxu1 }
0x1171   :  { %v6215_v41 = vpop.f32.mrb[79].mxu1 }
0x1177   :  { %v3938_v42 = vpop.f32.mrb[80].mxu1 }
0x1178   :  { %v4143_v44 = vpack.c.bf16 %v3938_v42, %v3938_v42  ;;  %v6226_v21 = vpop.f32.mrb[81].mxu1 }
0x1179   :  { %v3941_v33 = vpop.f32.mrb[82].mxu1 }
0x117a   :  { %v6227_v36 = vpop.f32.mrb[83].mxu1  ;;  %4441 = vmatprep.mubr.bf16.mxu0 %v4143_v44 }
0x117b   :  { %4442 = vmatmul.mubr.bf16.vlgmr.msra.gmra.mrb[76].mxu0 %v4142_v34 }
0x117c   :  { %6253 = vmatpush3.bf16.xpose.msra.mxu0 %v4493_v30  ;;  %6254 = vmatprep.mubr.msk.bf16.mxu0 %vm7328_vm0, %v7327_v0 }
0x117d   :  { %6264 = vmatprep.subr.bf16.mxu0 %v7327_v0 }
0x1183   :  { %6255 = vmatmul.mubr.bf16.vlgmr.msra.gmra.mrb[80].mxu0 %v4490_v57 }
0x1184   :  { %6265 = vmatpush3.bf16.xpose.msra.mxu0 %v4600_v49  ;;  %6266 = vmatprep.mubr.msk.bf16.mxu0 %vm7328_vm0, %v7327_v0 }
0x1185   :  { %6276 = vmatprep.subr.bf16.mxu0 %v7327_v0 }
0x118b   :  { %6267 = vmatmul.mubr.bf16.vlgmr.msra.gmra.mrb[84].mxu0 %v4597_v3 }
0x118c   :  { %6277 = vmatpush3.bf16.xpose.msra.mxu0 %v4707_v22  ;;  %6278 = vmatprep.mubr.msk.bf16.mxu0 %vm7328_vm0, %v7327_v0 }
0x118d   :  { %6288 = vmatprep.subr.bf16.mxu0 %v7327_v0 }
0x1193   :  { %6279 = vmatmul.mubr.bf16.vlgmr.msra.gmra.mrb[88].mxu0 %v4704_v25 }
0x1194   :  { %6289 = vmatpush3.bf16.xpose.msra.mxu0 %v4814_v63  ;;  %6290 = vmatprep.mubr.msk.bf16.mxu0 %vm7328_vm0, %v7327_v0 }
0x1195   :  { %5997 = vmatprep.subr.bf16.mxu0 %v8422_v48 }
0x119b   :  { %6291 = vmatmul.mubr.bf16.vlgmr.msra.gmra.mrb[92].mxu0 %v4811_v6 }
0x119c   :  { %5998 = vmatpush3.bf16.msra.mxu0 %v8424_v50 }
0x119d   :  { %5999 = vmatprep.subr.bf16.mxu0 %v8426_v43 }
0x11a0   :  { %6000 = vmatpush3.bf16.msra.mxu0 %v8430_v53  ;;  %v4549_v53 = vrot.slane %v8390_v45, 4 }
0x11a1   :  { %6001 = vmatprep.subr.bf16.mxu0 %v8433_v54 }
0x11a4   :  { %6002 = vmatpush3.bf16.msra.mxu0 %v8436_v18 }
0x11a5   :  { %6003 = vmatprep.subr.bf16.mxu0 %v8439_v60 }
0x11a8   :  { %6004 = vmatpush3.bf16.msra.mxu0 %v8442_v19 }
0x11a9   :  { %6005 = vmatprep.subr.bf16.mxu0 %v8445_v24 }
0x11ac   :  { %6006 = vmatpush3.bf16.msra.mxu0 %v8448_v46 }
0x11ad   :  { %6007 = vmatprep.subr.bf16.mxu0 %v8451_v58  ;;  %v4554_v58 = vsel %vm1579_vm1, %v4549_v53, 0 }
0x11b0   :  { %6008 = vmatpush3.bf16.msra.mxu0 %v8454_v7 }
0x11b1   :  { %6009 = vmatprep.subr.bf16.mxu0 %v8457_v9 }
0x11b4   :  { %6010 = vmatpush3.bf16.msra.mxu0 %v8460_v4 }
0x11b5   :  { %6011 = vmatprep.subr.bf16.mxu0 %v8464_v61 }
0x11b8   :  { %6012 = vmatpush3.bf16.msra.mxu0 %v8466_v10 }
0x11b9   :  { %6300 = vmatprep.subr.bf16.mxu0 %v7327_v0 }
0x1210   :  { %v4037_v52 = vpop.f32.mrb[84].mxu1 }
0x1211   :  { %v6238_v48 = vpop.f32.mrb[85].mxu1  ;;  %v4144_v19 = vpack.c.bf16 %v4037_v52, %v4037_v52 }
0x1212   :  { %v4040_v50 = vpop.f32.mrb[86].mxu1 }
0x1213   :  { %v6239_v43 = vpop.f32.mrb[87].mxu1  ;;  %v8571_v50 = vld [vmem:[#allocation18] ss:$0 sm:$0xff] }
0x1218   :  { %v4136_v54 = vpop.f32.mrb[88].mxu1 }
0x1219   :  { %v4145_v18 = vpack.c.bf16 %v4136_v54, %v4136_v54  ;;  %v6250_v60 = vpop.f32.mrb[89].mxu1 }
0x121a   :  { %v4139_v24 = vpop.f32.mrb[90].mxu1 }
0x121b   :  { %v6251_v46 = vpop.f32.mrb[91].mxu1  ;;  %4481 = vmatprep.mubr.bf16.mxu1 %v4145_v18 }
0x121c   :  { %4482 = vmatmul.mubr.bf16.vlgmr.msra.gmra.mrb[92].mxu1 %v4144_v19 }
0x121d   :  { %6259 = vmatpush3.bf16.msra.mxu1 %v4554_v58  ;;  %6260 = vmatprep.mubr.msk.bf16.mxu1 %vm7328_vm0, %v7327_v0 }
0x121e   :  { %6270 = vmatprep.subr.bf16.mxu1 %v7327_v0 }
0x124e   :  { %v5953_v7 = vpop.f32.mrb[76].mxu0 }
0x124f   :  { %v5954_v9 = vpop.f32.mrb[77].mxu0 }
0x1250   :  { %v5955_v4 = vadd.f32 %v5954_v9, %v5953_v7  ;;  %v5956_v45 = vpop.f32.mrb[78].mxu0 }
0x1251   :  { %v5957_v61 = vpop.f32.mrb[79].mxu0 }
0x1252   :  { %v4444_v60 = vadd.f32 %v5955_v4, %v8571_v50 }
0x1256   :  { %v4529_v10 = vpop.f32.mrb[80].mxu0 }
0x1257   :  { %v4535_v12 = vmul.f32 0.25, %v4529_v10  ;;  %v6256_v14 = vpop.f32.mrb[81].mxu0 }
0x1258   :  { %v4532_v15 = vpop.f32.mrb[82].mxu0 }
0x1259   :  { %v6257_v16 = vpop.f32.mrb[83].mxu0  ;;  %v4536_v62 = vsel %vm1563_vm3, %v4535_v12, -inf }
0x125a   :  { %4537 = vmax.xlane.f32.xlu0 %v4536_v62 }
0x125e   :  { %v4636_v31 = vpop.f32.mrb[84].mxu0 }
0x125f   :  { %v4642_v20 = vmul.f32 0.25, %v4636_v31  ;;  %v6268_v17 = vpop.f32.mrb[85].mxu0 }
0x1260   :  { %v4639_v40 = vpop.f32.mrb[86].mxu0 }
0x1261   :  { %v6269_v41 = vpop.f32.mrb[87].mxu0  ;;  %v4643_v42 = vsel %vm1563_vm3, %v4642_v20, -inf }
0x1262   :  { %4644 = vmax.xlane.f32.xlu1 %v4643_v42 }
0x1266   :  { %v4743_v44 = vpop.f32.mrb[88].mxu0 }
0x1267   :  { %v4749_v21 = vmul.f32 0.25, %v4743_v44  ;;  %v6280_v34 = vpop.f32.mrb[89].mxu0 }
0x1268   :  { %v4746_v33 = vpop.f32.mrb[90].mxu0 }
0x1269   :  { %v6281_v30 = vpop.f32.mrb[91].mxu0  ;;  %v4750_v36 = vsel %vm1563_vm3, %v4749_v21, -inf  ;;  %v4656_v33 = vrot.slane %v8394_v28, 4 }
0x126a   :  { %4751 = vmax.xlane.f32.xlu0 %v4750_v36 }
0x126b   :  { %v4661_v36 = vsel %vm1579_vm1, %v4656_v33, 0  ;;  %v6675_v33 = vld [vmem:[#allocation31 + $0x8] sm:$0xff]  }
0x126e   :  { %v4850_v57 = vpop.f32.mrb[92].mxu0 }
0x126f   :  { %v4856_v49 = vmul.f32 0.25, %v4850_v57  ;;  %v6292_v3 = vpop.f32.mrb[93].mxu0 }
0x1270   :  { %v4853_v22 = vpop.f32.mrb[94].mxu0  ;;  %v4763_v3 = vrot.slane %v8392_v13, 4 }
0x1271   :  { %v6293_v25 = vpop.f32.mrb[95].mxu0  ;;  %v4857_v63 = vsel %vm1563_vm3, %v4856_v49, -inf }
0x1272   :  { %4858 = vmax.xlane.f32.xlu1 %v4857_v63  ;;  %v4768_v28 = vsel %vm1579_vm1, %v4763_v3, 0 }
0x12e7   :  { %v4538_v6 = vpop.xlane.xlu0 %4537 }
0x12e8   :  { %v4539_v52 = vsub.f32 %v4535_v12, %v4538_v6 }
0x12ea   :  { %v4540_v48 = vmul.f32 1.442695, %v4539_v52  ;;  %v4870_v52 = vrot.slane %v8396_v29, 4 }
0x12ec   :  { %6742 = vpow2.f32 %v4540_v48  ;;  %v4875_v13 = vsel %vm1579_vm1, %v4870_v52, 0 }
0x12ef   :  { %v4645_v43 = vpop.xlane.xlu1 %4644  ;;  %v5975_v53 = vpop.f32.mrb[92].mxu1 }
0x12f0   :  { %v4646_v54 = vsub.f32 %v4642_v20, %v4645_v43  ;;  %v5976_v18 = vpop.f32.mrb[93].mxu1 }
0x12f1   :  { %v5977_v19 = vadd.f32 %v5976_v18, %v5975_v53  ;;  %v5978_v24 = vpop.f32.mrb[94].mxu1 }
0x12f2   :  { %v4647_v46 = vmul.f32 1.442695, %v4646_v54  ;;  %v5979_v58 = vpop.f32.mrb[95].mxu1 }
0x12f3   :  { %v4484_v7 = vadd.f32 %v5977_v19, %v4444_v60 }
0x12f4   :  { %6744 = vpow2.f32 %v4647_v46 }
0x12f5   :  { %v8578_v17 = vadd.f32 %v4484_v7, %v8313_v59 }
0x12f6   :  { %v6743_v9 = vpop.eup %6742 }
0x12f7   :  { %v4752_v45 = vpop.xlane.xlu0 %4751  ;;  %v4542_v61 = vsel %vm1563_vm3, %v6743_v9, 0.0  ;;  %v5009_v41 = vmul.f32 %v8578_v17, %v8578_v17 }
0x12f8   :  { %v4753_v10 = vsub.f32 %v4749_v21, %v4752_v45  ;;  %4543 = vadd.xlane.f32.xlu0 %v4542_v61 }
0x12fa   :  { %v4754_v12 = vmul.f32 1.442695, %v4753_v10 }
0x12fc   :  { %6746 = vpow2.f32 %v4754_v12 }
0x12fe   :  { %v6745_v14 = vpop.eup %6744 }
0x12ff   :  { %v4859_v15 = vpop.xlane.xlu1 %4858  ;;  %v4649_v16 = vsel %vm1563_vm3, %v6745_v14, 0.0 }
0x1300   :  { %v4860_v62 = vsub.f32 %v4856_v49, %v4859_v15  ;;  %4650 = vadd.xlane.f32.xlu1 %v4649_v16 }
0x1302   :  { %v4861_v4 = vmul.f32 1.442695, %v4860_v62 }
0x1304   :  { %6748 = vpow2.f32 %v4861_v4 }
0x1306   :  { %v6747_v31 = vpop.eup %6746 }
0x1307   :  { %v4756_v20 = vsel %vm1563_vm3, %v6747_v31, 0.0 }
0x1308   :  { %4757 = vadd.xlane.f32.xlu0 %v4756_v20  ;;  %v6666_v20 = vld [vmem:[#allocation28] sm:$0xff]  }
0x130c   :  { %5003 = vadd.xlane.f32.xlu0 %v8578_v17 }
0x130e   :  { %v6749_v40 = vpop.eup %6748 }
0x130f   :  { %v4863_v42 = vsel %vm1563_vm3, %v6749_v40, 0.0 }
0x1310   :  { %4864 = vadd.xlane.f32.xlu1 %v4863_v42  ;;  %5011 = vadd.xlane.f32.xlu0 %v5009_v41  ;;  %v6670_v41 = vld [vmem:[#allocation28 + $0x20] sm:$0xff]   ;;  %v6671_v42 = vld [vmem:[#allocation28 + $0x28] sm:$0xff]  }
0x1385   :  { %v4544_v44 = vpop.xlane.xlu0 %4543 }
0x1386   :  { %6750 = vrcp.f32 %v4544_v44  ;;  %v6672_v44 = vld [vmem:[#allocation28 + $0x30] sm:$0xff]  }
0x138d   :  { %v4651_v21 = vpop.xlane.xlu1 %4650 }
0x138e   :  { %6752 = vrcp.f32 %v4651_v21  ;;  %v6673_v21 = vld [vmem:[#allocation28 + $0x38] sm:$0xff]  }
0x1390   :  { %v6751_v34 = vpop.eup %6750 }
0x1391   :  { %v4546_v30 = vmul.f32 %v6751_v34, %v6743_v9  ;;  %v6674_v34 = vld [vmem:[#allocation31] sm:$0xff]  }
0x1393   :  { %v4547_v59 = vpack.c.bf16 %v4546_v30, %v4546_v30  ;;  %v6676_v30 = vld [vmem:[#allocation31 + $0x10] sm:$0xff]  }
0x1395   :  { %6261 = vmatmul.mubr.msk.bf16.vlgmr.msra.gmra.mrb[96].mxu1 %vm1563_vm3, %v4547_v59  ;;  %v4758_v57 = vpop.xlane.xlu0 %4757  ;;  %v6677_v59 = vld [vmem:[#allocation31 + $0x18] sm:$0xff]  }
0x1396   :  { %6271 = vmatpush3.bf16.msra.mxu1 %v4661_v36  ;;  %6754 = vrcp.f32 %v4758_v57  ;;  %6272 = vmatprep.mubr.msk.bf16.mxu1 %vm7328_vm0, %v7327_v0  ;;  %v6678_v36 = vld [vmem:[#allocation31 + $0x20] sm:$0xff]   ;;  %v6679_v57 = vld [vmem:[#allocation31 + $0x28] sm:$0xff]  }
0x1397   :  { %6282 = vmatprep.subr.bf16.mxu1 %v7327_v0 }
0x1398   :  { %v6753_v49 = vpop.eup %6752 }
0x1399   :  { %v4653_v22 = vmul.f32 %v6753_v49, %v6745_v14  ;;  %v5004_v49 = vpop.xlane.xlu0 %5003 }
0x139b   :  { %v4654_v25 = vpack.c.bf16 %v4653_v22, %v4653_v22  ;;  %v5007_v22 = vmul.f32 0.015625, %v5004_v49 }
0x139d   :  { %6273 = vmatmul.mubr.msk.bf16.vlgmr.msra.gmra.mrb[100].mxu1 %vm1563_vm3, %v4654_v25  ;;  %v4865_v63 = vpop.xlane.xlu1 %4864  ;;  %v5012_v3 = vpop.xlane.xlu0 %5011 }
0x139e   :  { %6283 = vmatpush3.bf16.msra.mxu1 %v4768_v28  ;;  %6756 = vrcp.f32 %v4865_v63  ;;  %6284 = vmatprep.mubr.msk.bf16.mxu1 %vm7328_vm0, %v7327_v0  ;;  %v5015_v25 = vmul.f32 0.015625, %v5012_v3  ;;  %v5017_v28 = vmul.f32 %v5007_v22, %v5007_v22 }
0x139f   :  { %6294 = vmatprep.subr.bf16.mxu1 %v7327_v0 }
0x13a0   :  { %v6755_v6 = vpop.eup %6754  ;;  %v5019_v63 = vsub.f32 %v5015_v25, %v5017_v28 }
0x13a1   :  { %v4760_v48 = vmul.f32 %v6755_v6, %v6747_v31 }
0x13a2   :  { %v5021_v6 = vmax.f32 %v5019_v63, 0.0 }
0x13a3   :  { %v4761_v43 = vpack.c.bf16 %v4760_v48, %v4760_v48 }
0x13a5   :  { %6285 = vmatmul.mubr.msk.bf16.vlgmr.msra.gmra.mrb[104].mxu1 %vm1563_vm3, %v4761_v43  ;;  %v5025_v43 = vadd.f32 1e-05, %v5021_v6 }
0x13a6   :  { %6295 = vmatpush3.bf16.msra.mxu1 %v4875_v13  ;;  %6296 = vmatprep.mubr.msk.bf16.mxu1 %vm7328_vm0, %v7327_v0 }
0x13a7   :  { %6019 = vmatprep.subr.bf16.mxu1 %v8471_v2  ;;  %6758 = vrsqrt.f32 %v5025_v43 }
0x13a8   :  { %v6757_v53 = vpop.eup %6756 }
0x13a9   :  { %v4867_v54 = vmul.f32 %v6757_v53, %v6749_v40  ;;  %v6667_v40 = vld [vmem:[#allocation28 + $0x8] sm:$0xff]  }
0x13ab   :  { %v4868_v18 = vpack.c.bf16 %v4867_v54, %v4867_v54 }
0x13ad   :  { %6297 = vmatmul.mubr.msk.bf16.vlgmr.msra.gmra.mrb[108].mxu1 %vm1563_vm3, %v4868_v18 }
0x13ae   :  { %6020 = vmatpush3.bf16.msra.mxu1 %v8479_v27 }
0x13af   :  { %6021 = vmatprep.subr.bf16.mxu1 %v8481_v35 }
0x13b2   :  { %6022 = vmatpush3.bf16.msra.mxu1 %v8485_v37 }
0x13b3   :  { %6023 = vmatprep.subr.bf16.mxu1 %v8488_v38 }
0x13b6   :  { %6024 = vmatpush3.bf16.msra.mxu1 %v8491_v39 }
0x13b7   :  { %6025 = vmatprep.subr.bf16.mxu1 %v8494_v55 }
0x13ba   :  { %6026 = vmatpush3.bf16.msra.mxu1 %v8497_v56 }
0x13bb   :  { %6027 = vmatprep.subr.bf16.mxu1 %v8500_v32 }
0x13be   :  { %6028 = vmatpush3.bf16.msra.mxu1 %v8503_v47 }
0x13bf   :  { %6029 = vmatprep.subr.bf16.mxu1 %v8506_v26 }
0x13c2   :  { %6030 = vmatpush3.bf16.msra.mxu1 %v8524_v5 }
0x13c3   :  { %6031 = vmatprep.subr.bf16.mxu1 %v8529_v23 }
0x13c6   :  { %6032 = vmatpush3.bf16.msra.mxu1 %v8531_v51 }
0x13c7   :  { %6033 = vmatprep.subr.bf16.mxu1 %v8533_v11 }
0x13ca   :  { %6034 = vmatpush3.bf16.msra.mxu1 %v8541_v1 }
0x13cb   :  { %6320 = vmatprep.subr.bf16.mxu1 %v7327_v0 }
0x1468   :  { %v4590_v29 = vpop.f32.mrb[96].mxu1 }
0x1469   :  { %v6262_v2 = vpop.f32.mrb[97].mxu1  ;;  %v4917_v55 = vpack.c.bf16 %v4590_v29, %v4590_v29 }
0x146a   :  { %v4593_v27 = vpop.f32.mrb[98].mxu1 }
0x146b   :  { %v6263_v35 = vpop.f32.mrb[99].mxu1  ;;  %v6759_v27 = vpop.eup %6758 }
0x146c   :  { %v5023_v35 = vsub.f32 %v8578_v17, %v5007_v22  ;;  %v6681_v17 = vld [vmem:[#allocation31 + $0x38] sm:$0xff]  }
0x1470   :  { %v4697_v37 = vpop.f32.mrb[100].mxu1 }
0x1471   :  { %v4918_v38 = vpack.c.bf16 %v4697_v37, %v4697_v37  ;;  %v6274_v39 = vpop.f32.mrb[101].mxu1  ;;  %v5029_v37 = vmul.f32 %v6759_v27, %v5023_v35 }
0x1472   :  { %v4700_v56 = vpop.f32.mrb[102].mxu1 }
0x1473   :  { %v6275_v32 = vpop.f32.mrb[103].mxu1  ;;  %4953 = vmatprep.mubr.bf16.mxu0 %v4918_v38  ;;  %v5752_v38 = vld [vmem:[#allocation22] ss:$0 sm:$0xff] }
0x1474   :  { %4954 = vmatmul.mubr.bf16.vlgmr.msra.gmra.mrb[96].mxu0 %v4917_v55  ;;  %v5038_v32 = vmul.f32 %v5752_v38, %v5029_v37 }
0x1475   :  { %6316 = vmatprep.mubr.msk.bf16.mxu0 %vm7328_vm0, %v7327_v0  ;;  %6301 = vmatpush3.bf16.msra.mxu0 %v6666_v20 }
0x1476   :  { %6302 = vmatprep.subr.bf16.mxu0 %v7327_v0 }
0x1478   :  { %v4804_v47 = vpop.f32.mrb[104].mxu1 }
0x1479   :  { %v6286_v26 = vpop.f32.mrb[105].mxu1  ;;  %v4919_v60 = vpack.c.bf16 %v4804_v47, %v4804_v47  ;;  %6303 = vmatpush3.bf16.msra.mxu0 %v6667_v40  ;;  %v5753_v47 = vld [vmem:[#allocation24] ss:$0 sm:$0xff] }
0x147a   :  { %v4807_v5 = vpop.f32.mrb[106].mxu1  ;;  %6304 = vmatprep.subr.bf16.mxu0 %v7327_v0 }
0x147b   :  { %v6287_v23 = vpop.f32.mrb[107].mxu1  ;;  %v5047_v5 = vadd.f32 %v5753_v47, %v5038_v32 }
0x1480   :  { %v4911_v51 = vpop.f32.mrb[108].mxu1 }
0x1481   :  { %v4920_v11 = vpack.c.bf16 %v4911_v51, %v4911_v51  ;;  %v6298_v1 = vpop.f32.mrb[109].mxu1 }
0x1482   :  { %v4914_v19 = vpop.f32.mrb[110].mxu1  ;;  %v5754_v1 = vld [vmem:[#allocation30] ss:$0 sm:$0xff] }
0x1483   :  { %v6299_v24 = vpop.f32.mrb[111].mxu1  ;;  %4993 = vmatprep.mubr.bf16.mxu1 %v4920_v11  ;;  %v6680_v11 = vld [vmem:[#allocation31 + $0x30] sm:$0xff]  }
0x1484   :  { %4994 = vmatmul.mubr.bf16.vlgmr.msra.gmra.mrb[112].mxu1 %v4919_v60 }
0x1485   :  { %6336 = vmatprep.mubr.msk.bf16.mxu1 %vm7328_vm0, %v7327_v0  ;;  %6321 = vmatpush3.bf16.msra.mxu1 %v6674_v34  ;;  %v6687_v34 = vld [vmem:[#allocation34 + $0x28] sm:$0xff]  }
0x1486   :  { %6322 = vmatprep.subr.bf16.mxu1 %v7327_v0 }
0x1489   :  { %6323 = vmatpush3.bf16.msra.mxu1 %v6675_v33  ;;  %v6688_v33 = vld [vmem:[#allocation34 + $0x30] sm:$0xff]  }
0x148a   :  { %6324 = vmatprep.subr.bf16.mxu1 %v7327_v0 }
0x148d   :  { %6325 = vmatpush3.bf16.msra.mxu1 %v6676_v30  ;;  %v6689_v30 = vld [vmem:[#allocation34 + $0x38] sm:$0xff]  }
0x148e   :  { %6326 = vmatprep.subr.bf16.mxu1 %v7327_v0 }
0x1491   :  { %6327 = vmatpush3.bf16.msra.mxu1 %v6677_v59 }
0x1492   :  { %6328 = vmatprep.subr.bf16.mxu1 %v7327_v0 }
0x1495   :  { %6329 = vmatpush3.bf16.msra.mxu1 %v6678_v36 }
0x1496   :  { %6330 = vmatprep.subr.bf16.mxu1 %v7327_v0 }
0x1499   :  { %6331 = vmatpush3.bf16.msra.mxu1 %v6679_v57 }
0x149a   :  { %6332 = vmatprep.subr.bf16.mxu1 %v7327_v0 }
0x149d   :  { %6333 = vmatpush3.bf16.msra.mxu1 %v6680_v11 }
0x149e   :  { %6334 = vmatprep.subr.bf16.mxu1 %v7327_v0 }
0x14a1   :  { %6335 = vmatpush3.bf16.msra.mxu1 %v6681_v17 }
0x1547   :  { %v6013_v46 = vpop.f32.mrb[96].mxu0 }
0x1548   :  { %v6014_v58 = vpop.f32.mrb[97].mxu0 }
0x1549   :  { %v6015_v7 = vadd.f32 %v6014_v58, %v6013_v46  ;;  %v6016_v9 = vpop.f32.mrb[98].mxu0 }
0x154a   :  { %v6017_v45 = vpop.f32.mrb[99].mxu0 }
0x154b   :  { %v4956_v12 = vadd.f32 %v6015_v7, %v8571_v50  ;;  %v6668_v50 = vld [vmem:[#allocation28 + $0x10] sm:$0xff]  }
0x154c   :  { %6305 = vmatpush3.bf16.msra.mxu0 %v6668_v50 }
0x154d   :  { %6306 = vmatprep.subr.bf16.mxu0 %v7327_v0 }
0x1557   :  { %v6035_v61 = vpop.f32.mrb[112].mxu1 }
0x1558   :  { %v6036_v10 = vpop.f32.mrb[113].mxu1 }
0x1559   :  { %v6037_v14 = vadd.f32 %v6036_v10, %v6035_v61  ;;  %v6038_v15 = vpop.f32.mrb[114].mxu1  ;;  %v5763_v10 = vld [vmem:[#allocation33] ss:$0 sm:$0xff] }
0x155a   :  { %v6039_v16 = vpop.f32.mrb[115].mxu1 }
0x155b   :  { %v4996_v62 = vadd.f32 %v6037_v14, %v4956_v12 }
0x155d   :  { %v8625_v4 = vadd.f32 %v4996_v62, %v8315_v8  ;;  %v6669_v8 = vld [vmem:[#allocation28 + $0x18] sm:$0xff]  }
0x155e   :  { %6307 = vmatpush3.bf16.msra.mxu0 %v6669_v8  ;;  %v6682_v8 = vld [vmem:[#allocation34] sm:$0xff]  }
0x155f   :  { %5005 = vadd.xlane.f32.xlu1 %v8625_v4  ;;  %v5010_v31 = vmul.f32 %v8625_v4, %v8625_v4  ;;  %6308 = vmatprep.subr.bf16.mxu0 %v7327_v0 }
0x1562   :  { %6309 = vmatpush3.bf16.msra.mxu0 %v6670_v41  ;;  %v6683_v41 = vld [vmem:[#allocation34 + $0x8] sm:$0xff]  }
0x1563   :  { %5013 = vadd.xlane.f32.xlu1 %v5010_v31  ;;  %6310 = vmatprep.subr.bf16.mxu0 %v7327_v0 }
0x1566   :  { %6311 = vmatpush3.bf16.msra.mxu0 %v6671_v42  ;;  %v6684_v42 = vld [vmem:[#allocation34 + $0x10] sm:$0xff]  }
0x1567   :  { %6312 = vmatprep.subr.bf16.mxu0 %v7327_v0 }
0x156a   :  { %6313 = vmatpush3.bf16.msra.mxu0 %v6672_v44  ;;  %v6685_v44 = vld [vmem:[#allocation34 + $0x18] sm:$0xff]  }
0x156b   :  { %6314 = vmatprep.subr.bf16.mxu0 %v7327_v0 }
0x156e   :  { %6315 = vmatpush3.bf16.msra.mxu0 %v6673_v21  ;;  %v6686_v21 = vld [vmem:[#allocation34 + $0x20] sm:$0xff]  }
0x156f   :  { %6340 = vmatprep.subr.bf16.mxu0 %v7327_v0 }
0x15ec   :  { %v5006_v52 = vpop.xlane.xlu1 %5005 }
0x15ed   :  { %v5008_v48 = vmul.f32 0.015625, %v5006_v52 }
0x15ef   :  { %v5018_v53 = vmul.f32 %v5008_v48, %v5008_v48  ;;  %v5024_v39 = vsub.f32 %v8625_v4, %v5008_v48 }
0x15f0   :  { %v5014_v13 = vpop.xlane.xlu1 %5013 }
0x15f1   :  { %v5016_v54 = vmul.f32 0.015625, %v5014_v13 }
0x15f3   :  { %v5020_v18 = vsub.f32 %v5016_v54, %v5018_v53 }
0x15f5   :  { %v5022_v29 = vmax.f32 %v5020_v18, 0.0 }
0x15f7   :  { %v5026_v2 = vadd.f32 1e-05, %v5022_v29  ;;  %v5772_v29 = vld [vmem:[#allocation25] ss:$0 sm:$0xff] }
0x15f9   :  { %6760 = vrsqrt.f32 %v5026_v2 }
0x1603   :  { %v6761_v55 = vpop.eup %6760 }
0x1604   :  { %v5030_v56 = vmul.f32 %v6761_v55, %v5024_v39  ;;  %v5773_v39 = vld [vmem:[#allocation27] ss:$0 sm:$0xff] }
0x1606   :  { %v5039_v26 = vmul.f32 %v5752_v38, %v5030_v56 }
0x1608   :  { %v5048_v23 = vadd.f32 %v5753_v47, %v5039_v26  ;;  %v5774_v26 = vld [vmem:[#allocation36] ss:$0 sm:$0xff] }
0x160a   :  { %v5049_v51 = vpack.c.bf16 %v5048_v23, %v5047_v5 }
0x160c   :  { %6317 = vmatmul.mubr.bf16.vlgmr.msra.gmra.mrb[100].mxu0 %v5049_v51 }
0x160d   :  { %6356 = vmatprep.mubr.msk.bf16.mxu0 %vm7328_vm0, %v7327_v0  ;;  %6341 = vmatpush3.bf16.msra.mxu0 %v6682_v8 }
0x160e   :  { %6342 = vmatprep.subr.bf16.mxu0 %v7327_v0 }
0x1611   :  { %6343 = vmatpush3.bf16.msra.mxu0 %v6683_v41 }
0x1612   :  { %6344 = vmatprep.subr.bf16.mxu0 %v7327_v0 }
0x1615   :  { %6345 = vmatpush3.bf16.msra.mxu0 %v6684_v42 }
0x1616   :  { %6346 = vmatprep.subr.bf16.mxu0 %v7327_v0 }
0x1619   :  { %6347 = vmatpush3.bf16.msra.mxu0 %v6685_v44 }
0x161a   :  { %6348 = vmatprep.subr.bf16.mxu0 %v7327_v0 }
0x161d   :  { %6349 = vmatpush3.bf16.msra.mxu0 %v6686_v21 }
0x161e   :  { %6350 = vmatprep.subr.bf16.mxu0 %v7327_v0 }
0x1621   :  { %6351 = vmatpush3.bf16.msra.mxu0 %v6687_v34 }
0x1622   :  { %6352 = vmatprep.subr.bf16.mxu0 %v7327_v0 }
0x1625   :  { %6353 = vmatpush3.bf16.msra.mxu0 %v6688_v33 }
0x1626   :  { %6354 = vmatprep.subr.bf16.mxu0 %v7327_v0 }
0x1629   :  { %6355 = vmatpush3.bf16.msra.mxu0 %v6689_v30 }
0x16df   :  { %v5155_v60 = vpop.f32.mrb[100].mxu0 }
0x16e0   :  { %v5156_v19 = vadd.f32 %v5754_v1, %v5155_v60  ;;  %v6318_v24 = vpop.f32.mrb[101].mxu0 }
0x16e1   :  { %v5158_v46 = vpop.f32.mrb[102].mxu0 }
0x16e2   :  { %v5159_v58 = vadd.f32 %v5754_v1, %v5158_v46  ;;  %v6319_v7 = vpop.f32.mrb[103].mxu0  ;;  %v5162_v9 = vmax.f32 %v5156_v19, 0.0 }
0x16e4   :  { %v5163_v45 = vmax.f32 %v5159_v58, 0.0 }
0x16e6   :  { %v5164_v61 = vpack.c.bf16 %v5163_v45, %v5162_v9 }
0x16e8   :  { %6337 = vmatmul.mubr.bf16.vlgmr.msra.gmra.mrb[116].mxu1 %v5164_v61 }
0x17bb   :  { %v5270_v12 = vpop.f32.mrb[116].mxu1 }
0x17bc   :  { %v5271_v14 = vadd.f32 %v5763_v10, %v5270_v12  ;;  %v6338_v15 = vpop.f32.mrb[117].mxu1 }
0x17bd   :  { %v5273_v16 = vpop.f32.mrb[118].mxu1 }
0x17be   :  { %v5277_v62 = vadd.f32 %v5271_v14, %v5047_v5  ;;  %v5274_v4 = vadd.f32 %v5763_v10, %v5273_v16  ;;  %v6339_v31 = vpop.f32.mrb[119].mxu1 }
0x17c0   :  { %v5278_v20 = vadd.f32 %v5274_v4, %v5048_v23  ;;  %5279 = vadd.xlane.f32.xlu0 %v5277_v62  ;;  %v5285_v40 = vmul.f32 %v5277_v62, %v5277_v62 }
0x17c2   :  { %5281 = vadd.xlane.f32.xlu1 %v5278_v20  ;;  %v5286_v50 = vmul.f32 %v5278_v20, %v5278_v20 }
0x17c4   :  { %5287 = vadd.xlane.f32.xlu0 %v5285_v40 }
0x17c6   :  { %5289 = vadd.xlane.f32.xlu1 %v5286_v50 }
0x184d   :  { %v5280_v59 = vpop.xlane.xlu0 %5279 }
0x184e   :  { %v5283_v36 = vmul.f32 0.015625, %v5280_v59 }
0x184f   :  { %v5282_v57 = vpop.xlane.xlu1 %5281 }
0x1850   :  { %v5284_v49 = vmul.f32 0.015625, %v5282_v57  ;;  %v5293_v22 = vmul.f32 %v5283_v36, %v5283_v36  ;;  %v5299_v0 = vsub.f32 %v5277_v62, %v5283_v36 }
0x1851   :  { %v5288_v3 = vpop.xlane.xlu0 %5287 }
0x1852   :  { %v5291_v25 = vmul.f32 0.015625, %v5288_v3  ;;  %v5294_v63 = vmul.f32 %v5284_v49, %v5284_v49  ;;  %v5300_v2 = vsub.f32 %v5278_v20, %v5284_v49 }
0x1853   :  { %v5290_v28 = vpop.xlane.xlu1 %5289 }
0x1854   :  { %v5295_v6 = vsub.f32 %v5291_v25, %v5293_v22  ;;  %v5292_v52 = vmul.f32 0.015625, %v5290_v28 }
0x1856   :  { %v5297_v48 = vmax.f32 %v5295_v6, 0.0  ;;  %v5296_v43 = vsub.f32 %v5292_v52, %v5294_v63 }
0x1858   :  { %v5301_v13 = vadd.f32 1e-05, %v5297_v48  ;;  %v5298_v53 = vmax.f32 %v5296_v43, 0.0 }
0x185a   :  { %6762 = vrsqrt.f32 %v5301_v13  ;;  %v5302_v54 = vadd.f32 1e-05, %v5298_v53 }
0x185c   :  { %6764 = vrsqrt.f32 %v5302_v54 }
0x1864   :  { %v6763_v18 = vpop.eup %6762 }
0x1865   :  { %v5305_v27 = vmul.f32 %v6763_v18, %v5299_v0 }
0x1866   :  { %v6765_v35 = vpop.eup %6764 }
0x1867   :  { %v5306_v37 = vmul.f32 %v6765_v35, %v5300_v2  ;;  %v5314_v38 = vmul.f32 %v5772_v29, %v5305_v27 }
0x1869   :  { %v5315_v55 = vmul.f32 %v5772_v29, %v5306_v37  ;;  %v5323_v56 = vadd.f32 %v5773_v39, %v5314_v38 }
0x186b   :  { %v5324_v32 = vadd.f32 %v5773_v39, %v5315_v55 }
0x186d   :  { %v5325_v47 = vpack.c.bf16 %v5324_v32, %v5323_v56 }
0x186f   :  { %6357 = vmatmul.mubr.bf16.vlgmr.msra.gmra.mrb[104].mxu0 %v5325_v47 }
0x1942   :  { %v5431_v5 = vpop.f32.mrb[104].mxu0 }
0x1943   :  { %v5432_v23 = vadd.f32 %v5774_v26, %v5431_v5  ;;  %v6358_v51 = vpop.f32.mrb[105].mxu0 }
0x1944   :  { %v5434_v11 = vpop.f32.mrb[106].mxu0 }
0x1945   :  { %v5438_v17 = vmax.f32 %v5432_v23, 0.0  ;;  %v5435_v1 = vadd.f32 %v5774_v26, %v5434_v11  ;;  %v6359_v60 = vpop.f32.mrb[107].mxu0 }
0x1947   :  { %5440 = vst [vmem:[%s8760_s17] sm:$0xff] %v5438_v17  ;;  %v5439_v19 = vmax.f32 %v5435_v1, 0.0 }
0x1949   :  { %5441 = vst [vmem:[%s8760_s17 + $0x8] sm:$0xff] %v5439_v19 }
0x194a   :  { %5446 = vsyncpa [#allocation3], 1 }
0x194b   :  { %5447 = vsyncpa [#allocation5], 1 }
0x194c   :  { %5448 = vsyncpa [#allocation8], 1 }
0x194d   :  { %5449 = vsyncpa [#allocation11], 1 }
0x194e   :  { %5450 = vsyncpa [#allocation14], 1 }
0x194f   :  { %5451 = vsyncpa [#allocation17], 1 }
0x1950   :  { %5452 = vsyncpa [#allocation20], 1 }
0x1951   :  { %5453 = vsyncpa [#allocation23], 1 }
0x1952   :  { %5454 = vsyncpa [#allocation26], 1 }
0x1953   :  { %5455 = vsyncpa [#allocation29], 1 }
0x1954   :  { %5456 = vsyncpa [#allocation32], 1 }
0x1955   :  { %5457 = vsyncpa [#allocation35], 1 }

</bundles_post_ra>
